<compile_context>
chip_gen: v7x
topology: tpu7x:2x2x1
jax: 0.10.0
libtpu: 0.0.40
codegen_flags: <defaults>
</compile_context>

<pallas_src>
import functools

import jax
import jax.numpy as jnp
from jax.experimental import pallas as pl
from jax.experimental.pallas import tpu as pltpu

# ----------------------------- config ---------------------------------------
NUM_CLASSES = 5
CLASS_AGNOSTIC = False
INPUT_CHANNELS = 4
BASE_OUT_DIM = 16
RPN_FEAT_SIZE = 4          # ROI-pool output size (SxS)
RPN_SPATIAL_SCALE = 1.0    # base net keeps spatial resolution (stride-1 conv)
ANCHOR_SIZES = (2.0, 4.0, 8.0)
NUM_ANCHORS = len(ANCHOR_SIZES)
RPN_HEAD_DIM = 2 * NUM_ANCHORS + 4 * NUM_ANCHORS      # cls(6) + loc(12) = 18
ROIS_PER_IMAGE = 8
HEAD_HIDDEN = 32
PRED_DIM = NUM_CLASSES + NUM_CLASSES * 4              # cls(5) + loc(20) = 25


# -------------------- weight reshaping for in-kernel conv --------------------
def _expand_conv3x3_weight(w, c_in, width):
    """(9*Cin, Cout) tap-major  ->  block-diagonal (9*W*Cin, W*Cout), bf16.

    Lets a 3x3 conv over an NHWC image be computed as 9 plain 2-D matmuls on a
    (H, W*Cin) slab with a lane-dense (H, W*Cout) result, with no in-kernel
    reshapes.  Built ONCE (outside jit) and reused for every forward.
    """
    c_out = w.shape[1]
    w_t = w.reshape(9, c_in, c_out)
    eye = jnp.eye(width, dtype=w.dtype)
    big = jnp.einsum("ab,tco->tacbo", eye, w_t)          # (9, W, Cin, W, Cout)
    return big.reshape(9 * width * c_in, width * c_out).astype(jnp.bfloat16)


def _expand_1x1_weight(w, width):
    """(Cin, Cout) -> block-diagonal (W*Cin, W*Cout), bf16."""
    c_in, c_out = w.shape
    eye = jnp.eye(width, dtype=w.dtype)
    big = jnp.einsum("ab,co->acbo", eye, w)              # (W, Cin, W, Cout)
    return big.reshape(width * c_in, width * c_out).astype(jnp.bfloat16)


def _tile_bias(b, width):
    return jnp.tile(b, width).reshape(1, -1).astype(jnp.float32)


def prepare_params(params, width):
    """Hoisted (one-time) weight expansion + dtype casts.  Call OUTSIDE jit."""
    w_hd = jnp.concatenate([params["w_rpn_cls"], params["w_rpn_loc"]], axis=1)
    b_hd = jnp.concatenate([params["b_rpn_cls"], params["b_rpn_loc"]])
    w2 = jnp.concatenate([params["w_cls"], params["w_loc"]], axis=1)
    b2 = jnp.concatenate([params["b_cls"], params["b_loc"]])
    return {
        "wb_big": _expand_conv3x3_weight(params["w_base"], INPUT_CHANNELS, width),
        "bb_big": _tile_bias(params["b_base"], width),
        "w3_big": _expand_conv3x3_weight(params["w_rpn"], BASE_OUT_DIM, width),
        "b3_big": _tile_bias(params["b_rpn"], width),
        "wh_big": _expand_1x1_weight(w_hd, width),
        "bh_big": _tile_bias(b_hd, width),
        "w_head": params["w_head"].astype(jnp.bfloat16),
        "b_head": params["b_head"].reshape(1, -1).astype(jnp.float32),
        "w_pred": w2.astype(jnp.bfloat16),
        "b_pred": b2.reshape(1, -1).astype(jnp.float32),
    }


# ------- Pallas kernel: fused base conv + RPN conv + RPN 1x1 heads -----------
def _conv3x3_accum(x_slab_bf16, w_ref, H, W, C, n_out):
    """9-tap 3x3 conv as shifted matmuls; 3 lane slices (one per dx) reused
    across the 3 dy sublane slices.  f32 accumulation."""
    kw = W * C
    acc = jnp.zeros((H, n_out), jnp.float32)
    for dx in range(3):
        xc = x_slab_bf16[:, dx * C:dx * C + kw]          # one lane shift per dx
        for dy in range(3):
            t = dy * 3 + dx                              # tap-major weight rows
            acc = acc + jnp.dot(xc[dy:dy + H, :],
                                w_ref[pl.ds(t * kw, kw), :],
                                preferred_element_type=jnp.float32)
    return acc


def _fused_backbone_rpn_kernel(x_ref, wb_ref, bb_ref, w3_ref, b3_ref,
                               wh_ref, bh_ref, base_ref, head_ref,
                               *, H, W, CIN, CMID):
    # ---- _base_net: 3x3 conv + ReLU (input slab cast to bf16 once) ----
    xb = x_ref[0].astype(jnp.bfloat16)                   # (H+2, (W+2)*CIN)
    acc = _conv3x3_accum(xb, wb_ref, H, W, CIN, W * CMID)
    base = jnp.maximum(acc + bb_ref[...], 0.0)           # (H, W*CMID) f32
    base_ref[0] = base                                   # lane-dense output

    # ---- zero-pad base_feat in VMEM (never leaves the kernel) ----
    zc = jnp.zeros((H, CMID), jnp.float32)
    zr = jnp.zeros((1, (W + 2) * CMID), jnp.float32)
    fpad = jnp.concatenate(
        [zr, jnp.concatenate([zc, base, zc], axis=1), zr], axis=0)
    fpad = fpad.astype(jnp.bfloat16)                     # cast once

    # ---- RPN 3x3 conv + ReLU ----
    acc2 = _conv3x3_accum(fpad, w3_ref, H, W, CMID, W * CMID)
    rpn_feat = jnp.maximum(acc2 + b3_ref[...], 0.0)      # stays in VMEM

    # ---- RPN cls + loc 1x1 heads (weights concatenated along N) ----
    head_ref[0] = jnp.dot(rpn_feat.astype(jnp.bfloat16), wh_ref[...],
                          preferred_element_type=jnp.float32) + bh_ref[...]


def fused_backbone_rpn(x_nhwc, prepared):
    """Returns (base_feat slab (N,H,W*16), rpn head slab (N,H,W*18))."""
    n, h, wd, c = x_nhwc.shape
    xp = jnp.pad(x_nhwc, ((0, 0), (1, 1), (1, 1), (0, 0)))
    x2 = xp.reshape(n, h + 2, (wd + 2) * c)              # free row-major view

    wb, bb = prepared["wb_big"], prepared["bb_big"]
    w3, b3 = prepared["w3_big"], prepared["b3_big"]
    wh, bh = prepared["wh_big"], prepared["bh_big"]

    return pl.pallas_call(
        functools.partial(_fused_backbone_rpn_kernel, H=h, W=wd,
                          CIN=c, CMID=BASE_OUT_DIM),
        out_shape=(jax.ShapeDtypeStruct((n, h, wd * BASE_OUT_DIM), jnp.float32),
                   jax.ShapeDtypeStruct((n, h, wd * RPN_HEAD_DIM), jnp.float32)),
        grid=(n,),
        in_specs=[
            pl.BlockSpec((1, h + 2, (wd + 2) * c), lambda i: (i, 0, 0)),
            pl.BlockSpec(wb.shape, lambda i: (0, 0)),
            pl.BlockSpec(bb.shape, lambda i: (0, 0)),
            pl.BlockSpec(w3.shape, lambda i: (0, 0)),
            pl.BlockSpec(b3.shape, lambda i: (0, 0)),
            pl.BlockSpec(wh.shape, lambda i: (0, 0)),
            pl.BlockSpec(bh.shape, lambda i: (0, 0)),
        ],
        out_specs=(
            pl.BlockSpec((1, h, wd * BASE_OUT_DIM), lambda i: (i, 0, 0)),
            pl.BlockSpec((1, h, wd * RPN_HEAD_DIM), lambda i: (i, 0, 0)),
        ),
        compiler_params=pltpu.CompilerParams(
            dimension_semantics=("parallel",),
            vmem_limit_bytes=32 * 1024 * 1024),
    )(x2, wb, bb, w3, b3, wh, bh)


# --------------- Pallas kernel: fused RCNN head (FC/ReLU/FC/softmax) ----------
def _head_kernel(x_ref, w1_ref, b1_ref, w2_ref, b2_ref, o_ref):
    h = jnp.dot(x_ref[...], w1_ref[...], preferred_element_type=jnp.float32)
    h = jnp.maximum(h + b1_ref[...], 0.0)                      # _head_net
    out = jnp.dot(h.astype(jnp.bfloat16), w2_ref[...],
                  preferred_element_type=jnp.float32) + b2_ref[...]
    logits = out[:, :NUM_CLASSES]                              # _pred_cls_net
    m = jnp.max(logits, axis=-1, keepdims=True)                # softmax(dim=1)
    e = jnp.exp(logits - m)
    inv = pl.reciprocal(jnp.sum(e, axis=-1, keepdims=True), approx=True)
    # single contiguous output slab: [cls_prob(5) | pred_loc(20)]
    o_ref[...] = jnp.concatenate([e * inv, out[:, NUM_CLASSES:]], axis=-1)


def rcnn_head(pooled_flat, prepared):
    m = pooled_flat.shape[0]
    vmem = pl.BlockSpec(memory_space=pltpu.MemorySpace.VMEM)
    return pl.pallas_call(
        _head_kernel,
        out_shape=jax.ShapeDtypeStruct((m, PRED_DIM), jnp.float32),
        in_specs=[vmem] * 5,
        out_specs=vmem,
    )(pooled_flat.astype(jnp.bfloat16),
      prepared["w_head"], prepared["b_head"],
      prepared["w_pred"], prepared["b_pred"])


# ------------------------------ plain-JAX glue --------------------------------
def make_anchors(h, w, sizes, stride):
    ys = (jnp.arange(h, dtype=jnp.float32) + 0.5) * stride
    xs = (jnp.arange(w, dtype=jnp.float32) + 0.5) * stride
    cy, cx = jnp.meshgrid(ys, xs, indexing="ij")
    half = jnp.asarray(sizes, jnp.float32) / 2.0
    x1 = cx[:, :, None] - half
    y1 = cy[:, :, None] - half
    x2 = cx[:, :, None] + half
    y2 = cy[:, :, None] + half
    return jnp.stack([x1, y1, x2, y2], axis=-1)  # (H, W, A, 4)


def apply_deltas(anchors, deltas):
    wa = anchors[..., 2] - anchors[..., 0]
    ha = anchors[..., 3] - anchors[..., 1]
    cxa = anchors[..., 0] + 0.5 * wa
    cya = anchors[..., 1] + 0.5 * ha
    cx = cxa + deltas[..., 0] * wa
    cy = cya + deltas[..., 1] * ha
    bw = wa * jnp.exp(deltas[..., 2])
    bh = ha * jnp.exp(deltas[..., 3])
    return jnp.stack([cx - 0.5 * bw, cy - 0.5 * bh, cx + 0.5 * bw, cy + 0.5 * bh], axis=-1)


def rpn_proposal_layer(head_out, im_info):
    """Simplified RPN proposal layer on the fused kernel's head output."""
    n, h, wd, _ = head_out.shape
    cls_out = head_out[..., :2 * NUM_ANCHORS].reshape(n, h, wd, NUM_ANCHORS, 2)
    fg_score = jax.nn.softmax(cls_out, axis=-1)[..., 1]                     # (N,H,W,A)
    deltas = head_out[..., 2 * NUM_ANCHORS:].reshape(n, h, wd, NUM_ANCHORS, 4)

    anchors = make_anchors(h, wd, ANCHOR_SIZES, 1.0 / RPN_SPATIAL_SCALE)
    boxes = apply_deltas(anchors[None], deltas)                             # (N,H,W,A,4)

    boxes = boxes.reshape(n, h * wd * NUM_ANCHORS, 4)
    scores = fg_score.reshape(n, h * wd * NUM_ANCHORS)

    im_h = im_info[:, 0][:, None]
    im_w = im_info[:, 1][:, None]
    boxes = jnp.stack([
        jnp.clip(boxes[..., 0], 0.0, im_w - 1.0),
        jnp.clip(boxes[..., 1], 0.0, im_h - 1.0),
        jnp.clip(boxes[..., 2], 0.0, im_w - 1.0),
        jnp.clip(boxes[..., 3], 0.0, im_h - 1.0),
    ], axis=-1)

    # TODO(synk): the real RPN proposal layer applies NMS; here we keep the
    # top-R proposals by objectness score only (no clean Pallas equivalent).
    _, idx = jax.lax.top_k(scores, ROIS_PER_IMAGE)
    top_boxes = jnp.take_along_axis(boxes, idx[..., None], axis=1)          # (N,R,4)
    batch_col = jnp.broadcast_to(
        jnp.arange(n, dtype=jnp.float32)[:, None, None], (n, ROIS_PER_IMAGE, 1))
    return jnp.concatenate([batch_col, top_boxes], axis=-1)                 # (N,R,5)


def roi_pool(feat_nhwc, rois, out_size, spatial_scale):
    """torchvision-style ROIPool (max), two-stage masked reduce (W then H)."""
    # TODO(synk): a scalar-prefetch Pallas kernel (roi bin bounds in SMEM) would
    # avoid the masked broadcast entirely at large H,W,C; fine at these sizes.
    n, h, w, c = feat_nhwc.shape
    batch_idx = rois[:, 0].astype(jnp.int32)
    x1 = jnp.round(rois[:, 1] * spatial_scale)
    y1 = jnp.round(rois[:, 2] * spatial_scale)
    x2 = jnp.round(rois[:, 3] * spatial_scale)
    y2 = jnp.round(rois[:, 4] * spatial_scale)
    bin_w = jnp.maximum(x2 - x1 + 1.0, 1.0) / out_size
    bin_h = jnp.maximum(y2 - y1 + 1.0, 1.0) / out_size

    g = jnp.arange(out_size, dtype=jnp.float32)
    hstart = jnp.clip(jnp.floor(g[None, :] * bin_h[:, None]) + y1[:, None], 0, h)
    hend = jnp.clip(jnp.ceil((g[None, :] + 1.0) * bin_h[:, None]) + y1[:, None], 0, h)
    wstart = jnp.clip(jnp.floor(g[None, :] * bin_w[:, None]) + x1[:, None], 0, w)
    wend = jnp.clip(jnp.ceil((g[None, :] + 1.0) * bin_w[:, None]) + x1[:, None], 0, w)

    hh = jnp.arange(h, dtype=jnp.float32)
    ww = jnp.arange(w, dtype=jnp.float32)
    mask_h = (hh[None, None, :] >= hstart[:, :, None]) & (hh[None, None, :] < hend[:, :, None])
    mask_w = (ww[None, None, :] >= wstart[:, :, None]) & (ww[None, None, :] < wend[:, :, None])

    roi_feat = feat_nhwc[batch_idx].astype(jnp.float32)                      # (NR,H,W,C)
    # stage 1: max over W within each w-bin
    vals_w = jnp.where(mask_w[:, None, :, :, None], roi_feat[:, :, None, :, :], -jnp.inf)
    red_w = jnp.max(vals_w, axis=3)                                          # (NR,H,S,C)
    # stage 2: max over H within each h-bin
    vals_h = jnp.where(mask_h[:, :, :, None, None], red_w[:, None, :, :, :], -jnp.inf)
    pooled = jnp.max(vals_h, axis=2)                                         # (NR,S,S,C)
    return jnp.where(jnp.isfinite(pooled), pooled, 0.0)


# ------------------------------- parameters ----------------------------------
def init_params(key):
    ks = jax.random.split(key, 8)
    std = 0.01  # cfg.train.model_init == 'normal' with std 0.01

    def w(k, shape):
        return jax.random.normal(k, shape, jnp.float32) * std

    feat_dim = BASE_OUT_DIM * RPN_FEAT_SIZE * RPN_FEAT_SIZE
    return {
        "w_base": w(ks[0], (9 * INPUT_CHANNELS, BASE_OUT_DIM)),
        "b_base": jnp.zeros((BASE_OUT_DIM,), jnp.float32),
        "w_rpn": w(ks[1], (9 * BASE_OUT_DIM, BASE_OUT_DIM)),
        "b_rpn": jnp.zeros((BASE_OUT_DIM,), jnp.float32),
        "w_rpn_cls": w(ks[2], (BASE_OUT_DIM, 2 * NUM_ANCHORS)),
        "b_rpn_cls": jnp.zeros((2 * NUM_ANCHORS,), jnp.float32),
        "w_rpn_loc": w(ks[3], (BASE_OUT_DIM, 4 * NUM_ANCHORS)),
        "b_rpn_loc": jnp.zeros((4 * NUM_ANCHORS,), jnp.float32),
        "w_head": w(ks[4], (feat_dim, HEAD_HIDDEN)),
        "b_head": jnp.zeros((HEAD_HIDDEN,), jnp.float32),
        "w_cls": w(ks[5], (HEAD_HIDDEN, NUM_CLASSES)),
        "b_cls": jnp.zeros((NUM_CLASSES,), jnp.float32),
        "w_loc": w(ks[6], (HEAD_HIDDEN, NUM_CLASSES * 4)),
        "b_loc": jnp.zeros((NUM_CLASSES * 4,), jnp.float32),
    }


# ------------------------------ forward pass ----------------------------------
def faster_rcnn_forward(prepared, x_nchw, im_info, gt_boxes, num_boxes):
    del gt_boxes, num_boxes  # only used by the training branch
    x = jnp.transpose(x_nchw, (0, 2, 3, 1)).astype(jnp.float32)   # NCHW -> NHWC
    n, h, wd, _ = x.shape

    # _base_net + RPN conv + RPN cls/loc heads : ONE fused Pallas kernel
    base_slab, head_slab = fused_backbone_rpn(x, prepared)
    base_feat = base_slab.reshape(n, h, wd, BASE_OUT_DIM)         # (N,H,W,16)
    rpn_head_out = head_slab.reshape(n, h, wd, RPN_HEAD_DIM)      # (N,H,W,18)

    # simplified proposal layer (top-k objectness; no NMS)
    rois = rpn_proposal_layer(rpn_head_out, im_info)              # (N,R,5)
    rpn_cls_loss = 0.0
    rpn_loc_loss = 0.0

    # roi_pool on rois.view(-1, 5)
    pooled = roi_pool(base_feat, rois.reshape(-1, 5),
                      RPN_FEAT_SIZE, RPN_SPATIAL_SCALE)           # (NR,S,S,C)
    pooled_flat = pooled.reshape(pooled.shape[0], -1)

    # _head_net + _pred_cls_net + softmax + _pred_loc_net : fused Pallas kernel
    pred = rcnn_head(pooled_flat, prepared)                       # (NR, 25)
    pred_cls_prob = pred[:, :NUM_CLASSES]
    pred_loc = pred[:, NUM_CLASSES:]

    # TODO(synk): training-only path (ProposalMatchLayer, cross_entropy,
    # smooth_l1, per-class pred_loc gather) not implemented (inference mode).
    cls_loss = 0.0
    loc_loss = 0.0
    rois_label = None

    r = rois.shape[1]
    pred_cls_prob = pred_cls_prob.reshape(n, r, NUM_CLASSES)
    pred_loc = pred_loc.reshape(n, r, -1)
    return (rois, pred_cls_prob, pred_loc, rpn_cls_loss, rpn_loc_loss,
            cls_loss, loc_loss, rois_label)


# ---------------------------------- main --------------------------------------
if __name__ == "__main__":
    key = jax.random.PRNGKey(0)
    k_param, k_x = jax.random.split(key)

    params = init_params(k_param)

    batch, height, width = 2, 16, 16
    x = jax.random.normal(k_x, (batch, INPUT_CHANNELS, height, width), jnp.float32)
    im_info = jnp.array([[height, width, 1.0]] * batch, jnp.float32)
    gt_boxes = jnp.zeros((batch, 5, 5), jnp.float32)
    num_boxes = jnp.zeros((batch,), jnp.int32)

    # one-time weight expansion (hoisted out of the per-forward path)
    prepared = prepare_params(params, width)
    prepared = jax.tree_util.tree_map(jax.block_until_ready, prepared)

    forward = jax.jit(faster_rcnn_forward)
    rois, prob, loc, *_ = forward(prepared, x, im_info, gt_boxes, num_boxes)
    jax.block_until_ready((rois, prob, loc))

    assert rois.shape == (batch, ROIS_PER_IMAGE, 5)
    assert prob.shape == (batch, ROIS_PER_IMAGE, NUM_CLASSES)
    assert loc.shape == (batch, ROIS_PER_IMAGE, NUM_CLASSES * 4)
    assert bool(jnp.all(jnp.isfinite(prob))) and bool(jnp.all(jnp.isfinite(loc)))
    print("KERNEL_OK")
</pallas_src>

<mosaic_0001>
module attributes {stable_mosaic.version = 11 : i64} {
  func.func @_fused_backbone_rpn_kernel(%arg0: i32, %arg1: memref<1x18x72xf32, #tpu.memory_space<vmem>>, %arg2: memref<576x256xbf16, #tpu.memory_space<vmem>>, %arg3: memref<1x256xf32, #tpu.memory_space<vmem>>, %arg4: memref<2304x256xbf16, #tpu.memory_space<vmem>>, %arg5: memref<1x256xf32, #tpu.memory_space<vmem>>, %arg6: memref<256x288xbf16, #tpu.memory_space<vmem>>, %arg7: memref<1x288xf32, #tpu.memory_space<vmem>>, %arg8: memref<1x16x256xf32, #tpu.memory_space<vmem>>, %arg9: memref<1x16x288xf32, #tpu.memory_space<vmem>>) attributes {dimension_semantics = [#tpu.dimension_semantics<parallel>], iteration_bounds = array<i64: 2>, scalar_prefetch = 0 : i64, scratch_operands = 0 : i64, tpu.core_type = #tpu.core_type<tc>, window_params = [{transform_indices = @transform_0, window_bounds = array<i64: 1, 18, 72>}, {pipeline_mode = #tpu.pipeline_mode<synchronous>, transform_indices = @transform_1, window_bounds = array<i64: 576, 256>}, {pipeline_mode = #tpu.pipeline_mode<synchronous>, transform_indices = @transform_2, window_bounds = array<i64: 1, 256>}, {pipeline_mode = #tpu.pipeline_mode<synchronous>, transform_indices = @transform_3, window_bounds = array<i64: 2304, 256>}, {pipeline_mode = #tpu.pipeline_mode<synchronous>, transform_indices = @transform_4, window_bounds = array<i64: 1, 256>}, {pipeline_mode = #tpu.pipeline_mode<synchronous>, transform_indices = @transform_5, window_bounds = array<i64: 256, 288>}, {pipeline_mode = #tpu.pipeline_mode<synchronous>, transform_indices = @transform_6, window_bounds = array<i64: 1, 288>}, {transform_indices = @transform_7, window_bounds = array<i64: 1, 16, 256>}, {transform_indices = @transform_8, window_bounds = array<i64: 1, 16, 288>}]} {
    %c0 = arith.constant 0 : index
    %c0_0 = arith.constant 0 : index
    %c0_1 = arith.constant 0 : index
    %0 = vector.load %arg1[%c0, %c0_0, %c0_1] : memref<1x18x72xf32, #tpu.memory_space<vmem>>, vector<1x18x72xf32>
    %1 = vector.shape_cast %0 : vector<1x18x72xf32> to vector<18x72xf32>
    %2 = arith.truncf %1 : vector<18x72xf32> to vector<18x72xbf16>
    %cst = arith.constant 0.000000e+00 : f32
    %3 = vector.broadcast %cst : f32 to vector<16x256xf32>
    %4 = vector.extract_strided_slice %2 {offsets = [0, 0], sizes = [18, 64], strides = [1, 1]} : vector<18x72xbf16> to vector<18x64xbf16>
    %5 = vector.extract_strided_slice %4 {offsets = [0, 0], sizes = [16, 64], strides = [1, 1]} : vector<18x64xbf16> to vector<16x64xbf16>
    %c0_2 = arith.constant 0 : index
    %c0_3 = arith.constant 0 : index
    %6 = vector.load %arg2[%c0_2, %c0_3] : memref<576x256xbf16, #tpu.memory_space<vmem>>, vector<64x256xbf16>
    %cst_4 = arith.constant dense<0.000000e+00> : vector<16x256xf32>
    %7 = tpu.matmul %5, %6, %cst_4 {dimension_numbers = #tpu.dot_dimension_numbers<[1], [0], [0], [1], [0, 0, 1, 1], [], []>} : vector<16x64xbf16>, vector<64x256xbf16>, vector<16x256xf32> -> vector<16x256xf32>
    %8 = arith.addf %3, %7 : vector<16x256xf32>
    %9 = vector.extract_strided_slice %4 {offsets = [1, 0], sizes = [16, 64], strides = [1, 1]} : vector<18x64xbf16> to vector<16x64xbf16>
    %c192 = arith.constant 192 : index
    %c0_5 = arith.constant 0 : index
    %10 = vector.load %arg2[%c192, %c0_5] : memref<576x256xbf16, #tpu.memory_space<vmem>>, vector<64x256xbf16>
    %cst_6 = arith.constant dense<0.000000e+00> : vector<16x256xf32>
    %11 = tpu.matmul %9, %10, %cst_6 {dimension_numbers = #tpu.dot_dimension_numbers<[1], [0], [0], [1], [0, 0, 1, 1], [], []>} : vector<16x64xbf16>, vector<64x256xbf16>, vector<16x256xf32> -> vector<16x256xf32>
    %12 = arith.addf %8, %11 : vector<16x256xf32>
    %13 = vector.extract_strided_slice %4 {offsets = [2, 0], sizes = [16, 64], strides = [1, 1]} : vector<18x64xbf16> to vector<16x64xbf16>
    %c384 = arith.constant 384 : index
    %c0_7 = arith.constant 0 : index
    %14 = vector.load %arg2[%c384, %c0_7] : memref<576x256xbf16, #tpu.memory_space<vmem>>, vector<64x256xbf16>
    %cst_8 = arith.constant dense<0.000000e+00> : vector<16x256xf32>
    %15 = tpu.matmul %13, %14, %cst_8 {dimension_numbers = #tpu.dot_dimension_numbers<[1], [0], [0], [1], [0, 0, 1, 1], [], []>} : vector<16x64xbf16>, vector<64x256xbf16>, vector<16x256xf32> -> vector<16x256xf32>
    %16 = arith.addf %12, %15 : vector<16x256xf32>
    %17 = vector.extract_strided_slice %2 {offsets = [0, 4], sizes = [18, 64], strides = [1, 1]} : vector<18x72xbf16> to vector<18x64xbf16>
    %18 = vector.extract_strided_slice %17 {offsets = [0, 0], sizes = [16, 64], strides = [1, 1]} : vector<18x64xbf16> to vector<16x64xbf16>
    %c64 = arith.constant 64 : index
    %c0_9 = arith.constant 0 : index
    %19 = vector.load %arg2[%c64, %c0_9] : memref<576x256xbf16, #tpu.memory_space<vmem>>, vector<64x256xbf16>
    %cst_10 = arith.constant dense<0.000000e+00> : vector<16x256xf32>
    %20 = tpu.matmul %18, %19, %cst_10 {dimension_numbers = #tpu.dot_dimension_numbers<[1], [0], [0], [1], [0, 0, 1, 1], [], []>} : vector<16x64xbf16>, vector<64x256xbf16>, vector<16x256xf32> -> vector<16x256xf32>
    %21 = arith.addf %16, %20 : vector<16x256xf32>
    %22 = vector.extract_strided_slice %17 {offsets = [1, 0], sizes = [16, 64], strides = [1, 1]} : vector<18x64xbf16> to vector<16x64xbf16>
    %c256 = arith.constant 256 : index
    %c0_11 = arith.constant 0 : index
    %23 = vector.load %arg2[%c256, %c0_11] : memref<576x256xbf16, #tpu.memory_space<vmem>>, vector<64x256xbf16>
    %cst_12 = arith.constant dense<0.000000e+00> : vector<16x256xf32>
    %24 = tpu.matmul %22, %23, %cst_12 {dimension_numbers = #tpu.dot_dimension_numbers<[1], [0], [0], [1], [0, 0, 1, 1], [], []>} : vector<16x64xbf16>, vector<64x256xbf16>, vector<16x256xf32> -> vector<16x256xf32>
    %25 = arith.addf %21, %24 : vector<16x256xf32>
    %26 = vector.extract_strided_slice %17 {offsets = [2, 0], sizes = [16, 64], strides = [1, 1]} : vector<18x64xbf16> to vector<16x64xbf16>
    %c448 = arith.constant 448 : index
    %c0_13 = arith.constant 0 : index
    %27 = vector.load %arg2[%c448, %c0_13] : memref<576x256xbf16, #tpu.memory_space<vmem>>, vector<64x256xbf16>
    %cst_14 = arith.constant dense<0.000000e+00> : vector<16x256xf32>
    %28 = tpu.matmul %26, %27, %cst_14 {dimension_numbers = #tpu.dot_dimension_numbers<[1], [0], [0], [1], [0, 0, 1, 1], [], []>} : vector<16x64xbf16>, vector<64x256xbf16>, vector<16x256xf32> -> vector<16x256xf32>
    %29 = arith.addf %25, %28 : vector<16x256xf32>
    %30 = vector.extract_strided_slice %2 {offsets = [0, 8], sizes = [18, 64], strides = [1, 1]} : vector<18x72xbf16> to vector<18x64xbf16>
    %31 = vector.extract_strided_slice %30 {offsets = [0, 0], sizes = [16, 64], strides = [1, 1]} : vector<18x64xbf16> to vector<16x64xbf16>
    %c128 = arith.constant 128 : index
    %c0_15 = arith.constant 0 : index
    %32 = vector.load %arg2[%c128, %c0_15] : memref<576x256xbf16, #tpu.memory_space<vmem>>, vector<64x256xbf16>
    %cst_16 = arith.constant dense<0.000000e+00> : vector<16x256xf32>
    %33 = tpu.matmul %31, %32, %cst_16 {dimension_numbers = #tpu.dot_dimension_numbers<[1], [0], [0], [1], [0, 0, 1, 1], [], []>} : vector<16x64xbf16>, vector<64x256xbf16>, vector<16x256xf32> -> vector<16x256xf32>
    %34 = arith.addf %29, %33 : vector<16x256xf32>
    %35 = vector.extract_strided_slice %30 {offsets = [1, 0], sizes = [16, 64], strides = [1, 1]} : vector<18x64xbf16> to vector<16x64xbf16>
    %c320 = arith.constant 320 : index
    %c0_17 = arith.constant 0 : index
    %36 = vector.load %arg2[%c320, %c0_17] : memref<576x256xbf16, #tpu.memory_space<vmem>>, vector<64x256xbf16>
    %cst_18 = arith.constant dense<0.000000e+00> : vector<16x256xf32>
    %37 = tpu.matmul %35, %36, %cst_18 {dimension_numbers = #tpu.dot_dimension_numbers<[1], [0], [0], [1], [0, 0, 1, 1], [], []>} : vector<16x64xbf16>, vector<64x256xbf16>, vector<16x256xf32> -> vector<16x256xf32>
    %38 = arith.addf %34, %37 : vector<16x256xf32>
    %39 = vector.extract_strided_slice %30 {offsets = [2, 0], sizes = [16, 64], strides = [1, 1]} : vector<18x64xbf16> to vector<16x64xbf16>
    %c512 = arith.constant 512 : index
    %c0_19 = arith.constant 0 : index
    %40 = vector.load %arg2[%c512, %c0_19] : memref<576x256xbf16, #tpu.memory_space<vmem>>, vector<64x256xbf16>
    %cst_20 = arith.constant dense<0.000000e+00> : vector<16x256xf32>
    %41 = tpu.matmul %39, %40, %cst_20 {dimension_numbers = #tpu.dot_dimension_numbers<[1], [0], [0], [1], [0, 0, 1, 1], [], []>} : vector<16x64xbf16>, vector<64x256xbf16>, vector<16x256xf32> -> vector<16x256xf32>
    %42 = arith.addf %38, %41 : vector<16x256xf32>
    %c0_21 = arith.constant 0 : index
    %c0_22 = arith.constant 0 : index
    %43 = vector.load %arg3[%c0_21, %c0_22] : memref<1x256xf32, #tpu.memory_space<vmem>>, vector<1x256xf32>
    %44 = vector.broadcast %43 : vector<1x256xf32> to vector<16x256xf32>
    %45 = arith.addf %42, %44 : vector<16x256xf32>
    %cst_23 = arith.constant 0.000000e+00 : f32
    %46 = vector.broadcast %cst_23 : f32 to vector<16x256xf32>
    %47 = arith.maximumf %45, %46 : vector<16x256xf32>
    %c0_24 = arith.constant 0 : index
    %c0_25 = arith.constant 0 : index
    %c0_26 = arith.constant 0 : index
    %48 = vector.load %arg8[%c0_24, %c0_25, %c0_26] : memref<1x16x256xf32, #tpu.memory_space<vmem>>, vector<1x16x256xf32>
    %49 = vector.shape_cast %48 : vector<1x16x256xf32> to vector<16x256xf32>
    %50 = vector.shape_cast %47 : vector<16x256xf32> to vector<1x16x256xf32>
    tpu.vector_store %arg8[%c0_24, %c0_25, %c0_26], %50 {strides = array<i32>} : memref<1x16x256xf32, #tpu.memory_space<vmem>>, vector<1x16x256xf32>,
    %cst_27 = arith.constant 0.000000e+00 : f32
    %51 = vector.broadcast %cst_27 : f32 to vector<16x16xf32>
    %cst_28 = arith.constant 0.000000e+00 : f32
    %52 = vector.broadcast %cst_28 : f32 to vector<1x288xf32>
    %53 = tpu.concatenate %51, %47, %51 in 1 : vector<16x16xf32>, vector<16x256xf32>, vector<16x16xf32> -> vector<16x288xf32>
    %54 = tpu.concatenate %52, %53, %52 in 0 : vector<1x288xf32>, vector<16x288xf32>, vector<1x288xf32> -> vector<18x288xf32>
    %55 = arith.truncf %54 : vector<18x288xf32> to vector<18x288xbf16>
    %cst_29 = arith.constant 0.000000e+00 : f32
    %56 = vector.broadcast %cst_29 : f32 to vector<16x256xf32>
    %57 = vector.extract_strided_slice %55 {offsets = [0, 0], sizes = [18, 256], strides = [1, 1]} : vector<18x288xbf16> to vector<18x256xbf16>
    %58 = vector.extract_strided_slice %57 {offsets = [0, 0], sizes = [16, 256], strides = [1, 1]} : vector<18x256xbf16> to vector<16x256xbf16>
    %c0_30 = arith.constant 0 : index
    %c0_31 = arith.constant 0 : index
    %59 = vector.load %arg4[%c0_30, %c0_31] : memref<2304x256xbf16, #tpu.memory_space<vmem>>, vector<256x256xbf16>
    %cst_32 = arith.constant dense<0.000000e+00> : vector<16x256xf32>
    %60 = tpu.matmul %58, %59, %cst_32 {dimension_numbers = #tpu.dot_dimension_numbers<[1], [0], [0], [1], [0, 0, 1, 1], [], []>} : vector<16x256xbf16>, vector<256x256xbf16>, vector<16x256xf32> -> vector<16x256xf32>
    %61 = arith.addf %56, %60 : vector<16x256xf32>
    %62 = vector.extract_strided_slice %57 {offsets = [1, 0], sizes = [16, 256], strides = [1, 1]} : vector<18x256xbf16> to vector<16x256xbf16>
    %c768 = arith.constant 768 : index
    %c0_33 = arith.constant 0 : index
    %63 = vector.load %arg4[%c768, %c0_33] : memref<2304x256xbf16, #tpu.memory_space<vmem>>, vector<256x256xbf16>
    %cst_34 = arith.constant dense<0.000000e+00> : vector<16x256xf32>
    %64 = tpu.matmul %62, %63, %cst_34 {dimension_numbers = #tpu.dot_dimension_numbers<[1], [0], [0], [1], [0, 0, 1, 1], [], []>} : vector<16x256xbf16>, vector<256x256xbf16>, vector<16x256xf32> -> vector<16x256xf32>
    %65 = arith.addf %61, %64 : vector<16x256xf32>
    %66 = vector.extract_strided_slice %57 {offsets = [2, 0], sizes = [16, 256], strides = [1, 1]} : vector<18x256xbf16> to vector<16x256xbf16>
    %c1536 = arith.constant 1536 : index
    %c0_35 = arith.constant 0 : index
    %67 = vector.load %arg4[%c1536, %c0_35] : memref<2304x256xbf16, #tpu.memory_space<vmem>>, vector<256x256xbf16>
    %cst_36 = arith.constant dense<0.000000e+00> : vector<16x256xf32>
    %68 = tpu.matmul %66, %67, %cst_36 {dimension_numbers = #tpu.dot_dimension_numbers<[1], [0], [0], [1], [0, 0, 1, 1], [], []>} : vector<16x256xbf16>, vector<256x256xbf16>, vector<16x256xf32> -> vector<16x256xf32>
    %69 = arith.addf %65, %68 : vector<16x256xf32>
    %70 = vector.extract_strided_slice %55 {offsets = [0, 16], sizes = [18, 256], strides = [1, 1]} : vector<18x288xbf16> to vector<18x256xbf16>
    %71 = vector.extract_strided_slice %70 {offsets = [0, 0], sizes = [16, 256], strides = [1, 1]} : vector<18x256xbf16> to vector<16x256xbf16>
    %c256_37 = arith.constant 256 : index
    %c0_38 = arith.constant 0 : index
    %72 = vector.load %arg4[%c256_37, %c0_38] : memref<2304x256xbf16, #tpu.memory_space<vmem>>, vector<256x256xbf16>
    %cst_39 = arith.constant dense<0.000000e+00> : vector<16x256xf32>
    %73 = tpu.matmul %71, %72, %cst_39 {dimension_numbers = #tpu.dot_dimension_numbers<[1], [0], [0], [1], [0, 0, 1, 1], [], []>} : vector<16x256xbf16>, vector<256x256xbf16>, vector<16x256xf32> -> vector<16x256xf32>
    %74 = arith.addf %69, %73 : vector<16x256xf32>
    %75 = vector.extract_strided_slice %70 {offsets = [1, 0], sizes = [16, 256], strides = [1, 1]} : vector<18x256xbf16> to vector<16x256xbf16>
    %c1024 = arith.constant 1024 : index
    %c0_40 = arith.constant 0 : index
    %76 = vector.load %arg4[%c1024, %c0_40] : memref<2304x256xbf16, #tpu.memory_space<vmem>>, vector<256x256xbf16>
    %cst_41 = arith.constant dense<0.000000e+00> : vector<16x256xf32>
    %77 = tpu.matmul %75, %76, %cst_41 {dimension_numbers = #tpu.dot_dimension_numbers<[1], [0], [0], [1], [0, 0, 1, 1], [], []>} : vector<16x256xbf16>, vector<256x256xbf16>, vector<16x256xf32> -> vector<16x256xf32>
    %78 = arith.addf %74, %77 : vector<16x256xf32>
    %79 = vector.extract_strided_slice %70 {offsets = [2, 0], sizes = [16, 256], strides = [1, 1]} : vector<18x256xbf16> to vector<16x256xbf16>
    %c1792 = arith.constant 1792 : index
    %c0_42 = arith.constant 0 : index
    %80 = vector.load %arg4[%c1792, %c0_42] : memref<2304x256xbf16, #tpu.memory_space<vmem>>, vector<256x256xbf16>
    %cst_43 = arith.constant dense<0.000000e+00> : vector<16x256xf32>
    %81 = tpu.matmul %79, %80, %cst_43 {dimension_numbers = #tpu.dot_dimension_numbers<[1], [0], [0], [1], [0, 0, 1, 1], [], []>} : vector<16x256xbf16>, vector<256x256xbf16>, vector<16x256xf32> -> vector<16x256xf32>
    %82 = arith.addf %78, %81 : vector<16x256xf32>
    %83 = vector.extract_strided_slice %55 {offsets = [0, 32], sizes = [18, 256], strides = [1, 1]} : vector<18x288xbf16> to vector<18x256xbf16>
    %84 = vector.extract_strided_slice %83 {offsets = [0, 0], sizes = [16, 256], strides = [1, 1]} : vector<18x256xbf16> to vector<16x256xbf16>
    %c512_44 = arith.constant 512 : index
    %c0_45 = arith.constant 0 : index
    %85 = vector.load %arg4[%c512_44, %c0_45] : memref<2304x256xbf16, #tpu.memory_space<vmem>>, vector<256x256xbf16>
    %cst_46 = arith.constant dense<0.000000e+00> : vector<16x256xf32>
    %86 = tpu.matmul %84, %85, %cst_46 {dimension_numbers = #tpu.dot_dimension_numbers<[1], [0], [0], [1], [0, 0, 1, 1], [], []>} : vector<16x256xbf16>, vector<256x256xbf16>, vector<16x256xf32> -> vector<16x256xf32>
    %87 = arith.addf %82, %86 : vector<16x256xf32>
    %88 = vector.extract_strided_slice %83 {offsets = [1, 0], sizes = [16, 256], strides = [1, 1]} : vector<18x256xbf16> to vector<16x256xbf16>
    %c1280 = arith.constant 1280 : index
    %c0_47 = arith.constant 0 : index
    %89 = vector.load %arg4[%c1280, %c0_47] : memref<2304x256xbf16, #tpu.memory_space<vmem>>, vector<256x256xbf16>
    %cst_48 = arith.constant dense<0.000000e+00> : vector<16x256xf32>
    %90 = tpu.matmul %88, %89, %cst_48 {dimension_numbers = #tpu.dot_dimension_numbers<[1], [0], [0], [1], [0, 0, 1, 1], [], []>} : vector<16x256xbf16>, vector<256x256xbf16>, vector<16x256xf32> -> vector<16x256xf32>
    %91 = arith.addf %87, %90 : vector<16x256xf32>
    %92 = vector.extract_strided_slice %83 {offsets = [2, 0], sizes = [16, 256], strides = [1, 1]} : vector<18x256xbf16> to vector<16x256xbf16>
    %c2048 = arith.constant 2048 : index
    %c0_49 = arith.constant 0 : index
    %93 = vector.load %arg4[%c2048, %c0_49] : memref<2304x256xbf16, #tpu.memory_space<vmem>>, vector<256x256xbf16>
    %cst_50 = arith.constant dense<0.000000e+00> : vector<16x256xf32>
    %94 = tpu.matmul %92, %93, %cst_50 {dimension_numbers = #tpu.dot_dimension_numbers<[1], [0], [0], [1], [0, 0, 1, 1], [], []>} : vector<16x256xbf16>, vector<256x256xbf16>, vector<16x256xf32> -> vector<16x256xf32>
    %95 = arith.addf %91, %94 : vector<16x256xf32>
    %c0_51 = arith.constant 0 : index
    %c0_52 = arith.constant 0 : index
    %96 = vector.load %arg5[%c0_51, %c0_52] : memref<1x256xf32, #tpu.memory_space<vmem>>, vector<1x256xf32>
    %97 = vector.broadcast %96 : vector<1x256xf32> to vector<16x256xf32>
    %98 = arith.addf %95, %97 : vector<16x256xf32>
    %cst_53 = arith.constant 0.000000e+00 : f32
    %99 = vector.broadcast %cst_53 : f32 to vector<16x256xf32>
    %100 = arith.maximumf %98, %99 : vector<16x256xf32>
    %101 = arith.truncf %100 : vector<16x256xf32> to vector<16x256xbf16>
    %c0_54 = arith.constant 0 : index
    %c0_55 = arith.constant 0 : index
    %102 = vector.load %arg6[%c0_54, %c0_55] : memref<256x288xbf16, #tpu.memory_space<vmem>>, vector<256x288xbf16>
    %cst_56 = arith.constant dense<0.000000e+00> : vector<16x288xf32>
    %103 = tpu.matmul %101, %102, %cst_56 {dimension_numbers = #tpu.dot_dimension_numbers<[1], [0], [0], [1], [0, 0, 1, 1], [], []>} : vector<16x256xbf16>, vector<256x288xbf16>, vector<16x288xf32> -> vector<16x288xf32>
    %c0_57 = arith.constant 0 : index
    %c0_58 = arith.constant 0 : index
    %104 = vector.load %arg7[%c0_57, %c0_58] : memref<1x288xf32, #tpu.memory_space<vmem>>, vector<1x288xf32>
    %105 = vector.broadcast %104 : vector<1x288xf32> to vector<16x288xf32>
    %106 = arith.addf %103, %105 : vector<16x288xf32>
    %c0_59 = arith.constant 0 : index
    %c0_60 = arith.constant 0 : index
    %c0_61 = arith.constant 0 : index
    %107 = vector.load %arg9[%c0_59, %c0_60, %c0_61] : memref<1x16x288xf32, #tpu.memory_space<vmem>>, vector<1x16x288xf32>
    %108 = vector.shape_cast %107 : vector<1x16x288xf32> to vector<16x288xf32>
    %109 = vector.shape_cast %106 : vector<16x288xf32> to vector<1x16x288xf32>
    tpu.vector_store %arg9[%c0_59, %c0_60, %c0_61], %109 {strides = array<i32>} : memref<1x16x288xf32, #tpu.memory_space<vmem>>, vector<1x16x288xf32>,
    return
  }
  func.func @transform_0(%arg0: i32) -> (i32, i32, i32) {
    %c0_i32 = arith.constant 0 : i32
    %c0_i32_0 = arith.constant 0 : i32
    %c0_i32_1 = arith.constant 0 : i32
    return %arg0, %c0_i32, %c0_i32_0 : i32, i32, i32
  }
  func.func @transform_1(%arg0: i32) -> (i32, i32) {
    %c0_i32 = arith.constant 0 : i32
    %c0_i32_0 = arith.constant 0 : i32
    %c0_i32_1 = arith.constant 0 : i32
    return %c0_i32, %c0_i32_0 : i32, i32
  }
  func.func @transform_2(%arg0: i32) -> (i32, i32) {
    %c0_i32 = arith.constant 0 : i32
    %c0_i32_0 = arith.constant 0 : i32
    %c0_i32_1 = arith.constant 0 : i32
    return %c0_i32, %c0_i32_0 : i32, i32
  }
  func.func @transform_3(%arg0: i32) -> (i32, i32) {
    %c0_i32 = arith.constant 0 : i32
    %c0_i32_0 = arith.constant 0 : i32
    %c0_i32_1 = arith.constant 0 : i32
    return %c0_i32, %c0_i32_0 : i32, i32
  }
  func.func @transform_4(%arg0: i32) -> (i32, i32) {
    %c0_i32 = arith.constant 0 : i32
    %c0_i32_0 = arith.constant 0 : i32
    %c0_i32_1 = arith.constant 0 : i32
    return %c0_i32, %c0_i32_0 : i32, i32
  }
  func.func @transform_5(%arg0: i32) -> (i32, i32) {
    %c0_i32 = arith.constant 0 : i32
    %c0_i32_0 = arith.constant 0 : i32
    %c0_i32_1 = arith.constant 0 : i32
    return %c0_i32, %c0_i32_0 : i32, i32
  }
  func.func @transform_6(%arg0: i32) -> (i32, i32) {
    %c0_i32 = arith.constant 0 : i32
    %c0_i32_0 = arith.constant 0 : i32
    %c0_i32_1 = arith.constant 0 : i32
    return %c0_i32, %c0_i32_0 : i32, i32
  }
  func.func @transform_7(%arg0: i32) -> (i32, i32, i32) {
    %c0_i32 = arith.constant 0 : i32
    %c0_i32_0 = arith.constant 0 : i32
    %c0_i32_1 = arith.constant 0 : i32
    return %arg0, %c0_i32, %c0_i32_0 : i32, i32, i32
  }
  func.func @transform_8(%arg0: i32) -> (i32, i32, i32) {
    %c0_i32 = arith.constant 0 : i32
    %c0_i32_0 = arith.constant 0 : i32
    %c0_i32_1 = arith.constant 0 : i32
    return %arg0, %c0_i32, %c0_i32_0 : i32, i32, i32
  }
}

module attributes {stable_mosaic.version = 11 : i64} {
  func.func @_head_kernel(%arg0: memref<16x256xbf16, #tpu.memory_space<vmem>>, %arg1: memref<256x32xbf16, #tpu.memory_space<vmem>>, %arg2: memref<1x32xf32, #tpu.memory_space<vmem>>, %arg3: memref<32x25xbf16, #tpu.memory_space<vmem>>, %arg4: memref<1x25xf32, #tpu.memory_space<vmem>>, %arg5: memref<16x25xf32, #tpu.memory_space<vmem>>) attributes {dimension_semantics = [], scalar_prefetch = 0 : i64, scratch_operands = 0 : i64, tpu.core_type = #tpu.core_type<tc>} {
    %c0 = arith.constant 0 : index
    %c0_0 = arith.constant 0 : index
    %0 = vector.load %arg0[%c0, %c0_0] : memref<16x256xbf16, #tpu.memory_space<vmem>>, vector<16x256xbf16>
    %c0_1 = arith.constant 0 : index
    %c0_2 = arith.constant 0 : index
    %1 = vector.load %arg1[%c0_1, %c0_2] : memref<256x32xbf16, #tpu.memory_space<vmem>>, vector<256x32xbf16>
    %cst = arith.constant dense<0.000000e+00> : vector<16x32xf32>
    %2 = tpu.matmul %0, %1, %cst {dimension_numbers = #tpu.dot_dimension_numbers<[1], [0], [0], [1], [0, 0, 1, 1], [], []>} : vector<16x256xbf16>, vector<256x32xbf16>, vector<16x32xf32> -> vector<16x32xf32>
    %c0_3 = arith.constant 0 : index
    %c0_4 = arith.constant 0 : index
    %3 = vector.load %arg2[%c0_3, %c0_4] : memref<1x32xf32, #tpu.memory_space<vmem>>, vector<1x32xf32>
    %4 = vector.broadcast %3 : vector<1x32xf32> to vector<16x32xf32>
    %5 = arith.addf %2, %4 : vector<16x32xf32>
    %cst_5 = arith.constant 0.000000e+00 : f32
    %6 = vector.broadcast %cst_5 : f32 to vector<16x32xf32>
    %7 = arith.maximumf %5, %6 : vector<16x32xf32>
    %8 = arith.truncf %7 : vector<16x32xf32> to vector<16x32xbf16>
    %c0_6 = arith.constant 0 : index
    %c0_7 = arith.constant 0 : index
    %9 = vector.load %arg3[%c0_6, %c0_7] : memref<32x25xbf16, #tpu.memory_space<vmem>>, vector<32x25xbf16>
    %cst_8 = arith.constant dense<0.000000e+00> : vector<16x25xf32>
    %10 = tpu.matmul %8, %9, %cst_8 {dimension_numbers = #tpu.dot_dimension_numbers<[1], [0], [0], [1], [0, 0, 1, 1], [], []>} : vector<16x32xbf16>, vector<32x25xbf16>, vector<16x25xf32> -> vector<16x25xf32>
    %c0_9 = arith.constant 0 : index
    %c0_10 = arith.constant 0 : index
    %11 = vector.load %arg4[%c0_9, %c0_10] : memref<1x25xf32, #tpu.memory_space<vmem>>, vector<1x25xf32>
    %12 = vector.broadcast %11 : vector<1x25xf32> to vector<16x25xf32>
    %13 = arith.addf %10, %12 : vector<16x25xf32>
    %14 = vector.extract_strided_slice %13 {offsets = [0, 0], sizes = [16, 5], strides = [1, 1]} : vector<16x25xf32> to vector<16x5xf32>
    %cst_11 = arith.constant dense<0xFF800000> : vector<16xf32>
    %15 = vector.multi_reduction <maximumf>, %14, %cst_11 [1] : vector<16x5xf32> to vector<16xf32>
    %16 = vector.shape_cast %15 : vector<16xf32> to vector<16x1xf32>
    %17 = vector.broadcast %16 : vector<16x1xf32> to vector<16x5xf32>
    %18 = arith.subf %14, %17 : vector<16x5xf32>
    %19 = math.exp %18 : vector<16x5xf32>
    %cst_12 = arith.constant dense<0.000000e+00> : vector<16xf32>
    %20 = vector.multi_reduction <add>, %19, %cst_12 [1] : vector<16x5xf32> to vector<16xf32>
    %21 = vector.shape_cast %20 : vector<16xf32> to vector<16x1xf32>
    %22 = tpu.reciprocal %21 {approx = true} : vector<16x1xf32> -> vector<16x1xf32>
    %23 = vector.broadcast %22 : vector<16x1xf32> to vector<16x5xf32>
    %24 = arith.mulf %19, %23 : vector<16x5xf32>
    %25 = vector.extract_strided_slice %13 {offsets = [0, 5], sizes = [16, 20], strides = [1, 1]} : vector<16x25xf32> to vector<16x20xf32>
    %26 = tpu.concatenate %24, %25 in 1 : vector<16x5xf32>, vector<16x20xf32> -> vector<16x25xf32>
    %c0_13 = arith.constant 0 : index
    %c0_14 = arith.constant 0 : index
    %27 = vector.load %arg5[%c0_13, %c0_14] : memref<16x25xf32, #tpu.memory_space<vmem>>, vector<16x25xf32>
    tpu.vector_store %arg5[%c0_13, %c0_14], %26 {strides = array<i32>} : memref<16x25xf32, #tpu.memory_space<vmem>>, vector<16x25xf32>,
    return
  }
}

</mosaic_0001>

<bundles_post_ra>
// kernel: custom-call
= control target key start
LH: loop header
LB: loop body
LE: loop exit
PB: predicated region body
PF: predicated region fallthrough
CT: control target
= control target key end

     0   :  { %5 = vsyncpa [#allocation9], 0  ;;  %v1086_v0 = vmov 2147483648   ;;  %v1087_v1 = vmov 2147483647   ;;  %s1221_s0 = inlined_call_operand.vmem [shape: f32[2,768], index: 0, kind: input, shape index: {}]   ;;  %s1222_s1 = inlined_call_operand.hbm [shape: f32[2,8], index: 1, kind: output, shape index: {0}]   ;;  %s1223_s2 = inlined_call_operand.vmem [shape: s32[2,8], index: 2, kind: output, shape index: {1}]  }
   0x1   :  { %7 = vst [vmem:[#allocation12] sm:$0xff] %v1086_v0  ;;  %8 = vst [vmem:[#allocation14] sm:$0xff] %v1087_v1 }
   0x2   :  { %v1022_v2 = vld [vmem:[%s1221_s0 + $0x8] sm:$0xf]  ;;  %v43_v3 = vlaneseq  ;;  %v27_v4 = vld [vmem:[%s1221_s0] sm:$0xff]  ;;  %v1088_v5 = vmov 2147483648   ;;  %v1089_v6 = vmov 2147483647  }
   0x3   :  { %39 = vst [vmem:[#allocation16 + $0x8] sm:$0xf] %v1022_v2  ;;  %84 = vst [vmem:[#allocation13] sm:$0xff] %v1088_v5  ;;  %v54_v10 = vsub.s32 2147483647, %v27_v4  ;;  %vm53_vm0 = vcmp.lt.s32.totalorder %v27_v4, 0 }
   0x4   :  { %85 = vst [vmem:[#allocation15] sm:$0xff] %v1089_v6  ;;  %v1118_v7 = vshrl.u32 %v43_v3, 7  ;;  %v44_v8 = vand.u32 127, %v43_v3  ;;  %s1122_s0 = smov 0  }
   0x5   :  { %v55_v13 = vsel %vm53_vm0, %v54_v10, %v27_v4 }
   0x6   :  { %v47_v9 = vshrl.u32 %v1118_v7, 1 }
   0x8   :  { %v49_v11 = vmul.u32 128, %v47_v9 }
   0xa   :  { %v50_v12 = vadd.s32 %v49_v11, %v44_v8  ;;  %v61_v14 = vld [vmem:[#allocation16 + $0x8] sm:$0xff] }
   0xb   :  { %vm62_vm1 = vcmp.lt.s32.totalorder %v61_v14, 0  ;;  %v63_v15 = vsub.s32 2147483647, %v61_v14 }
   0xc   :  { %vm57_vm2 = vcmp.lt.s32.totalorder %v50_v12, 768  ;;  %v65_v16 = vadd.s32 512, %v50_v12  ;;  %79 = vst [vmem:[#allocation17] sm:$0xff] %v50_v12 }
   0xd   :  { %v58_v17 = vsel %vm57_vm2, %v55_v13, 2147483648  ;;  %v64_v18 = vsel %vm62_vm1, %v63_v15, %v61_v14 }
   0xe   :  { %59 = vst [vmem:[#allocation16] sm:$0xff] %v58_v17  ;;  %vm66_vm3 = vcmp.lt.s32.totalorder %v65_v16, 768  ;;  %82 = vst [vmem:[#allocation17 + $0x8] sm:$0xff] %v65_v16 }
   0xf   :  { %v67_v19 = vsel %vm66_vm3, %v64_v18, 2147483648 }
  0x10   :  { %68 = vst [vmem:[#allocation16 + $0x8] sm:$0xff] %v67_v19 }
  0x11 LB: > { %s419_s13 = scalar_lea.vmem [#allocation13], %s1084_s0  ;;  %s421_s14 = scalar_lea.vmem [#allocation15], %s1084_s0  ;;  %s1084_s0 = sphi %s1122_s0, %s92_s0  }
  0x12   : > { %s92_s0 = sadd.s32 1, %s1084_s0  }
  0x13   : > { %v94_v21 = vld [vmem:[#allocation17] sm:$0xff]  ;;  %p89_p2 = scmp.ge.s32.totalorder %s92_s0, 8  }
  0x14   :  { %s1095_s0 = smov (%p89_p2), [#allocation8]  }
  0x15   : > { %v93_v20 = vld [vmem:[#allocation16] sm:$0xff]  ;;  %v99_v23 = vld [vmem:[#allocation17 + $0x8] sm:$0xff] }
  0x16   : > { %vm103_vm6 = vcmp.lt.s32.totalorder %v99_v23, %v94_v21 }
  0x17   : > { %v97_v22 = vld [vmem:[#allocation16 + $0x8] sm:$0xff] }
  0x18   : > { %vm101_vm4 = vcmp.gt.s32.totalorder %v97_v22, %v93_v20  ;;  %vm102_vm5 = vcmp.eq.s32.totalorder %v97_v22, %v93_v20 }
  0x19   : > { %vm104_vm7 = vmand %vm102_vm5, %vm103_vm6 }
  0x1a   : > { %vm105_vm8 = vmor %vm101_vm4, %vm104_vm7 }
  0x1b   : > { %v106_v24 = vsel %vm105_vm8, %v97_v22, %v93_v20  ;;  %v107_v25 = vsel %vm105_vm8, %v99_v23, %v94_v21 }
  0x1c   : > { %v109_v26 = vrot.slane %v106_v24, 2  ;;  %v110_v27 = vrot.slane %v107_v25, 2 }
  0x1e   : > { %vm112_vm9 = vcmp.gt.s32.totalorder %v109_v26, %v106_v24  ;;  %vm113_vm10 = vcmp.eq.s32.totalorder %v109_v26, %v106_v24  ;;  %vm114_vm11 = vcmp.lt.s32.totalorder %v110_v27, %v107_v25 }
  0x1f   : > { %vm115_vm12 = vmand %vm113_vm10, %vm114_vm11 }
  0x20   : > { %vm116_vm13 = vmor %vm112_vm9, %vm115_vm12 }
  0x21   : > { %v117_v28 = vsel %vm116_vm13, %v109_v26, %v106_v24  ;;  %v118_v29 = vsel %vm116_vm13, %v110_v27, %v107_v25 }
  0x22   : > { %v120_v30 = vrot.slane %v117_v28, 2  ;;  %v121_v31 = vrot.slane %v118_v29, 2 }
  0x24   : > { %vm123_vm14 = vcmp.gt.s32.totalorder %v120_v30, %v117_v28  ;;  %vm124_vm15 = vcmp.eq.s32.totalorder %v120_v30, %v117_v28  ;;  %vm125_vm0 = vcmp.lt.s32.totalorder %v121_v31, %v118_v29 }
  0x25   : > { %vm126_vm1 = vmand %vm124_vm15, %vm125_vm0 }
  0x26   : > { %vm127_vm2 = vmor %vm123_vm14, %vm126_vm1 }
  0x27   : > { %v128_v32 = vsel %vm127_vm2, %v120_v30, %v117_v28  ;;  %v129_v33 = vsel %vm127_vm2, %v121_v31, %v118_v29 }
  0x28   : > { %v131_v34 = vrot.slane %v128_v32, 2  ;;  %v132_v35 = vrot.slane %v129_v33, 2 }
  0x2a   : > { %vm134_vm3 = vcmp.gt.s32.totalorder %v131_v34, %v128_v32  ;;  %vm135_vm4 = vcmp.eq.s32.totalorder %v131_v34, %v128_v32  ;;  %vm136_vm5 = vcmp.lt.s32.totalorder %v132_v35, %v129_v33 }
  0x2b   : > { %vm137_vm6 = vmand %vm135_vm4, %vm136_vm5 }
  0x2c   : > { %vm138_vm7 = vmor %vm134_vm3, %vm137_vm6 }
  0x2d   : > { %v140_v36 = vsel %vm138_vm7, %v132_v35, %v129_v33  ;;  %v139_v37 = vsel %vm138_vm7, %v131_v34, %v128_v32 }
  0x2e   : > { %174 = vxpose.xlu1.b32.start [1/16] %v140_v36, 128  ;;  %142 = vxpose.xlu0.b32.start [1/16] %v139_v37, 128 }
  0x32   : > { %175 = vxpose.xlu1.b32.cont [2/16] %v140_v36, 128  ;;  %143 = vxpose.xlu0.b32.cont [2/16] %v139_v37, 128 }
  0x36   : > { %176 = vxpose.xlu1.b32.cont [3/16] %v140_v36, 128  ;;  %144 = vxpose.xlu0.b32.cont [3/16] %v139_v37, 128 }
  0x3a   : > { %177 = vxpose.xlu1.b32.cont [4/16] %v140_v36, 128  ;;  %145 = vxpose.xlu0.b32.cont [4/16] %v139_v37, 128 }
  0x3e   : > { %178 = vxpose.xlu1.b32.cont [5/16] %v140_v36, 128  ;;  %146 = vxpose.xlu0.b32.cont [5/16] %v139_v37, 128 }
  0x42   : > { %179 = vxpose.xlu1.b32.cont [6/16] %v140_v36, 128  ;;  %147 = vxpose.xlu0.b32.cont [6/16] %v139_v37, 128 }
  0x46   : > { %180 = vxpose.xlu1.b32.cont [7/16] %v140_v36, 128  ;;  %148 = vxpose.xlu0.b32.cont [7/16] %v139_v37, 128 }
  0x4a   : > { %181 = vxpose.xlu1.b32.cont [8/16] %v140_v36, 128  ;;  %149 = vxpose.xlu0.b32.cont [8/16] %v139_v37, 128 }
  0x4e   : > { %182 = vxpose.xlu1.b32.cont [9/16] %v140_v36, 128  ;;  %150 = vxpose.xlu0.b32.cont [9/16] %v139_v37, 128 }
  0x52   : > { %183 = vxpose.xlu1.b32.cont [10/16] %v140_v36, 128  ;;  %151 = vxpose.xlu0.b32.cont [10/16] %v139_v37, 128 }
  0x56   : > { %184 = vxpose.xlu1.b32.cont [11/16] %v140_v36, 128  ;;  %152 = vxpose.xlu0.b32.cont [11/16] %v139_v37, 128 }
  0x5a   : > { %185 = vxpose.xlu1.b32.cont [12/16] %v140_v36, 128  ;;  %153 = vxpose.xlu0.b32.cont [12/16] %v139_v37, 128 }
  0x5e   : > { %186 = vxpose.xlu1.b32.cont [13/16] %v140_v36, 128  ;;  %154 = vxpose.xlu0.b32.cont [13/16] %v139_v37, 128 }
  0x62   : > { %187 = vxpose.xlu1.b32.cont [14/16] %v140_v36, 128  ;;  %155 = vxpose.xlu0.b32.cont [14/16] %v139_v37, 128 }
  0x66   : > { %188 = vxpose.xlu1.b32.cont [15/16] %v140_v36, 128  ;;  %156 = vxpose.xlu0.b32.cont [15/16] %v139_v37, 128 }
  0x6a   : > { %189 = vxpose.xlu1.b32.end [16/16] %v140_v36, 128  ;;  %157 = vxpose.xlu0.b32.end [16/16] %v139_v37, 128 }
  0xae   : > { %v190_v38 = vpop.trf.xlu1  ;;  %v158_v39 = vpop.trf.xlu0 }
  0xb2   : > { %v191_v40 = vpop.trf.xlu1  ;;  %v159_v41 = vpop.trf.xlu0 }
  0xb3   : > { %vm210_vm8 = vcmp.lt.s32.totalorder %v191_v40, %v190_v38  ;;  %vm208_vm9 = vcmp.gt.s32.totalorder %v159_v41, %v158_v39  ;;  %vm209_vm10 = vcmp.eq.s32.totalorder %v159_v41, %v158_v39 }
  0xb4   : > { %vm211_vm11 = vmand %vm209_vm10, %vm210_vm8 }
  0xb5   : > { %vm212_vm12 = vmor %vm208_vm9, %vm211_vm11 }
  0xb6   : > { %v213_v42 = vsel %vm212_vm12, %v159_v41, %v158_v39  ;;  %v192_v43 = vpop.trf.xlu1  ;;  %v214_v44 = vsel %vm212_vm12, %v191_v40, %v190_v38  ;;  %v160_v45 = vpop.trf.xlu0 }
  0xb7   : > { %vm219_vm13 = vcmp.lt.s32.totalorder %v192_v43, %v214_v44  ;;  %vm217_vm14 = vcmp.gt.s32.totalorder %v160_v45, %v213_v42  ;;  %vm218_vm15 = vcmp.eq.s32.totalorder %v160_v45, %v213_v42 }
  0xb8   : > { %vm220_vm0 = vmand %vm218_vm15, %vm219_vm13 }
  0xb9   : > { %vm221_vm1 = vmor %vm217_vm14, %vm220_vm0 }
  0xba   : > { %v222_v46 = vsel %vm221_vm1, %v160_v45, %v213_v42  ;;  %v193_v47 = vpop.trf.xlu1  ;;  %v223_v48 = vsel %vm221_vm1, %v192_v43, %v214_v44  ;;  %v161_v49 = vpop.trf.xlu0 }
  0xbb   : > { %vm228_vm2 = vcmp.lt.s32.totalorder %v193_v47, %v223_v48  ;;  %vm226_vm3 = vcmp.gt.s32.totalorder %v161_v49, %v222_v46  ;;  %vm227_vm4 = vcmp.eq.s32.totalorder %v161_v49, %v222_v46 }
  0xbc   : > { %vm229_vm5 = vmand %vm227_vm4, %vm228_vm2 }
  0xbd   : > { %vm230_vm6 = vmor %vm226_vm3, %vm229_vm5 }
  0xbe   : > { %v231_v50 = vsel %vm230_vm6, %v161_v49, %v222_v46  ;;  %v194_v51 = vpop.trf.xlu1  ;;  %v232_v52 = vsel %vm230_vm6, %v193_v47, %v223_v48  ;;  %v162_v53 = vpop.trf.xlu0 }
  0xbf   : > { %vm237_vm7 = vcmp.lt.s32.totalorder %v194_v51, %v232_v52  ;;  %vm235_vm8 = vcmp.gt.s32.totalorder %v162_v53, %v231_v50  ;;  %vm236_vm9 = vcmp.eq.s32.totalorder %v162_v53, %v231_v50 }
  0xc0   : > { %vm238_vm10 = vmand %vm236_vm9, %vm237_vm7 }
  0xc1   : > { %vm239_vm11 = vmor %vm235_vm8, %vm238_vm10 }
  0xc2   : > { %v240_v54 = vsel %vm239_vm11, %v162_v53, %v231_v50  ;;  %v195_v55 = vpop.trf.xlu1  ;;  %v241_v56 = vsel %vm239_vm11, %v194_v51, %v232_v52  ;;  %v163_v57 = vpop.trf.xlu0 }
  0xc3   : > { %vm246_vm12 = vcmp.lt.s32.totalorder %v195_v55, %v241_v56  ;;  %vm244_vm13 = vcmp.gt.s32.totalorder %v163_v57, %v240_v54  ;;  %vm245_vm14 = vcmp.eq.s32.totalorder %v163_v57, %v240_v54 }
  0xc4   : > { %vm247_vm15 = vmand %vm245_vm14, %vm246_vm12 }
  0xc5   : > { %vm248_vm0 = vmor %vm244_vm13, %vm247_vm15 }
  0xc6   : > { %v249_v58 = vsel %vm248_vm0, %v163_v57, %v240_v54  ;;  %v196_v59 = vpop.trf.xlu1  ;;  %v250_v60 = vsel %vm248_vm0, %v195_v55, %v241_v56  ;;  %v164_v61 = vpop.trf.xlu0 }
  0xc7   : > { %vm255_vm1 = vcmp.lt.s32.totalorder %v196_v59, %v250_v60  ;;  %vm253_vm2 = vcmp.gt.s32.totalorder %v164_v61, %v249_v58  ;;  %vm254_vm3 = vcmp.eq.s32.totalorder %v164_v61, %v249_v58 }
  0xc8   : > { %vm256_vm4 = vmand %vm254_vm3, %vm255_vm1 }
  0xc9   : > { %vm257_vm5 = vmor %vm253_vm2, %vm256_vm4 }
  0xca   : > { %v258_v62 = vsel %vm257_vm5, %v164_v61, %v249_v58  ;;  %v197_v63 = vpop.trf.xlu1  ;;  %v259_v0 = vsel %vm257_vm5, %v196_v59, %v250_v60  ;;  %v165_v1 = vpop.trf.xlu0 }
  0xcb   : > { %vm264_vm6 = vcmp.lt.s32.totalorder %v197_v63, %v259_v0  ;;  %vm262_vm7 = vcmp.gt.s32.totalorder %v165_v1, %v258_v62  ;;  %vm263_vm8 = vcmp.eq.s32.totalorder %v165_v1, %v258_v62 }
  0xcc   : > { %vm265_vm9 = vmand %vm263_vm8, %vm264_vm6 }
  0xcd   : > { %vm266_vm10 = vmor %vm262_vm7, %vm265_vm9 }
  0xce   : > { %v267_v2 = vsel %vm266_vm10, %v165_v1, %v258_v62  ;;  %v198_v4 = vpop.trf.xlu1  ;;  %v268_v5 = vsel %vm266_vm10, %v197_v63, %v259_v0  ;;  %v166_v6 = vpop.trf.xlu0 }
  0xcf   : > { %vm273_vm11 = vcmp.lt.s32.totalorder %v198_v4, %v268_v5  ;;  %vm271_vm12 = vcmp.gt.s32.totalorder %v166_v6, %v267_v2  ;;  %vm272_vm13 = vcmp.eq.s32.totalorder %v166_v6, %v267_v2 }
  0xd0   : > { %vm274_vm14 = vmand %vm272_vm13, %vm273_vm11 }
  0xd1   : > { %vm275_vm15 = vmor %vm271_vm12, %vm274_vm14 }
  0xd2   : > { %v276_v8 = vsel %vm275_vm15, %v166_v6, %v267_v2  ;;  %v199_v9 = vpop.trf.xlu1  ;;  %v277_v10 = vsel %vm275_vm15, %v198_v4, %v268_v5  ;;  %v167_v11 = vpop.trf.xlu0  ;;  %v1090_v6 = vmov 2147483648  }
  0xd3   : > { %vm282_vm0 = vcmp.lt.s32.totalorder %v199_v9, %v277_v10  ;;  %vm280_vm1 = vcmp.gt.s32.totalorder %v167_v11, %v276_v8  ;;  %vm281_vm2 = vcmp.eq.s32.totalorder %v167_v11, %v276_v8 }
  0xd4   : > { %vm283_vm3 = vmand %vm281_vm2, %vm282_vm0 }
  0xd5   : > { %vm284_vm4 = vmor %vm280_vm1, %vm283_vm3 }
  0xd6   : > { %v285_v12 = vsel %vm284_vm4, %v167_v11, %v276_v8  ;;  %v200_v13 = vpop.trf.xlu1  ;;  %v286_v14 = vsel %vm284_vm4, %v199_v9, %v277_v10  ;;  %v168_v15 = vpop.trf.xlu0  ;;  %v1091_v8 = vmov 2147483647  }
  0xd7   : > { %vm291_vm5 = vcmp.lt.s32.totalorder %v200_v13, %v286_v14  ;;  %vm289_vm6 = vcmp.gt.s32.totalorder %v168_v15, %v285_v12  ;;  %vm290_vm7 = vcmp.eq.s32.totalorder %v168_v15, %v285_v12 }
  0xd8   : > { %vm292_vm8 = vmand %vm290_vm7, %vm291_vm5 }
  0xd9   : > { %vm293_vm9 = vmor %vm289_vm6, %vm292_vm8 }
  0xda   : > { %v294_v16 = vsel %vm293_vm9, %v168_v15, %v285_v12  ;;  %v201_v17 = vpop.trf.xlu1  ;;  %v295_v18 = vsel %vm293_vm9, %v200_v13, %v286_v14  ;;  %v169_v19 = vpop.trf.xlu0  ;;  %v517_v13 = vld [vmem:[#allocation12] sm:$0xff] (%p89_p2)  ;;  %v518_v14 = vld [vmem:[#allocation14] sm:$0xff] (%p89_p2)  ;;  %v1092_v15 = vmov (%p89_p2), 839939668  }
  0xdb   : > { %vm300_vm10 = vcmp.lt.s32.totalorder %v201_v17, %v295_v18  ;;  %vm298_vm11 = vcmp.gt.s32.totalorder %v169_v19, %v294_v16  ;;  %vm299_vm12 = vcmp.eq.s32.totalorder %v169_v19, %v294_v16 }
  0xdc   : > { %vm301_vm13 = vmand %vm299_vm12, %vm300_vm10 }
  0xdd   : > { %vm302_vm14 = vmor %vm298_vm11, %vm301_vm13 }
  0xde   : > { %v303_v20 = vsel %vm302_vm14, %v169_v19, %v294_v16  ;;  %v202_v21 = vpop.trf.xlu1  ;;  %v304_v22 = vsel %vm302_vm14, %v201_v17, %v295_v18  ;;  %v170_v23 = vpop.trf.xlu0  ;;  %v542_v16 = vunpack.c.l.s4 (%p89_p2), %v1092_v15  ;;  %v1093_v17 = vmov (%p89_p2), 1417023538  }
  0xdf   : > { %vm309_vm15 = vcmp.lt.s32.totalorder %v202_v21, %v304_v22  ;;  %vm307_vm0 = vcmp.gt.s32.totalorder %v170_v23, %v303_v20  ;;  %vm308_vm1 = vcmp.eq.s32.totalorder %v170_v23, %v303_v20  ;;  %v570_v18 = vunpack.c.l.s4 (%p89_p2), %v1093_v17 }
  0xe0   : > { %vm310_vm2 = vmand %vm308_vm1, %vm309_vm15  ;;  %v543_v19 = vunpack.c.0.s8 (%p89_p2), %v542_v16 }
  0xe1   : > { %vm311_vm3 = vmor %vm307_vm0, %vm310_vm2 }
  0xe2   : > { %v312_v24 = vsel %vm311_vm3, %v170_v23, %v303_v20  ;;  %v203_v25 = vpop.trf.xlu1  ;;  %v313_v26 = vsel %vm311_vm3, %v202_v21, %v304_v22  ;;  %v171_v27 = vpop.trf.xlu0  ;;  %v563_v23 = vand.u32 (%p89_p2), 4, %v1118_v7 }
  0xe3   : > { %vm318_vm4 = vcmp.lt.s32.totalorder %v203_v25, %v313_v26  ;;  %vm316_vm5 = vcmp.gt.s32.totalorder %v171_v27, %v312_v24  ;;  %vm317_vm6 = vcmp.eq.s32.totalorder %v171_v27, %v312_v24 }
  0xe4   : > { %vm319_vm7 = vmand %vm317_vm6, %vm318_vm4 }
  0xe5   : > { %vm320_vm8 = vmor %vm316_vm5, %vm319_vm7 }
  0xe6   : > { %v321_v28 = vsel %vm320_vm8, %v171_v27, %v312_v24  ;;  %v204_v29 = vpop.trf.xlu1  ;;  %v322_v30 = vsel %vm320_vm8, %v203_v25, %v313_v26  ;;  %v172_v31 = vpop.trf.xlu0  ;;  %v571_v25 = vunpack.c.0.s8 (%p89_p2), %v570_v18 }
  0xe7   : > { %vm327_vm9 = vcmp.lt.s32.totalorder %v204_v29, %v322_v30  ;;  %vm325_vm10 = vcmp.gt.s32.totalorder %v172_v31, %v321_v28  ;;  %vm326_vm11 = vcmp.eq.s32.totalorder %v172_v31, %v321_v28 }
  0xe8   : > { %vm328_vm12 = vmand %vm326_vm11, %vm327_vm9 }
  0xe9   : > { %vm329_vm13 = vmor %vm325_vm10, %vm328_vm12 }
  0xea   : > { %v330_v32 = vsel %vm329_vm13, %v172_v31, %v321_v28  ;;  %v205_v33 = vpop.trf.xlu1  ;;  %v331_v34 = vsel %vm329_vm13, %v204_v29, %v322_v30  ;;  %v173_v35 = vpop.trf.xlu0  ;;  %v1094_v31 = vmov (%p89_p2), 1732584193  }
  0xeb   : > { %vm336_vm14 = vcmp.lt.s32.totalorder %v205_v33, %v331_v34  ;;  %vm334_vm15 = vcmp.gt.s32.totalorder %v173_v35, %v330_v32  ;;  %vm335_vm0 = vcmp.eq.s32.totalorder %v173_v35, %v330_v32 }
  0xec   : > { %vm337_vm1 = vmand %vm335_vm0, %vm336_vm14 }
  0xed   : > { %vm338_vm2 = vmor %vm334_vm15, %vm337_vm1 }
  0xee   : > { %v339_v36 = vsel %vm338_vm2, %v173_v35, %v330_v32  ;;  %v340_v37 = vsel %vm338_vm2, %v205_v33, %v331_v34  ;;  %v598_v32 = vunpack.c.l.s4 (%p89_p2), %v1094_v31  ;;  %v1147_v33 = vsub.s32 (%p89_p2), %v571_v25, %v1118_v7 }
  0xef   : > { %v342_v38 = vrot.slane %v339_v36, 1  ;;  %v343_v39 = vrot.slane %v340_v37, 1  ;;  %v591_v34 = vand.u32 (%p89_p2), 2, %v1118_v7 }
  0xf1   : > { %vm345_vm3 = vcmp.gt.s32.totalorder %v342_v38, %v339_v36  ;;  %vm346_vm4 = vcmp.eq.s32.totalorder %v342_v38, %v339_v36  ;;  %vm347_vm5 = vcmp.lt.s32.totalorder %v343_v39, %v340_v37 }
  0xf2   : > { %vm348_vm6 = vmand %vm346_vm4, %vm347_vm5 }
  0xf3   : > { %vm349_vm7 = vmor %vm345_vm3, %vm348_vm6 }
  0xf4   : > { %v350_v40 = vsel %vm349_vm7, %v342_v38, %v339_v36  ;;  %v351_v41 = vsel %vm349_vm7, %v343_v39, %v340_v37  ;;  %v599_v37 = vunpack.c.0.s8 (%p89_p2), %v598_v32 }
  0xf5   : > { %v353_v42 = vrot.slane %v350_v40, 1  ;;  %v354_v43 = vrot.slane %v351_v41, 1 }
  0xf7   : > { %vm356_vm8 = vcmp.gt.s32.totalorder %v353_v42, %v350_v40  ;;  %vm357_vm9 = vcmp.eq.s32.totalorder %v353_v42, %v350_v40  ;;  %vm358_vm10 = vcmp.lt.s32.totalorder %v354_v43, %v351_v41 }
  0xf8   : > { %vm359_vm11 = vmand %vm357_vm9, %vm358_vm10 }
  0xf9   : > { %vm360_vm12 = vmor %vm356_vm8, %vm359_vm11 }
  0xfa   : > { %v361_v44 = vsel %vm360_vm12, %v353_v42, %v350_v40  ;;  %v362_v45 = vsel %vm360_vm12, %v354_v43, %v351_v41  ;;  %v1161_v42 = vsub.s32 (%p89_p2), %v599_v37, %v1118_v7 }
  0xfb   : > { %v364_v46 = vrot.slane %v361_v44, 1  ;;  %v365_v47 = vrot.slane %v362_v45, 1 }
  0xfd   : > { %vm369_vm13 = vcmp.lt.s32.totalorder %v365_v47, %v362_v45  ;;  %vm367_vm14 = vcmp.gt.s32.totalorder %v364_v46, %v361_v44  ;;  %vm368_vm15 = vcmp.eq.s32.totalorder %v364_v46, %v361_v44 }
  0xfe   : > { %vm370_vm0 = vmand %vm368_vm15, %vm369_vm13 }
  0xff   : > { %vm371_vm1 = vmor %vm367_vm14, %vm370_vm0 }
 0x100   : > { %v372_v48 = vsel %vm371_vm1, %v364_v46, %v361_v44  ;;  %v373_v49 = vsel %vm371_vm1, %v365_v47, %v362_v45  ;;  %v619_v46 = vand.u32 (%p89_p2), 1, %v1118_v7 }
 0x101   : > { %v375_v50 = vrot.slane %v372_v48, 1  ;;  %v376_v51 = vrot.slane %v373_v49, 1 }
 0x103   : > { %vm378_vm2 = vcmp.gt.s32.totalorder %v375_v50, %v372_v48  ;;  %vm379_vm3 = vcmp.eq.s32.totalorder %v375_v50, %v372_v48  ;;  %vm380_vm4 = vcmp.lt.s32.totalorder %v376_v51, %v373_v49 }
 0x104   : > { %vm381_vm5 = vmand %vm379_vm3, %vm380_vm4 }
 0x105   : > { %vm382_vm6 = vmor %vm378_vm2, %vm381_vm5 }
 0x106   : > { %v383_v52 = vsel %vm382_vm6, %v375_v50, %v372_v48  ;;  %v384_v53 = vsel %vm382_vm6, %v376_v51, %v373_v49 }
 0x107   : > { %v386_v54 = vrot.slane %v383_v52, 1  ;;  %v387_v55 = vrot.slane %v384_v53, 1 }
 0x109   : > { %vm389_vm7 = vcmp.gt.s32.totalorder %v386_v54, %v383_v52  ;;  %vm390_vm8 = vcmp.eq.s32.totalorder %v386_v54, %v383_v52  ;;  %vm391_vm9 = vcmp.lt.s32.totalorder %v387_v55, %v384_v53 }
 0x10a   : > { %vm392_vm10 = vmand %vm390_vm8, %vm391_vm9 }
 0x10b   : > { %vm393_vm11 = vmor %vm389_vm7, %vm392_vm10 }
 0x10c   : > { %v394_v56 = vsel %vm393_vm11, %v386_v54, %v383_v52  ;;  %v395_v57 = vsel %vm393_vm11, %v387_v55, %v384_v53 }
 0x10d   : > { %v397_v58 = vrot.slane %v394_v56, 1  ;;  %v398_v59 = vrot.slane %v395_v57, 1 }
 0x10f   : > { %vm400_vm12 = vcmp.gt.s32.totalorder %v397_v58, %v394_v56  ;;  %vm401_vm13 = vcmp.eq.s32.totalorder %v397_v58, %v394_v56  ;;  %vm402_vm14 = vcmp.lt.s32.totalorder %v398_v59, %v395_v57 }
 0x110   : > { %vm403_vm15 = vmand %vm401_vm13, %vm402_vm14  ;;  %vm1141_vm13 = vcmp.ne.s32.totalorder (%p89_p2), %v563_v23, 0 }
 0x111   : > { %vm404_vm0 = vmor %vm400_vm12, %vm403_vm15 }
 0x112   : > { %v405_v60 = vsel %vm404_vm0, %v397_v58, %v394_v56  ;;  %v406_v61 = vsel %vm404_vm0, %v398_v59, %v395_v57 }
 0x113   : > { %v408_v62 = vrot.slane %v405_v60, 1  ;;  %v409_v63 = vrot.slane %v406_v61, 1 }
 0x115   : > { %vm411_vm1 = vcmp.gt.s32.totalorder %v408_v62, %v405_v60  ;;  %vm412_vm2 = vcmp.eq.s32.totalorder %v408_v62, %v405_v60  ;;  %vm413_vm3 = vcmp.lt.s32.totalorder %v409_v63, %v406_v61 }
 0x116   : > { %vm414_vm4 = vmand %vm412_vm2, %vm413_vm3 }
 0x117   : > { %vm415_vm5 = vmor %vm411_vm1, %vm414_vm4 }
 0x118   : > { %v417_v0 = vsel %vm415_vm5, %v409_v63, %v406_v61  ;;  %v416_v1 = vsel %vm415_vm5, %v408_v62, %v405_v60 }
 0x119   : > { %424 = vxpose.xlu0.b32.start.end [1/1] (short) (narrow) %v417_v0, 8  ;;  %420 = vst [vmem:[%s419_s13] sm:$0x1] %v416_v1  ;;  %422 = vst [vmem:[%s421_s14] sm:$0x1] %v417_v0  ;;  %s958_s13 = sshll.u32 (%p89_p2), %s1095_s0, 4  ;;  %s959_s13 = int_to_ptr.vmem [resolvable:$true] %s958_s13 }
 0x11a   :  { %s1054_s14 = scalar_lea.vmem (%p89_p2), %s959_s13, 32  ;;  %p1059_p4 = scmp.lt.s32.totalorder (%p89_p2), %s959_s13, %s959_s13 }
 0x11b   :  { %p1055_p3 = scmp.ne.s32.totalorder (%p89_p2), %s959_s13, %s1054_s14  ;;  %p1060_p5 = scmp.lt.s32.totalorder (%p89_p2), %s1054_s14, %s1054_s14 }
 0x11d   :  { %p1061_p6 = por (%p89_p2), %p1060_p5, %p1059_p4 }
 0x11f   :  { %p1062_p7 = pnand (%p89_p2), %p1061_p6, %p1055_p3 }
 0x120   :  { %v505_v11 = vld [vmem:[#allocation13 + $0x7] ss:$-1 sm:$0xff] (%p89_p2)  ;;  %v511_v12 = vld [vmem:[#allocation15 + $0x7] ss:$-1 sm:$0xff] (%p89_p2) }
 0x121   :  { %vm523_vm8 = vcmp.gt.s32.totalorder (%p89_p2), %v517_v13, %v505_v11  ;;  %vm524_vm9 = vcmp.eq.s32.totalorder (%p89_p2), %v517_v13, %v505_v11  ;;  %vm525_vm10 = vcmp.lt.s32.totalorder (%p89_p2), %v518_v14, %v511_v12 }
 0x122   :  { %vm526_vm11 = vmand (%p89_p2), %vm524_vm9, %vm525_vm10  ;;  %vm1154_vm9 = vcmp.ne.s32.totalorder (%p89_p2), %v591_v34, 0 }
 0x123   :  { %vm527_vm12 = vmor (%p89_p2), %vm523_vm8, %vm526_vm11 }
 0x124   :  { %v528_v20 = vsel (%p89_p2), %vm527_vm12, %v517_v13, %v505_v11  ;;  %v530_v21 = vsel (%p89_p2), %vm527_vm12, %v505_v11, %v517_v13  ;;  %v532_v22 = vsel (%p89_p2), %vm527_vm12, %v518_v14, %v511_v12  ;;  %v534_v24 = vsel (%p89_p2), %vm527_vm12, %v511_v12, %v518_v14 }
 0x199   : > { %v440_v2 = vpop.trf.xlu0 }
 0x19a   : > { %v479_v4 = vrot.slane %v440_v2, 1  ;;  %1031 = vpush %v440_v2 }
 0x19c   : > { %1033 = vpush %v479_v4 }
 0x1cb   : > { %s1032_s15 = spop %1031 }
 0x1cc   : > { %s457_s16 = sshrl.u32 %s1032_s15, 9  ;;  %s459_s17 = ssub.s32 0, %s1032_s15 }
 0x1cd   : > { %p458_p0 = scmp.lt.s32.totalorder %s1032_s15, 0  ;;  %s1023_s18 = smin.u32 %s1032_s15, %s459_s17 }
 0x1ce   : > { %s461_s19 = sand.u32 511, %s1023_s18   ;;  %s1025_s20 = sshll.u32 %s457_s16, 3 }
 0x1cf   : > { %s462_s21 = ssub.s32 0, %s461_s19  ;;  %s1034_s22 = spop %1033 }
 0x1d0   : > { %s1231_s21 = smov (!%p458_p0, %s462_s21), %s461_s19  ;;  %s483_s26 = ssub.s32 0, %s1034_s22 }
 0x1d1   : > { %s464_s23 = sshrl.u32 %s1231_s21, 7  ;;  %s466_s24 = sand.u32 127, %s1231_s21  }
 0x1d2   : > { %s1024_s25 = sshll.u32 %s464_s23, 8  ;;  %s1027_s28 = smin.u32 %s1034_s22, %s483_s26 }
 0x1d3   : > { %s467_s27 = sadd.s32 %s1024_s25, %s466_s24  ;;  %p482_p1 = scmp.lt.s32.totalorder %s1034_s22, 0 }
 0x1d4   : > { %v469_v5 = vstv %s467_s27  ;;  %s485_s29 = sand.u32 511, %s1027_s28   ;;  %s473_s3 = scalar_lea.vmem [#allocation16], %s1025_s20 }
 0x1d5   : > { %vm471_vm6 = vcmp.eq.s32.totalorder %v43_v3, %v469_v5  ;;  %s486_s30 = ssub.s32 0, %s485_s29  ;;  %s476_s4 = scalar_lea.vmem [#allocation17], %s1025_s20 }
 0x1d6   : > { %474 = vst.msk [vmem:[%s473_s3] sm:$0xff] %vm471_vm6, %v1090_v6  ;;  %477 = vst.msk [vmem:[%s476_s4] sm:$0xff] %vm471_vm6, %v1091_v8  ;;  %s1233_s30 = smov (!%p482_p1, %s486_s30), %s485_s29  ;;  %s481_s5 = sshrl.u32 %s1034_s22, 9 }
 0x1d7   : > { %s488_s6 = sshrl.u32 %s1233_s30, 7  ;;  %s490_s7 = sand.u32 127, %s1233_s30  }
 0x1d8   : > { %s1028_s8 = sshll.u32 %s488_s6, 8  ;;  %s1029_s10 = sshll.u32 %s481_s5, 3 }
 0x1d9   : > { %s491_s9 = sadd.s32 %s1028_s8, %s490_s7  ;;  %s497_s11 = scalar_lea.vmem [#allocation16], %s1029_s10 }
 0x1da   : > { %v493_v9 = vstv %s491_s9  ;;  %s500_s12 = scalar_lea.vmem [#allocation17], %s1029_s10  ;;  %91 = sbr.rel (!%p89_p2) target bundleno = 17 (0x11), region = 107 }
 0x1db   : > { %v494_v10 = vadd.s32 128, %v493_v9 }
 0x1dd   : > { %vm495_vm7 = vcmp.eq.s32.totalorder %v43_v3, %v494_v10  ;;  %v1136_v3 = vsub.s32 (%p89_p2), %v543_v19, %v1118_v7 }
 0x1de   : > { %498 = vst.msk [vmem:[%s497_s11] sm:$0xff] %vm495_vm7, %v1090_v6  ;;  %501 = vst.msk [vmem:[%s500_s12] sm:$0xff] %vm495_vm7, %v1091_v8 }
 0x1df   :  { %v547_v26 = vrot.slane (%p89_p2), %v528_v20, %v1136_v3  ;;  %v554_v27 = vrot.slane (%p89_p2), %v532_v22, %v1136_v3  ;;  %v728_v28 = vrot.slane (%p89_p2), %v530_v21, %v1136_v3  ;;  %v735_v30 = vrot.slane (%p89_p2), %v534_v24, %v1136_v3 }
 0x1e1   :  { %vm556_vm14 = vcmp.gt.s32.totalorder %v528_v20, %v547_v26  ;;  %vm557_vm15 = vcmp.eq.s32.totalorder %v528_v20, %v547_v26  ;;  %vm558_vm0 = vcmp.lt.s32.totalorder %v532_v22, %v554_v27  ;;  %vm738_vm2 = vcmp.eq.s32.totalorder %v530_v21, %v728_v28 }
 0x1e2   :  { %vm559_vm1 = vmand %vm557_vm15, %vm558_vm0  ;;  %vm739_vm3 = vcmp.lt.s32.totalorder %v534_v24, %v735_v30  ;;  %vm737_vm5 = vcmp.gt.s32.totalorder %v530_v21, %v728_v28 }
 0x1e3   :  { %vm560_vm4 = vmor %vm556_vm14, %vm559_vm1 }
 0x1e4   :  { %vm565_vm6 = vmxor %vm560_vm4, %vm1141_vm13 }
 0x1e5   :  { %v566_v35 = vsel %vm565_vm6, %v528_v20, %v547_v26  ;;  %v567_v36 = vsel %vm565_vm6, %v532_v22, %v554_v27  ;;  %vm740_vm7 = vmand %vm738_vm2, %vm739_vm3 }
 0x1e6   :  { %v575_v38 = vrot.slane %v566_v35, %v1147_v33  ;;  %v582_v39 = vrot.slane %v567_v36, %v1147_v33  ;;  %vm741_vm8 = vmor %vm737_vm5, %vm740_vm7 }
 0x1e7   :  { %vm746_vm10 = vmxor %vm741_vm8, %vm1141_vm13 }
 0x1e8   :  { %vm584_vm11 = vcmp.gt.s32.totalorder %v566_v35, %v575_v38  ;;  %vm585_vm12 = vcmp.eq.s32.totalorder %v566_v35, %v575_v38  ;;  %vm586_vm14 = vcmp.lt.s32.totalorder %v567_v36, %v582_v39  ;;  %v747_v41 = vsel %vm746_vm10, %v530_v21, %v728_v28 }
 0x1e9   :  { %vm587_vm15 = vmand %vm585_vm12, %vm586_vm14  ;;  %v748_v43 = vsel %vm746_vm10, %v534_v24, %v735_v30  ;;  %v756_v44 = vrot.slane %v747_v41, %v1147_v33 }
 0x1ea   :  { %vm588_vm0 = vmor %vm584_vm11, %vm587_vm15  ;;  %v763_v45 = vrot.slane %v748_v43, %v1147_v33  ;;  %vm1170_vm11 = vcmp.ne.s32.totalorder %v619_v46, 0 }
 0x1eb   :  { %vm593_vm1 = vmxor %vm588_vm0, %vm1154_vm9  ;;  %vm765_vm2 = vcmp.gt.s32.totalorder %v747_v41, %v756_v44  ;;  %vm766_vm3 = vcmp.eq.s32.totalorder %v747_v41, %v756_v44 }
 0x1ec   :  { %v594_v47 = vsel %vm593_vm1, %v566_v35, %v575_v38  ;;  %v595_v48 = vsel %vm593_vm1, %v567_v36, %v582_v39  ;;  %vm767_vm4 = vcmp.lt.s32.totalorder %v748_v43, %v763_v45 }
 0x1ed   :  { %v603_v49 = vrot.slane %v594_v47, %v1161_v42  ;;  %v610_v50 = vrot.slane %v595_v48, %v1161_v42  ;;  %vm768_vm5 = vmand %vm766_vm3, %vm767_vm4 }
 0x1ee   :  { %vm769_vm6 = vmor %vm765_vm2, %vm768_vm5 }
 0x1ef   :  { %vm612_vm7 = vcmp.gt.s32.totalorder %v594_v47, %v603_v49  ;;  %vm613_vm8 = vcmp.eq.s32.totalorder %v594_v47, %v603_v49  ;;  %vm614_vm10 = vcmp.lt.s32.totalorder %v595_v48, %v610_v50  ;;  %vm774_vm12 = vmxor %vm769_vm6, %vm1154_vm9 }
 0x1f0   :  { %vm615_vm14 = vmand %vm613_vm8, %vm614_vm10  ;;  %v775_v7 = vsel %vm774_vm12, %v747_v41, %v756_v44  ;;  %v776_v52 = vsel %vm774_vm12, %v748_v43, %v763_v45 }
 0x1f1   :  { %vm616_vm15 = vmor %vm612_vm7, %vm615_vm14  ;;  %v784_v53 = vrot.slane %v775_v7, %v1161_v42  ;;  %v791_v54 = vrot.slane %v776_v52, %v1161_v42 }
 0x1f2   :  { %vm621_vm0 = vmxor %vm616_vm15, %vm1170_vm11 }
 0x1f3   :  { %v622_v55 = vsel %vm621_vm0, %v594_v47, %v603_v49  ;;  %v623_v56 = vsel %vm621_vm0, %v595_v48, %v610_v50  ;;  %vm793_vm1 = vcmp.gt.s32.totalorder %v775_v7, %v784_v53  ;;  %vm794_vm2 = vcmp.eq.s32.totalorder %v775_v7, %v784_v53 }
 0x1f4   :  { %v637_v57 = vrot.slane %v622_v55, %v1136_v3  ;;  %v644_v58 = vrot.slane %v623_v56, %v1136_v3  ;;  %vm795_vm3 = vcmp.lt.s32.totalorder %v776_v52, %v791_v54 }
 0x1f5   :  { %vm796_vm4 = vmand %vm794_vm2, %vm795_vm3 }
 0x1f6   :  { %vm646_vm5 = vcmp.gt.s32.totalorder %v622_v55, %v637_v57  ;;  %vm647_vm6 = vcmp.eq.s32.totalorder %v622_v55, %v637_v57  ;;  %vm648_vm7 = vcmp.lt.s32.totalorder %v623_v56, %v644_v58  ;;  %vm797_vm8 = vmor %vm793_vm1, %vm796_vm4 }
 0x1f7   :  { %vm649_vm10 = vmand %vm647_vm6, %vm648_vm7 }
 0x1f8   :  { %vm650_vm12 = vmor %vm646_vm5, %vm649_vm10 }
 0x1f9   :  { %vm655_vm14 = vmxor %vm650_vm12, %vm1141_vm13 }
 0x1fa   :  { %v656_v59 = vsel %vm655_vm14, %v622_v55, %v637_v57  ;;  %v657_v60 = vsel %vm655_vm14, %v623_v56, %v644_v58  ;;  %vm802_vm15 = vmxor %vm797_vm8, %vm1170_vm11 }
 0x1fb   :  { %v665_v61 = vrot.slane %v656_v59, %v1147_v33  ;;  %v672_v62 = vrot.slane %v657_v60, %v1147_v33  ;;  %v803_v63 = vsel %vm802_vm15, %v775_v7, %v784_v53  ;;  %v804_v0 = vsel %vm802_vm15, %v776_v52, %v791_v54 }
 0x1fc   :  { %v818_v1 = vrot.slane %v803_v63, %v1136_v3  ;;  %v825_v2 = vrot.slane %v804_v0, %v1136_v3 }
 0x1fd   :  { %vm674_vm0 = vcmp.gt.s32.totalorder %v656_v59, %v665_v61  ;;  %vm675_vm1 = vcmp.eq.s32.totalorder %v656_v59, %v665_v61  ;;  %vm676_vm2 = vcmp.lt.s32.totalorder %v657_v60, %v672_v62 }
 0x1fe   :  { %vm677_vm3 = vmand %vm675_vm1, %vm676_vm2  ;;  %vm828_vm4 = vcmp.eq.s32.totalorder %v803_v63, %v818_v1  ;;  %vm829_vm5 = vcmp.lt.s32.totalorder %v804_v0, %v825_v2  ;;  %vm827_vm7 = vcmp.gt.s32.totalorder %v803_v63, %v818_v1 }
 0x1ff   :  { %vm678_vm6 = vmor %vm674_vm0, %vm677_vm3 }
 0x200   :  { %vm683_vm8 = vmxor %vm678_vm6, %vm1154_vm9 }
 0x201   :  { %v684_v4 = vsel %vm683_vm8, %v656_v59, %v665_v61  ;;  %v685_v5 = vsel %vm683_vm8, %v657_v60, %v672_v62  ;;  %vm830_vm10 = vmand %vm828_vm4, %vm829_vm5 }
 0x202   :  { %v693_v6 = vrot.slane %v684_v4, %v1161_v42  ;;  %v700_v8 = vrot.slane %v685_v5, %v1161_v42  ;;  %vm831_vm12 = vmor %vm827_vm7, %vm830_vm10 }
 0x203   :  { %vm836_vm14 = vmxor %vm831_vm12, %vm1141_vm13 }
 0x204   :  { %vm702_vm15 = vcmp.gt.s32.totalorder %v684_v4, %v693_v6  ;;  %vm703_vm1 = vcmp.eq.s32.totalorder %v684_v4, %v693_v6  ;;  %vm704_vm2 = vcmp.lt.s32.totalorder %v685_v5, %v700_v8  ;;  %v837_v9 = vsel %vm836_vm14, %v803_v63, %v818_v1 }
 0x205   :  { %vm705_vm0 = vmand %vm703_vm1, %vm704_vm2  ;;  %v838_v10 = vsel %vm836_vm14, %v804_v0, %v825_v2  ;;  %v846_v11 = vrot.slane %v837_v9, %v1147_v33 }
 0x206   :  { %vm706_vm3 = vmor %vm702_vm15, %vm705_vm0  ;;  %v853_v12 = vrot.slane %v838_v10, %v1147_v33 }
 0x207   :  { %vm711_vm4 = vmxor %vm706_vm3, %vm1170_vm11  ;;  %vm855_vm5 = vcmp.gt.s32.totalorder %v837_v9, %v846_v11  ;;  %vm856_vm6 = vcmp.eq.s32.totalorder %v837_v9, %v846_v11 }
 0x208   :  { %v712_v13 = vsel %vm711_vm4, %v684_v4, %v693_v6  ;;  %v713_v14 = vsel %vm711_vm4, %v685_v5, %v700_v8  ;;  %vm857_vm7 = vcmp.lt.s32.totalorder %v838_v10, %v853_v12 }
 0x209   :  { %715 = vst [vmem:[#allocation12] sm:$0xff] %v712_v13  ;;  %716 = vst [vmem:[#allocation14] sm:$0xff] %v713_v14 }
 0x20a   :  { %vm858_vm13 = vmand %vm856_vm6, %vm857_vm7 }
 0x20b   :  { %vm859_vm8 = vmor %vm855_vm5, %vm858_vm13 }
 0x20c   :  { %vm864_vm10 = vmxor %vm859_vm8, %vm1154_vm9 }
 0x20d   :  { %v865_v15 = vsel %vm864_vm10, %v837_v9, %v846_v11  ;;  %v866_v16 = vsel %vm864_vm10, %v838_v10, %v853_v12 }
 0x20e   :  { %v874_v17 = vrot.slane %v865_v15, %v1161_v42  ;;  %v881_v18 = vrot.slane %v866_v16, %v1161_v42 }
 0x210   :  { %vm883_vm12 = vcmp.gt.s32.totalorder %v865_v15, %v874_v17  ;;  %vm884_vm14 = vcmp.eq.s32.totalorder %v865_v15, %v874_v17  ;;  %vm885_vm15 = vcmp.lt.s32.totalorder %v866_v16, %v881_v18  ;;  %v923_v21 = vld [vmem:[#allocation14] sm:$0xff]  ;;  %v899_v22 = vld [vmem:[#allocation12] sm:$0xff] }
 0x211   :  { %vm886_vm1 = vmand %vm884_vm14, %vm885_vm15  ;;  %924 = vxpose.xlu0.b32.start.end [1/1] (short) (narrow) %v923_v21, 8  ;;  %vm900_vm9 = vcmp.lt.s32.totalorder %v899_v22, 0  ;;  %v901_v23 = vsub.s32 2147483647, %v899_v22 }
 0x212   :  { %vm887_vm2 = vmor %vm883_vm12, %vm886_vm1 }
 0x213   :  { %vm892_vm0 = vmxor %vm887_vm2, %vm1170_vm11  ;;  %v902_v24 = vsel %vm900_vm9, %v901_v23, %v899_v22 }
 0x214   :  { %v893_v19 = vsel %vm892_vm0, %v865_v15, %v874_v17  ;;  %v894_v20 = vsel %vm892_vm0, %v866_v16, %v881_v18  ;;  %903 = vst [vmem:[#allocation12] sm:$0xff] %v902_v24 }
 0x215   :  { %896 = vst [vmem:[#allocation13] sm:$0xff] %v893_v19  ;;  %897 = vst [vmem:[#allocation15] sm:$0xff] %v894_v20  ;;  %905 = vxpose.xlu0.b32.start.end [1/1] (short) (narrow) %v902_v24, 8 }
 0x291   :  { %v925_v3 = vpop.trf.xlu0 }
 0x292   :  { %941 = vst [vmem:[#allocation10] sm:$0xff] %v925_v3 }
 0x295   :  { %v906_v25 = vpop.trf.xlu0 }
 0x296   :  { %922 = vst [vmem:[#allocation7] sm:$0xff] %v906_v25 }
 0x299   :  { %v951_v26 = vld [vmem:[#allocation10] sm:$0x3] }
 0x29a   :  { %953 = vst [vmem:[#allocation11] sm:$0x3] %v951_v26 }
 0x29d   :  { %v945_v27 = vld [vmem:[#allocation7] sm:$0x3] }
 0x29e   :  { %947 = vst [vmem:[#allocation8] sm:$0x3] %v945_v27 }
 0x29f   :  { %1065 = shalt.err (!%p1062_p7)
}
 0x2a0   :  { %s1066_s17 = scalar_lea.hbm %s1222_s1, 32 }
 0x2a1   :  { %p1067_p8 = scmp.ne.s32.totalorder %s1222_s1, %s1066_s17  ;;  %p1070_p9 = scmp.lt.u32.totalorder %s1066_s17, %s1222_s1 }
 0x2a3   :  { %p1072_p10 = pnand %p1070_p9, %p1067_p8 }
 0x2a5   :  { %1075 = shalt.err (!%p1072_p10)
}
 0x2a6   :  { %961 = dma.vmem_to_hbm [thread:$0]  %s959_s13, 32, %s1222_s1, [#allocation9]   ;;  %v977_v28 = vld [vmem:[#allocation11] sm:$0x3] }
 0x2a7   :  { %978 = vst [vmem:[%s1223_s2] sm:$0x3] %v977_v28 }
 0x2a8   :  { %1080 = dma.done.wait [#allocation9], 32  }
 0x2a9   :  { %1081 = vsyncadd [#allocation9], 4294967264 }
 0x2aa   :  { %994 = vsyncpa [#allocation9], 1 }

// kernel: squeeze.30
= control target key start
LH: loop header
LB: loop body
LE: loop exit
PB: predicated region body
PF: predicated region fallthrough
CT: control target
= control target key end

     0   :  { %vm5_vm0 = vcmask 1041409   ;;  %vm9_vm1 = vcmask 1042434   ;;  %vm13_vm2 = vcmask 1043459   ;;  %vm47_vm3 = vcmask 7168   ;;  %s3376_s11 = smov 127   ;;  %s3377_s18 = smov 125   ;;  %s5555_s0 = inlined_call_operand.vmem [shape: f32[2,16,16,3,1], index: 0, kind: input, shape index: {}]   ;;  %s5556_s1 = inlined_call_operand.vmem [shape: f32[2,768], index: 1, kind: output, shape index: {}]  }
   0x1   :  { %v2728_v0 = vld [vmem:[%s5555_s0 + $0xd5] sm:$0x1]   ;;  %v2744_v11 = vld [vmem:[%s5555_s0 + $0xff] sm:$0x1]   ;;  %vm51_vm4 = vcmask 15360   ;;  %s3378_s10 = smov 126  }
   0x2   :  { %v2729_v1 = vld [vmem:[%s5555_s0 + $0x1d4] sm:$0x2]   ;;  %v2745_v14 = vld [vmem:[%s5555_s0 + $0x1fe] sm:$0x2]   ;;  %v2736_v19 = vld [vmem:[%s5555_s0 + $0xaa] sm:$0x1]  }
   0x3   :  { %v2730_v2 = vld [vmem:[%s5555_s0 + $0x53] sm:$0x4]   ;;  %v24_v4 = vsel %vm5_vm0, %v2729_v1, %v2728_v0  ;;  %v2746_v15 = vld [vmem:[%s5555_s0 + $0x7d] sm:$0x4]   ;;  %v107_v18 = vsel %vm5_vm0, %v2745_v14, %v2744_v11  ;;  %v2737_v20 = vld [vmem:[%s5555_s0 + $0x1a9] sm:$0x2]  }
   0x4   :  { %v2731_v3 = vld [vmem:[%s5555_s0 + $0x152] sm:$0x8]   ;;  %v28_v8 = vsel %vm9_vm1, %v2730_v2, %v24_v4  ;;  %v2747_v16 = vld [vmem:[%s5555_s0 + $0x17c] sm:$0x8]   ;;  %v111_v22 = vsel %vm9_vm1, %v2746_v15, %v107_v18  ;;  %v66_v23 = vsel %vm5_vm0, %v2737_v20, %v2736_v19  ;;  %v2738_v24 = vld [vmem:[%s5555_s0 + $0x28] sm:$0x4]  }
   0x5   :  { %v2732_v5 = vld [vmem:[%s5555_s0 + $0xd5] sm:$0x1]   ;;  %v32_v12 = vsel %vm13_vm2, %v2731_v3, %v28_v8  ;;  %v2739_v25 = vld [vmem:[%s5555_s0 + $0x127] sm:$0x8]   ;;  %v115_v27 = vsel %vm13_vm2, %v2747_v16, %v111_v22  ;;  %v70_v28 = vsel %vm9_vm1, %v2738_v24, %v66_v23  ;;  %v2748_v34 = vld [vmem:[%s5555_s0 + $0xd4] sm:$0x1]  }
   0x6   :  { %v2733_v6 = vld [vmem:[%s5555_s0 + $0x1d4] sm:$0x2]   ;;  %v2740_v26 = vld [vmem:[%s5555_s0 + $0x2a] sm:$0x1]   ;;  %116 = vrot.lane.b32.xlu1 %v115_v27, %s3377_s18  ;;  %v74_v32 = vsel %vm13_vm2, %v2739_v25, %v70_v28  ;;  %v2749_v35 = vld [vmem:[%s5555_s0 + $0x1d3] sm:$0x2]  }
   0x7   :  { %v2734_v7 = vld [vmem:[%s5555_s0 + $0x53] sm:$0x4]   ;;  %v38_v9 = vsel %vm5_vm0, %v2733_v6, %v2732_v5  ;;  %v2741_v29 = vld [vmem:[%s5555_s0 + $0x129] sm:$0x2]   ;;  %v128_v37 = vsel %vm5_vm0, %v2749_v35, %v2748_v34  ;;  %v2750_v38 = vld [vmem:[%s5555_s0 + $0x52] sm:$0x4]  }
   0x8   :  { %v2735_v10 = vld [vmem:[%s5555_s0 + $0x152] sm:$0x8]   ;;  %v42_v13 = vsel %vm9_vm1, %v2734_v7, %v38_v9  ;;  %v2742_v30 = vld [vmem:[%s5555_s0 + $0xa8] sm:$0x4]   ;;  %v80_v33 = vsel %vm5_vm0, %v2741_v29, %v2740_v26  ;;  %v2751_v39 = vld [vmem:[%s5555_s0 + $0x151] sm:$0x8]   ;;  %v132_v42 = vsel %vm9_vm1, %v2750_v38, %v128_v37 }
   0x9   :  { %v46_v17 = vsel %vm13_vm2, %v2735_v10, %v42_v13  ;;  %v2743_v31 = vld [vmem:[%s5555_s0 + $0x1a7] sm:$0x8]   ;;  %v84_v36 = vsel %vm9_vm1, %v2742_v30, %v80_v33  ;;  %v2752_v40 = vld [vmem:[%s5555_s0 + $0x29] sm:$0x1]   ;;  %v136_v47 = vsel %vm13_vm2, %v2751_v39, %v132_v42  ;;  %v2756_v49 = vld [vmem:[%s5555_s0 + $0xfe] sm:$0x1]  }
   0xa   :  { %v48_v21 = vsel %vm47_vm3, %v46_v17, %v32_v12  ;;  %v88_v41 = vsel %vm13_vm2, %v2743_v31, %v84_v36  ;;  %v2753_v43 = vld [vmem:[%s5555_s0 + $0x128] sm:$0x2]   ;;  %v2757_v50 = vld [vmem:[%s5555_s0 + $0x1fd] sm:$0x2]   ;;  %v2760_v57 = vld [vmem:[%s5555_s0 + $0xd3] sm:$0x1]  }
   0xb   :  { %49 = vrot.lane.b32.xlu0 %v48_v21, %s3376_s11  ;;  %v2754_v44 = vld [vmem:[%s5555_s0 + $0xa7] sm:$0x4]   ;;  %v90_v46 = vsel %vm51_vm4, %v88_v41, %v74_v32  ;;  %v149_v48 = vsel %vm5_vm0, %v2753_v43, %v2752_v40  ;;  %s3379_s11 = smov 124   ;;  %v169_v52 = vsel %vm5_vm0, %v2757_v50, %v2756_v49  ;;  %v2758_v53 = vld [vmem:[%s5555_s0 + $0x7c] sm:$0x4]   ;;  %s3380_s5 = smov 123  }
   0xc   :  { %v2755_v45 = vld [vmem:[%s5555_s0 + $0x1a6] sm:$0x8]   ;;  %137 = vrot.lane.b32.xlu1 %v136_v47, %s3379_s11  ;;  %v153_v51 = vsel %vm9_vm1, %v2754_v44, %v149_v48  ;;  %v2759_v54 = vld [vmem:[%s5555_s0 + $0x17b] sm:$0x8]   ;;  %v173_v56 = vsel %vm9_vm1, %v2758_v53, %v169_v52  ;;  %v2761_v58 = vld [vmem:[%s5555_s0 + $0x1d2] sm:$0x2]  }
   0xd   :  { %v157_v55 = vsel %vm13_vm2, %v2755_v45, %v153_v51  ;;  %v2762_v59 = vld [vmem:[%s5555_s0 + $0x51] sm:$0x4]   ;;  %v177_v60 = vsel %vm13_vm2, %v2759_v54, %v173_v56  ;;  %v190_v61 = vsel %vm5_vm0, %v2761_v58, %v2760_v57  ;;  %v2764_v63 = vld [vmem:[%s5555_s0 + $0x28] sm:$0x1]   ;;  %v2768_v5 = vld [vmem:[%s5555_s0 + $0xfd] sm:$0x1]  }
   0xe   :  { %v2763_v62 = vld [vmem:[%s5555_s0 + $0x150] sm:$0x8]   ;;  %v2765_v0 = vld [vmem:[%s5555_s0 + $0x127] sm:$0x2]   ;;  %v194_v1 = vsel %vm9_vm1, %v2762_v59, %v190_v61  ;;  %s3381_s6 = smov 122   ;;  %s3382_s27 = smov 121  }
   0xf   :  { %91 = vrot.lane.b32.xlu0 %v90_v46, %s3378_s10  ;;  %v211_v2 = vsel %vm5_vm0, %v2765_v0, %v2764_v63  ;;  %v2766_v3 = vld [vmem:[%s5555_s0 + $0xa6] sm:$0x4]   ;;  %v2769_v7 = vld [vmem:[%s5555_s0 + $0x1fc] sm:$0x2]   ;;  %v198_v9 = vsel %vm13_vm2, %v2763_v62, %v194_v1  ;;  %v2772_v13 = vld [vmem:[%s5555_s0 + $0xd2] sm:$0x1]  }
  0x10   :  { %v2767_v4 = vld [vmem:[%s5555_s0 + $0x1a5] sm:$0x8]   ;;  %178 = vrot.lane.b32.xlu1 %v177_v60, %s3381_s6  ;;  %v215_v6 = vsel %vm9_vm1, %v2766_v3, %v211_v2  ;;  %v2770_v8 = vld [vmem:[%s5555_s0 + $0x7b] sm:$0x4]   ;;  %v231_v11 = vsel %vm5_vm0, %v2769_v7, %v2768_v5  ;;  %v2773_v14 = vld [vmem:[%s5555_s0 + $0x1d1] sm:$0x2]  }
  0x11   :  { %v219_v10 = vsel %vm13_vm2, %v2767_v4, %v215_v6  ;;  %v2771_v12 = vld [vmem:[%s5555_s0 + $0x17a] sm:$0x8]   ;;  %v235_v15 = vsel %vm9_vm1, %v2770_v8, %v231_v11  ;;  %v252_v16 = vsel %vm5_vm0, %v2773_v14, %v2772_v13  ;;  %v2774_v17 = vld [vmem:[%s5555_s0 + $0x50] sm:$0x4]   ;;  %v2776_v19 = vld [vmem:[%s5555_s0 + $0x27] sm:$0x1]  }
  0x12   :  { %v2775_v18 = vld [vmem:[%s5555_s0 + $0x14f] sm:$0x8]   ;;  %v256_v20 = vsel %vm9_vm1, %v2774_v17, %v252_v16  ;;  %v2777_v21 = vld [vmem:[%s5555_s0 + $0x126] sm:$0x2]   ;;  %s3383_s28 = smov 120   ;;  %v239_v26 = vsel %vm13_vm2, %v2771_v12, %v235_v15  ;;  %s3384_s20 = smov 119  }
  0x13   :  { %158 = vrot.lane.b32.xlu0 %v157_v55, %s3380_s5  ;;  %v2778_v22 = vld [vmem:[%s5555_s0 + $0xa5] sm:$0x4]   ;;  %v273_v23 = vsel %vm5_vm0, %v2777_v21, %v2776_v19  ;;  %v2780_v24 = vld [vmem:[%s5555_s0 + $0xfc] sm:$0x1]   ;;  %v260_v27 = vsel %vm13_vm2, %v2775_v18, %v256_v20  ;;  %v2784_v30 = vld [vmem:[%s5555_s0 + $0xd1] sm:$0x1]  }
  0x14   :  { %220 = vrot.lane.b32.xlu1 %v219_v10, %s3383_s28  ;;  %v2781_v25 = vld [vmem:[%s5555_s0 + $0x1fb] sm:$0x2]   ;;  %v277_v31 = vsel %vm9_vm1, %v2778_v22, %v273_v23  ;;  %v2779_v32 = vld [vmem:[%s5555_s0 + $0x1a4] sm:$0x8]   ;;  %v2785_v35 = vld [vmem:[%s5555_s0 + $0x1d0] sm:$0x2]  }
  0x15   :  { %v293_v28 = vsel %vm5_vm0, %v2781_v25, %v2780_v24  ;;  %v2782_v29 = vld [vmem:[%s5555_s0 + $0x7a] sm:$0x4]   ;;  %v314_v36 = vsel %vm5_vm0, %v2785_v35, %v2784_v30  ;;  %v2786_v37 = vld [vmem:[%s5555_s0 + $0x4f] sm:$0x4]   ;;  %v2788_v38 = vld [vmem:[%s5555_s0 + $0x26] sm:$0x1]   ;;  %v281_v42 = vsel %vm13_vm2, %v2779_v32, %v277_v31 }
  0x16   :  { %v297_v33 = vsel %vm9_vm1, %v2782_v29, %v293_v28  ;;  %v2783_v34 = vld [vmem:[%s5555_s0 + $0x179] sm:$0x8]   ;;  %v2789_v39 = vld [vmem:[%s5555_s0 + $0x125] sm:$0x2]   ;;  %s3385_s21 = smov 118   ;;  %v318_v47 = vsel %vm9_vm1, %v2786_v37, %v314_v36  ;;  %s3386_s11 = smov 117  }
  0x17   :  { %199 = vrot.lane.b32.xlu0 %v198_v9, %s3382_s27  ;;  %v335_v40 = vsel %vm5_vm0, %v2789_v39, %v2788_v38  ;;  %v2790_v41 = vld [vmem:[%s5555_s0 + $0xa4] sm:$0x4]   ;;  %v301_v43 = vsel %vm13_vm2, %v2783_v34, %v297_v33  ;;  %v2787_v44 = vld [vmem:[%s5555_s0 + $0x14e] sm:$0x8]   ;;  %v2792_v45 = vld [vmem:[%s5555_s0 + $0xfb] sm:$0x1]  }
  0x18   :  { %261 = vrot.lane.b32.xlu1 %v260_v27, %s3385_s21  ;;  %v2793_v46 = vld [vmem:[%s5555_s0 + $0x1fa] sm:$0x2]   ;;  %v339_v48 = vsel %vm9_vm1, %v2790_v41, %v335_v40  ;;  %v2791_v49 = vld [vmem:[%s5555_s0 + $0x1a3] sm:$0x8]   ;;  %v2796_v50 = vld [vmem:[%s5555_s0 + $0xd0] sm:$0x1]   ;;  %v322_v58 = vsel %vm13_vm2, %v2787_v44, %v318_v47 }
  0x19   :  { %v2797_v51 = vld [vmem:[%s5555_s0 + $0x1cf] sm:$0x2]   ;;  %v355_v52 = vsel %vm5_vm0, %v2793_v46, %v2792_v45  ;;  %v2794_v53 = vld [vmem:[%s5555_s0 + $0x79] sm:$0x4]   ;;  %s3387_s12 = smov 116   ;;  %v343_v59 = vsel %vm13_vm2, %v2791_v49, %v339_v48  ;;  %s3388_s4 = smov 115  }
  0x1a   :  { %v376_v54 = vsel %vm5_vm0, %v2797_v51, %v2796_v50  ;;  %v2798_v55 = vld [vmem:[%s5555_s0 + $0x4e] sm:$0x4]   ;;  %v2800_v56 = vld [vmem:[%s5555_s0 + $0x25] sm:$0x1]   ;;  %v2804_v60 = vld [vmem:[%s5555_s0 + $0xfa] sm:$0x1]   ;;  %v359_v62 = vsel %vm9_vm1, %v2794_v53, %v355_v52 }
  0x1b   :  { %240 = vrot.lane.b32.xlu0 %v239_v26, %s3384_s20  ;;  %v2801_v57 = vld [vmem:[%s5555_s0 + $0x124] sm:$0x2]   ;;  %v2805_v61 = vld [vmem:[%s5555_s0 + $0x1f9] sm:$0x2]   ;;  %v2795_v63 = vld [vmem:[%s5555_s0 + $0x178] sm:$0x8]   ;;  %v380_v0 = vsel %vm9_vm1, %v2798_v55, %v376_v54 }
  0x1c   :  { %302 = vrot.lane.b32.xlu1 %v301_v43, %s3387_s12  ;;  %v2799_v1 = vld [vmem:[%s5555_s0 + $0x14d] sm:$0x8]   ;;  %v2802_v2 = vld [vmem:[%s5555_s0 + $0xa3] sm:$0x4]   ;;  %v397_v3 = vsel %vm5_vm0, %v2801_v57, %v2800_v56  ;;  %v417_v4 = vsel %vm5_vm0, %v2805_v61, %v2804_v60  ;;  %v2806_v5 = vld [vmem:[%s5555_s0 + $0x78] sm:$0x4]   ;;  %v363_v10 = vsel %vm13_vm2, %v2795_v63, %v359_v62 }
  0x1d   :  { %v2808_v6 = vld [vmem:[%s5555_s0 + $0xcf] sm:$0x1]   ;;  %s3389_s5 = smov 114   ;;  %v2812_v8 = vld [vmem:[%s5555_s0 + $0x24] sm:$0x1]   ;;  %v384_v11 = vsel %vm13_vm2, %v2799_v1, %v380_v0  ;;  %v401_v12 = vsel %vm9_vm1, %v2802_v2, %v397_v3  ;;  %v421_v14 = vsel %vm9_vm1, %v2806_v5, %v417_v4  ;;  %s3390_s22 = smov 113  }
  0x1e   :  { %v2809_v7 = vld [vmem:[%s5555_s0 + $0x1ce] sm:$0x2]   ;;  %v2813_v9 = vld [vmem:[%s5555_s0 + $0x123] sm:$0x2]   ;;  %v2803_v13 = vld [vmem:[%s5555_s0 + $0x1a2] sm:$0x8]  }
  0x1f   :  { %282 = vrot.lane.b32.xlu0 %v281_v42, %s3386_s11  ;;  %v2807_v15 = vld [vmem:[%s5555_s0 + $0x177] sm:$0x8]   ;;  %v2810_v16 = vld [vmem:[%s5555_s0 + $0x4d] sm:$0x4]   ;;  %v438_v17 = vsel %vm5_vm0, %v2809_v7, %v2808_v6  ;;  %v459_v18 = vsel %vm5_vm0, %v2813_v9, %v2812_v8  ;;  %v2814_v19 = vld [vmem:[%s5555_s0 + $0xa2] sm:$0x4]   ;;  %v405_v24 = vsel %vm13_vm2, %v2803_v13, %v401_v12 }
  0x20   :  { %344 = vrot.lane.b32.xlu1 %v343_v59, %s3389_s5  ;;  %v2816_v20 = vld [vmem:[%s5555_s0 + $0xf9] sm:$0x1]   ;;  %s3391_s23 = smov 112   ;;  %v2820_v22 = vld [vmem:[%s5555_s0 + $0xce] sm:$0x1]   ;;  %v425_v25 = vsel %vm13_vm2, %v2807_v15, %v421_v14  ;;  %v442_v26 = vsel %vm9_vm1, %v2810_v16, %v438_v17  ;;  %v463_v28 = vsel %vm9_vm1, %v2814_v19, %v459_v18  ;;  %s3392_s11 = smov 111  }
  0x21   :  { %v2817_v21 = vld [vmem:[%s5555_s0 + $0x1f8] sm:$0x2]   ;;  %v2821_v23 = vld [vmem:[%s5555_s0 + $0x1cd] sm:$0x2]   ;;  %v2811_v27 = vld [vmem:[%s5555_s0 + $0x14c] sm:$0x8]  }
  0x22   :  { %v2815_v29 = vld [vmem:[%s5555_s0 + $0x1a1] sm:$0x8]   ;;  %v2818_v30 = vld [vmem:[%s5555_s0 + $0x77] sm:$0x4]   ;;  %v479_v31 = vsel %vm5_vm0, %v2817_v21, %v2816_v20  ;;  %v500_v32 = vsel %vm5_vm0, %v2821_v23, %v2820_v22  ;;  %v2822_v33 = vld [vmem:[%s5555_s0 + $0x4c] sm:$0x4]   ;;  %v446_v38 = vsel %vm13_vm2, %v2811_v27, %v442_v26 }
  0x23   :  { %323 = vrot.lane.b32.xlu0 %v322_v58, %s3388_s4  ;;  %v2824_v34 = vld [vmem:[%s5555_s0 + $0x23] sm:$0x1]   ;;  %s3393_s12 = smov 110   ;;  %v2828_v36 = vld [vmem:[%s5555_s0 + $0xf8] sm:$0x1]   ;;  %v467_v39 = vsel %vm13_vm2, %v2815_v29, %v463_v28  ;;  %v483_v40 = vsel %vm9_vm1, %v2818_v30, %v479_v31  ;;  %v504_v42 = vsel %vm9_vm1, %v2822_v33, %v500_v32  ;;  %s3394_s29 = smov 109  }
  0x24   :  { %385 = vrot.lane.b32.xlu1 %v384_v11, %s3391_s23  ;;  %v2825_v35 = vld [vmem:[%s5555_s0 + $0x122] sm:$0x2]   ;;  %v2829_v37 = vld [vmem:[%s5555_s0 + $0x1f7] sm:$0x2]   ;;  %v2819_v41 = vld [vmem:[%s5555_s0 + $0x176] sm:$0x8]  }
  0x25   :  { %v2823_v43 = vld [vmem:[%s5555_s0 + $0x14b] sm:$0x8]   ;;  %v2826_v44 = vld [vmem:[%s5555_s0 + $0xa1] sm:$0x4]   ;;  %v521_v45 = vsel %vm5_vm0, %v2825_v35, %v2824_v34  ;;  %v541_v46 = vsel %vm5_vm0, %v2829_v37, %v2828_v36  ;;  %v2830_v47 = vld [vmem:[%s5555_s0 + $0x76] sm:$0x4]   ;;  %v487_v52 = vsel %vm13_vm2, %v2819_v41, %v483_v40 }
  0x26   :  { %v2832_v48 = vld [vmem:[%s5555_s0 + $0xcd] sm:$0x1]   ;;  %s3395_s30 = smov 108   ;;  %v2836_v50 = vld [vmem:[%s5555_s0 + $0x22] sm:$0x1]   ;;  %v508_v53 = vsel %vm13_vm2, %v2823_v43, %v504_v42  ;;  %v525_v54 = vsel %vm9_vm1, %v2826_v44, %v521_v45  ;;  %v545_v56 = vsel %vm9_vm1, %v2830_v47, %v541_v46  ;;  %s3396_s18 = smov 107  }
  0x27   :  { %364 = vrot.lane.b32.xlu0 %v363_v10, %s3390_s22  ;;  %v2833_v49 = vld [vmem:[%s5555_s0 + $0x1cc] sm:$0x2]   ;;  %v2837_v51 = vld [vmem:[%s5555_s0 + $0x121] sm:$0x2]   ;;  %v2827_v55 = vld [vmem:[%s5555_s0 + $0x1a0] sm:$0x8]  }
  0x28   :  { %426 = vrot.lane.b32.xlu1 %v425_v25, %s3393_s12  ;;  %v2831_v57 = vld [vmem:[%s5555_s0 + $0x175] sm:$0x8]   ;;  %v2834_v58 = vld [vmem:[%s5555_s0 + $0x4b] sm:$0x4]   ;;  %v562_v59 = vsel %vm5_vm0, %v2833_v49, %v2832_v48  ;;  %v583_v60 = vsel %vm5_vm0, %v2837_v51, %v2836_v50  ;;  %v2838_v61 = vld [vmem:[%s5555_s0 + $0xa0] sm:$0x4]   ;;  %v529_v2 = vsel %vm13_vm2, %v2827_v55, %v525_v54 }
  0x29   :  { %v2840_v62 = vld [vmem:[%s5555_s0 + $0xf7] sm:$0x1]   ;;  %s3397_s19 = smov 106   ;;  %v2844_v0 = vld [vmem:[%s5555_s0 + $0xcc] sm:$0x1]   ;;  %v549_v3 = vsel %vm13_vm2, %v2831_v57, %v545_v56  ;;  %v566_v4 = vsel %vm9_vm1, %v2834_v58, %v562_v59  ;;  %v587_v6 = vsel %vm9_vm1, %v2838_v61, %v583_v60  ;;  %s3398_s7 = smov 105  }
  0x2a   :  { %v2841_v63 = vld [vmem:[%s5555_s0 + $0x1f6] sm:$0x2]   ;;  %v2845_v1 = vld [vmem:[%s5555_s0 + $0x1cb] sm:$0x2]   ;;  %v2835_v5 = vld [vmem:[%s5555_s0 + $0x14a] sm:$0x8]  }
  0x2b   :  { %406 = vrot.lane.b32.xlu0 %v405_v24, %s3392_s11  ;;  %v2839_v7 = vld [vmem:[%s5555_s0 + $0x19f] sm:$0x8]   ;;  %v2842_v8 = vld [vmem:[%s5555_s0 + $0x75] sm:$0x4]   ;;  %v603_v9 = vsel %vm5_vm0, %v2841_v63, %v2840_v62  ;;  %v624_v10 = vsel %vm5_vm0, %v2845_v1, %v2844_v0  ;;  %v2846_v11 = vld [vmem:[%s5555_s0 + $0x4a] sm:$0x4]   ;;  %v570_v16 = vsel %vm13_vm2, %v2835_v5, %v566_v4 }
  0x2c   :  { %468 = vrot.lane.b32.xlu1 %v467_v39, %s3395_s30  ;;  %v2848_v12 = vld [vmem:[%s5555_s0 + $0x21] sm:$0x1]   ;;  %s3399_s8 = smov 104   ;;  %v2852_v14 = vld [vmem:[%s5555_s0 + $0xf6] sm:$0x1]   ;;  %v591_v17 = vsel %vm13_vm2, %v2839_v7, %v587_v6  ;;  %v607_v18 = vsel %vm9_vm1, %v2842_v8, %v603_v9  ;;  %v628_v20 = vsel %vm9_vm1, %v2846_v11, %v624_v10  ;;  %s3400_s25 = smov 103  }
  0x2d   :  { %v2849_v13 = vld [vmem:[%s5555_s0 + $0x120] sm:$0x2]   ;;  %v2853_v15 = vld [vmem:[%s5555_s0 + $0x1f5] sm:$0x2]   ;;  %v2843_v19 = vld [vmem:[%s5555_s0 + $0x174] sm:$0x8]  }
  0x2e   :  { %v2847_v21 = vld [vmem:[%s5555_s0 + $0x149] sm:$0x8]   ;;  %v2850_v22 = vld [vmem:[%s5555_s0 + $0x9f] sm:$0x4]   ;;  %v645_v23 = vsel %vm5_vm0, %v2849_v13, %v2848_v12  ;;  %v665_v24 = vsel %vm5_vm0, %v2853_v15, %v2852_v14  ;;  %v2854_v25 = vld [vmem:[%s5555_s0 + $0x74] sm:$0x4]   ;;  %v611_v30 = vsel %vm13_vm2, %v2843_v19, %v607_v18 }
  0x2f   :  { %447 = vrot.lane.b32.xlu0 %v446_v38, %s3394_s29  ;;  %v2856_v26 = vld [vmem:[%s5555_s0 + $0xcb] sm:$0x1]   ;;  %s3401_s26 = smov 102   ;;  %v2860_v28 = vld [vmem:[%s5555_s0 + $0x20] sm:$0x1]   ;;  %v632_v31 = vsel %vm13_vm2, %v2847_v21, %v628_v20  ;;  %v649_v32 = vsel %vm9_vm1, %v2850_v22, %v645_v23  ;;  %v669_v34 = vsel %vm9_vm1, %v2854_v25, %v665_v24  ;;  %s3402_s14 = smov 101  }
  0x30   :  { %509 = vrot.lane.b32.xlu1 %v508_v53, %s3397_s19  ;;  %v2857_v27 = vld [vmem:[%s5555_s0 + $0x1ca] sm:$0x2]   ;;  %v2861_v29 = vld [vmem:[%s5555_s0 + $0x11f] sm:$0x2]   ;;  %v2851_v33 = vld [vmem:[%s5555_s0 + $0x19e] sm:$0x8]  }
  0x31   :  { %v2855_v35 = vld [vmem:[%s5555_s0 + $0x173] sm:$0x8]   ;;  %v2858_v36 = vld [vmem:[%s5555_s0 + $0x49] sm:$0x4]   ;;  %v686_v37 = vsel %vm5_vm0, %v2857_v27, %v2856_v26  ;;  %v707_v38 = vsel %vm5_vm0, %v2861_v29, %v2860_v28  ;;  %v2862_v39 = vld [vmem:[%s5555_s0 + $0x9e] sm:$0x4]   ;;  %v653_v44 = vsel %vm13_vm2, %v2851_v33, %v649_v32 }
  0x32   :  { %v2864_v40 = vld [vmem:[%s5555_s0 + $0xf5] sm:$0x1]   ;;  %s3403_s15 = smov 100   ;;  %v2868_v42 = vld [vmem:[%s5555_s0 + $0xca] sm:$0x1]   ;;  %v673_v45 = vsel %vm13_vm2, %v2855_v35, %v669_v34  ;;  %v690_v46 = vsel %vm9_vm1, %v2858_v36, %v686_v37  ;;  %v711_v48 = vsel %vm9_vm1, %v2862_v39, %v707_v38  ;;  %s3404_s3 = smov 99  }
  0x33   :  { %488 = vrot.lane.b32.xlu0 %v487_v52, %s3396_s18  ;;  %v2865_v41 = vld [vmem:[%s5555_s0 + $0x1f4] sm:$0x2]   ;;  %v2869_v43 = vld [vmem:[%s5555_s0 + $0x1c9] sm:$0x2]   ;;  %v2859_v47 = vld [vmem:[%s5555_s0 + $0x148] sm:$0x8]  }
  0x34   :  { %550 = vrot.lane.b32.xlu1 %v549_v3, %s3399_s8  ;;  %v2863_v49 = vld [vmem:[%s5555_s0 + $0x19d] sm:$0x8]   ;;  %v2866_v50 = vld [vmem:[%s5555_s0 + $0x73] sm:$0x4]   ;;  %v727_v51 = vsel %vm5_vm0, %v2865_v41, %v2864_v40  ;;  %v748_v52 = vsel %vm5_vm0, %v2869_v43, %v2868_v42  ;;  %v2870_v53 = vld [vmem:[%s5555_s0 + $0x48] sm:$0x4]   ;;  %v694_v58 = vsel %vm13_vm2, %v2859_v47, %v690_v46 }
  0x35   :  { %v2872_v54 = vld [vmem:[%s5555_s0 + $0x1f] sm:$0x1]   ;;  %s3405_s4 = smov 98   ;;  %v2876_v56 = vld [vmem:[%s5555_s0 + $0xf4] sm:$0x1]   ;;  %v715_v59 = vsel %vm13_vm2, %v2863_v49, %v711_v48  ;;  %v731_v60 = vsel %vm9_vm1, %v2866_v50, %v727_v51  ;;  %v752_v62 = vsel %vm9_vm1, %v2870_v53, %v748_v52  ;;  %s3406_s21 = smov 97  }
  0x36   :  { %v2873_v55 = vld [vmem:[%s5555_s0 + $0x11e] sm:$0x2]   ;;  %v2877_v57 = vld [vmem:[%s5555_s0 + $0x1f3] sm:$0x2]   ;;  %v2867_v61 = vld [vmem:[%s5555_s0 + $0x172] sm:$0x8]  }
  0x37   :  { %530 = vrot.lane.b32.xlu0 %v529_v2, %s3398_s7  ;;  %v2871_v63 = vld [vmem:[%s5555_s0 + $0x147] sm:$0x8]   ;;  %v2874_v0 = vld [vmem:[%s5555_s0 + $0x9d] sm:$0x4]   ;;  %v769_v1 = vsel %vm5_vm0, %v2873_v55, %v2872_v54  ;;  %v789_v2 = vsel %vm5_vm0, %v2877_v57, %v2876_v56  ;;  %v2878_v3 = vld [vmem:[%s5555_s0 + $0x72] sm:$0x4]   ;;  %v735_v8 = vsel %vm13_vm2, %v2867_v61, %v731_v60 }
  0x38   :  { %592 = vrot.lane.b32.xlu1 %v591_v17, %s3401_s26  ;;  %v2880_v4 = vld [vmem:[%s5555_s0 + $0xc9] sm:$0x1]   ;;  %s3407_s22 = smov 96   ;;  %v2884_v6 = vld [vmem:[%s5555_s0 + $0x1e] sm:$0x1]   ;;  %v756_v9 = vsel %vm13_vm2, %v2871_v63, %v752_v62  ;;  %v773_v10 = vsel %vm9_vm1, %v2874_v0, %v769_v1  ;;  %v793_v12 = vsel %vm9_vm1, %v2878_v3, %v789_v2  ;;  %s3408_s10 = smov 95  }
  0x39   :  { %v2881_v5 = vld [vmem:[%s5555_s0 + $0x1c8] sm:$0x2]   ;;  %v2885_v7 = vld [vmem:[%s5555_s0 + $0x11d] sm:$0x2]   ;;  %v2875_v11 = vld [vmem:[%s5555_s0 + $0x19c] sm:$0x8]  }
  0x3a   :  { %v2879_v13 = vld [vmem:[%s5555_s0 + $0x171] sm:$0x8]   ;;  %v2882_v14 = vld [vmem:[%s5555_s0 + $0x47] sm:$0x4]   ;;  %v810_v15 = vsel %vm5_vm0, %v2881_v5, %v2880_v4  ;;  %v2886_v17 = vld [vmem:[%s5555_s0 + $0x9c] sm:$0x4]   ;;  %v777_v22 = vsel %vm13_vm2, %v2875_v11, %v773_v10 }
  0x3b   :  { %571 = vrot.lane.b32.xlu0 %v570_v16, %s3400_s25  ;;  %v831_v16 = vsel %vm5_vm0, %v2885_v7, %v2884_v6  ;;  %v2888_v18 = vld [vmem:[%s5555_s0 + $0xf3] sm:$0x1]   ;;  %s3409_s11 = smov 94   ;;  %v2892_v20 = vld [vmem:[%s5555_s0 + $0xc8] sm:$0x1]   ;;  %v797_v23 = vsel %vm13_vm2, %v2879_v13, %v793_v12  ;;  %v814_v24 = vsel %vm9_vm1, %v2882_v14, %v810_v15  ;;  %s3410_s28 = smov 93  }
  0x3c   :  { %633 = vrot.lane.b32.xlu1 %v632_v31, %s3403_s15  ;;  %v2889_v19 = vld [vmem:[%s5555_s0 + $0x1f2] sm:$0x2]   ;;  %v2893_v21 = vld [vmem:[%s5555_s0 + $0x1c7] sm:$0x2]   ;;  %v2883_v25 = vld [vmem:[%s5555_s0 + $0x146] sm:$0x8]   ;;  %v835_v26 = vsel %vm9_vm1, %v2886_v17, %v831_v16 }
  0x3d   :  { %v2887_v27 = vld [vmem:[%s5555_s0 + $0x19b] sm:$0x8]   ;;  %v2890_v28 = vld [vmem:[%s5555_s0 + $0x71] sm:$0x4]   ;;  %v851_v29 = vsel %vm5_vm0, %v2889_v19, %v2888_v18  ;;  %v2894_v31 = vld [vmem:[%s5555_s0 + $0x46] sm:$0x4]   ;;  %v818_v36 = vsel %vm13_vm2, %v2883_v25, %v814_v24 }
  0x3e   :  { %v2896_v32 = vld [vmem:[%s5555_s0 + $0x1d] sm:$0x1]   ;;  %s3411_s29 = smov 92   ;;  %v2900_v34 = vld [vmem:[%s5555_s0 + $0xf2] sm:$0x1]   ;;  %v839_v37 = vsel %vm13_vm2, %v2887_v27, %v835_v26  ;;  %v855_v38 = vsel %vm9_vm1, %v2890_v28, %v851_v29  ;;  %s3412_s17 = smov 91  }
  0x3f   :  { %612 = vrot.lane.b32.xlu0 %v611_v30, %s3402_s14  ;;  %v872_v30 = vsel %vm5_vm0, %v2893_v21, %v2892_v20  ;;  %v2897_v33 = vld [vmem:[%s5555_s0 + $0x11c] sm:$0x2]   ;;  %v2901_v35 = vld [vmem:[%s5555_s0 + $0x1f1] sm:$0x2]   ;;  %v2891_v39 = vld [vmem:[%s5555_s0 + $0x170] sm:$0x8]  }
  0x40   :  { %674 = vrot.lane.b32.xlu1 %v673_v45, %s3405_s4  ;;  %v876_v40 = vsel %vm9_vm1, %v2894_v31, %v872_v30  ;;  %v2895_v41 = vld [vmem:[%s5555_s0 + $0x145] sm:$0x8]   ;;  %v2898_v42 = vld [vmem:[%s5555_s0 + $0x9b] sm:$0x4]   ;;  %v893_v43 = vsel %vm5_vm0, %v2897_v33, %v2896_v32  ;;  %v2902_v45 = vld [vmem:[%s5555_s0 + $0x70] sm:$0x4]   ;;  %v859_v50 = vsel %vm13_vm2, %v2891_v39, %v855_v38 }
  0x41   :  { %v2904_v46 = vld [vmem:[%s5555_s0 + $0xc7] sm:$0x1]   ;;  %s3413_s18 = smov 90   ;;  %v2908_v48 = vld [vmem:[%s5555_s0 + $0x1c] sm:$0x1]   ;;  %v880_v51 = vsel %vm13_vm2, %v2895_v41, %v876_v40  ;;  %v897_v52 = vsel %vm9_vm1, %v2898_v42, %v893_v43  ;;  %s3414_s6 = smov 89  }
  0x42   :  { %v2905_v47 = vld [vmem:[%s5555_s0 + $0x1c6] sm:$0x2]   ;;  %v2909_v49 = vld [vmem:[%s5555_s0 + $0x11b] sm:$0x2]   ;;  %v2899_v53 = vld [vmem:[%s5555_s0 + $0x19a] sm:$0x8]  }
  0x43   :  { %654 = vrot.lane.b32.xlu0 %v653_v44, %s3404_s3  ;;  %v913_v44 = vsel %vm5_vm0, %v2901_v35, %v2900_v34  ;;  %v2903_v55 = vld [vmem:[%s5555_s0 + $0x16f] sm:$0x8]   ;;  %v2906_v56 = vld [vmem:[%s5555_s0 + $0x45] sm:$0x4]   ;;  %v934_v57 = vsel %vm5_vm0, %v2905_v47, %v2904_v46  ;;  %v2912_v60 = vld [vmem:[%s5555_s0 + $0xf1] sm:$0x1]   ;;  %v901_v0 = vsel %vm13_vm2, %v2899_v53, %v897_v52 }
  0x44   :  { %716 = vrot.lane.b32.xlu1 %v715_v59, %s3407_s22  ;;  %v917_v54 = vsel %vm9_vm1, %v2902_v45, %v913_v44  ;;  %v2910_v59 = vld [vmem:[%s5555_s0 + $0x9a] sm:$0x4]   ;;  %v2913_v61 = vld [vmem:[%s5555_s0 + $0x1f0] sm:$0x2]   ;;  %s3415_s7 = smov 88   ;;  %v938_v2 = vsel %vm9_vm1, %v2906_v56, %v934_v57  ;;  %s3416_s24 = smov 87  }
  0x45   :  { %v2916_v62 = vld [vmem:[%s5555_s0 + $0xc6] sm:$0x1]   ;;  %v921_v1 = vsel %vm13_vm2, %v2903_v55, %v917_v54  ;;  %v2907_v3 = vld [vmem:[%s5555_s0 + $0x144] sm:$0x8]   ;;  %v2911_v5 = vld [vmem:[%s5555_s0 + $0x199] sm:$0x8]   ;;  %v975_v7 = vsel %vm5_vm0, %v2913_v61, %v2912_v60 }
  0x46   :  { %v2917_v63 = vld [vmem:[%s5555_s0 + $0x1c5] sm:$0x2]   ;;  %v2914_v6 = vld [vmem:[%s5555_s0 + $0x6f] sm:$0x4]   ;;  %v2920_v10 = vld [vmem:[%s5555_s0 + $0x1b] sm:$0x1]   ;;  %v942_v14 = vsel %vm13_vm2, %v2907_v3, %v938_v2 }
  0x47   :  { %695 = vrot.lane.b32.xlu0 %v694_v58, %s3406_s21  ;;  %v955_v58 = vsel %vm5_vm0, %v2909_v49, %v2908_v48  ;;  %v2921_v11 = vld [vmem:[%s5555_s0 + $0x11a] sm:$0x2]   ;;  %s3417_s25 = smov 86   ;;  %v2924_v12 = vld [vmem:[%s5555_s0 + $0xf0] sm:$0x1]   ;;  %v979_v16 = vsel %vm9_vm1, %v2914_v6, %v975_v7  ;;  %s3418_s13 = smov 85  }
  0x48   :  { %757 = vrot.lane.b32.xlu1 %v756_v9, %s3409_s11  ;;  %v959_v4 = vsel %vm9_vm1, %v2910_v59, %v955_v58  ;;  %v2918_v9 = vld [vmem:[%s5555_s0 + $0x44] sm:$0x4]   ;;  %v2925_v13 = vld [vmem:[%s5555_s0 + $0x1ef] sm:$0x2]   ;;  %v2915_v17 = vld [vmem:[%s5555_s0 + $0x16e] sm:$0x8]   ;;  %v1017_v21 = vsel %vm5_vm0, %v2921_v11, %v2920_v10 }
  0x49   :  { %v963_v15 = vsel %vm13_vm2, %v2911_v5, %v959_v4  ;;  %v2919_v19 = vld [vmem:[%s5555_s0 + $0x143] sm:$0x8]   ;;  %v2922_v20 = vld [vmem:[%s5555_s0 + $0x99] sm:$0x4]   ;;  %v2928_v24 = vld [vmem:[%s5555_s0 + $0xc5] sm:$0x1]   ;;  %v983_v28 = vsel %vm13_vm2, %v2915_v17, %v979_v16 }
  0x4a   :  { %v2929_v25 = vld [vmem:[%s5555_s0 + $0x1c4] sm:$0x2]   ;;  %s3419_s14 = smov 84   ;;  %v2932_v26 = vld [vmem:[%s5555_s0 + $0x1a] sm:$0x1]   ;;  %v1021_v32 = vsel %vm9_vm1, %v2922_v20, %v1017_v21  ;;  %vm15_vm5 = vcmask 23552  }
  0x4b   :  { %736 = vrot.lane.b32.xlu0 %v735_v8, %s3408_s10  ;;  %v996_v8 = vsel %vm5_vm0, %v2917_v63, %v2916_v62  ;;  %v2933_v27 = vld [vmem:[%s5555_s0 + $0x119] sm:$0x2]   ;;  %v2923_v30 = vld [vmem:[%s5555_s0 + $0x198] sm:$0x8]   ;;  %v2927_v31 = vld [vmem:[%s5555_s0 + $0x16d] sm:$0x8]  }
  0x4c   :  { %798 = vrot.lane.b32.xlu1 %v797_v23, %s3411_s29  ;;  %v1000_v18 = vsel %vm9_vm1, %v2918_v9, %v996_v8  ;;  %v2926_v23 = vld [vmem:[%s5555_s0 + $0x6e] sm:$0x4]   ;;  %v2930_v34 = vld [vmem:[%s5555_s0 + $0x43] sm:$0x4]   ;;  %v2934_v35 = vld [vmem:[%s5555_s0 + $0x98] sm:$0x4]   ;;  %v1079_v38 = vsel %vm5_vm0, %v2933_v27, %v2932_v26  ;;  %v1025_v44 = vsel %vm13_vm2, %v2923_v30, %v1021_v32 }
  0x4d   :  { %v1004_v29 = vsel %vm13_vm2, %v2919_v19, %v1000_v18  ;;  %v2937_v39 = vld [vmem:[%s5555_s0 + $0x1ee] sm:$0x2]   ;;  %v2940_v40 = vld [vmem:[%s5555_s0 + $0xc4] sm:$0x1]   ;;  %v2726_v42 = vld [vmem:[%s5555_s0 + $0xfe] sm:$0x4]  }
  0x4e   :  { %v2941_v41 = vld [vmem:[%s5555_s0 + $0x1c3] sm:$0x2]   ;;  %v2_v43 = vld [vmem:[%s5555_s0] sm:$0x1]   ;;  %v2931_v46 = vld [vmem:[%s5555_s0 + $0x142] sm:$0x8]  }
  0x4f   :  { %778 = vrot.lane.b32.xlu0 %v777_v22, %s3410_s28  ;;  %v1037_v22 = vsel %vm5_vm0, %v2925_v13, %v2924_v12  ;;  %v2727_v47 = vld [vmem:[%s5555_s0 + $0x17d] sm:$0x8]   ;;  %v2938_v52 = vld [vmem:[%s5555_s0 + $0x6d] sm:$0x4]   ;;  %v1120_v55 = vsel %vm5_vm0, %v2941_v41, %v2940_v40  ;;  %v2942_v56 = vld [vmem:[%s5555_s0 + $0x42] sm:$0x4]  }
  0x50   :  { %840 = vrot.lane.b32.xlu1 %v839_v37, %s3413_s18  ;;  %v1041_v33 = vsel %vm9_vm1, %v2926_v23, %v1037_v22  ;;  %v1058_v37 = vsel %vm5_vm0, %v2929_v25, %v2928_v24  ;;  %v2725_v48 = vld [vmem:[%s5555_s0 + $0x7f] sm:$0x2]   ;;  %v2944_v57 = vld [vmem:[%s5555_s0 + $0x19] sm:$0x1]   ;;  %s3422_s28 = smov 81   ;;  %s3423_s29 = smov 80   ;;  %v1124_v3 = vsel %vm9_vm1, %v2942_v56, %v1120_v55 }
  0x51   :  { %v1045_v45 = vsel %vm13_vm2, %v2927_v31, %v1041_v33  ;;  %v1062_v49 = vsel %vm9_vm1, %v2930_v34, %v1058_v37  ;;  %v6_v53 = vsel %vm5_vm0, %v2725_v48, %v2_v43  ;;  %v2945_v58 = vld [vmem:[%s5555_s0 + $0x118] sm:$0x2]   ;;  %v2948_v60 = vld [vmem:[%s5555_s0 + $0xee] sm:$0x1]   ;;  %v2939_v2 = vld [vmem:[%s5555_s0 + $0x16c] sm:$0x8]  }
  0x52   :  { %v10_v59 = vsel %vm9_vm1, %v2726_v42, %v6_v53  ;;  %v2949_v61 = vld [vmem:[%s5555_s0 + $0x1ed] sm:$0x2]   ;;  %v1066_v63 = vsel %vm13_vm2, %v2931_v46, %v1062_v49  ;;  %v2943_v4 = vld [vmem:[%s5555_s0 + $0x141] sm:$0x8]   ;;  %v2946_v5 = vld [vmem:[%s5555_s0 + $0x97] sm:$0x4]   ;;  %v1141_v6 = vsel %vm5_vm0, %v2945_v58, %v2944_v57 }
  0x53   :  { %819 = vrot.lane.b32.xlu0 %v818_v36, %s3412_s17  ;;  %v2936_v36 = vld [vmem:[%s5555_s0 + $0xef] sm:$0x1]   ;;  %v14_v62 = vsel %vm13_vm2, %v2727_v47, %v10_v59  ;;  %v1161_v7 = vsel %vm5_vm0, %v2949_v61, %v2948_v60  ;;  %v2950_v8 = vld [vmem:[%s5555_s0 + $0x6c] sm:$0x4]   ;;  %v2952_v9 = vld [vmem:[%s5555_s0 + $0xc3] sm:$0x1]  }
  0x54   :  { %881 = vrot.lane.b32.xlu1 %v880_v51, %s3415_s7  ;;  %s3421_s7 = smov 82   ;;  %v2935_v51 = vld [vmem:[%s5555_s0 + $0x197] sm:$0x8]   ;;  %v1099_v54 = vsel %vm5_vm0, %v2937_v39, %v2936_v36  ;;  %16 = vst.msk [vmem:[#allocation0] ss:$24 sm:$0x3] %vm15_vm5, %v14_v62   ;;  %v1165_v17 = vsel %vm9_vm1, %v2950_v8, %v1161_v7 }
  0x55   :  { %18 = vst.msk [vmem:[#allocation0 - $0x2f] ss:$24 sm:$0xc] %vm15_vm5, %v14_v62   ;;  %v2953_v10 = vld [vmem:[%s5555_s0 + $0x1c2] sm:$0x2]   ;;  %s3424_s17 = smov 79  }
  0x56   :  { %s3425_s18 = smov 78   ;;  %v2956_v11 = vld [vmem:[%s5555_s0 + $0x18] sm:$0x1]   ;;  %v2947_v16 = vld [vmem:[%s5555_s0 + $0x196] sm:$0x8]   ;;  %v1182_v20 = vsel %vm5_vm0, %v2953_v10, %v2952_v9  ;;  %vm56_vm6 = vcmask 1048568  }
  0x57   :  { %860 = vrot.lane.b32.xlu0 %v859_v50, %s3414_s6  ;;  %s3420_s6 = smov 83   ;;  %v1083_v50 = vsel %vm9_vm1, %v2934_v35, %v1079_v38  ;;  %v2957_v12 = vld [vmem:[%s5555_s0 + $0x117] sm:$0x2]   ;;  %v2951_v18 = vld [vmem:[%s5555_s0 + $0x16b] sm:$0x8]   ;;  %s3432_s2 = smov 71  }
  0x58   :  { %922 = vrot.lane.b32.xlu1 %v921_v1, %s3417_s25  ;;  %v1103_v1 = vsel %vm9_vm1, %v2938_v52, %v1099_v54  ;;  %v2954_v19 = vld [vmem:[%s5555_s0 + $0x41] sm:$0x4]   ;;  %v1203_v21 = vsel %vm5_vm0, %v2957_v12, %v2956_v11  ;;  %v2958_v22 = vld [vmem:[%s5555_s0 + $0x96] sm:$0x4]   ;;  %v2960_v23 = vld [vmem:[%s5555_s0 + $0xed] sm:$0x1]  }
  0x59   :  { %v1107_v13 = vsel %vm13_vm2, %v2939_v2, %v1103_v1  ;;  %v2961_v24 = vld [vmem:[%s5555_s0 + $0x1ec] sm:$0x2]   ;;  %v2964_v25 = vld [vmem:[%s5555_s0 + $0xc2] sm:$0x1]   ;;  %v2955_v30 = vld [vmem:[%s5555_s0 + $0x140] sm:$0x8]   ;;  %v1207_v31 = vsel %vm9_vm1, %v2958_v22, %v1203_v21 }
  0x5a   :  { %v2965_v26 = vld [vmem:[%s5555_s0 + $0x1c1] sm:$0x2]   ;;  %v2959_v32 = vld [vmem:[%s5555_s0 + $0x195] sm:$0x8]   ;;  %v2962_v33 = vld [vmem:[%s5555_s0 + $0x6b] sm:$0x4]   ;;  %v1223_v34 = vsel %vm5_vm0, %v2961_v24, %v2960_v23 }
  0x5b   :  { %902 = vrot.lane.b32.xlu0 %v901_v0, %s3416_s24  ;;  %v1087_v0 = vsel %vm13_vm2, %v2935_v51, %v1083_v50  ;;  %v1244_v35 = vsel %vm5_vm0, %v2965_v26, %v2964_v25  ;;  %v2966_v36 = vld [vmem:[%s5555_s0 + $0x40] sm:$0x4]   ;;  %v2968_v37 = vld [vmem:[%s5555_s0 + $0x17] sm:$0x1]   ;;  %s3428_s24 = smov 75   ;;  %s3429_s25 = smov 74   ;;  %v1211_v42 = vsel %vm13_vm2, %v2959_v32, %v1207_v31  ;;  %v1227_v43 = vsel %vm9_vm1, %v2962_v33, %v1223_v34 }
  0x5c   :  { %964 = vrot.lane.b32.xlu1 %v963_v15, %s3419_s14  ;;  %v1145_v15 = vsel %vm9_vm1, %v2946_v5, %v1141_v6  ;;  %v2969_v38 = vld [vmem:[%s5555_s0 + $0x116] sm:$0x2]   ;;  %v2972_v39 = vld [vmem:[%s5555_s0 + $0xec] sm:$0x1]   ;;  %v2967_v46 = vld [vmem:[%s5555_s0 + $0x13f] sm:$0x8]  }
  0x5d   :  { %v1149_v27 = vsel %vm13_vm2, %v2947_v16, %v1145_v15  ;;  %v2973_v40 = vld [vmem:[%s5555_s0 + $0x1eb] sm:$0x2]   ;;  %v2970_v47 = vld [vmem:[%s5555_s0 + $0x95] sm:$0x4]   ;;  %v1265_v48 = vsel %vm5_vm0, %v2969_v38, %v2968_v37  ;;  %v2976_v51 = vld [vmem:[%s5555_s0 + $0xc1] sm:$0x1]  }
  0x5e   :  { %v1285_v49 = vsel %vm5_vm0, %v2973_v40, %v2972_v39  ;;  %v2974_v50 = vld [vmem:[%s5555_s0 + $0x6a] sm:$0x4]   ;;  %v2977_v52 = vld [vmem:[%s5555_s0 + $0x1c0] sm:$0x2]   ;;  %s3431_s14 = smov 72   ;;  %v1269_v57 = vsel %vm9_vm1, %v2970_v47, %v1265_v48  ;;  %s3433_s3 = smov 70  }
  0x5f   :  { %943 = vrot.lane.b32.xlu0 %v942_v14, %s3418_s13  ;;  %v1128_v14 = vsel %vm13_vm2, %v2943_v4, %v1124_v3  ;;  %s3430_s13 = smov 73   ;;  %v2980_v53 = vld [vmem:[%s5555_s0 + $0x16] sm:$0x1]   ;;  %v2971_v58 = vld [vmem:[%s5555_s0 + $0x194] sm:$0x8]   ;;  %v1289_v59 = vsel %vm9_vm1, %v2974_v50, %v1285_v49  ;;  %v1306_v62 = vsel %vm5_vm0, %v2977_v52, %v2976_v51  ;;  %vm118_vm7 = vcmask 1048552  }
  0x60   :  { %1005 = vrot.lane.b32.xlu1 %v1004_v29, %s3421_s7  ;;  %s3427_s7 = smov 76   ;;  %v1186_v29 = vsel %vm9_vm1, %v2954_v19, %v1182_v20  ;;  %v2981_v54 = vld [vmem:[%s5555_s0 + $0x115] sm:$0x2]   ;;  %v2975_v60 = vld [vmem:[%s5555_s0 + $0x169] sm:$0x8]   ;;  %v1273_v6 = vsel %vm13_vm2, %v2971_v58, %v1269_v57  ;;  %s3434_s20 = smov 69  }
  0x61   :  { %v1190_v41 = vsel %vm13_vm2, %v2955_v30, %v1186_v29  ;;  %v2978_v61 = vld [vmem:[%s5555_s0 + $0x3f] sm:$0x4]   ;;  %v2984_v1 = vld [vmem:[%s5555_s0 + $0xeb] sm:$0x1]   ;;  %v2988_v3 = vld [vmem:[%s5555_s0 + $0xc0] sm:$0x1]   ;;  %v1293_v7 = vsel %vm13_vm2, %v2975_v60, %v1289_v59 }
  0x62   :  { %v2985_v2 = vld [vmem:[%s5555_s0 + $0x1ea] sm:$0x2]   ;;  %v2989_v4 = vld [vmem:[%s5555_s0 + $0x1bf] sm:$0x2]   ;;  %v1310_v9 = vsel %vm9_vm1, %v2978_v61, %v1306_v62  ;;  %v2979_v10 = vld [vmem:[%s5555_s0 + $0x13e] sm:$0x8]  }
  0x63   :  { %984 = vrot.lane.b32.xlu0 %v983_v28, %s3420_s6  ;;  %s3426_s6 = smov 77   ;;  %v1169_v28 = vsel %vm13_vm2, %v2951_v18, %v1165_v17  ;;  %v2983_v12 = vld [vmem:[%s5555_s0 + $0x193] sm:$0x8]   ;;  %v1368_v15 = vsel %vm5_vm0, %v2989_v4, %v2988_v3  ;;  %v2990_v16 = vld [vmem:[%s5555_s0 + $0x3e] sm:$0x4]   ;;  %s3435_s21 = smov 68   ;;  %v1314_v21 = vsel %vm13_vm2, %v2979_v10, %v1310_v9 }
  0x64   :  { %1046 = vrot.lane.b32.xlu1 %v1045_v45, %s3423_s29  ;;  %v1248_v45 = vsel %vm9_vm1, %v2966_v36, %v1244_v35  ;;  %v2992_v17 = vld [vmem:[%s5555_s0 + $0x15] sm:$0x1]   ;;  %vm98_vm8 = vcmask 1048560   ;;  %v2996_v19 = vld [vmem:[%s5555_s0 + $0xea] sm:$0x1]   ;;  %vm139_vm9 = vcmask 1040352  }
  0x65   :  { %v1252_v56 = vsel %vm13_vm2, %v2967_v46, %v1248_v45  ;;  %v2993_v18 = vld [vmem:[%s5555_s0 + $0x114] sm:$0x2]   ;;  %v2997_v20 = vld [vmem:[%s5555_s0 + $0x1e9] sm:$0x2]   ;;  %v2987_v26 = vld [vmem:[%s5555_s0 + $0x168] sm:$0x8]  }
  0x66   :  { %v2994_v29 = vld [vmem:[%s5555_s0 + $0x93] sm:$0x4]   ;;  %v1389_v30 = vsel %vm5_vm0, %v2993_v18, %v2992_v17  ;;  %v1409_v31 = vsel %vm5_vm0, %v2997_v20, %v2996_v19  ;;  %v2998_v32 = vld [vmem:[%s5555_s0 + $0x68] sm:$0x4]   ;;  %v3000_v33 = vld [vmem:[%s5555_s0 + $0xbf] sm:$0x1]  }
  0x67   :  { %1026 = vrot.lane.b32.xlu0 %v1025_v44, %s3422_s28  ;;  %v2963_v44 = vld [vmem:[%s5555_s0 + $0x16a] sm:$0x8]   ;;  %v3001_v34 = vld [vmem:[%s5555_s0 + $0x1be] sm:$0x2]   ;;  %s3436_s9 = smov 67   ;;  %vm160_vm10 = vcmask 1032152  }
  0x68   :  { %1088 = vrot.lane.b32.xlu1 %v1087_v0, %s3425_s18  ;;  %v1231_v55 = vsel %vm13_vm2, %v2963_v44, %v1227_v43  ;;  %v2982_v0 = vld [vmem:[%s5555_s0 + $0x94] sm:$0x4]   ;;  %s3437_s10 = smov 66   ;;  %vm180_vm11 = vcmask 1023952   ;;  %v3004_v35 = vld [vmem:[%s5555_s0 + $0x14] sm:$0x1]   ;;  %v1413_v43 = vsel %vm9_vm1, %v2998_v32, %v1409_v31  ;;  %v1430_v46 = vsel %vm5_vm0, %v3001_v34, %v3000_v33 }
  0x69   :  { %v3005_v36 = vld [vmem:[%s5555_s0 + $0x113] sm:$0x2]   ;;  %v2999_v44 = vld [vmem:[%s5555_s0 + $0x167] sm:$0x8]   ;;  %v3002_v45 = vld [vmem:[%s5555_s0 + $0x3d] sm:$0x4]  }
  0x6a   :  { %v1451_v47 = vsel %vm5_vm0, %v3005_v36, %v3004_v35  ;;  %v3006_v48 = vld [vmem:[%s5555_s0 + $0x92] sm:$0x4]   ;;  %v3008_v49 = vld [vmem:[%s5555_s0 + $0xe9] sm:$0x1]   ;;  %s3438_s27 = smov 65   ;;  %vm201_vm12 = vcmask 1015752   ;;  %v1434_v57 = vsel %vm9_vm1, %v3002_v45, %v1430_v46 }
  0x6b   :  { %1067 = vrot.lane.b32.xlu0 %v1066_v63, %s3424_s17  ;;  %v1327_v63 = vsel %vm5_vm0, %v2981_v54, %v2980_v53  ;;  %v3009_v50 = vld [vmem:[%s5555_s0 + $0x1e8] sm:$0x2]   ;;  %s3439_s28 = smov 64   ;;  %vm222_vm13 = vcmask 1007552   ;;  %v3012_v51 = vld [vmem:[%s5555_s0 + $0xbe] sm:$0x1]   ;;  %v1417_v54 = vsel %vm13_vm2, %v2999_v44, %v1413_v43  ;;  %v1455_v59 = vsel %vm9_vm1, %v3006_v48, %v1451_v47 }
  0x6c   :  { %1129 = vrot.lane.b32.xlu1 %v1128_v14, %s3427_s7  ;;  %v1331_v11 = vsel %vm9_vm1, %v2982_v0, %v1327_v63  ;;  %v1347_v14 = vsel %vm5_vm0, %v2985_v2, %v2984_v1  ;;  %v3013_v52 = vld [vmem:[%s5555_s0 + $0x1bd] sm:$0x2]   ;;  %v3003_v58 = vld [vmem:[%s5555_s0 + $0x13c] sm:$0x8]   ;;  %v3007_v60 = vld [vmem:[%s5555_s0 + $0x191] sm:$0x8]   ;;  %v1471_v62 = vsel %vm5_vm0, %v3009_v50, %v3008_v49 }
  0x6d   :  { %v1335_v22 = vsel %vm13_vm2, %v2983_v12, %v1331_v11  ;;  %v3010_v61 = vld [vmem:[%s5555_s0 + $0x67] sm:$0x4]   ;;  %v1492_v63 = vsel %vm5_vm0, %v3013_v52, %v3012_v51  ;;  %v3014_v0 = vld [vmem:[%s5555_s0 + $0x3c] sm:$0x4]   ;;  %v3016_v1 = vld [vmem:[%s5555_s0 + $0x13] sm:$0x1]  }
  0x6e   :  { %v3017_v2 = vld [vmem:[%s5555_s0 + $0x112] sm:$0x2]   ;;  %s3440_s16 = smov 63   ;;  %vm242_vm14 = vcmask 999352   ;;  %s3441_s17 = smov 62   ;;  %vm263_vm15 = vcmask 991152   ;;  %v1475_v9 = vsel %vm9_vm1, %v3010_v61, %v1471_v62  ;;  %v1496_v11 = vsel %vm9_vm1, %v3014_v0, %v1492_v63 }
  0x6f   :  { %1108 = vrot.lane.b32.xlu0 %v1107_v13, %s3426_s6  ;;  %v2986_v13 = vld [vmem:[%s5555_s0 + $0x69] sm:$0x4]   ;;  %v3020_v3 = vld [vmem:[%s5555_s0 + $0xe8] sm:$0x1]   ;;  %v3011_v10 = vld [vmem:[%s5555_s0 + $0x166] sm:$0x8]  }
  0x70   :  { %1170 = vrot.lane.b32.xlu1 %v1169_v28, %s3429_s25  ;;  %v1351_v25 = vsel %vm9_vm1, %v2986_v13, %v1347_v14  ;;  %v2991_v28 = vld [vmem:[%s5555_s0 + $0x13d] sm:$0x8]   ;;  %v3021_v4 = vld [vmem:[%s5555_s0 + $0x1e7] sm:$0x2]   ;;  %v3015_v12 = vld [vmem:[%s5555_s0 + $0x13b] sm:$0x8]   ;;  %v1513_v14 = vsel %vm5_vm0, %v3017_v2, %v3016_v1 }
  0x71   :  { %v1355_v37 = vsel %vm13_vm2, %v2987_v26, %v1351_v25  ;;  %v3018_v13 = vld [vmem:[%s5555_s0 + $0x91] sm:$0x4]   ;;  %v3024_v17 = vld [vmem:[%s5555_s0 + $0xbd] sm:$0x1]   ;;  %s3442_s5 = smov 61   ;;  %s3443_s6 = smov 60  }
  0x72   :  { %v3025_v18 = vld [vmem:[%s5555_s0 + $0x1bc] sm:$0x2]   ;;  %v3028_v19 = vld [vmem:[%s5555_s0 + $0x12] sm:$0x1]   ;;  %v1517_v25 = vsel %vm9_vm1, %v3018_v13, %v1513_v14  ;;  %v3019_v26 = vld [vmem:[%s5555_s0 + $0x190] sm:$0x8]  }
  0x73   :  { %1150 = vrot.lane.b32.xlu0 %v1149_v27, %s3428_s24  ;;  %v1372_v27 = vsel %vm9_vm1, %v2990_v16, %v1368_v15  ;;  %v1533_v15 = vsel %vm5_vm0, %v3021_v4, %v3020_v3  ;;  %v3022_v16 = vld [vmem:[%s5555_s0 + $0x66] sm:$0x4]   ;;  %v3029_v20 = vld [vmem:[%s5555_s0 + $0x111] sm:$0x2]   ;;  %v3032_v33 = vld [vmem:[%s5555_s0 + $0xe7] sm:$0x1]  }
  0x74   :  { %1212 = vrot.lane.b32.xlu1 %v1211_v42, %s3431_s14  ;;  %v1376_v38 = vsel %vm13_vm2, %v2991_v28, %v1372_v27  ;;  %v2995_v42 = vld [vmem:[%s5555_s0 + $0x192] sm:$0x8]   ;;  %v1537_v27 = vsel %vm9_vm1, %v3022_v16, %v1533_v15  ;;  %v3023_v28 = vld [vmem:[%s5555_s0 + $0x165] sm:$0x8]   ;;  %v1575_v31 = vsel %vm5_vm0, %v3029_v20, %v3028_v19  ;;  %v3030_v32 = vld [vmem:[%s5555_s0 + $0x90] sm:$0x4]  }
  0x75   :  { %v3033_v34 = vld [vmem:[%s5555_s0 + $0x1e6] sm:$0x2]   ;;  %s3444_s23 = smov 59   ;;  %vm325_vm5 = vcmask 966552   ;;  %s3445_s24 = smov 58   ;;  %v1579_v43 = vsel %vm9_vm1, %v3030_v32, %v1575_v31 }
  0x76   :  { %v3036_v35 = vld [vmem:[%s5555_s0 + $0xbc] sm:$0x1]   ;;  %v3031_v44 = vld [vmem:[%s5555_s0 + $0x18f] sm:$0x8]   ;;  %v3034_v45 = vld [vmem:[%s5555_s0 + $0x65] sm:$0x4]   ;;  %v1595_v46 = vsel %vm5_vm0, %v3033_v34, %v3032_v33 }
  0x77   :  { %1191 = vrot.lane.b32.xlu0 %v1190_v41, %s3430_s13  ;;  %v1393_v41 = vsel %vm9_vm1, %v2994_v29, %v1389_v30  ;;  %v3026_v29 = vld [vmem:[%s5555_s0 + $0x3b] sm:$0x4]   ;;  %v1554_v30 = vsel %vm5_vm0, %v3025_v18, %v3024_v17  ;;  %v3037_v36 = vld [vmem:[%s5555_s0 + $0x1bb] sm:$0x2]   ;;  %v3040_v49 = vld [vmem:[%s5555_s0 + $0x11] sm:$0x1]  }
  0x78   :  { %1253 = vrot.lane.b32.xlu1 %v1252_v56, %s3433_s3  ;;  %v117_v8 = vpop.permute.xlu1 %116   ;;  %v1397_v53 = vsel %vm13_vm2, %v2995_v42, %v1393_v41  ;;  %v1558_v41 = vsel %vm9_vm1, %v3026_v29, %v1554_v30  ;;  %v3027_v42 = vld [vmem:[%s5555_s0 + $0x13a] sm:$0x8]   ;;  %v1616_v47 = vsel %vm5_vm0, %v3037_v36, %v3036_v35  ;;  %v3038_v48 = vld [vmem:[%s5555_s0 + $0x3a] sm:$0x4]   ;;  %v3041_v50 = vld [vmem:[%s5555_s0 + $0x110] sm:$0x2]  }
  0x79   :  { %s3446_s12 = smov 57   ;;  %s3447_s13 = smov 56   ;;  %v3044_v51 = vld [vmem:[%s5555_s0 + $0xe6] sm:$0x1]   ;;  %v3042_v61 = vld [vmem:[%s5555_s0 + $0x8f] sm:$0x4]   ;;  %v1637_v62 = vsel %vm5_vm0, %v3041_v50, %v3040_v49 }
  0x7a   :  { %v3045_v52 = vld [vmem:[%s5555_s0 + $0x1e5] sm:$0x2]   ;;  %v3048_v1 = vld [vmem:[%s5555_s0 + $0xbb] sm:$0x1]   ;;  %s3448_s30 = smov 55   ;;  %s3450_s19 = smov 53  }
  0x7b   :  { %1232 = vrot.lane.b32.xlu0 %v1231_v55, %s3432_s2  ;;  %v1657_v63 = vsel %vm5_vm0, %v3045_v52, %v3044_v51  ;;  %v3046_v0 = vld [vmem:[%s5555_s0 + $0x64] sm:$0x4]   ;;  %v3049_v2 = vld [vmem:[%s5555_s0 + $0x1ba] sm:$0x2]   ;;  %s3449_s2 = smov 54   ;;  %s3452_s8 = smov 51  }
  0x7c   :  { %1294 = vrot.lane.b32.xlu1 %v1293_v7, %s3435_s21  ;;  %v3052_v3 = vld [vmem:[%s5555_s0 + $0x10] sm:$0x1]   ;;  %v3050_v13 = vld [vmem:[%s5555_s0 + $0x39] sm:$0x4]   ;;  %v1678_v14 = vsel %vm5_vm0, %v3049_v2, %v3048_v1  ;;  %v3056_v17 = vld [vmem:[%s5555_s0 + $0xe5] sm:$0x1]  }
  0x7d   :  { %v50_v5 = vpop.permute.xlu0 %49   ;;  %v3053_v4 = vld [vmem:[%s5555_s0 + $0x10f] sm:$0x2]   ;;  %v3057_v18 = vld [vmem:[%s5555_s0 + $0x1e4] sm:$0x2]   ;;  %v3060_v19 = vld [vmem:[%s5555_s0 + $0xba] sm:$0x1]  }
  0x7e   :  { %53 = vst.msk [vmem:[#allocation0 + $0x28] sm:$0x3] %vm51_vm4, %v50_v5   ;;  %55 = vst.msk [vmem:[#allocation0 + $0xe] sm:$0xc] %vm51_vm4, %v50_v5   ;;  %v138_v24 = vpop.permute.xlu1 %137   ;;  %vm304_vm4 = vcmask 974752   ;;  %v1699_v15 = vsel %vm5_vm0, %v3053_v4, %v3052_v3  ;;  %v1719_v30 = vsel %vm5_vm0, %v3057_v18, %v3056_v17  ;;  %s3454_s26 = smov 49  }
  0x7f   :  { %58 = vst.msk [vmem:[#allocation0 + $0x20] sm:$0x3] %vm56_vm6, %v50_v5   ;;  %60 = vst.msk [vmem:[#allocation0 + $0x6] sm:$0xc] %vm56_vm6, %v50_v5   ;;  %1274 = vrot.lane.b32.xlu0 %v1273_v6, %s3434_s20  ;;  %v1438_v5 = vsel %vm13_vm2, %v3003_v58, %v1434_v57  ;;  %v1459_v6 = vsel %vm13_vm2, %v3007_v60, %v1455_v59  ;;  %vm346_vm6 = vcmask 958352   ;;  %v1599_v57 = vsel %vm9_vm1, %v3034_v45, %v1595_v46  ;;  %s3451_s20 = smov 52  }
  0x80   :  { %120 = vst.msk [vmem:[#allocation0 + $0x28] sm:$0x3] %vm118_vm7, %v117_v8   ;;  %122 = vst.msk [vmem:[#allocation0 + $0xe] sm:$0xc] %vm118_vm7, %v117_v8   ;;  %1336 = vrot.lane.b32.xlu1 %v1335_v22, %s3437_s10  ;;  %v1500_v22 = vsel %vm13_vm2, %v3015_v12, %v1496_v11  ;;  %vm366_vm7 = vcmask 950152   ;;  %v1620_v59 = vsel %vm9_vm1, %v3038_v48, %v1616_v47  ;;  %v1661_v11 = vsel %vm9_vm1, %v3046_v0, %v1657_v63  ;;  %s3456_s15 = smov 47  }
  0x81   :  { %v92_v23 = vpop.permute.xlu0 %91   ;;  %v3035_v58 = vld [vmem:[%s5555_s0 + $0x164] sm:$0x8]   ;;  %v3039_v60 = vld [vmem:[%s5555_s0 + $0x139] sm:$0x8]   ;;  %v3047_v12 = vld [vmem:[%s5555_s0 + $0x163] sm:$0x8]  }
  0x82   :  { %95 = vst.msk [vmem:[#allocation0 + $0x20] sm:$0x3] %vm47_vm3, %v92_v23   ;;  %97 = vst.msk [vmem:[#allocation0 + $0x6] sm:$0xc] %vm47_vm3, %v92_v23   ;;  %v179_v40 = vpop.permute.xlu1 %178   ;;  %vm284_vm3 = vcmask 982952   ;;  %s3458_s4 = smov 45  }
  0x83   :  { %99 = vst.msk [vmem:[#allocation0] sm:$0x3] %vm98_vm8, %v92_v23   ;;  %101 = vst.msk [vmem:[#allocation0 + $0x16] sm:$0xc] %vm98_vm8, %v92_v23   ;;  %1315 = vrot.lane.b32.xlu0 %v1314_v21, %s3436_s9  ;;  %v1479_v21 = vsel %vm13_vm2, %v3011_v10, %v1475_v9  ;;  %vm387_vm8 = vcmask 941952   ;;  %v1641_v9 = vsel %vm9_vm1, %v3042_v61, %v1637_v62  ;;  %s3453_s9 = smov 50  }
  0x84   :  { %141 = vst.msk [vmem:[#allocation0 + $0x20] sm:$0x3] %vm139_vm9, %v138_v24   ;;  %143 = vst.msk [vmem:[#allocation0 + $0x6] sm:$0xc] %vm139_vm9, %v138_v24   ;;  %1377 = vrot.lane.b32.xlu1 %v1376_v38, %s3439_s28  ;;  %v1541_v38 = vsel %vm13_vm2, %v3023_v28, %v1537_v27  ;;  %vm408_vm9 = vcmask 933752   ;;  %s3460_s22 = smov 43  }
  0x85   :  { %v159_v39 = vpop.permute.xlu0 %158   ;;  %182 = vst.msk [vmem:[#allocation0 + $0x28] sm:$0x3] %vm180_vm11, %v179_v40   ;;  %184 = vst.msk [vmem:[#allocation0 + $0xe] sm:$0xc] %vm180_vm11, %v179_v40   ;;  %v3043_v10 = vld [vmem:[%s5555_s0 + $0x18e] sm:$0x8]  }
  0x86   :  { %161 = vst.msk [vmem:[#allocation0] sm:$0x3] %vm160_vm10, %v159_v39   ;;  %163 = vst.msk [vmem:[#allocation0 + $0x16] sm:$0xc] %vm160_vm10, %v159_v39   ;;  %v221_v56 = vpop.permute.xlu1 %220   ;;  %vm428_vm10 = vcmask 925552   ;;  %vm449_vm11 = vcmask 917352  }
  0x87   :  { %1356 = vrot.lane.b32.xlu0 %v1355_v37, %s3438_s27  ;;  %223 = vst.msk [vmem:[#allocation0] sm:$0x3] %vm222_vm13, %v221_v56   ;;  %225 = vst.msk [vmem:[#allocation0 + $0x16] sm:$0xc] %vm222_vm13, %v221_v56   ;;  %v1521_v37 = vsel %vm13_vm2, %v3019_v26, %v1517_v25  ;;  %v3054_v16 = vld [vmem:[%s5555_s0 + $0x8e] sm:$0x4]   ;;  %v1682_v25 = vsel %vm9_vm1, %v3050_v13, %v1678_v14 }
  0x88   :  { %1418 = vrot.lane.b32.xlu1 %v1417_v54, %s3441_s17  ;;  %v1583_v54 = vsel %vm13_vm2, %v3031_v44, %v1579_v43  ;;  %v3061_v20 = vld [vmem:[%s5555_s0 + $0x1b9] sm:$0x2]   ;;  %v3051_v26 = vld [vmem:[%s5555_s0 + $0x138] sm:$0x8]   ;;  %v1703_v27 = vsel %vm9_vm1, %v3054_v16, %v1699_v15  ;;  %v3055_v28 = vld [vmem:[%s5555_s0 + $0x18d] sm:$0x8]  }
  0x89   :  { %v200_v55 = vpop.permute.xlu0 %199   ;;  %v3058_v29 = vld [vmem:[%s5555_s0 + $0x63] sm:$0x4]   ;;  %v1740_v31 = vsel %vm5_vm0, %v3061_v20, %v3060_v19  ;;  %v3062_v32 = vld [vmem:[%s5555_s0 + $0x38] sm:$0x4]   ;;  %v3064_v33 = vld [vmem:[%s5555_s0 + $0xf] sm:$0x1]  }
  0x8a   :  { %203 = vst.msk [vmem:[#allocation0 + $0x20] sm:$0x3] %vm201_vm12, %v200_v55   ;;  %205 = vst.msk [vmem:[#allocation0 + $0x6] sm:$0xc] %vm201_vm12, %v200_v55   ;;  %v262_v8 = vpop.permute.xlu1 %261   ;;  %vm470_vm12 = vcmask 909152   ;;  %vm490_vm13 = vcmask 900952   ;;  %v1744_v43 = vsel %vm9_vm1, %v3062_v32, %v1740_v31 }
  0x8b   :  { %1398 = vrot.lane.b32.xlu0 %v1397_v53, %s3440_s16  ;;  %265 = vst.msk [vmem:[#allocation0 + $0x20] sm:$0x3] %vm263_vm15, %v262_v8   ;;  %267 = vst.msk [vmem:[#allocation0 + $0x6] sm:$0xc] %vm263_vm15, %v262_v8   ;;  %v1562_v53 = vsel %vm13_vm2, %v3027_v42, %v1558_v41  ;;  %v3065_v34 = vld [vmem:[%s5555_s0 + $0x10e] sm:$0x2]   ;;  %v1723_v41 = vsel %vm9_vm1, %v3058_v29, %v1719_v30 }
  0x8c   :  { %1460 = vrot.lane.b32.xlu1 %v1459_v6, %s3443_s6  ;;  %v1624_v6 = vsel %vm13_vm2, %v3039_v60, %v1620_v59  ;;  %v3068_v35 = vld [vmem:[%s5555_s0 + $0xe4] sm:$0x1]   ;;  %v3059_v42 = vld [vmem:[%s5555_s0 + $0x162] sm:$0x8]   ;;  %v3063_v44 = vld [vmem:[%s5555_s0 + $0x137] sm:$0x8]   ;;  %v1761_v46 = vsel %vm5_vm0, %v3065_v34, %v3064_v33 }
  0x8d   :  { %v241_v7 = vpop.permute.xlu0 %240   ;;  %v3069_v36 = vld [vmem:[%s5555_s0 + $0x1e3] sm:$0x2]   ;;  %v3066_v45 = vld [vmem:[%s5555_s0 + $0x8d] sm:$0x4]   ;;  %v3072_v49 = vld [vmem:[%s5555_s0 + $0xb9] sm:$0x1]  }
  0x8e   :  { %244 = vst.msk [vmem:[#allocation0 + $0x28] sm:$0x3] %vm242_vm14, %v241_v7   ;;  %246 = vst.msk [vmem:[#allocation0 + $0xe] sm:$0xc] %vm242_vm14, %v241_v7   ;;  %v303_v24 = vpop.permute.xlu1 %302   ;;  %vm511_vm14 = vcmask 892752   ;;  %v1781_v47 = vsel %vm5_vm0, %v3069_v36, %v3068_v35  ;;  %vm532_vm15 = vcmask 884552  }
  0x8f   :  { %1439 = vrot.lane.b32.xlu0 %v1438_v5, %s3442_s5  ;;  %306 = vst.msk [vmem:[#allocation0 + $0x28] sm:$0x3] %vm304_vm4, %v303_v24   ;;  %308 = vst.msk [vmem:[#allocation0 + $0xe] sm:$0xc] %vm304_vm4, %v303_v24   ;;  %v1603_v5 = vsel %vm13_vm2, %v3035_v58, %v1599_v57  ;;  %v3070_v48 = vld [vmem:[%s5555_s0 + $0x62] sm:$0x4]   ;;  %v1765_v57 = vsel %vm9_vm1, %v3066_v45, %v1761_v46 }
  0x90   :  { %1501 = vrot.lane.b32.xlu1 %v1500_v22, %s3445_s24  ;;  %v1665_v22 = vsel %vm13_vm2, %v3047_v12, %v1661_v11  ;;  %v3073_v50 = vld [vmem:[%s5555_s0 + $0x1b8] sm:$0x2]   ;;  %s3455_s27 = smov 48   ;;  %v3076_v51 = vld [vmem:[%s5555_s0 + $0xe] sm:$0x1]   ;;  %v1785_v59 = vsel %vm9_vm1, %v3070_v48, %v1781_v47  ;;  %vm573_vm4 = vcmask 868152  }
  0x91   :  { %v283_v23 = vpop.permute.xlu0 %282   ;;  %v3077_v52 = vld [vmem:[%s5555_s0 + $0x10d] sm:$0x2]   ;;  %v3067_v58 = vld [vmem:[%s5555_s0 + $0x18c] sm:$0x8]   ;;  %v3071_v60 = vld [vmem:[%s5555_s0 + $0x161] sm:$0x8]   ;;  %v1802_v62 = vsel %vm5_vm0, %v3073_v50, %v3072_v49 }
  0x92   :  { %285 = vst.msk [vmem:[#allocation0] sm:$0x3] %vm284_vm3, %v283_v23   ;;  %287 = vst.msk [vmem:[#allocation0 + $0x16] sm:$0xc] %vm284_vm3, %v283_v23   ;;  %v345_v40 = vpop.permute.xlu1 %344   ;;  %vm552_vm3 = vcmask 876352   ;;  %v1823_v63 = vsel %vm5_vm0, %v3077_v52, %v3076_v51  ;;  %s3457_s16 = smov 46  }
  0x93   :  { %1480 = vrot.lane.b32.xlu0 %v1479_v21, %s3444_s23  ;;  %347 = vst.msk [vmem:[#allocation0] sm:$0x3] %vm346_vm6, %v345_v40   ;;  %349 = vst.msk [vmem:[#allocation0 + $0x16] sm:$0xc] %vm346_vm6, %v345_v40   ;;  %v1645_v21 = vsel %vm13_vm2, %v3043_v10, %v1641_v9  ;;  %v3074_v61 = vld [vmem:[%s5555_s0 + $0x37] sm:$0x4]  }
  0x94   :  { %1542 = vrot.lane.b32.xlu1 %v1541_v38, %s3447_s13  ;;  %v1707_v38 = vsel %vm13_vm2, %v3055_v28, %v1703_v27  ;;  %v3078_v0 = vld [vmem:[%s5555_s0 + $0x8c] sm:$0x4]   ;;  %v3080_v1 = vld [vmem:[%s5555_s0 + $0xe3] sm:$0x1]   ;;  %v3084_v3 = vld [vmem:[%s5555_s0 + $0xb8] sm:$0x1]   ;;  %v1806_v9 = vsel %vm9_vm1, %v3074_v61, %v1802_v62 }
  0x95   :  { %v324_v39 = vpop.permute.xlu0 %323   ;;  %v3081_v2 = vld [vmem:[%s5555_s0 + $0x1e2] sm:$0x2]   ;;  %v3085_v4 = vld [vmem:[%s5555_s0 + $0x1b7] sm:$0x2]   ;;  %v3075_v10 = vld [vmem:[%s5555_s0 + $0x136] sm:$0x8]   ;;  %v1827_v11 = vsel %vm9_vm1, %v3078_v0, %v1823_v63 }
  0x96   :  { %327 = vst.msk [vmem:[#allocation0 + $0x20] sm:$0x3] %vm325_vm5, %v324_v39   ;;  %329 = vst.msk [vmem:[#allocation0 + $0x6] sm:$0xc] %vm325_vm5, %v324_v39   ;;  %v386_v56 = vpop.permute.xlu1 %385   ;;  %vm594_vm5 = vcmask 859952   ;;  %v1843_v14 = vsel %vm5_vm0, %v3081_v2, %v3080_v1  ;;  %v1864_v15 = vsel %vm5_vm0, %v3085_v4, %v3084_v3  ;;  %vm614_vm6 = vcmask 851752  }
  0x97   :  { %1522 = vrot.lane.b32.xlu0 %v1521_v37, %s3446_s12  ;;  %389 = vst.msk [vmem:[#allocation0 + $0x20] sm:$0x3] %vm387_vm8, %v386_v56   ;;  %391 = vst.msk [vmem:[#allocation0 + $0x6] sm:$0xc] %vm387_vm8, %v386_v56   ;;  %v1686_v37 = vsel %vm13_vm2, %v3051_v26, %v1682_v25  ;;  %v3079_v12 = vld [vmem:[%s5555_s0 + $0x18b] sm:$0x8]  }
  0x98   :  { %1584 = vrot.lane.b32.xlu1 %v1583_v54, %s3449_s2  ;;  %v1748_v54 = vsel %vm13_vm2, %v3063_v44, %v1744_v43  ;;  %v3082_v13 = vld [vmem:[%s5555_s0 + $0x61] sm:$0x4]   ;;  %v3086_v16 = vld [vmem:[%s5555_s0 + $0x36] sm:$0x4]   ;;  %v3088_v17 = vld [vmem:[%s5555_s0 + $0xd] sm:$0x1]  }
  0x99   :  { %v365_v55 = vpop.permute.xlu0 %364   ;;  %v3089_v18 = vld [vmem:[%s5555_s0 + $0x10c] sm:$0x2]   ;;  %s3459_s5 = smov 44   ;;  %v3092_v19 = vld [vmem:[%s5555_s0 + $0xe2] sm:$0x1]   ;;  %v1847_v25 = vsel %vm9_vm1, %v3082_v13, %v1843_v14  ;;  %v1868_v27 = vsel %vm9_vm1, %v3086_v16, %v1864_v15  ;;  %vm656_vm8 = vcmask 835352  }
  0x9a   :  { %368 = vst.msk [vmem:[#allocation0 + $0x28] sm:$0x3] %vm366_vm7, %v365_v55   ;;  %370 = vst.msk [vmem:[#allocation0 + $0xe] sm:$0xc] %vm366_vm7, %v365_v55   ;;  %v427_v8 = vpop.permute.xlu1 %426   ;;  %vm635_vm7 = vcmask 843552   ;;  %v1885_v30 = vsel %vm5_vm0, %v3089_v18, %v3088_v17  ;;  %s3461_s23 = smov 42  }
  0x9b   :  { %1563 = vrot.lane.b32.xlu0 %v1562_v53, %s3448_s30  ;;  %430 = vst.msk [vmem:[#allocation0 + $0x28] sm:$0x3] %vm428_vm10, %v427_v8   ;;  %432 = vst.msk [vmem:[#allocation0 + $0xe] sm:$0xc] %vm428_vm10, %v427_v8   ;;  %v1727_v53 = vsel %vm13_vm2, %v3059_v42, %v1723_v41  ;;  %v3093_v20 = vld [vmem:[%s5555_s0 + $0x1e1] sm:$0x2]  }
  0x9c   :  { %1625 = vrot.lane.b32.xlu1 %v1624_v6, %s3451_s20  ;;  %v1789_v6 = vsel %vm13_vm2, %v3071_v60, %v1785_v59  ;;  %v3083_v26 = vld [vmem:[%s5555_s0 + $0x160] sm:$0x8]   ;;  %v3087_v28 = vld [vmem:[%s5555_s0 + $0x135] sm:$0x8]   ;;  %v3090_v29 = vld [vmem:[%s5555_s0 + $0x8b] sm:$0x4]   ;;  %v1905_v31 = vsel %vm5_vm0, %v3093_v20, %v3092_v19 }
  0x9d   :  { %v407_v7 = vpop.permute.xlu0 %406   ;;  %v3094_v32 = vld [vmem:[%s5555_s0 + $0x60] sm:$0x4]   ;;  %v3096_v33 = vld [vmem:[%s5555_s0 + $0xb7] sm:$0x1]   ;;  %v3100_v35 = vld [vmem:[%s5555_s0 + $0xc] sm:$0x1]   ;;  %v1889_v41 = vsel %vm9_vm1, %v3090_v29, %v1885_v30 }
  0x9e   :  { %409 = vst.msk [vmem:[#allocation0] sm:$0x3] %vm408_vm9, %v407_v7   ;;  %411 = vst.msk [vmem:[#allocation0 + $0x16] sm:$0xc] %vm408_vm9, %v407_v7   ;;  %v469_v24 = vpop.permute.xlu1 %468   ;;  %v3097_v34 = vld [vmem:[%s5555_s0 + $0x1b6] sm:$0x2]   ;;  %v1909_v43 = vsel %vm9_vm1, %v3094_v32, %v1905_v31 }
  0x9f   :  { %1604 = vrot.lane.b32.xlu0 %v1603_v5, %s3450_s19  ;;  %471 = vst.msk [vmem:[#allocation0] sm:$0x3] %vm470_vm12, %v469_v24   ;;  %473 = vst.msk [vmem:[#allocation0 + $0x16] sm:$0xc] %vm470_vm12, %v469_v24   ;;  %v1769_v5 = vsel %vm13_vm2, %v3067_v58, %v1765_v57  ;;  %vm676_vm9 = vcmask 827152   ;;  %v1926_v46 = vsel %vm5_vm0, %v3097_v34, %v3096_v33  ;;  %s3462_s11 = smov 41  }
  0xa0   :  { %1666 = vrot.lane.b32.xlu1 %v1665_v22, %s3453_s9  ;;  %v1831_v22 = vsel %vm13_vm2, %v3079_v12, %v1827_v11  ;;  %v3101_v36 = vld [vmem:[%s5555_s0 + $0x10b] sm:$0x2]   ;;  %v3091_v42 = vld [vmem:[%s5555_s0 + $0x18a] sm:$0x8]   ;;  %v3095_v44 = vld [vmem:[%s5555_s0 + $0x15f] sm:$0x8]  }
  0xa1   :  { %v448_v23 = vpop.permute.xlu0 %447   ;;  %v3098_v45 = vld [vmem:[%s5555_s0 + $0x35] sm:$0x4]   ;;  %v1947_v47 = vsel %vm5_vm0, %v3101_v36, %v3100_v35  ;;  %v3102_v48 = vld [vmem:[%s5555_s0 + $0x8a] sm:$0x4]   ;;  %v3104_v49 = vld [vmem:[%s5555_s0 + $0xe1] sm:$0x1]  }
  0xa2   :  { %451 = vst.msk [vmem:[#allocation0 + $0x20] sm:$0x3] %vm449_vm11, %v448_v23   ;;  %453 = vst.msk [vmem:[#allocation0 + $0x6] sm:$0xc] %vm449_vm11, %v448_v23   ;;  %v510_v40 = vpop.permute.xlu1 %509   ;;  %v3105_v50 = vld [vmem:[%s5555_s0 + $0x1e0] sm:$0x2]   ;;  %v1930_v57 = vsel %vm9_vm1, %v3098_v45, %v1926_v46  ;;  %v1951_v59 = vsel %vm9_vm1, %v3102_v48, %v1947_v47 }
  0xa3   :  { %1646 = vrot.lane.b32.xlu0 %v1645_v21, %s3452_s8  ;;  %513 = vst.msk [vmem:[#allocation0 + $0x20] sm:$0x3] %vm511_vm14, %v510_v40   ;;  %515 = vst.msk [vmem:[#allocation0 + $0x6] sm:$0xc] %vm511_vm14, %v510_v40   ;;  %v1810_v21 = vsel %vm13_vm2, %v3075_v10, %v1806_v9  ;;  %vm697_vm10 = vcmask 818952   ;;  %s3463_s12 = smov 40   ;;  %v1967_v62 = vsel %vm5_vm0, %v3105_v50, %v3104_v49 }
  0xa4   :  { %1708 = vrot.lane.b32.xlu1 %v1707_v38, %s3455_s27  ;;  %v1872_v38 = vsel %vm13_vm2, %v3087_v28, %v1868_v27  ;;  %vm718_vm11 = vcmask 810752   ;;  %v3108_v51 = vld [vmem:[%s5555_s0 + $0xb6] sm:$0x1]   ;;  %v3099_v58 = vld [vmem:[%s5555_s0 + $0x134] sm:$0x8]   ;;  %s3464_s29 = smov 39  }
  0xa5   :  { %v489_v39 = vpop.permute.xlu0 %488   ;;  %v3109_v52 = vld [vmem:[%s5555_s0 + $0x1b5] sm:$0x2]   ;;  %v3103_v60 = vld [vmem:[%s5555_s0 + $0x189] sm:$0x8]   ;;  %v3106_v61 = vld [vmem:[%s5555_s0 + $0x5f] sm:$0x4]  }
  0xa6   :  { %492 = vst.msk [vmem:[#allocation0 + $0x28] sm:$0x3] %vm490_vm13, %v489_v39   ;;  %494 = vst.msk [vmem:[#allocation0 + $0xe] sm:$0xc] %vm490_vm13, %v489_v39   ;;  %v551_v56 = vpop.permute.xlu1 %550   ;;  %v1988_v63 = vsel %vm5_vm0, %v3109_v52, %v3108_v51  ;;  %v3110_v0 = vld [vmem:[%s5555_s0 + $0x34] sm:$0x4]   ;;  %v1971_v9 = vsel %vm9_vm1, %v3106_v61, %v1967_v62 }
  0xa7   :  { %1687 = vrot.lane.b32.xlu0 %v1686_v37, %s3454_s26  ;;  %554 = vst.msk [vmem:[#allocation0 + $0x28] sm:$0x3] %vm552_vm3, %v551_v56   ;;  %556 = vst.msk [vmem:[#allocation0 + $0xe] sm:$0xc] %vm552_vm3, %v551_v56   ;;  %v1851_v37 = vsel %vm13_vm2, %v3083_v26, %v1847_v25  ;;  %v3112_v1 = vld [vmem:[%s5555_s0 + $0xb] sm:$0x1]   ;;  %v1992_v11 = vsel %vm9_vm1, %v3110_v0, %v1988_v63 }
  0xa8   :  { %1749 = vrot.lane.b32.xlu1 %v1748_v54, %s3457_s16  ;;  %v1913_v54 = vsel %vm13_vm2, %v3095_v44, %v1909_v43  ;;  %v3113_v2 = vld [vmem:[%s5555_s0 + $0x10a] sm:$0x2]   ;;  %vm738_vm12 = vcmask 802552   ;;  %s3465_s30 = smov 38   ;;  %vm759_vm13 = vcmask 794352   ;;  %s3466_s18 = smov 37  }
  0xa9   :  { %v531_v55 = vpop.permute.xlu0 %530   ;;  %v3116_v3 = vld [vmem:[%s5555_s0 + $0xe0] sm:$0x1]   ;;  %v3107_v10 = vld [vmem:[%s5555_s0 + $0x15e] sm:$0x8]   ;;  %v3111_v12 = vld [vmem:[%s5555_s0 + $0x133] sm:$0x8]   ;;  %v2009_v14 = vsel %vm5_vm0, %v3113_v2, %v3112_v1 }
  0xaa   :  { %533 = vst.msk [vmem:[#allocation0] sm:$0x3] %vm532_vm15, %v531_v55   ;;  %535 = vst.msk [vmem:[#allocation0 + $0x16] sm:$0xc] %vm532_vm15, %v531_v55   ;;  %v593_v8 = vpop.permute.xlu1 %592   ;;  %v3117_v4 = vld [vmem:[%s5555_s0 + $0x1df] sm:$0x2]  }
  0xab   :  { %1728 = vrot.lane.b32.xlu0 %v1727_v53, %s3456_s15  ;;  %595 = vst.msk [vmem:[#allocation0] sm:$0x3] %vm594_vm5, %v593_v8   ;;  %597 = vst.msk [vmem:[#allocation0 + $0x16] sm:$0xc] %vm594_vm5, %v593_v8   ;;  %v1893_v53 = vsel %vm13_vm2, %v3091_v42, %v1889_v41  ;;  %v3114_v13 = vld [vmem:[%s5555_s0 + $0x89] sm:$0x4]   ;;  %v2029_v15 = vsel %vm5_vm0, %v3117_v4, %v3116_v3 }
  0xac   :  { %1790 = vrot.lane.b32.xlu1 %v1789_v6, %s3459_s5  ;;  %v1955_v6 = vsel %vm13_vm2, %v3103_v60, %v1951_v59  ;;  %v3118_v16 = vld [vmem:[%s5555_s0 + $0x5e] sm:$0x4]   ;;  %v3120_v17 = vld [vmem:[%s5555_s0 + $0xb5] sm:$0x1]   ;;  %vm780_vm14 = vcmask 786152   ;;  %s3467_s19 = smov 36   ;;  %v2013_v25 = vsel %vm9_vm1, %v3114_v13, %v2009_v14 }
  0xad   :  { %v572_v7 = vpop.permute.xlu0 %571   ;;  %v3121_v18 = vld [vmem:[%s5555_s0 + $0x1b4] sm:$0x2]   ;;  %vm800_vm15 = vcmask 777952   ;;  %v3124_v19 = vld [vmem:[%s5555_s0 + $0xa] sm:$0x1]   ;;  %v2033_v27 = vsel %vm9_vm1, %v3118_v16, %v2029_v15  ;;  %s3468_s7 = smov 35  }
  0xae   :  { %575 = vst.msk [vmem:[#allocation0 + $0x20] sm:$0x3] %vm573_vm4, %v572_v7   ;;  %577 = vst.msk [vmem:[#allocation0 + $0x6] sm:$0xc] %vm573_vm4, %v572_v7   ;;  %v634_v24 = vpop.permute.xlu1 %633   ;;  %v3125_v20 = vld [vmem:[%s5555_s0 + $0x109] sm:$0x2]   ;;  %v2050_v30 = vsel %vm5_vm0, %v3121_v18, %v3120_v17 }
  0xaf   :  { %1770 = vrot.lane.b32.xlu0 %v1769_v5, %s3458_s4  ;;  %637 = vst.msk [vmem:[#allocation0 + $0x20] sm:$0x3] %vm635_vm7, %v634_v24   ;;  %639 = vst.msk [vmem:[#allocation0 + $0x6] sm:$0xc] %vm635_vm7, %v634_v24   ;;  %v1934_v5 = vsel %vm13_vm2, %v3099_v58, %v1930_v57  ;;  %v3115_v26 = vld [vmem:[%s5555_s0 + $0x188] sm:$0x8]   ;;  %v2071_v31 = vsel %vm5_vm0, %v3125_v20, %v3124_v19 }
  0xb0   :  { %1832 = vrot.lane.b32.xlu1 %v1831_v22, %s3461_s23  ;;  %v1996_v22 = vsel %vm13_vm2, %v3111_v12, %v1992_v11  ;;  %v3119_v28 = vld [vmem:[%s5555_s0 + $0x15d] sm:$0x8]   ;;  %v3122_v29 = vld [vmem:[%s5555_s0 + $0x33] sm:$0x4]   ;;  %v3126_v32 = vld [vmem:[%s5555_s0 + $0x88] sm:$0x4]  }
  0xb1   :  { %v613_v23 = vpop.permute.xlu0 %612   ;;  %v3128_v33 = vld [vmem:[%s5555_s0 + $0xdf] sm:$0x1]   ;;  %vm821_vm3 = vcmask 769752   ;;  %s3469_s8 = smov 34   ;;  %vm842_vm4 = vcmask 761552   ;;  %v2054_v41 = vsel %vm9_vm1, %v3122_v29, %v2050_v30  ;;  %v2075_v43 = vsel %vm9_vm1, %v3126_v32, %v2071_v31  ;;  %s3470_s25 = smov 33  }
  0xb2   :  { %616 = vst.msk [vmem:[#allocation0 + $0x28] sm:$0x3] %vm614_vm6, %v613_v23   ;;  %618 = vst.msk [vmem:[#allocation0 + $0xe] sm:$0xc] %vm614_vm6, %v613_v23   ;;  %v675_v40 = vpop.permute.xlu1 %674   ;;  %v3129_v34 = vld [vmem:[%s5555_s0 + $0x1de] sm:$0x2]  }
  0xb3   :  { %1811 = vrot.lane.b32.xlu0 %v1810_v21, %s3460_s22  ;;  %678 = vst.msk [vmem:[#allocation0 + $0x28] sm:$0x3] %vm676_vm9, %v675_v40   ;;  %680 = vst.msk [vmem:[#allocation0 + $0xe] sm:$0xc] %vm676_vm9, %v675_v40   ;;  %v1975_v21 = vsel %vm13_vm2, %v3107_v10, %v1971_v9  ;;  %v3132_v35 = vld [vmem:[%s5555_s0 + $0xb4] sm:$0x1]   ;;  %v2091_v46 = vsel %vm5_vm0, %v3129_v34, %v3128_v33 }
  0xb4   :  { %1873 = vrot.lane.b32.xlu1 %v1872_v38, %s3463_s12  ;;  %v3133_v36 = vld [vmem:[%s5555_s0 + $0x1b3] sm:$0x2]   ;;  %v2037_v38 = vsel %vm13_vm2, %v3119_v28, %v2033_v27  ;;  %v3123_v42 = vld [vmem:[%s5555_s0 + $0x132] sm:$0x8]   ;;  %v3127_v44 = vld [vmem:[%s5555_s0 + $0x187] sm:$0x8]  }
  0xb5   :  { %v655_v39 = vpop.permute.xlu0 %654   ;;  %v3130_v45 = vld [vmem:[%s5555_s0 + $0x5d] sm:$0x4]   ;;  %v2112_v47 = vsel %vm5_vm0, %v3133_v36, %v3132_v35  ;;  %v3134_v48 = vld [vmem:[%s5555_s0 + $0x32] sm:$0x4]   ;;  %v3136_v49 = vld [vmem:[%s5555_s0 + $0x9] sm:$0x1]  }
  0xb6   :  { %657 = vst.msk [vmem:[#allocation0] sm:$0x3] %vm656_vm8, %v655_v39   ;;  %659 = vst.msk [vmem:[#allocation0 + $0x16] sm:$0xc] %vm656_vm8, %v655_v39   ;;  %v717_v56 = vpop.permute.xlu1 %716   ;;  %v3137_v50 = vld [vmem:[%s5555_s0 + $0x108] sm:$0x2]   ;;  %v2095_v57 = vsel %vm9_vm1, %v3130_v45, %v2091_v46  ;;  %v2116_v59 = vsel %vm9_vm1, %v3134_v48, %v2112_v47 }
  0xb7   :  { %1852 = vrot.lane.b32.xlu0 %v1851_v37, %s3462_s11  ;;  %719 = vst.msk [vmem:[#allocation0] sm:$0x3] %vm718_vm11, %v717_v56   ;;  %721 = vst.msk [vmem:[#allocation0 + $0x16] sm:$0xc] %vm718_vm11, %v717_v56   ;;  %v2017_v37 = vsel %vm13_vm2, %v3115_v26, %v2013_v25  ;;  %vm862_vm5 = vcmask 753352   ;;  %s3471_s26 = smov 32   ;;  %v2133_v62 = vsel %vm5_vm0, %v3137_v50, %v3136_v49 }
  0xb8   :  { %1914 = vrot.lane.b32.xlu1 %v1913_v54, %s3465_s30  ;;  %vm883_vm6 = vcmask 745152   ;;  %v3140_v51 = vld [vmem:[%s5555_s0 + $0xde] sm:$0x1]   ;;  %v2079_v54 = vsel %vm13_vm2, %v3127_v44, %v2075_v43  ;;  %v3131_v58 = vld [vmem:[%s5555_s0 + $0x15c] sm:$0x8]   ;;  %s3472_s14 = smov 31  }
  0xb9   :  { %v696_v55 = vpop.permute.xlu0 %695   ;;  %v3141_v52 = vld [vmem:[%s5555_s0 + $0x1dd] sm:$0x2]   ;;  %v3135_v60 = vld [vmem:[%s5555_s0 + $0x131] sm:$0x8]   ;;  %v3138_v61 = vld [vmem:[%s5555_s0 + $0x87] sm:$0x4]  }
  0xba   :  { %699 = vst.msk [vmem:[#allocation0 + $0x20] sm:$0x3] %vm697_vm10, %v696_v55   ;;  %701 = vst.msk [vmem:[#allocation0 + $0x6] sm:$0xc] %vm697_vm10, %v696_v55   ;;  %v758_v8 = vpop.permute.xlu1 %757   ;;  %v2153_v63 = vsel %vm5_vm0, %v3141_v52, %v3140_v51  ;;  %v3142_v0 = vld [vmem:[%s5555_s0 + $0x5c] sm:$0x4]   ;;  %v2137_v9 = vsel %vm9_vm1, %v3138_v61, %v2133_v62 }
  0xbb   :  { %1894 = vrot.lane.b32.xlu0 %v1893_v53, %s3464_s29  ;;  %761 = vst.msk [vmem:[#allocation0 + $0x20] sm:$0x3] %vm759_vm13, %v758_v8   ;;  %763 = vst.msk [vmem:[#allocation0 + $0x6] sm:$0xc] %vm759_vm13, %v758_v8   ;;  %v2058_v53 = vsel %vm13_vm2, %v3123_v42, %v2054_v41  ;;  %v3144_v1 = vld [vmem:[%s5555_s0 + $0xb3] sm:$0x1]   ;;  %v2157_v11 = vsel %vm9_vm1, %v3142_v0, %v2153_v63 }
  0xbc   :  { %1956 = vrot.lane.b32.xlu1 %v1955_v6, %s3467_s19  ;;  %v3145_v2 = vld [vmem:[%s5555_s0 + $0x1b2] sm:$0x2]   ;;  %vm904_vm7 = vcmask 736952   ;;  %s3473_s15 = smov 30   ;;  %vm924_vm8 = vcmask 728752   ;;  %v2120_v6 = vsel %vm13_vm2, %v3135_v60, %v2116_v59  ;;  %s3474_s3 = smov 29  }
  0xbd   :  { %v737_v7 = vpop.permute.xlu0 %736   ;;  %v3148_v3 = vld [vmem:[%s5555_s0 + $0x8] sm:$0x1]   ;;  %v3139_v10 = vld [vmem:[%s5555_s0 + $0x186] sm:$0x8]   ;;  %v3143_v12 = vld [vmem:[%s5555_s0 + $0x15b] sm:$0x8]   ;;  %v2174_v14 = vsel %vm5_vm0, %v3145_v2, %v3144_v1 }
  0xbe   :  { %740 = vst.msk [vmem:[#allocation0 + $0x28] sm:$0x3] %vm738_vm12, %v737_v7   ;;  %742 = vst.msk [vmem:[#allocation0 + $0xe] sm:$0xc] %vm738_vm12, %v737_v7   ;;  %v799_v24 = vpop.permute.xlu1 %798   ;;  %v3149_v4 = vld [vmem:[%s5555_s0 + $0x107] sm:$0x2]  }
  0xbf   :  { %1935 = vrot.lane.b32.xlu0 %v1934_v5, %s3466_s18  ;;  %802 = vst.msk [vmem:[#allocation0 + $0x28] sm:$0x3] %vm800_vm15, %v799_v24   ;;  %804 = vst.msk [vmem:[#allocation0 + $0xe] sm:$0xc] %vm800_vm15, %v799_v24   ;;  %v2099_v5 = vsel %vm13_vm2, %v3131_v58, %v2095_v57  ;;  %v3146_v13 = vld [vmem:[%s5555_s0 + $0x31] sm:$0x4]   ;;  %v2195_v15 = vsel %vm5_vm0, %v3149_v4, %v3148_v3 }
  0xc0   :  { %1997 = vrot.lane.b32.xlu1 %v1996_v22, %s3469_s8  ;;  %v3150_v16 = vld [vmem:[%s5555_s0 + $0x86] sm:$0x4]   ;;  %v3152_v17 = vld [vmem:[%s5555_s0 + $0xdd] sm:$0x1]   ;;  %vm945_vm9 = vcmask 720552   ;;  %s3475_s4 = smov 28   ;;  %v2161_v22 = vsel %vm13_vm2, %v3143_v12, %v2157_v11  ;;  %v2178_v25 = vsel %vm9_vm1, %v3146_v13, %v2174_v14 }
  0xc1   :  { %v779_v23 = vpop.permute.xlu0 %778   ;;  %v3153_v18 = vld [vmem:[%s5555_s0 + $0x1dc] sm:$0x2]   ;;  %vm966_vm10 = vcmask 712352   ;;  %v3156_v19 = vld [vmem:[%s5555_s0 + $0xb2] sm:$0x1]   ;;  %v2199_v27 = vsel %vm9_vm1, %v3150_v16, %v2195_v15  ;;  %s3476_s21 = smov 27  }
  0xc2   :  { %781 = vst.msk [vmem:[#allocation0] sm:$0x3] %vm780_vm14, %v779_v23   ;;  %783 = vst.msk [vmem:[#allocation0 + $0x16] sm:$0xc] %vm780_vm14, %v779_v23   ;;  %v841_v40 = vpop.permute.xlu1 %840   ;;  %v3157_v20 = vld [vmem:[%s5555_s0 + $0x1b1] sm:$0x2]   ;;  %v2215_v30 = vsel %vm5_vm0, %v3153_v18, %v3152_v17 }
  0xc3   :  { %1976 = vrot.lane.b32.xlu0 %v1975_v21, %s3468_s7  ;;  %843 = vst.msk [vmem:[#allocation0] sm:$0x3] %vm842_vm4, %v841_v40   ;;  %845 = vst.msk [vmem:[#allocation0 + $0x16] sm:$0xc] %vm842_vm4, %v841_v40   ;;  %v2141_v21 = vsel %vm13_vm2, %v3139_v10, %v2137_v9  ;;  %v3147_v26 = vld [vmem:[%s5555_s0 + $0x130] sm:$0x8]   ;;  %v2236_v31 = vsel %vm5_vm0, %v3157_v20, %v3156_v19 }
  0xc4   :  { %2038 = vrot.lane.b32.xlu1 %v2037_v38, %s3471_s26  ;;  %v3151_v28 = vld [vmem:[%s5555_s0 + $0x185] sm:$0x8]   ;;  %v3154_v29 = vld [vmem:[%s5555_s0 + $0x5b] sm:$0x4]   ;;  %v3158_v32 = vld [vmem:[%s5555_s0 + $0x30] sm:$0x4]  }
  0xc5   :  { %v820_v39 = vpop.permute.xlu0 %819   ;;  %v3160_v33 = vld [vmem:[%s5555_s0 + $0x7] sm:$0x1]   ;;  %vm986_vm11 = vcmask 704152   ;;  %s3477_s22 = smov 26   ;;  %vm1007_vm12 = vcmask 695952   ;;  %v2203_v38 = vsel %vm13_vm2, %v3151_v28, %v2199_v27  ;;  %v2219_v41 = vsel %vm9_vm1, %v3154_v29, %v2215_v30  ;;  %s3478_s10 = smov 25  }
  0xc6   :  { %823 = vst.msk [vmem:[#allocation0 + $0x20] sm:$0x3] %vm821_vm3, %v820_v39   ;;  %825 = vst.msk [vmem:[#allocation0 + $0x6] sm:$0xc] %vm821_vm3, %v820_v39   ;;  %v882_v56 = vpop.permute.xlu1 %881   ;;  %v3161_v34 = vld [vmem:[%s5555_s0 + $0x106] sm:$0x2]   ;;  %v2240_v43 = vsel %vm9_vm1, %v3158_v32, %v2236_v31 }
  0xc7   :  { %2018 = vrot.lane.b32.xlu0 %v2017_v37, %s3470_s25  ;;  %885 = vst.msk [vmem:[#allocation0 + $0x20] sm:$0x3] %vm883_vm6, %v882_v56   ;;  %887 = vst.msk [vmem:[#allocation0 + $0x6] sm:$0xc] %vm883_vm6, %v882_v56   ;;  %v3164_v35 = vld [vmem:[%s5555_s0 + $0xdc] sm:$0x1]   ;;  %v2182_v37 = vsel %vm13_vm2, %v3147_v26, %v2178_v25  ;;  %v2257_v46 = vsel %vm5_vm0, %v3161_v34, %v3160_v33 }
  0xc8   :  { %2080 = vrot.lane.b32.xlu1 %v2079_v54, %s3473_s15  ;;  %v3165_v36 = vld [vmem:[%s5555_s0 + $0x1db] sm:$0x2]   ;;  %v3155_v42 = vld [vmem:[%s5555_s0 + $0x15a] sm:$0x8]   ;;  %v3159_v44 = vld [vmem:[%s5555_s0 + $0x12f] sm:$0x8]  }
  0xc9   :  { %v861_v55 = vpop.permute.xlu0 %860   ;;  %v3162_v45 = vld [vmem:[%s5555_s0 + $0x85] sm:$0x4]   ;;  %v2277_v47 = vsel %vm5_vm0, %v3165_v36, %v3164_v35  ;;  %v3166_v48 = vld [vmem:[%s5555_s0 + $0x5a] sm:$0x4]   ;;  %v3168_v49 = vld [vmem:[%s5555_s0 + $0xb1] sm:$0x1]   ;;  %v2244_v54 = vsel %vm13_vm2, %v3159_v44, %v2240_v43 }
  0xca   :  { %864 = vst.msk [vmem:[#allocation0 + $0x28] sm:$0x3] %vm862_vm5, %v861_v55   ;;  %866 = vst.msk [vmem:[#allocation0 + $0xe] sm:$0xc] %vm862_vm5, %v861_v55   ;;  %v923_v8 = vpop.permute.xlu1 %922   ;;  %v3169_v50 = vld [vmem:[%s5555_s0 + $0x1b0] sm:$0x2]   ;;  %v2261_v57 = vsel %vm9_vm1, %v3162_v45, %v2257_v46  ;;  %v2281_v59 = vsel %vm9_vm1, %v3166_v48, %v2277_v47 }
  0xcb   :  { %2059 = vrot.lane.b32.xlu0 %v2058_v53, %s3472_s14  ;;  %926 = vst.msk [vmem:[#allocation0 + $0x28] sm:$0x3] %vm924_vm8, %v923_v8   ;;  %928 = vst.msk [vmem:[#allocation0 + $0xe] sm:$0xc] %vm924_vm8, %v923_v8   ;;  %vm1028_vm13 = vcmask 687752   ;;  %s3479_s11 = smov 24   ;;  %v2223_v53 = vsel %vm13_vm2, %v3155_v42, %v2219_v41  ;;  %v2298_v62 = vsel %vm5_vm0, %v3169_v50, %v3168_v49 }
  0xcc   :  { %2121 = vrot.lane.b32.xlu1 %v2120_v6, %s3475_s4  ;;  %vm1048_vm14 = vcmask 679552   ;;  %v3172_v51 = vld [vmem:[%s5555_s0 + $0x6] sm:$0x1]   ;;  %v3163_v58 = vld [vmem:[%s5555_s0 + $0x184] sm:$0x8]   ;;  %s3480_s28 = smov 23  }
  0xcd   :  { %v903_v7 = vpop.permute.xlu0 %902   ;;  %v3173_v52 = vld [vmem:[%s5555_s0 + $0x105] sm:$0x2]   ;;  %v3167_v60 = vld [vmem:[%s5555_s0 + $0x159] sm:$0x8]   ;;  %v3170_v61 = vld [vmem:[%s5555_s0 + $0x2f] sm:$0x4]  }
  0xce   :  { %905 = vst.msk [vmem:[#allocation0] sm:$0x3] %vm904_vm7, %v903_v7   ;;  %907 = vst.msk [vmem:[#allocation0 + $0x16] sm:$0xc] %vm904_vm7, %v903_v7   ;;  %v965_v24 = vpop.permute.xlu1 %964   ;;  %v2319_v63 = vsel %vm5_vm0, %v3173_v52, %v3172_v51  ;;  %v3174_v0 = vld [vmem:[%s5555_s0 + $0x84] sm:$0x4]   ;;  %v2285_v6 = vsel %vm13_vm2, %v3167_v60, %v2281_v59  ;;  %v2302_v9 = vsel %vm9_vm1, %v3170_v61, %v2298_v62 }
  0xcf   :  { %2100 = vrot.lane.b32.xlu0 %v2099_v5, %s3474_s3  ;;  %967 = vst.msk [vmem:[#allocation0] sm:$0x3] %vm966_vm10, %v965_v24   ;;  %969 = vst.msk [vmem:[#allocation0 + $0x16] sm:$0xc] %vm966_vm10, %v965_v24   ;;  %v3176_v1 = vld [vmem:[%s5555_s0 + $0xdb] sm:$0x1]   ;;  %v2265_v5 = vsel %vm13_vm2, %v3163_v58, %v2261_v57  ;;  %v2323_v11 = vsel %vm9_vm1, %v3174_v0, %v2319_v63 }
  0xd0   :  { %2162 = vrot.lane.b32.xlu1 %v2161_v22, %s3477_s22  ;;  %v3177_v2 = vld [vmem:[%s5555_s0 + $0x1da] sm:$0x2]   ;;  %vm1069_vm15 = vcmask 671352   ;;  %s3481_s29 = smov 22   ;;  %vm1090_vm3 = vcmask 663152   ;;  %s3482_s17 = smov 21  }
  0xd1   :  { %v944_v23 = vpop.permute.xlu0 %943   ;;  %v3180_v3 = vld [vmem:[%s5555_s0 + $0xb0] sm:$0x1]   ;;  %v3171_v10 = vld [vmem:[%s5555_s0 + $0x12e] sm:$0x8]   ;;  %v3175_v12 = vld [vmem:[%s5555_s0 + $0x183] sm:$0x8]   ;;  %v2339_v14 = vsel %vm5_vm0, %v3177_v2, %v3176_v1 }
  0xd2   :  { %947 = vst.msk [vmem:[#allocation0 + $0x20] sm:$0x3] %vm945_vm9, %v944_v23   ;;  %949 = vst.msk [vmem:[#allocation0 + $0x6] sm:$0xc] %vm945_vm9, %v944_v23   ;;  %v1006_v40 = vpop.permute.xlu1 %1005   ;;  %v3181_v4 = vld [vmem:[%s5555_s0 + $0x1af] sm:$0x2]   ;;  %v2327_v22 = vsel %vm13_vm2, %v3175_v12, %v2323_v11 }
  0xd3   :  { %2142 = vrot.lane.b32.xlu0 %v2141_v21, %s3476_s21  ;;  %1009 = vst.msk [vmem:[#allocation0 + $0x20] sm:$0x3] %vm1007_vm12, %v1006_v40   ;;  %1011 = vst.msk [vmem:[#allocation0 + $0x6] sm:$0xc] %vm1007_vm12, %v1006_v40   ;;  %v3178_v13 = vld [vmem:[%s5555_s0 + $0x59] sm:$0x4]   ;;  %v2360_v15 = vsel %vm5_vm0, %v3181_v4, %v3180_v3  ;;  %v2306_v21 = vsel %vm13_vm2, %v3171_v10, %v2302_v9 }
  0xd4   :  { %2204 = vrot.lane.b32.xlu1 %v2203_v38, %s3479_s11  ;;  %v3182_v16 = vld [vmem:[%s5555_s0 + $0x2e] sm:$0x4]   ;;  %v3184_v17 = vld [vmem:[%s5555_s0 + $0x5] sm:$0x1]   ;;  %vm1110_vm4 = vcmask 654952   ;;  %s3483_s18 = smov 20   ;;  %v2343_v25 = vsel %vm9_vm1, %v3178_v13, %v2339_v14 }
  0xd5   :  { %v985_v39 = vpop.permute.xlu0 %984   ;;  %v3185_v18 = vld [vmem:[%s5555_s0 + $0x104] sm:$0x2]   ;;  %vm1131_vm5 = vcmask 646752   ;;  %v3188_v19 = vld [vmem:[%s5555_s0 + $0xda] sm:$0x1]   ;;  %v2364_v27 = vsel %vm9_vm1, %v3182_v16, %v2360_v15  ;;  %s3484_s6 = smov 19  }
  0xd6   :  { %988 = vst.msk [vmem:[#allocation0 + $0x28] sm:$0x3] %vm986_vm11, %v985_v39   ;;  %990 = vst.msk [vmem:[#allocation0 + $0xe] sm:$0xc] %vm986_vm11, %v985_v39   ;;  %v1047_v56 = vpop.permute.xlu1 %1046   ;;  %v3189_v20 = vld [vmem:[%s5555_s0 + $0x1d9] sm:$0x2]   ;;  %v2381_v30 = vsel %vm5_vm0, %v3185_v18, %v3184_v17 }
  0xd7   :  { %2183 = vrot.lane.b32.xlu0 %v2182_v37, %s3478_s10  ;;  %1050 = vst.msk [vmem:[#allocation0 + $0x28] sm:$0x3] %vm1048_vm14, %v1047_v56   ;;  %1052 = vst.msk [vmem:[#allocation0 + $0xe] sm:$0xc] %vm1048_vm14, %v1047_v56   ;;  %v3179_v26 = vld [vmem:[%s5555_s0 + $0x158] sm:$0x8]   ;;  %v2401_v31 = vsel %vm5_vm0, %v3189_v20, %v3188_v19 }
  0xd8   :  { %2245 = vrot.lane.b32.xlu1 %v2244_v54, %s3481_s29  ;;  %v3183_v28 = vld [vmem:[%s5555_s0 + $0x12d] sm:$0x8]   ;;  %v3186_v29 = vld [vmem:[%s5555_s0 + $0x83] sm:$0x4]   ;;  %v3190_v32 = vld [vmem:[%s5555_s0 + $0x58] sm:$0x4]   ;;  %v2347_v37 = vsel %vm13_vm2, %v3179_v26, %v2343_v25 }
  0xd9   :  { %v1027_v55 = vpop.permute.xlu0 %1026   ;;  %v3192_v33 = vld [vmem:[%s5555_s0 + $0xaf] sm:$0x1]   ;;  %vm1152_vm6 = vcmask 638552   ;;  %s3485_s7 = smov 18   ;;  %vm1172_vm7 = vcmask 630352   ;;  %v2368_v38 = vsel %vm13_vm2, %v3183_v28, %v2364_v27  ;;  %v2385_v41 = vsel %vm9_vm1, %v3186_v29, %v2381_v30  ;;  %s3486_s24 = smov 17  }
  0xda   :  { %1029 = vst.msk [vmem:[#allocation0] sm:$0x3] %vm1028_vm13, %v1027_v55   ;;  %1031 = vst.msk [vmem:[#allocation0 + $0x16] sm:$0xc] %vm1028_vm13, %v1027_v55   ;;  %v1089_v8 = vpop.permute.xlu1 %1088   ;;  %v3193_v34 = vld [vmem:[%s5555_s0 + $0x1ae] sm:$0x2]   ;;  %v2405_v43 = vsel %vm9_vm1, %v3190_v32, %v2401_v31 }
  0xdb   :  { %2224 = vrot.lane.b32.xlu0 %v2223_v53, %s3480_s28  ;;  %1091 = vst.msk [vmem:[#allocation0] sm:$0x3] %vm1090_vm3, %v1089_v8   ;;  %1093 = vst.msk [vmem:[#allocation0 + $0x16] sm:$0xc] %vm1090_vm3, %v1089_v8   ;;  %v3196_v35 = vld [vmem:[%s5555_s0 + $0x4] sm:$0x1]   ;;  %v2422_v46 = vsel %vm5_vm0, %v3193_v34, %v3192_v33 }
  0xdc   :  { %2286 = vrot.lane.b32.xlu1 %v2285_v6, %s3483_s18  ;;  %v3197_v36 = vld [vmem:[%s5555_s0 + $0x103] sm:$0x2]   ;;  %v3187_v42 = vld [vmem:[%s5555_s0 + $0x182] sm:$0x8]   ;;  %v3191_v44 = vld [vmem:[%s5555_s0 + $0x157] sm:$0x8]  }
  0xdd   :  { %v1068_v7 = vpop.permute.xlu0 %1067   ;;  %v3194_v45 = vld [vmem:[%s5555_s0 + $0x2d] sm:$0x4]   ;;  %v2443_v47 = vsel %vm5_vm0, %v3197_v36, %v3196_v35  ;;  %v3198_v48 = vld [vmem:[%s5555_s0 + $0x82] sm:$0x4]   ;;  %v3200_v49 = vld [vmem:[%s5555_s0 + $0xd9] sm:$0x1]   ;;  %v2389_v53 = vsel %vm13_vm2, %v3187_v42, %v2385_v41  ;;  %v2409_v54 = vsel %vm13_vm2, %v3191_v44, %v2405_v43 }
  0xde   :  { %1071 = vst.msk [vmem:[#allocation0 + $0x20] sm:$0x3] %vm1069_vm15, %v1068_v7   ;;  %1073 = vst.msk [vmem:[#allocation0 + $0x6] sm:$0xc] %vm1069_vm15, %v1068_v7   ;;  %v1130_v24 = vpop.permute.xlu1 %1129   ;;  %v3201_v50 = vld [vmem:[%s5555_s0 + $0x1d8] sm:$0x2]   ;;  %v2426_v57 = vsel %vm9_vm1, %v3194_v45, %v2422_v46  ;;  %v2447_v59 = vsel %vm9_vm1, %v3198_v48, %v2443_v47 }
  0xdf   :  { %2266 = vrot.lane.b32.xlu0 %v2265_v5, %s3482_s17  ;;  %1133 = vst.msk [vmem:[#allocation0 + $0x20] sm:$0x3] %vm1131_vm5, %v1130_v24   ;;  %1135 = vst.msk [vmem:[#allocation0 + $0x6] sm:$0xc] %vm1131_vm5, %v1130_v24   ;;  %vm1193_vm8 = vcmask 622152   ;;  %s3487_s25 = smov 16   ;;  %v2463_v62 = vsel %vm5_vm0, %v3201_v50, %v3200_v49 }
  0xe0   :  { %2328 = vrot.lane.b32.xlu1 %v2327_v22, %s3485_s7  ;;  %vm1214_vm9 = vcmask 613952   ;;  %v3204_v51 = vld [vmem:[%s5555_s0 + $0xae] sm:$0x1]   ;;  %v3195_v58 = vld [vmem:[%s5555_s0 + $0x12c] sm:$0x8]   ;;  %s3488_s13 = smov 15  }
  0xe1   :  { %v1109_v23 = vpop.permute.xlu0 %1108   ;;  %v3205_v52 = vld [vmem:[%s5555_s0 + $0x1ad] sm:$0x2]   ;;  %v3199_v60 = vld [vmem:[%s5555_s0 + $0x181] sm:$0x8]   ;;  %v3202_v61 = vld [vmem:[%s5555_s0 + $0x57] sm:$0x4]   ;;  %v2430_v5 = vsel %vm13_vm2, %v3195_v58, %v2426_v57 }
  0xe2   :  { %1112 = vst.msk [vmem:[#allocation0 + $0x28] sm:$0x3] %vm1110_vm4, %v1109_v23   ;;  %1114 = vst.msk [vmem:[#allocation0 + $0xe] sm:$0xc] %vm1110_vm4, %v1109_v23   ;;  %v1171_v40 = vpop.permute.xlu1 %1170   ;;  %v2484_v63 = vsel %vm5_vm0, %v3205_v52, %v3204_v51  ;;  %v3206_v0 = vld [vmem:[%s5555_s0 + $0x2c] sm:$0x4]   ;;  %v2451_v6 = vsel %vm13_vm2, %v3199_v60, %v2447_v59  ;;  %v2467_v9 = vsel %vm9_vm1, %v3202_v61, %v2463_v62 }
  0xe3   :  { %2307 = vrot.lane.b32.xlu0 %v2306_v21, %s3484_s6  ;;  %1174 = vst.msk [vmem:[#allocation0 + $0x28] sm:$0x3] %vm1172_vm7, %v1171_v40   ;;  %1176 = vst.msk [vmem:[#allocation0 + $0xe] sm:$0xc] %vm1172_vm7, %v1171_v40   ;;  %v3208_v1 = vld [vmem:[%s5555_s0 + $0x3] sm:$0x1]   ;;  %v2488_v11 = vsel %vm9_vm1, %v3206_v0, %v2484_v63 }
  0xe4   :  { %2369 = vrot.lane.b32.xlu1 %v2368_v38, %s3487_s25  ;;  %v3209_v2 = vld [vmem:[%s5555_s0 + $0x102] sm:$0x2]   ;;  %vm1234_vm10 = vcmask 605752   ;;  %s3489_s14 = smov 14   ;;  %vm1255_vm11 = vcmask 597552   ;;  %s3490_s2 = smov 13  }
  0xe5   :  { %v1151_v39 = vpop.permute.xlu0 %1150   ;;  %v3212_v3 = vld [vmem:[%s5555_s0 + $0xd8] sm:$0x1]   ;;  %v3203_v10 = vld [vmem:[%s5555_s0 + $0x156] sm:$0x8]   ;;  %v3207_v12 = vld [vmem:[%s5555_s0 + $0x12b] sm:$0x8]   ;;  %v2505_v14 = vsel %vm5_vm0, %v3209_v2, %v3208_v1 }
  0xe6   :  { %1153 = vst.msk [vmem:[#allocation0] sm:$0x3] %vm1152_vm6, %v1151_v39   ;;  %1155 = vst.msk [vmem:[#allocation0 + $0x16] sm:$0xc] %vm1152_vm6, %v1151_v39   ;;  %v1213_v56 = vpop.permute.xlu1 %1212   ;;  %v3213_v4 = vld [vmem:[%s5555_s0 + $0x1d7] sm:$0x2]   ;;  %v2471_v21 = vsel %vm13_vm2, %v3203_v10, %v2467_v9  ;;  %v2492_v22 = vsel %vm13_vm2, %v3207_v12, %v2488_v11 }
  0xe7   :  { %2348 = vrot.lane.b32.xlu0 %v2347_v37, %s3486_s24  ;;  %1215 = vst.msk [vmem:[#allocation0] sm:$0x3] %vm1214_vm9, %v1213_v56   ;;  %1217 = vst.msk [vmem:[#allocation0 + $0x16] sm:$0xc] %vm1214_vm9, %v1213_v56   ;;  %v3210_v13 = vld [vmem:[%s5555_s0 + $0x81] sm:$0x4]   ;;  %v2525_v15 = vsel %vm5_vm0, %v3213_v4, %v3212_v3 }
  0xe8   :  { %2410 = vrot.lane.b32.xlu1 %v2409_v54, %s3489_s14  ;;  %v3214_v16 = vld [vmem:[%s5555_s0 + $0x56] sm:$0x4]   ;;  %v3216_v17 = vld [vmem:[%s5555_s0 + $0xad] sm:$0x1]   ;;  %vm1276_vm12 = vcmask 589352   ;;  %s3491_s3 = smov 12   ;;  %v2509_v25 = vsel %vm9_vm1, %v3210_v13, %v2505_v14 }
  0xe9   :  { %v1192_v55 = vpop.permute.xlu0 %1191   ;;  %v3217_v18 = vld [vmem:[%s5555_s0 + $0x1ac] sm:$0x2]   ;;  %vm1296_vm13 = vcmask 581152   ;;  %v3220_v19 = vld [vmem:[%s5555_s0 + $0x2] sm:$0x1]   ;;  %v2529_v27 = vsel %vm9_vm1, %v3214_v16, %v2525_v15  ;;  %s3492_s20 = smov 11  }
  0xea   :  { %1195 = vst.msk [vmem:[#allocation0 + $0x20] sm:$0x3] %vm1193_vm8, %v1192_v55   ;;  %1197 = vst.msk [vmem:[#allocation0 + $0x6] sm:$0xc] %vm1193_vm8, %v1192_v55   ;;  %v1254_v8 = vpop.permute.xlu1 %1253   ;;  %v3221_v20 = vld [vmem:[%s5555_s0 + $0x101] sm:$0x2]   ;;  %v2546_v30 = vsel %vm5_vm0, %v3217_v18, %v3216_v17 }
  0xeb   :  { %2390 = vrot.lane.b32.xlu0 %v2389_v53, %s3488_s13  ;;  %1257 = vst.msk [vmem:[#allocation0 + $0x20] sm:$0x3] %vm1255_vm11, %v1254_v8   ;;  %1259 = vst.msk [vmem:[#allocation0 + $0x6] sm:$0xc] %vm1255_vm11, %v1254_v8   ;;  %v3211_v26 = vld [vmem:[%s5555_s0 + $0x180] sm:$0x8]   ;;  %v2567_v31 = vsel %vm5_vm0, %v3221_v20, %v3220_v19 }
  0xec   :  { %2452 = vrot.lane.b32.xlu1 %v2451_v6, %s3491_s3  ;;  %v3215_v28 = vld [vmem:[%s5555_s0 + $0x155] sm:$0x8]   ;;  %v3218_v29 = vld [vmem:[%s5555_s0 + $0x2b] sm:$0x4]   ;;  %v3222_v32 = vld [vmem:[%s5555_s0 + $0x80] sm:$0x4]   ;;  %v2513_v37 = vsel %vm13_vm2, %v3211_v26, %v2509_v25 }
  0xed   :  { %v1233_v7 = vpop.permute.xlu0 %1232   ;;  %v3224_v33 = vld [vmem:[%s5555_s0 + $0xd7] sm:$0x1]   ;;  %vm1317_vm14 = vcmask 572952   ;;  %s3493_s21 = smov 10   ;;  %vm1338_vm15 = vcmask 564752   ;;  %v2533_v38 = vsel %vm13_vm2, %v3215_v28, %v2529_v27  ;;  %v2550_v41 = vsel %vm9_vm1, %v3218_v29, %v2546_v30  ;;  %s3494_s9 = smov 9  }
  0xee   :  { %1236 = vst.msk [vmem:[#allocation0 + $0x28] sm:$0x3] %vm1234_vm10, %v1233_v7   ;;  %1238 = vst.msk [vmem:[#allocation0 + $0xe] sm:$0xc] %vm1234_vm10, %v1233_v7   ;;  %v1295_v24 = vpop.permute.xlu1 %1294   ;;  %v3225_v34 = vld [vmem:[%s5555_s0 + $0x1d6] sm:$0x2]   ;;  %v2571_v43 = vsel %vm9_vm1, %v3222_v32, %v2567_v31 }
  0xef   :  { %2431 = vrot.lane.b32.xlu0 %v2430_v5, %s3490_s2  ;;  %1298 = vst.msk [vmem:[#allocation0 + $0x28] sm:$0x3] %vm1296_vm13, %v1295_v24   ;;  %1300 = vst.msk [vmem:[#allocation0 + $0xe] sm:$0xc] %vm1296_vm13, %v1295_v24   ;;  %v3228_v35 = vld [vmem:[%s5555_s0 + $0xac] sm:$0x1]   ;;  %v2587_v46 = vsel %vm5_vm0, %v3225_v34, %v3224_v33 }
  0xf0   :  { %2493 = vrot.lane.b32.xlu1 %v2492_v22, %s3493_s21  ;;  %v3229_v36 = vld [vmem:[%s5555_s0 + $0x1ab] sm:$0x2]   ;;  %v3219_v42 = vld [vmem:[%s5555_s0 + $0x12a] sm:$0x8]   ;;  %v3223_v44 = vld [vmem:[%s5555_s0 + $0x17f] sm:$0x8]  }
  0xf1   :  { %v1275_v23 = vpop.permute.xlu0 %1274   ;;  %v3226_v45 = vld [vmem:[%s5555_s0 + $0x55] sm:$0x4]   ;;  %v2608_v47 = vsel %vm5_vm0, %v3229_v36, %v3228_v35  ;;  %v3230_v48 = vld [vmem:[%s5555_s0 + $0x2a] sm:$0x4]   ;;  %v3232_v49 = vld [vmem:[%s5555_s0 + $0x1] sm:$0x1]   ;;  %v2554_v53 = vsel %vm13_vm2, %v3219_v42, %v2550_v41  ;;  %v2575_v54 = vsel %vm13_vm2, %v3223_v44, %v2571_v43 }
  0xf2   :  { %1277 = vst.msk [vmem:[#allocation0] sm:$0x3] %vm1276_vm12, %v1275_v23   ;;  %1279 = vst.msk [vmem:[#allocation0 + $0x16] sm:$0xc] %vm1276_vm12, %v1275_v23   ;;  %v1337_v40 = vpop.permute.xlu1 %1336   ;;  %v3233_v50 = vld [vmem:[%s5555_s0 + $0x100] sm:$0x2]   ;;  %v2591_v57 = vsel %vm9_vm1, %v3226_v45, %v2587_v46  ;;  %v2612_v59 = vsel %vm9_vm1, %v3230_v48, %v2608_v47 }
  0xf3   :  { %2472 = vrot.lane.b32.xlu0 %v2471_v21, %s3492_s20  ;;  %1339 = vst.msk [vmem:[#allocation0] sm:$0x3] %vm1338_vm15, %v1337_v40   ;;  %1341 = vst.msk [vmem:[#allocation0 + $0x16] sm:$0xc] %vm1338_vm15, %v1337_v40   ;;  %vm1358_vm3 = vcmask 556552   ;;  %s3495_s10 = smov 8   ;;  %v2629_v61 = vsel %vm5_vm0, %v3233_v50, %v3232_v49 }
  0xf4   :  { %2534 = vrot.lane.b32.xlu1 %v2533_v38, %s3495_s10  ;;  %vm1379_vm4 = vcmask 548352   ;;  %v3236_v51 = vld [vmem:[%s5555_s0 + $0xd6] sm:$0x1]   ;;  %v3227_v58 = vld [vmem:[%s5555_s0 + $0x154] sm:$0x8]   ;;  %s3496_s23 = smov 7  }
  0xf5   :  { %v1316_v39 = vpop.permute.xlu0 %1315   ;;  %v3237_v52 = vld [vmem:[%s5555_s0 + $0x1d5] sm:$0x2]   ;;  %v3231_v60 = vld [vmem:[%s5555_s0 + $0x129] sm:$0x8]   ;;  %v3234_v62 = vld [vmem:[%s5555_s0 + $0x7f] sm:$0x4]   ;;  %v2595_v3 = vsel %vm13_vm2, %v3227_v58, %v2591_v57 }
  0xf6   :  { %1319 = vst.msk [vmem:[#allocation0 + $0x20] sm:$0x3] %vm1317_vm14, %v1316_v39   ;;  %1321 = vst.msk [vmem:[#allocation0 + $0x6] sm:$0xc] %vm1317_vm14, %v1316_v39   ;;  %v1378_v56 = vpop.permute.xlu1 %1377   ;;  %v2649_v63 = vsel %vm5_vm0, %v3237_v52, %v3236_v51  ;;  %v3238_v0 = vld [vmem:[%s5555_s0 + $0x54] sm:$0x4]   ;;  %v2616_v4 = vsel %vm13_vm2, %v3231_v60, %v2612_v59  ;;  %v2633_v7 = vsel %vm9_vm1, %v3234_v62, %v2629_v61 }
  0xf7   :  { %2514 = vrot.lane.b32.xlu0 %v2513_v37, %s3494_s9  ;;  %1381 = vst.msk [vmem:[#allocation0 + $0x20] sm:$0x3] %vm1379_vm4, %v1378_v56   ;;  %1383 = vst.msk [vmem:[#allocation0 + $0x6] sm:$0xc] %vm1379_vm4, %v1378_v56   ;;  %vm1400_vm5 = vcmask 540152   ;;  %s3497_s24 = smov 6   ;;  %v2653_v9 = vsel %vm9_vm1, %v3238_v0, %v2649_v63 }
  0xf8   :  { %2576 = vrot.lane.b32.xlu1 %v2575_v54, %s3497_s24  ;;  %vm1420_vm6 = vcmask 531952   ;;  %v3240_v1 = vld [vmem:[%s5555_s0 + $0xab] sm:$0x1]   ;;  %v3235_v8 = vld [vmem:[%s5555_s0 + $0x17e] sm:$0x8]   ;;  %s3498_s6 = smov 5  }
  0xf9   :  { %v1357_v55 = vpop.permute.xlu0 %1356   ;;  %v3241_v2 = vld [vmem:[%s5555_s0 + $0x1aa] sm:$0x2]   ;;  %v3239_v10 = vld [vmem:[%s5555_s0 + $0x153] sm:$0x8]   ;;  %s3499_s7 = smov 4   ;;  %vm1462_vm7 = vcmask 515552   ;;  %v2637_v13 = vsel %vm13_vm2, %v3235_v8, %v2633_v7 }
  0xfa   :  { %1360 = vst.msk [vmem:[#allocation0 + $0x28] sm:$0x3] %vm1358_vm3, %v1357_v55   ;;  %1362 = vst.msk [vmem:[#allocation0 + $0xe] sm:$0xc] %vm1358_vm3, %v1357_v55   ;;  %v1419_v6 = vpop.permute.xlu1 %1418   ;;  %v2670_v11 = vsel %vm5_vm0, %v3241_v2, %v3240_v1  ;;  %v3242_v12 = vld [vmem:[%s5555_s0 + $0x29] sm:$0x4]   ;;  %v2657_v14 = vsel %vm13_vm2, %v3239_v10, %v2653_v9 }
  0xfb   :  { %2555 = vrot.lane.b32.xlu0 %v2554_v53, %s3496_s23  ;;  %1422 = vst.msk [vmem:[#allocation0 + $0x28] sm:$0x3] %vm1420_vm6, %v1419_v6   ;;  %1424 = vst.msk [vmem:[#allocation0 + $0xe] sm:$0xc] %vm1420_vm6, %v1419_v6   ;;  %vm1441_vm0 = vcmask 523752   ;;  %v2674_v17 = vsel %vm9_vm1, %v3242_v12, %v2670_v11  ;;  %vm1482_vm1 = vcmask 507352  }
  0xfc   :  { %2617 = vrot.lane.b32.xlu1 %v2616_v4, %s3499_s7  ;;  %v3243_v18 = vld [vmem:[%s5555_s0 + $0x128] sm:$0x8]   ;;  %s3500_s0 = smov 3   ;;  %s3501_s10 = smov 2   ;;  %vm1503_vm8 = vcmask 499152   ;;  %vm1544_vm9 = vcmask 482752  }
  0xfd   :  { %v1399_v5 = vpop.permute.xlu0 %1398   ;;  %v2678_v19 = vsel %vm13_vm2, %v3243_v18, %v2674_v17  ;;  %s3502_s11 = smov 1   ;;  %vm1524_vm2 = vcmask 490952   ;;  %vm1565_vm10 = vcmask 474552   ;;  %vm1586_vm11 = vcmask 466352  }
  0xfe   :  { %1401 = vst.msk [vmem:[#allocation0] sm:$0x3] %vm1400_vm5, %v1399_v5   ;;  %1403 = vst.msk [vmem:[#allocation0 + $0x16] sm:$0xc] %vm1400_vm5, %v1399_v5   ;;  %v1461_v16 = vpop.permute.xlu1 %1460   ;;  %vm1606_vm12 = vcmask 458152   ;;  %vm1627_vm13 = vcmask 449952  }
  0xff   :  { %2596 = vrot.lane.b32.xlu0 %v2595_v3, %s3498_s6  ;;  %1463 = vst.msk [vmem:[#allocation0] sm:$0x3] %vm1462_vm7, %v1461_v16   ;;  %1465 = vst.msk [vmem:[#allocation0 + $0x16] sm:$0xc] %vm1462_vm7, %v1461_v16   ;;  %vm1648_vm14 = vcmask 441752   ;;  %vm1668_vm15 = vcmask 433552  }
 0x100   :  { %2658 = vrot.lane.b32.xlu1 %v2657_v14, %s3501_s10  ;;  %vm1689_vm3 = vcmask 425352   ;;  %vm1710_vm4 = vcmask 417152   ;;  %vm1730_vm5 = vcmask 408952   ;;  %vm1751_vm6 = vcmask 400752  }
 0x101   :  { %v1440_v15 = vpop.permute.xlu0 %1439   ;;  %vm1792_vm7 = vcmask 384352  }
 0x102   :  { %1443 = vst.msk [vmem:[#allocation0 + $0x20] sm:$0x3] %vm1441_vm0, %v1440_v15   ;;  %1445 = vst.msk [vmem:[#allocation0 + $0x6] sm:$0xc] %vm1441_vm0, %v1440_v15   ;;  %v1502_v21 = vpop.permute.xlu1 %1501   ;;  %vm1772_vm0 = vcmask 392552  }
 0x103   :  { %2638 = vrot.lane.b32.xlu0 %v2637_v13, %s3500_s0  ;;  %1505 = vst.msk [vmem:[#allocation0 + $0x20] sm:$0x3] %vm1503_vm8, %v1502_v21   ;;  %1507 = vst.msk [vmem:[#allocation0 + $0x6] sm:$0xc] %vm1503_vm8, %v1502_v21   ;;  %vm1834_vm8 = vcmask 367952  }
 0x105   :  { %v1481_v20 = vpop.permute.xlu0 %1480  }
 0x106   :  { %1484 = vst.msk [vmem:[#allocation0 + $0x28] sm:$0x3] %vm1482_vm1, %v1481_v20   ;;  %1486 = vst.msk [vmem:[#allocation0 + $0xe] sm:$0xc] %vm1482_vm1, %v1481_v20   ;;  %v1543_v23 = vpop.permute.xlu1 %1542   ;;  %vm1813_vm1 = vcmask 376152  }
 0x107   :  { %2679 = vrot.lane.b32.xlu0 %v2678_v19, %s3502_s11  ;;  %1546 = vst.msk [vmem:[#allocation0 + $0x28] sm:$0x3] %vm1544_vm9, %v1543_v23   ;;  %1548 = vst.msk [vmem:[#allocation0 + $0xe] sm:$0xc] %vm1544_vm9, %v1543_v23   ;;  %vm1875_vm9 = vcmask 351552  }
 0x109   :  { %v1523_v22 = vpop.permute.xlu0 %1522  }
 0x10a   :  { %1525 = vst.msk [vmem:[#allocation0] sm:$0x3] %vm1524_vm2, %v1523_v22   ;;  %1527 = vst.msk [vmem:[#allocation0 + $0x16] sm:$0xc] %vm1524_vm2, %v1523_v22   ;;  %v1585_v25 = vpop.permute.xlu1 %1584   ;;  %vm1854_vm2 = vcmask 359752  }
 0x10b   :  { %1587 = vst.msk [vmem:[#allocation0] sm:$0x3] %vm1586_vm11, %v1585_v25   ;;  %1589 = vst.msk [vmem:[#allocation0 + $0x16] sm:$0xc] %vm1586_vm11, %v1585_v25   ;;  %vm1916_vm11 = vcmask 335152  }
 0x10d   :  { %v1564_v24 = vpop.permute.xlu0 %1563  }
 0x10e   :  { %1567 = vst.msk [vmem:[#allocation0 + $0x20] sm:$0x3] %vm1565_vm10, %v1564_v24   ;;  %1569 = vst.msk [vmem:[#allocation0 + $0x6] sm:$0xc] %vm1565_vm10, %v1564_v24   ;;  %v1626_v27 = vpop.permute.xlu1 %1625   ;;  %vm1896_vm10 = vcmask 343352  }
 0x10f   :  { %1629 = vst.msk [vmem:[#allocation0 + $0x20] sm:$0x3] %vm1627_vm13, %v1626_v27   ;;  %1631 = vst.msk [vmem:[#allocation0 + $0x6] sm:$0xc] %vm1627_vm13, %v1626_v27   ;;  %vm1958_vm13 = vcmask 318752  }
 0x111   :  { %v1605_v26 = vpop.permute.xlu0 %1604  }
 0x112   :  { %1608 = vst.msk [vmem:[#allocation0 + $0x28] sm:$0x3] %vm1606_vm12, %v1605_v26   ;;  %1610 = vst.msk [vmem:[#allocation0 + $0xe] sm:$0xc] %vm1606_vm12, %v1605_v26   ;;  %v1667_v29 = vpop.permute.xlu1 %1666   ;;  %vm1937_vm12 = vcmask 326952  }
 0x113   :  { %1670 = vst.msk [vmem:[#allocation0 + $0x28] sm:$0x3] %vm1668_vm15, %v1667_v29   ;;  %1672 = vst.msk [vmem:[#allocation0 + $0xe] sm:$0xc] %vm1668_vm15, %v1667_v29   ;;  %vm1999_vm15 = vcmask 302352  }
 0x115   :  { %v1647_v28 = vpop.permute.xlu0 %1646  }
 0x116   :  { %1649 = vst.msk [vmem:[#allocation0] sm:$0x3] %vm1648_vm14, %v1647_v28   ;;  %1651 = vst.msk [vmem:[#allocation0 + $0x16] sm:$0xc] %vm1648_vm14, %v1647_v28   ;;  %v1709_v31 = vpop.permute.xlu1 %1708   ;;  %vm1978_vm14 = vcmask 310552  }
 0x117   :  { %1711 = vst.msk [vmem:[#allocation0] sm:$0x3] %vm1710_vm4, %v1709_v31   ;;  %1713 = vst.msk [vmem:[#allocation0 + $0x16] sm:$0xc] %vm1710_vm4, %v1709_v31   ;;  %vm2040_vm4 = vcmask 285952  }
 0x119   :  { %v1688_v30 = vpop.permute.xlu0 %1687  }
 0x11a   :  { %1691 = vst.msk [vmem:[#allocation0 + $0x20] sm:$0x3] %vm1689_vm3, %v1688_v30   ;;  %1693 = vst.msk [vmem:[#allocation0 + $0x6] sm:$0xc] %vm1689_vm3, %v1688_v30   ;;  %v1750_v33 = vpop.permute.xlu1 %1749   ;;  %vm2020_vm3 = vcmask 294152  }
 0x11b   :  { %1753 = vst.msk [vmem:[#allocation0 + $0x20] sm:$0x3] %vm1751_vm6, %v1750_v33   ;;  %1755 = vst.msk [vmem:[#allocation0 + $0x6] sm:$0xc] %vm1751_vm6, %v1750_v33   ;;  %vm2082_vm6 = vcmask 269552  }
 0x11d   :  { %v1729_v32 = vpop.permute.xlu0 %1728  }
 0x11e   :  { %1732 = vst.msk [vmem:[#allocation0 + $0x28] sm:$0x3] %vm1730_vm5, %v1729_v32   ;;  %1734 = vst.msk [vmem:[#allocation0 + $0xe] sm:$0xc] %vm1730_vm5, %v1729_v32   ;;  %v1791_v35 = vpop.permute.xlu1 %1790   ;;  %vm2061_vm5 = vcmask 277752  }
 0x11f   :  { %1794 = vst.msk [vmem:[#allocation0 + $0x28] sm:$0x3] %vm1792_vm7, %v1791_v35   ;;  %1796 = vst.msk [vmem:[#allocation0 + $0xe] sm:$0xc] %vm1792_vm7, %v1791_v35   ;;  %vm2123_vm7 = vcmask 253152  }
 0x121   :  { %v1771_v34 = vpop.permute.xlu0 %1770  }
 0x122   :  { %1773 = vst.msk [vmem:[#allocation0] sm:$0x3] %vm1772_vm0, %v1771_v34   ;;  %1775 = vst.msk [vmem:[#allocation0 + $0x16] sm:$0xc] %vm1772_vm0, %v1771_v34   ;;  %v1833_v37 = vpop.permute.xlu1 %1832   ;;  %vm2102_vm0 = vcmask 261352  }
 0x123   :  { %1835 = vst.msk [vmem:[#allocation0] sm:$0x3] %vm1834_vm8, %v1833_v37   ;;  %1837 = vst.msk [vmem:[#allocation0 + $0x16] sm:$0xc] %vm1834_vm8, %v1833_v37   ;;  %vm2164_vm8 = vcmask 236752  }
 0x125   :  { %v1812_v36 = vpop.permute.xlu0 %1811  }
 0x126   :  { %1815 = vst.msk [vmem:[#allocation0 + $0x20] sm:$0x3] %vm1813_vm1, %v1812_v36   ;;  %1817 = vst.msk [vmem:[#allocation0 + $0x6] sm:$0xc] %vm1813_vm1, %v1812_v36   ;;  %v1874_v39 = vpop.permute.xlu1 %1873   ;;  %vm2144_vm1 = vcmask 244952  }
 0x127   :  { %1877 = vst.msk [vmem:[#allocation0 + $0x20] sm:$0x3] %vm1875_vm9, %v1874_v39   ;;  %1879 = vst.msk [vmem:[#allocation0 + $0x6] sm:$0xc] %vm1875_vm9, %v1874_v39   ;;  %vm2206_vm9 = vcmask 220352  }
 0x129   :  { %v1853_v38 = vpop.permute.xlu0 %1852  }
 0x12a   :  { %1856 = vst.msk [vmem:[#allocation0 + $0x28] sm:$0x3] %vm1854_vm2, %v1853_v38   ;;  %1858 = vst.msk [vmem:[#allocation0 + $0xe] sm:$0xc] %vm1854_vm2, %v1853_v38   ;;  %v1915_v41 = vpop.permute.xlu1 %1914   ;;  %vm2185_vm2 = vcmask 228552  }
 0x12b   :  { %1918 = vst.msk [vmem:[#allocation0 + $0x28] sm:$0x3] %vm1916_vm11, %v1915_v41   ;;  %1920 = vst.msk [vmem:[#allocation0 + $0xe] sm:$0xc] %vm1916_vm11, %v1915_v41   ;;  %vm2247_vm11 = vcmask 203952  }
 0x12d   :  { %v1895_v40 = vpop.permute.xlu0 %1894  }
 0x12e   :  { %1897 = vst.msk [vmem:[#allocation0] sm:$0x3] %vm1896_vm10, %v1895_v40   ;;  %1899 = vst.msk [vmem:[#allocation0 + $0x16] sm:$0xc] %vm1896_vm10, %v1895_v40   ;;  %v1957_v43 = vpop.permute.xlu1 %1956   ;;  %vm2226_vm10 = vcmask 212152  }
 0x12f   :  { %1959 = vst.msk [vmem:[#allocation0] sm:$0x3] %vm1958_vm13, %v1957_v43   ;;  %1961 = vst.msk [vmem:[#allocation0 + $0x16] sm:$0xc] %vm1958_vm13, %v1957_v43   ;;  %vm2288_vm13 = vcmask 187552  }
 0x131   :  { %v1936_v42 = vpop.permute.xlu0 %1935  }
 0x132   :  { %1939 = vst.msk [vmem:[#allocation0 + $0x20] sm:$0x3] %vm1937_vm12, %v1936_v42   ;;  %1941 = vst.msk [vmem:[#allocation0 + $0x6] sm:$0xc] %vm1937_vm12, %v1936_v42   ;;  %v1998_v45 = vpop.permute.xlu1 %1997   ;;  %vm2268_vm12 = vcmask 195752  }
 0x133   :  { %2001 = vst.msk [vmem:[#allocation0 + $0x20] sm:$0x3] %vm1999_vm15, %v1998_v45   ;;  %2003 = vst.msk [vmem:[#allocation0 + $0x6] sm:$0xc] %vm1999_vm15, %v1998_v45   ;;  %vm2330_vm15 = vcmask 171152  }
 0x135   :  { %v1977_v44 = vpop.permute.xlu0 %1976  }
 0x136   :  { %1980 = vst.msk [vmem:[#allocation0 + $0x28] sm:$0x3] %vm1978_vm14, %v1977_v44   ;;  %1982 = vst.msk [vmem:[#allocation0 + $0xe] sm:$0xc] %vm1978_vm14, %v1977_v44   ;;  %v2039_v47 = vpop.permute.xlu1 %2038   ;;  %vm2309_vm14 = vcmask 179352  }
 0x137   :  { %2042 = vst.msk [vmem:[#allocation0 + $0x28] sm:$0x3] %vm2040_vm4, %v2039_v47   ;;  %2044 = vst.msk [vmem:[#allocation0 + $0xe] sm:$0xc] %vm2040_vm4, %v2039_v47   ;;  %vm2371_vm4 = vcmask 154752  }
 0x139   :  { %v2019_v46 = vpop.permute.xlu0 %2018  }
 0x13a   :  { %2021 = vst.msk [vmem:[#allocation0] sm:$0x3] %vm2020_vm3, %v2019_v46   ;;  %2023 = vst.msk [vmem:[#allocation0 + $0x16] sm:$0xc] %vm2020_vm3, %v2019_v46   ;;  %v2081_v49 = vpop.permute.xlu1 %2080   ;;  %vm2350_vm3 = vcmask 162952  }
 0x13b   :  { %2083 = vst.msk [vmem:[#allocation0] sm:$0x3] %vm2082_vm6, %v2081_v49   ;;  %2085 = vst.msk [vmem:[#allocation0 + $0x16] sm:$0xc] %vm2082_vm6, %v2081_v49   ;;  %vm2412_vm6 = vcmask 138352  }
 0x13d   :  { %v2060_v48 = vpop.permute.xlu0 %2059  }
 0x13e   :  { %2063 = vst.msk [vmem:[#allocation0 + $0x20] sm:$0x3] %vm2061_vm5, %v2060_v48   ;;  %2065 = vst.msk [vmem:[#allocation0 + $0x6] sm:$0xc] %vm2061_vm5, %v2060_v48   ;;  %v2122_v51 = vpop.permute.xlu1 %2121   ;;  %vm2392_vm5 = vcmask 146552  }
 0x13f   :  { %2125 = vst.msk [vmem:[#allocation0 + $0x20] sm:$0x3] %vm2123_vm7, %v2122_v51   ;;  %2127 = vst.msk [vmem:[#allocation0 + $0x6] sm:$0xc] %vm2123_vm7, %v2122_v51   ;;  %vm2454_vm7 = vcmask 121952  }
 0x141   :  { %v2101_v50 = vpop.permute.xlu0 %2100  }
 0x142   :  { %2104 = vst.msk [vmem:[#allocation0 + $0x28] sm:$0x3] %vm2102_vm0, %v2101_v50   ;;  %2106 = vst.msk [vmem:[#allocation0 + $0xe] sm:$0xc] %vm2102_vm0, %v2101_v50   ;;  %v2163_v53 = vpop.permute.xlu1 %2162   ;;  %vm2433_vm0 = vcmask 130152  }
 0x143   :  { %2166 = vst.msk [vmem:[#allocation0 + $0x28] sm:$0x3] %vm2164_vm8, %v2163_v53   ;;  %2168 = vst.msk [vmem:[#allocation0 + $0xe] sm:$0xc] %vm2164_vm8, %v2163_v53   ;;  %vm2495_vm8 = vcmask 105552  }
 0x145   :  { %v2143_v52 = vpop.permute.xlu0 %2142  }
 0x146   :  { %2145 = vst.msk [vmem:[#allocation0] sm:$0x3] %vm2144_vm1, %v2143_v52   ;;  %2147 = vst.msk [vmem:[#allocation0 + $0x16] sm:$0xc] %vm2144_vm1, %v2143_v52   ;;  %v2205_v55 = vpop.permute.xlu1 %2204   ;;  %vm2474_vm1 = vcmask 113752  }
 0x147   :  { %2207 = vst.msk [vmem:[#allocation0] sm:$0x3] %vm2206_vm9, %v2205_v55   ;;  %2209 = vst.msk [vmem:[#allocation0 + $0x16] sm:$0xc] %vm2206_vm9, %v2205_v55   ;;  %vm2536_vm9 = vcmask 89152  }
 0x149   :  { %v2184_v54 = vpop.permute.xlu0 %2183  }
 0x14a   :  { %2187 = vst.msk [vmem:[#allocation0 + $0x20] sm:$0x3] %vm2185_vm2, %v2184_v54   ;;  %2189 = vst.msk [vmem:[#allocation0 + $0x6] sm:$0xc] %vm2185_vm2, %v2184_v54   ;;  %v2246_v57 = vpop.permute.xlu1 %2245   ;;  %vm2516_vm2 = vcmask 97352  }
 0x14b   :  { %2249 = vst.msk [vmem:[#allocation0 + $0x20] sm:$0x3] %vm2247_vm11, %v2246_v57   ;;  %2251 = vst.msk [vmem:[#allocation0 + $0x6] sm:$0xc] %vm2247_vm11, %v2246_v57   ;;  %vm2578_vm11 = vcmask 72752  }
 0x14d   :  { %v2225_v56 = vpop.permute.xlu0 %2224  }
 0x14e   :  { %2228 = vst.msk [vmem:[#allocation0 + $0x28] sm:$0x3] %vm2226_vm10, %v2225_v56   ;;  %2230 = vst.msk [vmem:[#allocation0 + $0xe] sm:$0xc] %vm2226_vm10, %v2225_v56   ;;  %v2287_v59 = vpop.permute.xlu1 %2286   ;;  %vm2557_vm10 = vcmask 80952  }
 0x14f   :  { %2290 = vst.msk [vmem:[#allocation0 + $0x28] sm:$0x3] %vm2288_vm13, %v2287_v59   ;;  %2292 = vst.msk [vmem:[#allocation0 + $0xe] sm:$0xc] %vm2288_vm13, %v2287_v59   ;;  %vm2619_vm13 = vcmask 56352  }
 0x151   :  { %v2267_v58 = vpop.permute.xlu0 %2266  }
 0x152   :  { %2269 = vst.msk [vmem:[#allocation0] sm:$0x3] %vm2268_vm12, %v2267_v58   ;;  %2271 = vst.msk [vmem:[#allocation0 + $0x16] sm:$0xc] %vm2268_vm12, %v2267_v58   ;;  %v2329_v61 = vpop.permute.xlu1 %2328   ;;  %vm2598_vm12 = vcmask 64552  }
 0x153   :  { %2331 = vst.msk [vmem:[#allocation0] sm:$0x3] %vm2330_vm15, %v2329_v61   ;;  %2333 = vst.msk [vmem:[#allocation0 + $0x16] sm:$0xc] %vm2330_vm15, %v2329_v61   ;;  %vm2660_vm15 = vcmask 39952  }
 0x155   :  { %v2308_v60 = vpop.permute.xlu0 %2307  }
 0x156   :  { %2311 = vst.msk [vmem:[#allocation0 + $0x20] sm:$0x3] %vm2309_vm14, %v2308_v60   ;;  %2313 = vst.msk [vmem:[#allocation0 + $0x6] sm:$0xc] %vm2309_vm14, %v2308_v60   ;;  %v2370_v63 = vpop.permute.xlu1 %2369   ;;  %vm2640_vm14 = vcmask 48152  }
 0x157   :  { %2373 = vst.msk [vmem:[#allocation0 + $0x20] sm:$0x3] %vm2371_vm4, %v2370_v63   ;;  %2375 = vst.msk [vmem:[#allocation0 + $0x6] sm:$0xc] %vm2371_vm4, %v2370_v63  }
 0x159   :  { %v2349_v62 = vpop.permute.xlu0 %2348  }
 0x15a   :  { %2352 = vst.msk [vmem:[#allocation0 + $0x28] sm:$0x3] %vm2350_vm3, %v2349_v62   ;;  %2354 = vst.msk [vmem:[#allocation0 + $0xe] sm:$0xc] %vm2350_vm3, %v2349_v62   ;;  %v2411_v1 = vpop.permute.xlu1 %2410   ;;  %vm2681_vm3 = vcmask 31752  }
 0x15b   :  { %2414 = vst.msk [vmem:[#allocation0 + $0x28] sm:$0x3] %vm2412_vm6, %v2411_v1   ;;  %2416 = vst.msk [vmem:[#allocation0 + $0xe] sm:$0xc] %vm2412_vm6, %v2411_v1  }
 0x15d   :  { %v2391_v0 = vpop.permute.xlu0 %2390  }
 0x15e   :  { %2393 = vst.msk [vmem:[#allocation0] sm:$0x3] %vm2392_vm5, %v2391_v0   ;;  %2395 = vst.msk [vmem:[#allocation0 + $0x16] sm:$0xc] %vm2392_vm5, %v2391_v0   ;;  %v2453_v3 = vpop.permute.xlu1 %2452  }
 0x15f   :  { %2455 = vst.msk [vmem:[#allocation0] sm:$0x3] %vm2454_vm7, %v2453_v3   ;;  %2457 = vst.msk [vmem:[#allocation0 + $0x16] sm:$0xc] %vm2454_vm7, %v2453_v3  }
 0x161   :  { %v2432_v2 = vpop.permute.xlu0 %2431  }
 0x162   :  { %2435 = vst.msk [vmem:[#allocation0 + $0x20] sm:$0x3] %vm2433_vm0, %v2432_v2   ;;  %2437 = vst.msk [vmem:[#allocation0 + $0x6] sm:$0xc] %vm2433_vm0, %v2432_v2   ;;  %v2494_v5 = vpop.permute.xlu1 %2493  }
 0x163   :  { %2497 = vst.msk [vmem:[#allocation0 + $0x20] sm:$0x3] %vm2495_vm8, %v2494_v5   ;;  %2499 = vst.msk [vmem:[#allocation0 + $0x6] sm:$0xc] %vm2495_vm8, %v2494_v5  }
 0x165   :  { %v2473_v4 = vpop.permute.xlu0 %2472  }
 0x166   :  { %2476 = vst.msk [vmem:[#allocation0 + $0x28] sm:$0x3] %vm2474_vm1, %v2473_v4   ;;  %2478 = vst.msk [vmem:[#allocation0 + $0xe] sm:$0xc] %vm2474_vm1, %v2473_v4   ;;  %v2535_v7 = vpop.permute.xlu1 %2534  }
 0x167   :  { %2538 = vst.msk [vmem:[#allocation0 + $0x28] sm:$0x3] %vm2536_vm9, %v2535_v7   ;;  %2540 = vst.msk [vmem:[#allocation0 + $0xe] sm:$0xc] %vm2536_vm9, %v2535_v7  }
 0x169   :  { %v2515_v6 = vpop.permute.xlu0 %2514  }
 0x16a   :  { %2517 = vst.msk [vmem:[#allocation0] sm:$0x3] %vm2516_vm2, %v2515_v6   ;;  %2519 = vst.msk [vmem:[#allocation0 + $0x16] sm:$0xc] %vm2516_vm2, %v2515_v6   ;;  %v2577_v9 = vpop.permute.xlu1 %2576  }
 0x16b   :  { %2579 = vst.msk [vmem:[#allocation0] sm:$0x3] %vm2578_vm11, %v2577_v9   ;;  %2581 = vst.msk [vmem:[#allocation0 + $0x16] sm:$0xc] %vm2578_vm11, %v2577_v9  }
 0x16d   :  { %v2556_v8 = vpop.permute.xlu0 %2555  }
 0x16e   :  { %2559 = vst.msk [vmem:[#allocation0 + $0x20] sm:$0x3] %vm2557_vm10, %v2556_v8   ;;  %2561 = vst.msk [vmem:[#allocation0 + $0x6] sm:$0xc] %vm2557_vm10, %v2556_v8   ;;  %v2618_v11 = vpop.permute.xlu1 %2617  }
 0x16f   :  { %2621 = vst.msk [vmem:[#allocation0 + $0x20] sm:$0x3] %vm2619_vm13, %v2618_v11   ;;  %2623 = vst.msk [vmem:[#allocation0 + $0x6] sm:$0xc] %vm2619_vm13, %v2618_v11  }
 0x171   :  { %v2597_v10 = vpop.permute.xlu0 %2596  }
 0x172   :  { %2600 = vst.msk [vmem:[#allocation0 + $0x28] sm:$0x3] %vm2598_vm12, %v2597_v10   ;;  %2602 = vst.msk [vmem:[#allocation0 + $0xe] sm:$0xc] %vm2598_vm12, %v2597_v10   ;;  %v2659_v13 = vpop.permute.xlu1 %2658  }
 0x173   :  { %2662 = vst.msk [vmem:[#allocation0 + $0x28] sm:$0x3] %vm2660_vm15, %v2659_v13   ;;  %2664 = vst.msk [vmem:[#allocation0 + $0xe] sm:$0xc] %vm2660_vm15, %v2659_v13  }
 0x175   :  { %v2639_v12 = vpop.permute.xlu0 %2638  }
 0x176   :  { %2641 = vst.msk [vmem:[#allocation0] sm:$0x3] %vm2640_vm14, %v2639_v12   ;;  %2643 = vst.msk [vmem:[#allocation0 + $0x16] sm:$0xc] %vm2640_vm14, %v2639_v12  }
 0x179   :  { %v2680_v14 = vpop.permute.xlu0 %2679  }
 0x17a   :  { %2683 = vst.msk [vmem:[#allocation0 + $0x20] sm:$0x3] %vm2681_vm3, %v2680_v14   ;;  %2685 = vst.msk [vmem:[#allocation0 + $0x6] sm:$0xc] %vm2681_vm3, %v2680_v14   ;;  %v2698_v17 = vld [vmem:[#allocation0 + $0x10] sm:$0x3] }
 0x17b   :  { %3245 = vst [vmem:[%s5556_s1 + $0x4] sm:$0x3] %v2698_v17  ;;  %v2716_v18 = vld [vmem:[#allocation0 + $0x28] sm:$0x3] }
 0x17c   :  { %3248 = vst [vmem:[%s5556_s1 + $0xa] sm:$0x3] %v2716_v18 }
 0x17d   :  { %v2689_v15 = vld [vmem:[#allocation0] sm:$0x3]  ;;  %v2704_v16 = vld [vmem:[#allocation0 + $0x18] sm:$0x3] }
 0x17e   :  { %2691 = vst [vmem:[%s5556_s1] sm:$0x3] %v2689_v15  ;;  %3246 = vst [vmem:[%s5556_s1 + $0x6] sm:$0x3] %v2704_v16 }
 0x181   :  { %v2693_v19 = vld [vmem:[#allocation0 + $0x8] sm:$0x3]  ;;  %v2710_v20 = vld [vmem:[#allocation0 + $0x20] sm:$0x3] }
 0x182   :  { %3244 = vst [vmem:[%s5556_s1 + $0x2] sm:$0x3] %v2693_v19  ;;  %3247 = vst [vmem:[%s5556_s1 + $0x8] sm:$0x3] %v2710_v20 }

// kernel: faster_rcnn_forward.2
= control target key start
LH: loop header
LB: loop body
LE: loop exit
PB: predicated region body
PF: predicated region fallthrough
CT: control target
= control target key end

     0   :  { %14 = vsyncpa [#allocation3], 0  ;;  %s6163_s0 = inlined_call_operand.vmem [shape: f32[2,18,72], index: 0, kind: input, shape index: {}]   ;;  %s6164_s1 = inlined_call_operand.hbm [shape: bf16[576,256], index: 1, kind: input, shape index: {}]   ;;  %s6165_s2 = inlined_call_operand.hbm [shape: f32[1,256], index: 2, kind: input, shape index: {}]   ;;  %s6166_s3 = inlined_call_operand.hbm [shape: bf16[2304,256], index: 3, kind: input, shape index: {}]   ;;  %s6167_s4 = inlined_call_operand.hbm [shape: f32[1,256], index: 4, kind: input, shape index: {}]   ;;  %s6168_s5 = inlined_call_operand.vmem [shape: bf16[256,288], index: 5, kind: input, shape index: {}]   ;;  %s6169_s6 = inlined_call_operand.hbm [shape: f32[1,288], index: 6, kind: input, shape index: {}]   ;;  %s6170_s7 = inlined_call_operand.vmem [shape: f32[2,16,256], index: 7, kind: output, shape index: {0}]   ;;  %s6171_s8 = inlined_call_operand.vmem [shape: f32[2,16,288], index: 8, kind: output, shape index: {1}]  }
   0x1   :  { %15 = vsyncpa [#allocation5], 0 }
   0x2   :  { %16 = vsyncpa [#allocation8], 0  ;;  %s5663_s27 = smov 0  }
   0x3 LB: > { %s5604_s28 = smov [#allocation4]   ;;  %s5669_s30 = sadd.s32 4294967295, %s5602_s27   ;;  %s5602_s27 = sphi %s5663_s27, %s22_s27  }
   0x4   : > { %s257_s29 = sshll.u32 %s5604_s28, 4  ;;  %p4229_p0 = scmp.ge.s32.totalorder %s5602_s27, 1  ;;  %s5674_s29 = int_to_ptr.vmem [resolvable:$true] %s257_s29 }
   0x5   : > { %p231_p1 = scmp.lt.s32.totalorder %s5602_s27, 3  ;;  %p6172_p2 = scmp.eq.s32.totalorder %s5669_s30, 0 }
   0x6   : > { %s5605_s10 = smov [#allocation7]   ;;  %s5606_s12 = smov [#allocation2]  }
   0x7   : > { %p5676_p3 = pnand %p4229_p0, %p231_p1  ;;  %s281_s11 = sshll.u32 %s5605_s10, 4  ;;  %s5682_s11 = int_to_ptr.vmem [resolvable:$true] %s281_s11 }
   0x8   : > { %s243_s13 = sshll.u32 %s5606_s12, 4  ;;  %s5607_s15 = smov [#allocation6]   ;;  %s5690_s13 = int_to_ptr.vmem [resolvable:$true] %s243_s13 }
   0x9   : > { %s6174_s9 = scalar_select %p5676_p3, 1, 0 }
   0xa   : > { %p4782_p4 = pneg %p5676_p3  ;;  %s5692_s16 = sshll.u32 %s5607_s15, 4  ;;  %s268_s16 = int_to_ptr.vmem [resolvable:$true] %s5692_s16 }
   0xb   : > { %s5444_s19 = scalar_lea.hbm %s6165_s2, 32 }
   0xc   : > { %p5686_p5 = pnand %p6172_p2, %p4782_p4  ;;  %p5445_p6 = scmp.ne.s32.totalorder %s6165_s2, %s5444_s19 }
   0xd   : > { %p5451_p10 = scmp.lt.u32.totalorder %s5444_s19, %s6165_s2 }
   0xe   : > { %p5702_p7 = pneg %p5686_p5 }
  0x10   : > { %p5447_p8 = pnand %p5702_p7, %p5445_p6 }
  0x12   : > { %p5448_p9 = pneg %p5447_p8 }
  0x14   : > { %p5453_p11 = pnand %p5451_p10, %p5448_p9 }
  0x16   : > { %5456 = shalt.err (!%p5453_p11)
}
  0x17   : > { %s5457_s25 = scalar_lea.vmem %s5674_s29, 32  ;;  %p5465_p1 = scmp.lt.s32.totalorder %s5674_s29, %s5674_s29 }
  0x18   : > { %p5458_p12 = scmp.ne.s32.totalorder %s5674_s29, %s5457_s25  ;;  %p5466_p4 = scmp.lt.s32.totalorder %s5457_s25, %s5457_s25 }
  0x1a   : > { %p5460_p13 = pnand %p5458_p12, %p5702_p7  ;;  %p5467_p6 = por %p5466_p4, %p5465_p1 }
  0x1c   : > { %p5461_p0 = pneg %p5460_p13 }
  0x1e   : > { %p5468_p8 = pnand %p5467_p6, %p5461_p0 }
  0x20   : > { %5471 = shalt.err (!%p5468_p8)
}
  0x21   : > { %4788 = dma.hbm_to_vmem [thread:$0]  (!%p5686_p5), %s6165_s2, 32, %s5674_s29, [#allocation5]  }
  0x22   : > { %s5472_s15 = scalar_lea.hbm %s6167_s4, 32 }
  0x23   : > { %p5473_p9 = scmp.ne.s32.totalorder %s6167_s4, %s5472_s15  ;;  %p5479_p12 = scmp.lt.u32.totalorder %s5472_s15, %s6167_s4 }
  0x25   : > { %p5475_p10 = pnand %p5473_p9, %p5702_p7 }
  0x27   : > { %p5476_p11 = pneg %p5475_p10 }
  0x29   : > { %p5481_p13 = pnand %p5479_p12, %p5476_p11 }
  0x2b   : > { %5484 = shalt.err (!%p5481_p13)
}
  0x2c   : > { %s5485_s29 = scalar_lea.vmem %s5682_s11, 32  ;;  %p5493_p6 = scmp.lt.s32.totalorder %s5682_s11, %s5682_s11 }
  0x2d   : > { %p5486_p0 = scmp.ne.s32.totalorder %s5682_s11, %s5485_s29  ;;  %p5494_p8 = scmp.lt.s32.totalorder %s5485_s29, %s5485_s29 }
  0x2f   : > { %p5488_p1 = pnand %p5486_p0, %p5702_p7  ;;  %p5495_p9 = por %p5494_p8, %p5493_p6 }
  0x31   : > { %p5489_p4 = pneg %p5488_p1 }
  0x33   : > { %p5496_p10 = pnand %p5495_p9, %p5489_p4 }
  0x35   : > { %5499 = shalt.err (!%p5496_p10)
}
  0x36   : > { %4794 = dma.hbm_to_vmem [thread:$0]  (!%p5686_p5), %s6167_s4, 32, %s5682_s11, [#allocation8]  }
  0x37   : > { %s5500_s26 = scalar_lea.hbm %s6164_s1, 9216 }
  0x38   : > { %p5501_p11 = scmp.ne.s32.totalorder %s6164_s1, %s5500_s26  ;;  %p5507_p0 = scmp.lt.u32.totalorder %s5500_s26, %s6164_s1 }
  0x3a   : > { %p5503_p12 = pnand %p5501_p11, %p5702_p7 }
  0x3c   : > { %p5504_p13 = pneg %p5503_p12 }
  0x3e   : > { %p5509_p1 = pnand %p5507_p0, %p5504_p13 }
  0x40   : > { %5512 = shalt.err (!%p5509_p1)
}
  0x41   : > { %s5513_s11 = scalar_lea.vmem %s5690_s13, 9216  ;;  %p5521_p9 = scmp.lt.s32.totalorder %s5690_s13, %s5690_s13 }
  0x42   : > { %p5514_p4 = scmp.ne.s32.totalorder %s5690_s13, %s5513_s11  ;;  %p5522_p10 = scmp.lt.s32.totalorder %s5513_s11, %s5513_s11 }
  0x44   : > { %p5516_p6 = pnand %p5514_p4, %p5702_p7  ;;  %p5523_p11 = por %p5522_p10, %p5521_p9 }
  0x46   : > { %p5517_p8 = pneg %p5516_p6 }
  0x48   : > { %p5524_p12 = pnand %p5523_p11, %p5517_p8 }
  0x4a   : > { %5527 = shalt.err (!%p5524_p12)
}
  0x4b   : > { %s5608_s17 = smov 128   ;;  %s5609_s18 = smov 8  }
  0x4c   : > { %4785 = dma.hbm_to_vmem [thread:$0]  (!%p5686_p5), %s6164_s1, 9216, %s5690_s13, [#allocation3], %s5608_s17, %s5608_s17, %s5609_s18  }
  0x4d   : > { %s5528_s23 = scalar_lea.hbm %s6166_s3, 36864 }
  0x4e   : > { %p5529_p13 = scmp.ne.s32.totalorder %s6166_s3, %s5528_s23  ;;  %p5535_p4 = scmp.lt.u32.totalorder %s5528_s23, %s6166_s3 }
  0x50   : > { %p5531_p0 = pnand %p5529_p13, %p5702_p7 }
  0x52   : > { %p5532_p1 = pneg %p5531_p0 }
  0x54   : > { %p5537_p6 = pnand %p5535_p4, %p5532_p1 }
  0x56   : > { %5540 = shalt.err (!%p5537_p6)
}
  0x57   : > { %s5541_s10 = scalar_lea.vmem %s268_s16, 36864  ;;  %p5549_p11 = scmp.lt.s32.totalorder %s268_s16, %s268_s16 }
  0x58   : > { %p5542_p8 = scmp.ne.s32.totalorder %s268_s16, %s5541_s10  ;;  %p5550_p12 = scmp.lt.s32.totalorder %s5541_s10, %s5541_s10 }
  0x5a   : > { %p5544_p9 = pnand %p5542_p8, %p5702_p7  ;;  %p5551_p2 = por %p5550_p12, %p5549_p11 }
  0x5c   : > { %p5545_p10 = pneg %p5544_p9 }
  0x5e   : > { %p5552_p3 = pnand %p5551_p2, %p5545_p10 }
  0x60   : > { %5555 = shalt.err (!%p5552_p3)
}
  0x61   : > { %4791 = dma.hbm_to_vmem [thread:$0]  (!%p5686_p5), %s6166_s3, 36864, %s268_s16, [#allocation5], %s5608_s17, %s5608_s17, %s5609_s18  }
  0x62   : > { %s5610_s15 = smov [#allocation9]   ;;  %s5556_s29 = scalar_lea.hbm %s6169_s6, 48 }
  0x63   : > { %s295_s11 = sshll.u32 %s5610_s15, 4  ;;  %p5557_p13 = scmp.ne.s32.totalorder %s6169_s6, %s5556_s29  ;;  %s296_s11 = int_to_ptr.vmem [resolvable:$true] %s295_s11 }
  0x64   : > { %p5563_p0 = scmp.lt.u32.totalorder %s5556_s29, %s6169_s6 }
  0x65   : > { %p5559_p2 = pnand %p5557_p13, %p5702_p7 }
  0x67   : > { %p5560_p3 = pneg %p5559_p2 }
  0x69   : > { %p5565_p1 = pnand %p5563_p0, %p5560_p3 }
  0x6b   : > { %5568 = shalt.err (!%p5565_p1)
}
  0x6c   : > { %s5569_s16 = scalar_lea.vmem %s296_s11, 48  ;;  %s5576_s17 = scalar_lea.vmem %s296_s11, 64 }
  0x6d   : > { %p5570_p4 = scmp.ne.s32.totalorder %s296_s11, %s5569_s16  ;;  %p5577_p9 = scmp.lt.s32.totalorder %s296_s11, %s296_s11 }
  0x6e   : > { %p5578_p10 = scmp.lt.s32.totalorder %s5576_s17, %s5569_s16 }
  0x6f   : > { %p5572_p6 = pnand %p5570_p4, %p5702_p7 }
  0x70   : > { %p5579_p11 = por %p5578_p10, %p5577_p9 }
  0x71   : > { %p5573_p8 = pneg %p5572_p6 }
  0x73   : > { %p5580_p12 = pnand %p5579_p11, %p5573_p8 }
  0x75   : > { %5583 = shalt.err (!%p5580_p12)
}
  0x76   : > { %4797 = dma.hbm_to_vmem [thread:$0]  (!%p5686_p5), %s6169_s6, 48, %s296_s11, [#allocation8]  }
  0x77   : > { %p6177_p13 = scmp.ne.s32.totalorder %s6174_s9, 0 }
  0x78   : > { %p6178_p2 = scmp.eq.s32.totalorder (!%p6177_p13), %s5669_s30, 0 }
  0x79   : > { %316 = sbr.rel (%p6177_p13) target bundleno = 1604 (0x644), region = 48 }
  0x80   : > { %5589 = dma.done.wait (%p6178_p2), [#allocation3], 9216   ;;  %p6179_p7 = pmov %p6178_p2 }
  0x81   : > { %p6180_p3 = pmov %p6178_p2 }
  0x82   : > { %5591 = vsyncadd (%p6179_p7), [#allocation3], 4294958080 }
  0x83   : > { %5593 = dma.done.wait (%p6180_p3), [#allocation5], 36896   ;;  %p6181_p0 = pmov %p6178_p2 }
  0x85   : > { %5595 = vsyncadd (%p6181_p0), [#allocation5], 4294930400  ;;  %p6182_p1 = pmov %p6181_p0 }
  0x86   : > { %p6183_p5 = pmov %p6181_p0 }
  0x87   : > { %5597 = dma.done.wait (%p6182_p1), [#allocation8], 80  }
  0x88   : > { %5599 = vsyncadd (%p6183_p5), [#allocation8], 4294967216  ;;  %p371_p4 = scmp.lt.s32.totalorder %s5669_s30, 1  ;;  %v5611_v0 = vmov 0   ;;  %v4840_v6 = vld [vmem:[#allocation2 + $0x4] ss:$8 sps:$4 sm:$0xff]  }
  0x89   : > { %582 = vmatprep.mubr.bf16.mxu0 %v5611_v0  ;;  %497 = vmatprep.mubr.bf16.mxu1 %v5611_v0  ;;  %vm603_vm0 = vcmask 1046528   ;;  %v4842_v7 = vld [vmem:[#allocation2] ss:$8 sps:$4 sm:$0xff]   ;;  %s5612_s10 = smov 124   ;;  %v4843_v12 = vld [vmem:[#allocation2 + $0x14] ss:$8 sps:$4 sm:$0xff]  }
  0x8a   : > { %s6187_s30 = smov (!%p371_p4, %s5669_s30), 1  ;;  %550 = vmatprep.subr.bf16.mxu0 %v4840_v6  ;;  %v4845_v14 = vld [vmem:[#allocation2 + $0x10] ss:$8 sps:$4 sm:$0xff]   ;;  %v4846_v17 = vld [vmem:[#allocation2 + $0x24] ss:$8 sps:$4 sm:$0xff]   ;;  %s5613_s13 = smov 120  }
  0x8b   : > { %s4760_s9 = smul.u32 24, %s6187_s30  ;;  %551 = vmatpush1.bf16.msra.mxu0 %v4842_v7  ;;  %vm408_vm1 = vsmask.f32 7424  ;;  %v4848_v20 = vld [vmem:[#allocation2 + $0x20] ss:$8 sps:$4 sm:$0xff]   ;;  %vm461_vm2 = vcmask 523264  }
  0x8c   : > { %552 = vmatprep.subr.bf16.mxu0 %v4843_v12  ;;  %v4849_v22 = vld [vmem:[#allocation2 + $0x34] ss:$8 sps:$4 sm:$0xff]   ;;  %v4851_v23 = vld [vmem:[#allocation2 + $0x30] ss:$8 sps:$4 sm:$0xff]   ;;  %v4854_v24 = vld [vmem:[#allocation2 + $0x184] ss:$8 sps:$4 sm:$0xff]  }
  0x8d   : > { %s375_s28 = scalar_lea.vmem %s6163_s0, %s4760_s9  ;;  %v4852_v25 = vld [vmem:[#allocation2 + $0x180] ss:$8 sps:$4 sm:$0xff]   ;;  %v4857_v26 = vld [vmem:[#allocation2 + $0x194] ss:$8 sps:$4 sm:$0xff]   ;;  %v4855_v27 = vld [vmem:[#allocation2 + $0x190] ss:$8 sps:$4 sm:$0xff]  }
  0x8e   : > { %v387_v1 = vld [vmem:[%s375_s28] sm:$0xff]  ;;  %v388_v2 = vld [vmem:[%s375_s28 + $0x8] sm:$0xff]  ;;  %v389_v3 = vld [vmem:[%s375_s28 + $0x10] sm:$0x3]  ;;  %s4673_s12 = sshll.u32 %s6187_s30, 5  ;;  %s5614_s20 = smov 16  }
  0x8f   : > { %v390_v4 = vpack.c.bf16 %v388_v2, %v387_v1  ;;  %v391_v5 = vpack.c.bf16 %v389_v3, %v389_v3  ;;  %553 = vmatpush1.bf16.msra.mxu0 %v4845_v14  ;;  %v4860_v28 = vld [vmem:[#allocation2 + $0x1a4] ss:$8 sps:$4 sm:$0xff]   ;;  %v4858_v29 = vld [vmem:[#allocation2 + $0x1a0] ss:$8 sps:$4 sm:$0xff]   ;;  %v4863_v30 = vld [vmem:[#allocation2 + $0x1b4] ss:$8 sps:$4 sm:$0xff]   ;;  %s380_s19 = scalar_lea.vmem %s6170_s7, %s4673_s12 }
  0x90   : > { %554 = vmatprep.subr.bf16.mxu0 %v4846_v17  ;;  %v4861_v31 = vld [vmem:[#allocation2 + $0x1b0] ss:$8 sps:$4 sm:$0xff]   ;;  %v4866_v32 = vld [vmem:[#allocation2 + $0x44] ss:$8 sps:$4 sm:$0xff]   ;;  %v4864_v33 = vld [vmem:[#allocation2 + $0x40] ss:$8 sps:$4 sm:$0xff]  }
  0x91   : > { %705 = vrot.lane.b32.xlu0 %v390_v4, %s5612_s10  ;;  %v410_v8 = vshrl.u32 %v390_v4, 16  ;;  %v412_v9 = vshll.u32 %v390_v4, 16  ;;  %v417_v10 = vshll.u32 %v391_v5, 16  ;;  %v604_v11 = vrot.slane %v390_v4, 1  ;;  %v4869_v34 = vld [vmem:[#allocation2 + $0x54] ss:$8 sps:$4 sm:$0xff]  }
  0x92   : > { %v605_v13 = vrot.slane %v391_v5, 1  ;;  %v4867_v35 = vld [vmem:[#allocation2 + $0x50] ss:$8 sps:$4 sm:$0xff]   ;;  %v4872_v36 = vld [vmem:[#allocation2 + $0x64] ss:$8 sps:$4 sm:$0xff]   ;;  %vm1333_vm3 = vcmask 130048  }
  0x93   : > { %v414_v15 = vrot.slane %v412_v9, 1  ;;  %v419_v16 = vrot.slane %v417_v10, 1  ;;  %555 = vmatpush1.bf16.msra.mxu0 %v4848_v20  ;;  %v4870_v37 = vld [vmem:[#allocation2 + $0x60] ss:$8 sps:$4 sm:$0xff]   ;;  %v4875_v38 = vld [vmem:[#allocation2 + $0x74] ss:$8 sps:$4 sm:$0xff]  }
  0x94   : > { %v606_v18 = vsel %vm603_vm0, %v604_v11, %v605_v13  ;;  %556 = vmatprep.subr.bf16.mxu0 %v4849_v22  ;;  %v4873_v39 = vld [vmem:[#allocation2 + $0x70] ss:$8 sps:$4 sm:$0xff]   ;;  %v4878_v40 = vld [vmem:[#allocation2 + $0x104] ss:$8 sps:$4 sm:$0xff]   ;;  %v4926_v42 = vld [vmem:[#allocation2 + $0xc0] ss:$8 sps:$4 sm:$0xff]  }
  0x95   : > { %v415_v19 = vor.u32 %v414_v15, %v410_v8  ;;  %905 = vrot.lane.b32.xlu1 %v606_v18, %s5612_s10  ;;  %v4924_v41 = vld [vmem:[#allocation2 + $0xc4] ss:$8 sps:$4 sm:$0xff]   ;;  %v4930_v43 = vld [vmem:[#allocation2 + $0xd4] ss:$8 sps:$4 sm:$0xff]   ;;  %v4932_v44 = vld [vmem:[#allocation2 + $0xd0] ss:$8 sps:$4 sm:$0xff]  }
  0x96   : > { %465 = vmatprep.subr.bf16.mxu1 %v4924_v41  ;;  %v4936_v45 = vld [vmem:[#allocation2 + $0xe4] ss:$8 sps:$4 sm:$0xff]   ;;  %v4938_v46 = vld [vmem:[#allocation2 + $0xe0] ss:$8 sps:$4 sm:$0xff]   ;;  %v4942_v47 = vld [vmem:[#allocation2 + $0xf4] ss:$8 sps:$4 sm:$0xff]  }
  0x97   : > { %v5832_v21 = vsel %vm408_vm1, %v415_v19, %v419_v16  ;;  %557 = vmatpush1.bf16.msra.mxu0 %v4851_v23  ;;  %466 = vmatpush1.bf16.msra.mxu1 %v4926_v42  ;;  %v4944_v48 = vld [vmem:[#allocation2 + $0xf0] ss:$8 sps:$4 sm:$0xff]   ;;  %v4876_v49 = vld [vmem:[#allocation2 + $0x100] ss:$8 sps:$4 sm:$0xff]   ;;  %v4881_v50 = vld [vmem:[#allocation2 + $0x114] ss:$8 sps:$4 sm:$0xff]  }
  0x98   : > { %805 = vrot.lane.b32.xlu0 %v5832_v21, %s5612_s10  ;;  %650 = vmatprep.subr.bf16.mxu0 %v4854_v24  ;;  %v4879_v52 = vld [vmem:[#allocation2 + $0x110] ss:$8 sps:$4 sm:$0xff]   ;;  %v4884_v53 = vld [vmem:[#allocation2 + $0x124] ss:$8 sps:$4 sm:$0xff]   ;;  %v4882_v54 = vld [vmem:[#allocation2 + $0x120] ss:$8 sps:$4 sm:$0xff]  }
  0x99   : > { %1005 = vrot.lane.b32.xlu1 %v390_v4, %s5613_s13  ;;  %467 = vmatprep.subr.bf16.mxu1 %v4930_v43  ;;  %v4887_v55 = vld [vmem:[#allocation2 + $0x134] ss:$8 sps:$4 sm:$0xff]   ;;  %v4885_v56 = vld [vmem:[#allocation2 + $0x130] ss:$8 sps:$4 sm:$0xff]   ;;  %v4890_v57 = vld [vmem:[#allocation2 + $0x1c4] ss:$8 sps:$4 sm:$0xff]  }
  0x9a   : > { %4263 = vmatmul.mubr.msk.bf16.vlgmr.msra.gmra.mrb[0].mxu0 %vm461_vm2, %v390_v4  ;;  %v4888_v58 = vld [vmem:[#allocation2 + $0x1c0] ss:$8 sps:$4 sm:$0xff]   ;;  %v4893_v59 = vld [vmem:[#allocation2 + $0x1d4] ss:$8 sps:$4 sm:$0xff]   ;;  %v4891_v61 = vld [vmem:[#allocation2 + $0x1d0] ss:$8 sps:$4 sm:$0xff]  }
  0x9b   : > { %651 = vmatpush1.bf16.msra.mxu0 %v4852_v25  ;;  %682 = vmatprep.mubr.bf16.mxu0 %v5611_v0  ;;  %v4896_v62 = vld [vmem:[#allocation2 + $0x1e4] ss:$8 sps:$4 sm:$0xff]   ;;  %v4894_v63 = vld [vmem:[#allocation2 + $0x1e0] ss:$8 sps:$4 sm:$0xff]   ;;  %v4899_v1 = vld [vmem:[#allocation2 + $0x1f4] ss:$8 sps:$4 sm:$0xff]  }
  0x9c   : > { %1105 = vrot.lane.b32.xlu0 %v5832_v21, %s5613_s13  ;;  %652 = vmatprep.subr.bf16.mxu0 %v4857_v26  ;;  %v4897_v2 = vld [vmem:[#allocation2 + $0x1f0] ss:$8 sps:$4 sm:$0xff]   ;;  %v4902_v3 = vld [vmem:[#allocation2 + $0x84] ss:$8 sps:$4 sm:$0xff]   ;;  %v4900_v4 = vld [vmem:[#allocation2 + $0x80] ss:$8 sps:$4 sm:$0xff]  }
  0x9d   : > { %1205 = vrot.lane.b32.xlu1 %v606_v18, %s5613_s13  ;;  %468 = vmatpush1.bf16.msra.mxu1 %v4932_v44  ;;  %v4905_v5 = vld [vmem:[#allocation2 + $0x94] ss:$8 sps:$4 sm:$0xff]   ;;  %v4903_v7 = vld [vmem:[#allocation2 + $0x90] ss:$8 sps:$4 sm:$0xff]   ;;  %v4908_v8 = vld [vmem:[#allocation2 + $0xa4] ss:$8 sps:$4 sm:$0xff]  }
  0x9e   : > { %469 = vmatprep.subr.bf16.mxu1 %v4936_v45  ;;  %v4906_v9 = vld [vmem:[#allocation2 + $0xa0] ss:$8 sps:$4 sm:$0xff]   ;;  %v4911_v10 = vld [vmem:[#allocation2 + $0xb4] ss:$8 sps:$4 sm:$0xff]   ;;  %v4909_v11 = vld [vmem:[#allocation2 + $0xb0] ss:$8 sps:$4 sm:$0xff]  }
  0x9f   : > { %653 = vmatpush1.bf16.msra.mxu0 %v4855_v27  ;;  %v4914_v12 = vld [vmem:[#allocation2 + $0x144] ss:$8 sps:$4 sm:$0xff]   ;;  %v4912_v13 = vld [vmem:[#allocation2 + $0x140] ss:$8 sps:$4 sm:$0xff]   ;;  %v4917_v14 = vld [vmem:[#allocation2 + $0x154] ss:$8 sps:$4 sm:$0xff]  }
  0xa0   : > { %654 = vmatprep.subr.bf16.mxu0 %v4860_v28  ;;  %v4915_v16 = vld [vmem:[#allocation2 + $0x150] ss:$8 sps:$4 sm:$0xff]   ;;  %v4920_v17 = vld [vmem:[#allocation2 + $0x164] ss:$8 sps:$4 sm:$0xff]   ;;  %v4923_v19 = vld [vmem:[#allocation2 + $0x174] ss:$8 sps:$4 sm:$0xff]  }
  0xa1   : > { %470 = vmatpush1.bf16.msra.mxu1 %v4938_v46  ;;  %v4921_v20 = vld [vmem:[#allocation2 + $0x170] ss:$8 sps:$4 sm:$0xff]   ;;  %v4927_v22 = vld [vmem:[#allocation2 + $0x200] ss:$8 sps:$4 sm:$0xff]   ;;  %v4935_v24 = vld [vmem:[#allocation2 + $0x214] ss:$8 sps:$4 sm:$0xff]  }
  0xa2   : > { %471 = vmatprep.subr.bf16.mxu1 %v4942_v47  ;;  %v4933_v25 = vld [vmem:[#allocation2 + $0x210] ss:$8 sps:$4 sm:$0xff]   ;;  %v4941_v26 = vld [vmem:[#allocation2 + $0x224] ss:$8 sps:$4 sm:$0xff]   ;;  %v4939_v27 = vld [vmem:[#allocation2 + $0x220] ss:$8 sps:$4 sm:$0xff]  }
  0xa3   : > { %655 = vmatpush1.bf16.msra.mxu0 %v4858_v29  ;;  %v4947_v28 = vld [vmem:[#allocation2 + $0x234] ss:$8 sps:$4 sm:$0xff]   ;;  %v4945_v29 = vld [vmem:[#allocation2 + $0x230] ss:$8 sps:$4 sm:$0xff]   ;;  %v4960_v43 = vld [vmem:[#allocation6 + $0x340] ss:$8 sps:$4 sm:$0xff]  }
  0xa4   : > { %656 = vmatprep.subr.bf16.mxu0 %v4863_v30  ;;  %v4957_v41 = vld [vmem:[#allocation6 + $0x330] ss:$8 sps:$4 sm:$0xff]   ;;  %v4962_v42 = vld [vmem:[#allocation6 + $0x344] ss:$8 sps:$4 sm:$0xff]   ;;  %v4965_v44 = vld [vmem:[#allocation6 + $0x354] ss:$8 sps:$4 sm:$0xff]  }
  0xa5   : > { %472 = vmatpush1.bf16.msra.mxu1 %v4944_v48  ;;  %v4963_v45 = vld [vmem:[#allocation6 + $0x350] ss:$8 sps:$4 sm:$0xff]   ;;  %v4968_v46 = vld [vmem:[#allocation6 + $0x364] ss:$8 sps:$4 sm:$0xff]   ;;  %v4966_v47 = vld [vmem:[#allocation6 + $0x360] ss:$8 sps:$4 sm:$0xff]  }
  0xa6   : > { %v4971_v48 = vld [vmem:[#allocation6 + $0x374] ss:$8 sps:$4 sm:$0xff]   ;;  %vm1348_vm4 = vcmask 1040384   ;;  %s5615_s29 = smov 112   ;;  %vm5616_vm6 = vmmov 1   ;;  %s5617_s21 = smov 96  }
  0xa7   : > { %657 = vmatpush1.bf16.msra.mxu0 %v4861_v31  ;;  %vm4391_vm5 = vmneg %vm1348_vm4  ;;  %vm2165_vm8 = vcmask 916480   ;;  %vm2929_vm9 = vcmask 785408   ;;  %vm4084_vm10 = vcmask 261120  }
  0xa8   : > { %750 = vmatprep.subr.bf16.mxu0 %v4866_v32  ;;  %4254 = vmatmul.mubr.msk.bf16.vlgmr.msra.gmra.mrb[0].mxu1 %vm461_vm2, %v5832_v21  ;;  %v4929_v21 = vld [vmem:[#allocation2 + $0x204] ss:$8 sps:$4 sm:$0xff]   ;;  %vm5926_vm7 = vmpackc.low %vm5616_vm6, %vm4391_vm5 }
  0xaa   : > { %4272 = vmatmul.mubr.msk.bf16.vlgmr.msra.gmra.mrb[0].mxu0 %vm461_vm2, %v606_v18  ;;  %v4918_v18 = vld [vmem:[#allocation2 + $0x160] ss:$8 sps:$4 sm:$0xff]  }
  0xab   : > { %751 = vmatpush1.bf16.msra.mxu0 %v4864_v33  ;;  %782 = vmatprep.mubr.bf16.mxu0 %v5611_v0 }
  0xac   : > { %752 = vmatprep.subr.bf16.mxu0 %v4869_v34  ;;  %v4948_v34 = vld [vmem:[#allocation6 + $0x300] ss:$8 sps:$4 sm:$0xff]  }
  0xaf   : > { %753 = vmatpush1.bf16.msra.mxu0 %v4867_v35  ;;  %v4950_v35 = vld [vmem:[#allocation6 + $0x304] ss:$8 sps:$4 sm:$0xff]  }
  0xb0   : > { %754 = vmatprep.subr.bf16.mxu0 %v4872_v36  ;;  %v4953_v36 = vld [vmem:[#allocation6 + $0x314] ss:$8 sps:$4 sm:$0xff]  }
  0xb3   : > { %755 = vmatpush1.bf16.msra.mxu0 %v4870_v37  ;;  %v4951_v37 = vld [vmem:[#allocation6 + $0x310] ss:$8 sps:$4 sm:$0xff]  }
  0xb4   : > { %756 = vmatprep.subr.bf16.mxu0 %v4875_v38  ;;  %v4956_v38 = vld [vmem:[#allocation6 + $0x324] ss:$8 sps:$4 sm:$0xff]  }
  0xb7   : > { %757 = vmatpush1.bf16.msra.mxu0 %v4873_v39  ;;  %v4954_v39 = vld [vmem:[#allocation6 + $0x320] ss:$8 sps:$4 sm:$0xff]  }
  0xb8   : > { %850 = vmatprep.subr.bf16.mxu0 %v4878_v40  ;;  %v4959_v40 = vld [vmem:[#allocation6 + $0x334] ss:$8 sps:$4 sm:$0xff]  }
 0x103   : > { %v706_v51 = vpop.permute.xlu0 %705 }
 0x104   : > { %4281 = vmatmul.mubr.msk.bf16.vlgmr.msra.gmra.mrb[0].mxu0 %vm461_vm2, %v706_v51  ;;  %v4972_v51 = vld [vmem:[#allocation6 + $0x380] ss:$8 sps:$4 sm:$0xff]  }
 0x105   : > { %851 = vmatpush1.bf16.msra.mxu0 %v4876_v49  ;;  %882 = vmatprep.mubr.bf16.mxu0 %v5611_v0  ;;  %v4969_v49 = vld [vmem:[#allocation6 + $0x370] ss:$8 sps:$4 sm:$0xff]  }
 0x106   : > { %852 = vmatprep.subr.bf16.mxu0 %v4881_v50  ;;  %v4974_v50 = vld [vmem:[#allocation6 + $0x384] ss:$8 sps:$4 sm:$0xff]  }
 0x107   : > { %v906_v6 = vpop.permute.xlu1 %905 }
 0x109   : > { %853 = vmatpush1.bf16.msra.mxu0 %v4879_v52  ;;  %v4977_v52 = vld [vmem:[#allocation6 + $0x394] ss:$8 sps:$4 sm:$0xff]  }
 0x10a   : > { %854 = vmatprep.subr.bf16.mxu0 %v4884_v53  ;;  %v806_v60 = vpop.permute.xlu0 %805  ;;  %v4975_v53 = vld [vmem:[#allocation6 + $0x390] ss:$8 sps:$4 sm:$0xff]  }
 0x10b   : > { %v1006_v15 = vpop.permute.xlu1 %1005 }
 0x10d   : > { %855 = vmatpush1.bf16.msra.mxu0 %v4882_v54  ;;  %v4980_v54 = vld [vmem:[#allocation6 + $0x3a4] ss:$8 sps:$4 sm:$0xff]  }
 0x10e   : > { %856 = vmatprep.subr.bf16.mxu0 %v4887_v55  ;;  %v1106_v23 = vpop.permute.xlu0 %1105  ;;  %v4978_v55 = vld [vmem:[#allocation6 + $0x3a0] ss:$8 sps:$4 sm:$0xff]  }
 0x10f   : > { %v1206_v30 = vpop.permute.xlu1 %1205 }
 0x111   : > { %857 = vmatpush1.bf16.msra.mxu0 %v4885_v56  ;;  %v4983_v56 = vld [vmem:[#allocation6 + $0x3b4] ss:$8 sps:$4 sm:$0xff]  }
 0x112   : > { %950 = vmatprep.subr.bf16.mxu0 %v4890_v57  ;;  %v4981_v57 = vld [vmem:[#allocation6 + $0x3b0] ss:$8 sps:$4 sm:$0xff]  }
 0x114   : > { %4290 = vmatmul.mubr.msk.bf16.vlgmr.msra.gmra.mrb[0].mxu0 %vm461_vm2, %v806_v60 }
 0x115   : > { %951 = vmatpush1.bf16.msra.mxu0 %v4888_v58  ;;  %982 = vmatprep.mubr.bf16.mxu0 %v5611_v0  ;;  %v1299_v58 = vlaneseq }
 0x116   : > { %952 = vmatprep.subr.bf16.mxu0 %v4893_v59 }
 0x117   : > { %v5861_v59 = vshrl.u32 %v1299_v58, 7 }
 0x119   : > { %953 = vmatpush1.bf16.msra.mxu0 %v4891_v61  ;;  %v5864_v60 = vsub.s32 0, %v5861_v59  ;;  %v1297_v61 = vld [vmem:[#allocation4] sm:$0x3] }
 0x11a   : > { %954 = vmatprep.subr.bf16.mxu0 %v4896_v62  ;;  %v5867_v62 = vsub.s32 1, %v5861_v59 }
 0x11d   : > { %955 = vmatpush1.bf16.msra.mxu0 %v4894_v63  ;;  %v4986_v63 = vld [vmem:[#allocation6 + $0x3c4] ss:$8 sps:$4 sm:$0xff]  }
 0x11e   : > { %956 = vmatprep.subr.bf16.mxu0 %v4899_v1  ;;  %v4984_v1 = vld [vmem:[#allocation6 + $0x3c0] ss:$8 sps:$4 sm:$0xff]  }
 0x121   : > { %957 = vmatpush1.bf16.msra.mxu0 %v4897_v2  ;;  %v1302_v2 = vrot.slane %v1297_v61, %v5864_v60 }
 0x122   : > { %1050 = vmatprep.subr.bf16.mxu0 %v4902_v3 }
 0x124   : > { %4299 = vmatmul.mubr.msk.bf16.vlgmr.msra.gmra.mrb[0].mxu0 %vm461_vm2, %v906_v6 }
 0x125   : > { %1051 = vmatpush1.bf16.msra.mxu0 %v4900_v4  ;;  %1082 = vmatprep.mubr.bf16.mxu0 %v5611_v0  ;;  %v1306_v4 = vrot.slane %v1297_v61, %v5867_v62  ;;  %v5127_v61 = vld [vmem:[#allocation6 + $0x1f4] ss:$8 sps:$4 sm:$0xff]  }
 0x126   : > { %1052 = vmatprep.subr.bf16.mxu0 %v4905_v5 }
 0x129   : > { %1053 = vmatpush1.bf16.msra.mxu0 %v4903_v7 }
 0x12a   : > { %1054 = vmatprep.subr.bf16.mxu0 %v4908_v8 }
 0x12d   : > { %1055 = vmatpush1.bf16.msra.mxu0 %v4906_v9  ;;  %v4989_v9 = vld [vmem:[#allocation6 + $0x3d4] ss:$8 sps:$4 sm:$0xff]  }
 0x12e   : > { %1056 = vmatprep.subr.bf16.mxu0 %v4911_v10 }
 0x131   : > { %1057 = vmatpush1.bf16.msra.mxu0 %v4909_v11 }
 0x132   : > { %1150 = vmatprep.subr.bf16.mxu0 %v4914_v12 }
 0x134   : > { %4308 = vmatmul.mubr.msk.bf16.vlgmr.msra.gmra.mrb[0].mxu0 %vm461_vm2, %v1006_v15 }
 0x135   : > { %1151 = vmatpush1.bf16.msra.mxu0 %v4912_v13  ;;  %1182 = vmatprep.mubr.bf16.mxu0 %v5611_v0  ;;  %v4987_v13 = vld [vmem:[#allocation6 + $0x3d0] ss:$8 sps:$4 sm:$0xff]  }
 0x136   : > { %1152 = vmatprep.subr.bf16.mxu0 %v4917_v14 }
 0x139   : > { %1153 = vmatpush1.bf16.msra.mxu0 %v4915_v16 }
 0x13a   : > { %1154 = vmatprep.subr.bf16.mxu0 %v4920_v17 }
 0x13d   : > { %1155 = vmatpush1.bf16.msra.mxu0 %v4918_v18 }
 0x13e   : > { %1156 = vmatprep.subr.bf16.mxu0 %v4923_v19 }
 0x141   : > { %1157 = vmatpush1.bf16.msra.mxu0 %v4921_v20  ;;  %v4992_v20 = vld [vmem:[#allocation6 + $0x3e4] ss:$8 sps:$4 sm:$0xff]  }
 0x142   : > { %1250 = vmatprep.subr.bf16.mxu0 %v4929_v21 }
 0x144   : > { %4317 = vmatmul.mubr.msk.bf16.vlgmr.msra.gmra.mrb[0].mxu0 %vm461_vm2, %v1106_v23 }
 0x145   : > { %1251 = vmatpush1.bf16.msra.mxu0 %v4927_v22  ;;  %1282 = vmatprep.mubr.bf16.mxu0 %v5611_v0  ;;  %v4990_v22 = vld [vmem:[#allocation6 + $0x3e0] ss:$8 sps:$4 sm:$0xff]  }
 0x146   : > { %1252 = vmatprep.subr.bf16.mxu0 %v4935_v24 }
 0x149   : > { %1253 = vmatpush1.bf16.msra.mxu0 %v4933_v25  ;;  %v4993_v25 = vld [vmem:[#allocation6 + $0x3f0] ss:$8 sps:$4 sm:$0xff]  }
 0x14a   : > { %1254 = vmatprep.subr.bf16.mxu0 %v4941_v26  ;;  %v4995_v26 = vld [vmem:[#allocation6 + $0x3f4] ss:$8 sps:$4 sm:$0xff]  }
 0x14d   : > { %1255 = vmatpush1.bf16.msra.mxu0 %v4939_v27 }
 0x14e   : > { %1256 = vmatprep.subr.bf16.mxu0 %v4947_v28  ;;  %v4998_v28 = vld [vmem:[#allocation6 + $0x4] ss:$8 sps:$4 sm:$0xff]  }
 0x151   : > { %1257 = vmatpush1.bf16.msra.mxu0 %v4945_v29  ;;  %v5035_v29 = vld [vmem:[#allocation6 + $0x100] ss:$8 sps:$4 sm:$0xff]  }
 0x152   : > { %1629 = vmatprep.subr.bf16.mxu0 %v4950_v35  ;;  %v5055_v35 = vld [vmem:[#allocation6 + $0x134] ss:$8 sps:$4 sm:$0xff]  }
 0x154   : > { %4326 = vmatmul.mubr.msk.bf16.vlgmr.msra.gmra.mrb[0].mxu0 %vm461_vm2, %v1206_v30  ;;  %v5037_v30 = vld [vmem:[#allocation6 + $0x104] ss:$8 sps:$4 sm:$0xff]  }
 0x155   : > { %1630 = vmatpush1.bf16.msra.mxu0 %v4948_v34  ;;  %2330 = vmatprep.subr.bf16.mxu1 %v5037_v30  ;;  %v5053_v34 = vld [vmem:[#allocation6 + $0x130] ss:$8 sps:$4 sm:$0xff]  }
 0x156   : > { %1631 = vmatprep.subr.bf16.mxu0 %v4953_v36  ;;  %2331 = vmatpush1.bf16.msra.mxu1 %v5035_v29  ;;  %v5059_v36 = vld [vmem:[#allocation6 + $0x140] ss:$8 sps:$4 sm:$0xff]  }
 0x159   : > { %1632 = vmatpush1.bf16.msra.mxu0 %v4951_v37  ;;  %v5061_v37 = vld [vmem:[#allocation6 + $0x144] ss:$8 sps:$4 sm:$0xff]  }
 0x15a   : > { %1633 = vmatprep.subr.bf16.mxu0 %v4956_v38  ;;  %v5067_v38 = vld [vmem:[#allocation6 + $0x154] ss:$8 sps:$4 sm:$0xff]  }
 0x15d   : > { %1634 = vmatpush1.bf16.msra.mxu0 %v4954_v39  ;;  %v5065_v39 = vld [vmem:[#allocation6 + $0x150] ss:$8 sps:$4 sm:$0xff]  }
 0x15e   : > { %1635 = vmatprep.subr.bf16.mxu0 %v4959_v40  ;;  %v5073_v40 = vld [vmem:[#allocation6 + $0x164] ss:$8 sps:$4 sm:$0xff]  }
 0x161   : > { %1636 = vmatpush1.bf16.msra.mxu0 %v4957_v41  ;;  %v5071_v41 = vld [vmem:[#allocation6 + $0x160] ss:$8 sps:$4 sm:$0xff]  }
 0x162   : > { %1637 = vmatprep.subr.bf16.mxu0 %v4962_v42  ;;  %v5079_v42 = vld [vmem:[#allocation6 + $0x174] ss:$8 sps:$4 sm:$0xff]  }
 0x165   : > { %1638 = vmatpush1.bf16.msra.mxu0 %v4960_v43  ;;  %v5077_v43 = vld [vmem:[#allocation6 + $0x170] ss:$8 sps:$4 sm:$0xff]  }
 0x166   : > { %1639 = vmatprep.subr.bf16.mxu0 %v4965_v44  ;;  %v5085_v44 = vld [vmem:[#allocation6 + $0x184] ss:$8 sps:$4 sm:$0xff]  }
 0x169   : > { %1640 = vmatpush1.bf16.msra.mxu0 %v4963_v45  ;;  %v5083_v45 = vld [vmem:[#allocation6 + $0x180] ss:$8 sps:$4 sm:$0xff]  }
 0x16a   : > { %1641 = vmatprep.subr.bf16.mxu0 %v4968_v46  ;;  %v5091_v46 = vld [vmem:[#allocation6 + $0x194] ss:$8 sps:$4 sm:$0xff]  }
 0x16d   : > { %1642 = vmatpush1.bf16.msra.mxu0 %v4966_v47  ;;  %v5089_v47 = vld [vmem:[#allocation6 + $0x190] ss:$8 sps:$4 sm:$0xff]  }
 0x16e   : > { %1643 = vmatprep.subr.bf16.mxu0 %v4971_v48  ;;  %v5097_v48 = vld [vmem:[#allocation6 + $0x1a4] ss:$8 sps:$4 sm:$0xff]  }
 0x171   : > { %1644 = vmatpush1.bf16.msra.mxu0 %v4969_v49  ;;  %v5095_v49 = vld [vmem:[#allocation6 + $0x1a0] ss:$8 sps:$4 sm:$0xff]  }
 0x172   : > { %1645 = vmatprep.subr.bf16.mxu0 %v4974_v50  ;;  %v5103_v50 = vld [vmem:[#allocation6 + $0x1b4] ss:$8 sps:$4 sm:$0xff]  }
 0x175   : > { %1646 = vmatpush1.bf16.msra.mxu0 %v4972_v51  ;;  %v5101_v51 = vld [vmem:[#allocation6 + $0x1b0] ss:$8 sps:$4 sm:$0xff]  }
 0x176   : > { %1647 = vmatprep.subr.bf16.mxu0 %v4977_v52  ;;  %v5109_v52 = vld [vmem:[#allocation6 + $0x1c4] ss:$8 sps:$4 sm:$0xff]  }
 0x179   : > { %1648 = vmatpush1.bf16.msra.mxu0 %v4975_v53  ;;  %v5107_v53 = vld [vmem:[#allocation6 + $0x1c0] ss:$8 sps:$4 sm:$0xff]  }
 0x17a   : > { %1649 = vmatprep.subr.bf16.mxu0 %v4980_v54  ;;  %v5115_v54 = vld [vmem:[#allocation6 + $0x1d4] ss:$8 sps:$4 sm:$0xff]  }
 0x17b   : > { %v5853_v31 = vpop.f32.mrb[0].mxu1 }
 0x17c   : > { %v5855_v32 = vpop.f32.mrb[1].mxu1 }
 0x17d   : > { %v5857_v33 = vpop.f32.mrb[2].mxu1  ;;  %1650 = vmatpush1.bf16.msra.mxu0 %v4978_v55  ;;  %v5113_v55 = vld [vmem:[#allocation6 + $0x1d0] ss:$8 sps:$4 sm:$0xff]  }
 0x17e   : > { %v5859_v0 = vpop.f32.mrb[3].mxu1  ;;  %1651 = vmatprep.subr.bf16.mxu0 %v4983_v56  ;;  %v5121_v56 = vld [vmem:[#allocation6 + $0x1e4] ss:$8 sps:$4 sm:$0xff]  }
 0x181   : > { %1652 = vmatpush1.bf16.msra.mxu0 %v4981_v57  ;;  %v5119_v57 = vld [vmem:[#allocation6 + $0x1e0] ss:$8 sps:$4 sm:$0xff]  }
 0x182   : > { %1653 = vmatprep.subr.bf16.mxu0 %v4986_v63 }
 0x185   : > { %1654 = vmatpush1.bf16.msra.mxu0 %v4984_v1 }
 0x186   : > { %1655 = vmatprep.subr.bf16.mxu0 %v4989_v9 }
 0x189   : > { %1656 = vmatpush1.bf16.msra.mxu0 %v4987_v13 }
 0x18a   : > { %1657 = vmatprep.subr.bf16.mxu0 %v4992_v20 }
 0x18d   : > { %1658 = vmatpush1.bf16.msra.mxu0 %v4990_v22 }
 0x18e   : > { %1659 = vmatprep.subr.bf16.mxu0 %v4995_v26 }
 0x191   : > { %1660 = vmatpush1.bf16.msra.mxu0 %v4993_v25 }
 0x192   : > { %1832 = vmatprep.subr.bf16.mxu0 %v4998_v28 }
 0x227   : > { %v1284_v3 = vpop.f32.mrb[0].mxu0 }
 0x228   : > { %v4696_v5 = vadd.f32 %v1284_v3, %v5853_v31  ;;  %v1286_v6 = vpop.f32.mrb[1].mxu0  ;;  %v5041_v31 = vld [vmem:[#allocation6 + $0x110] ss:$8 sps:$4 sm:$0xff]  }
 0x229   : > { %v4697_v7 = vadd.f32 %v1286_v6, %v5855_v32  ;;  %v1288_v8 = vpop.f32.mrb[2].mxu0  ;;  %v5043_v32 = vld [vmem:[#allocation6 + $0x114] ss:$8 sps:$4 sm:$0xff]  }
 0x22a   : > { %v1309_v10 = vadd.f32 %v4696_v5, %v1302_v2  ;;  %v4698_v11 = vadd.f32 %v1288_v8, %v5857_v33  ;;  %v1290_v12 = vpop.f32.mrb[3].mxu0  ;;  %2332 = vmatprep.subr.bf16.mxu1 %v5043_v32  ;;  %v5047_v33 = vld [vmem:[#allocation6 + $0x120] ss:$8 sps:$4 sm:$0xff]  }
 0x22b   : > { %v1310_v14 = vadd.f32 %v4697_v7, %v1306_v4  ;;  %v4699_v15 = vadd.f32 %v1290_v12, %v5859_v0  ;;  %2333 = vmatpush1.bf16.msra.mxu1 %v5041_v31  ;;  %v5049_v0 = vld [vmem:[#allocation6 + $0x124] ss:$8 sps:$4 sm:$0xff]  }
 0x22c   : > { %v1313_v16 = vmax.f32 %v1309_v10, 0.0  ;;  %v1311_v17 = vadd.f32 %v4698_v11, %v1302_v2  ;;  %2334 = vmatprep.subr.bf16.mxu1 %v5049_v0  ;;  %v5125_v2 = vld [vmem:[#allocation6 + $0x1f0] ss:$8 sps:$4 sm:$0xff]  }
 0x22d   : > { %v1314_v18 = vmax.f32 %v1310_v14, 0.0  ;;  %v1312_v19 = vadd.f32 %v4699_v15, %v1306_v4  ;;  %v5133_v14 = vld [vmem:[#allocation6 + $0x404] ss:$8 sps:$4 sm:$0xff]  }
 0x22e   : > { %1317 = vst [vmem:[%s380_s19] sm:$0xff] %v1313_v16  ;;  %v1315_v21 = vmax.f32 %v1311_v17, 0.0 }
 0x22f   : > { %1318 = vst [vmem:[%s380_s19 + $0x8] sm:$0xff] %v1314_v18  ;;  %v1316_v23 = vmax.f32 %v1312_v19, 0.0  ;;  %v4830_v24 = vpack.i.bf16 %v1314_v18, %v1313_v16  ;;  %2335 = vmatpush1.bf16.msra.mxu1 %v5047_v33 }
 0x230   : > { %1319 = vst [vmem:[%s380_s19 + $0x10] sm:$0xff] %v1315_v21  ;;  %2336 = vmatprep.subr.bf16.mxu1 %v5055_v35 }
 0x231   : > { %1320 = vst [vmem:[%s380_s19 + $0x18] sm:$0xff] %v1316_v23  ;;  %4831 = vrot.lane.b32.xlu0 %v4830_v24, %s5614_s20  ;;  %v4835_v27 = vpack.i.bf16 %v1316_v23, %v1315_v21  ;;  %s4761_s19 = smul.u32 48, %s6187_s30 }
 0x233   : > { %4836 = vrot.lane.b32.xlu1 %v4835_v27, %s5614_s20  ;;  %2337 = vmatpush1.bf16.msra.mxu1 %v5053_v34 }
 0x234   : > { %2338 = vmatprep.subr.bf16.mxu1 %v5061_v37 }
 0x237   : > { %2339 = vmatpush1.bf16.msra.mxu1 %v5059_v36 }
 0x238   : > { %2340 = vmatprep.subr.bf16.mxu1 %v5067_v38 }
 0x23b   : > { %2341 = vmatpush1.bf16.msra.mxu1 %v5065_v39 }
 0x23c   : > { %2342 = vmatprep.subr.bf16.mxu1 %v5073_v40 }
 0x23f   : > { %2343 = vmatpush1.bf16.msra.mxu1 %v5071_v41 }
 0x240   : > { %2344 = vmatprep.subr.bf16.mxu1 %v5079_v42 }
 0x243   : > { %2345 = vmatpush1.bf16.msra.mxu1 %v5077_v43 }
 0x244   : > { %2346 = vmatprep.subr.bf16.mxu1 %v5085_v44 }
 0x247   : > { %2347 = vmatpush1.bf16.msra.mxu1 %v5083_v45 }
 0x248   : > { %2348 = vmatprep.subr.bf16.mxu1 %v5091_v46 }
 0x24b   : > { %2349 = vmatpush1.bf16.msra.mxu1 %v5089_v47 }
 0x24c   : > { %2350 = vmatprep.subr.bf16.mxu1 %v5097_v48 }
 0x24f   : > { %2351 = vmatpush1.bf16.msra.mxu1 %v5095_v49 }
 0x250   : > { %2352 = vmatprep.subr.bf16.mxu1 %v5103_v50  ;;  %v4996_v50 = vld [vmem:[#allocation6] ss:$8 sps:$4 sm:$0xff]  }
 0x253   : > { %2353 = vmatpush1.bf16.msra.mxu1 %v5101_v51 }
 0x254   : > { %2354 = vmatprep.subr.bf16.mxu1 %v5109_v52 }
 0x257   : > { %2355 = vmatpush1.bf16.msra.mxu1 %v5107_v53 }
 0x258   : > { %2356 = vmatprep.subr.bf16.mxu1 %v5115_v54 }
 0x25b   : > { %2357 = vmatpush1.bf16.msra.mxu1 %v5113_v55  ;;  %v5110_v55 = vld [vmem:[#allocation6 + $0x690] ss:$8 sps:$4 sm:$0xff]  }
 0x25c   : > { %2358 = vmatprep.subr.bf16.mxu1 %v5121_v56  ;;  %v5001_v56 = vld [vmem:[#allocation6 + $0x14] ss:$8 sps:$4 sm:$0xff]  }
 0x25f   : > { %2359 = vmatpush1.bf16.msra.mxu1 %v5119_v57 }
 0x260   : > { %2360 = vmatprep.subr.bf16.mxu1 %v5127_v61 }
 0x263   : > { %2361 = vmatpush1.bf16.msra.mxu1 %v5125_v2 }
 0x264   : > { %2591 = vmatprep.subr.bf16.mxu1 %v5133_v14  ;;  %v5010_v14 = vld [vmem:[#allocation6 + $0x44] ss:$8 sps:$4 sm:$0xff]  }
 0x2a3   : > { %v4832_v58 = vpop.permute.xlu0 %4831 }
 0x2a4   : > { %v4834_v63 = vunpack.i.h.bf16 %v4832_v58  ;;  %v4833_v1 = vunpack.i.l.bf16 %v4832_v58 }
 0x2a5   : > { %v4837_v3 = vpop.permute.xlu1 %4836 }
 0x2a6   : > { %v1342_v4 = vsel %vm1333_vm3, %v4834_v63, 0.0  ;;  %v1334_v5 = vsel %vm1333_vm3, %v4833_v1, %v4834_v63  ;;  %v1340_v6 = vsel %vm1333_vm3, 0.0, %v4833_v1  ;;  %v4839_v7 = vunpack.i.h.bf16 %v4837_v3  ;;  %v4999_v1 = vld [vmem:[#allocation6 + $0x10] ss:$8 sps:$4 sm:$0xff]  }
 0x2a7   : > { %v1351_v8 = vrot.slane %v1342_v4, 7  ;;  %v4838_v9 = vunpack.i.l.bf16 %v4837_v3  ;;  %v5882_v10 = vrot.slane %v1340_v6, 7  ;;  %v5884_v11 = vrot.slane %v1334_v5, 7  ;;  %v5004_v4 = vld [vmem:[#allocation6 + $0x24] ss:$8 sps:$4 sm:$0xff]  }
 0x2a8   : > { %v1343_v12 = vsel %vm1333_vm3, %v4839_v7, 0.0 }
 0x2a9   : > { %v1356_v13 = vrot.slane %v1343_v12, 7  ;;  %v1369_v15 = vsel %vm1348_vm4, 0.0, %v1351_v8  ;;  %v1335_v16 = vsel %vm1333_vm3, %v4838_v9, %v4839_v7  ;;  %v1341_v17 = vsel %vm1333_vm3, 0.0, %v4838_v9 }
 0x2aa   : > { %v1352_v20 = vrot.slane %v1341_v17, 7  ;;  %v1354_v21 = vrot.slane %v1335_v16, 7  ;;  %v1367_v22 = vsel %vm1348_vm4, 0.0, %v5882_v10  ;;  %v1368_v23 = vsel %vm1348_vm4, 0.0, %v5884_v11  ;;  %v5013_v16 = vld [vmem:[#allocation6 + $0x54] ss:$8 sps:$4 sm:$0xff]  }
 0x2ab   : > { %v1357_v18 = vsel %vm1348_vm4, %v1351_v8, %v1356_v13  ;;  %v1372_v19 = vsel %vm1348_vm4, %v1356_v13, 0.0  ;;  %v5002_v8 = vld [vmem:[#allocation6 + $0x20] ss:$8 sps:$4 sm:$0xff]   ;;  %v5005_v13 = vld [vmem:[#allocation6 + $0x30] ss:$8 sps:$4 sm:$0xff]  }
 0x2ac   : > { %v5896_v24 = vpack.c.bf16 %v1357_v18, %v1369_v15  ;;  %v5898_v25 = vpack.c.bf16 %v1372_v19, %v1372_v19  ;;  %v5902_v26 = vsel %vm1348_vm4, %v5882_v10, %v1352_v20  ;;  %v1355_v27 = vsel %vm1348_vm4, %v5884_v11, %v1354_v21  ;;  %v5008_v15 = vld [vmem:[#allocation6 + $0x40] ss:$8 sps:$4 sm:$0xff]   ;;  %v5011_v17 = vld [vmem:[#allocation6 + $0x50] ss:$8 sps:$4 sm:$0xff]   ;;  %v5016_v18 = vld [vmem:[#allocation6 + $0x64] ss:$8 sps:$4 sm:$0xff]  }
 0x2ad   : > { %v1370_v28 = vsel %vm1348_vm4, %v1352_v20, 0.0  ;;  %v1371_v29 = vsel %vm1348_vm4, %v1354_v21, 0.0  ;;  %v5909_v30 = vpack.c.bf16 %v5902_v26, %v1367_v22  ;;  %v4397_v32 = vpack.c.bf16 %v5902_v26, %v5882_v10  ;;  %v5014_v19 = vld [vmem:[#allocation6 + $0x60] ss:$8 sps:$4 sm:$0xff]   ;;  %v5019_v20 = vld [vmem:[#allocation6 + $0x74] ss:$8 sps:$4 sm:$0xff]  }
 0x2ae   : > { %v1376_v31 = vpack.c.bf16 %v1370_v28, %v1370_v28  ;;  %2163 = vrot.lane.b32.xlu1 %v5896_v24, %s5615_s29  ;;  %v1374_v33 = vpack.c.bf16 %v1355_v27, %v1368_v23  ;;  %v1377_v0 = vpack.c.bf16 %v1371_v29, %v1371_v29  ;;  %v2412_v34 = vshll.u32 %v5896_v24, 16  ;;  %v5017_v21 = vld [vmem:[#allocation6 + $0x70] ss:$8 sps:$4 sm:$0xff]   ;;  %v5022_v22 = vld [vmem:[#allocation6 + $0x84] ss:$8 sps:$4 sm:$0xff]  }
 0x2af   : > { %v2417_v35 = vshll.u32 %v5898_v25, 16  ;;  %v2410_v37 = vshrl.u32 %v5896_v24, 16  ;;  %v1446_v41 = vshll.u32 %v5909_v30, 16  ;;  %v1444_v46 = vshrl.u32 %v5909_v30, 16  ;;  %v5020_v23 = vld [vmem:[#allocation6 + $0x80] ss:$8 sps:$4 sm:$0xff]  }
 0x2b0   : > { %2161 = vrot.lane.b32.xlu0 %v1374_v33, %s5615_s29  ;;  %v1458_v36 = vshll.u32 %v1374_v33, 16  ;;  %v1451_v38 = vshll.u32 %v1376_v31, 16  ;;  %v1463_v39 = vshll.u32 %v1377_v0, 16  ;;  %v2414_v40 = vrot.slane %v2412_v34, 1  ;;  %v5026_v28 = vld [vmem:[#allocation6 + $0xa0] ss:$8 sps:$4 sm:$0xff]  }
 0x2b1   : > { %v1456_v42 = vshrl.u32 %v1374_v33, 16  ;;  %v2419_v45 = vrot.slane %v2417_v35, 1  ;;  %v1448_v47 = vrot.slane %v1446_v41, 1  ;;  %v4393_v58 = vpack.c.bf16 %v1355_v27, %v5884_v11  ;;  %v5007_v11 = vld [vmem:[#allocation6 + $0x34] ss:$8 sps:$4 sm:$0xff]  }
 0x2b2   : > { %v1460_v43 = vrot.slane %v1458_v36, 1  ;;  %v2415_v44 = vor.u32 %v2414_v40, %v2410_v37  ;;  %v1465_v49 = vrot.slane %v1463_v39, 1  ;;  %v1453_v53 = vrot.slane %v1451_v38, 1  ;;  %v5028_v27 = vld [vmem:[#allocation6 + $0xa4] ss:$8 sps:$4 sm:$0xff]  }
 0x2b3   : > { %v1449_v52 = vor.u32 %v1448_v47, %v1444_v46  ;;  %v1914_v61 = vrot.slane %v1374_v33, 1  ;;  %v1915_v63 = vrot.slane %v1377_v0, 1  ;;  %v2671_v2 = vrot.slane %v5896_v24, 1  ;;  %v5031_v29 = vld [vmem:[#allocation6 + $0xb4] ss:$8 sps:$4 sm:$0xff]  }
 0x2b4   : > { %2159 = vrot.lane.b32.xlu0 %v5909_v30, %s5615_s29  ;;  %v1461_v48 = vor.u32 %v1460_v43, %v1456_v42  ;;  %v2420_v51 = vsel %vm408_vm1, %v2415_v44, %v2419_v45  ;;  %v2672_v3 = vrot.slane %v5898_v25, 1  ;;  %v1911_v6 = vrot.slane %v5909_v30, 1  ;;  %v5023_v25 = vld [vmem:[#allocation6 + $0x90] ss:$8 sps:$4 sm:$0xff]   ;;  %v5040_v0 = vld [vmem:[#allocation6 + $0xd4] ss:$8 sps:$4 sm:$0xff]  }
 0x2b5   : > { %v1454_v57 = vsel %vm408_vm1, %v1449_v52, %v1453_v53  ;;  %v5940_v5 = vsel %vm603_vm0, %v1914_v61, %v1915_v63  ;;  %v1912_v7 = vrot.slane %v1376_v31, 1  ;;  %v5034_v31 = vld [vmem:[#allocation6 + $0xc4] ss:$8 sps:$4 sm:$0xff]   ;;  %v5038_v34 = vld [vmem:[#allocation6 + $0xd0] ss:$8 sps:$4 sm:$0xff]  }
 0x2b6   : > { %v1466_v54 = vsel %vm408_vm1, %v1461_v48, %v1465_v49  ;;  %v2673_v9 = vsel %vm603_vm0, %v2671_v2, %v2672_v3  ;;  %v5046_v35 = vld [vmem:[#allocation6 + $0xe4] ss:$8 sps:$4 sm:$0xff]   ;;  %v5044_v36 = vld [vmem:[#allocation6 + $0xe0] ss:$8 sps:$4 sm:$0xff]   ;;  %v5052_v37 = vld [vmem:[#allocation6 + $0xf4] ss:$8 sps:$4 sm:$0xff]  }
 0x2b7   : > { %2423 = vrot.lane.b32.xlu1 %v1466_v54, %s5615_s29  ;;  %1661 = vmatprep.mubr.bf16.mxu0 %v1466_v54  ;;  %v5948_v12 = vsel %vm603_vm0, %v1911_v6, %v1912_v7  ;;  %v5050_v38 = vld [vmem:[#allocation6 + $0xf0] ss:$8 sps:$4 sm:$0xff]   ;;  %v5058_v39 = vld [vmem:[#allocation6 + $0x604] ss:$8 sps:$4 sm:$0xff]   ;;  %v5056_v40 = vld [vmem:[#allocation6 + $0x600] ss:$8 sps:$4 sm:$0xff]  }
 0x2b8   : > { %2425 = vrot.lane.b32.xlu0 %v2420_v51, %s5615_s29  ;;  %1662 = vmatmul.mubr.bf16.vlgmr.msra.gmra.mrb[4].mxu0 %v1454_v57  ;;  %v5064_v41 = vld [vmem:[#allocation6 + $0x614] ss:$8 sps:$4 sm:$0xff]   ;;  %v5062_v42 = vld [vmem:[#allocation6 + $0x610] ss:$8 sps:$4 sm:$0xff]   ;;  %v5070_v43 = vld [vmem:[#allocation6 + $0x624] ss:$8 sps:$4 sm:$0xff]  }
 0x2b9   : > { %1833 = vmatpush1.bf16.msra.mxu0 %v4996_v50  ;;  %4394 = vmatprep.mubr.msk.bf16.mxu0 %vm5926_vm7, %v4393_v58  ;;  %v5068_v44 = vld [vmem:[#allocation6 + $0x620] ss:$8 sps:$4 sm:$0xff]   ;;  %v5076_v45 = vld [vmem:[#allocation6 + $0x634] ss:$8 sps:$4 sm:$0xff]   ;;  %v5074_v46 = vld [vmem:[#allocation6 + $0x630] ss:$8 sps:$4 sm:$0xff]  }
 0x2ba   : > { %1834 = vmatprep.subr.bf16.mxu0 %v5001_v56  ;;  %v5082_v47 = vld [vmem:[#allocation6 + $0x644] ss:$8 sps:$4 sm:$0xff]   ;;  %v5080_v48 = vld [vmem:[#allocation6 + $0x640] ss:$8 sps:$4 sm:$0xff]   ;;  %v5088_v10 = vld [vmem:[#allocation6 + $0x654] ss:$8 sps:$4 sm:$0xff]  }
 0x2bb   : > { %2421 = vrot.lane.b32.xlu1 %v1454_v57, %s5615_s29  ;;  %v5086_v26 = vld [vmem:[#allocation6 + $0x650] ss:$8 sps:$4 sm:$0xff]   ;;  %v5092_v49 = vld [vmem:[#allocation6 + $0x660] ss:$8 sps:$4 sm:$0xff]   ;;  %v5100_v50 = vld [vmem:[#allocation6 + $0x674] ss:$8 sps:$4 sm:$0xff]  }
 0x2bc   : > { %2676 = vrot.lane.b32.xlu0 %v5940_v5, %s5615_s29  ;;  %v5106_v52 = vld [vmem:[#allocation6 + $0x684] ss:$8 sps:$4 sm:$0xff]   ;;  %v5104_v53 = vld [vmem:[#allocation6 + $0x680] ss:$8 sps:$4 sm:$0xff]   ;;  %v5124_v58 = vld [vmem:[#allocation6 + $0x6b4] ss:$8 sps:$4 sm:$0xff]  }
 0x2bd   : > { %1835 = vmatpush1.bf16.msra.mxu0 %v4999_v1  ;;  %v5118_v56 = vld [vmem:[#allocation6 + $0x6a4] ss:$8 sps:$4 sm:$0xff]   ;;  %v5122_v63 = vld [vmem:[#allocation6 + $0x6b0] ss:$8 sps:$4 sm:$0xff]   ;;  %v5136_v7 = vld [vmem:[#allocation6 + $0x6d4] ss:$8 sps:$4 sm:$0xff]  }
 0x2be   : > { %1836 = vmatprep.subr.bf16.mxu0 %v5004_v4  ;;  %v5130_v2 = vld [vmem:[#allocation6 + $0x6c4] ss:$8 sps:$4 sm:$0xff]   ;;  %v5128_v4 = vld [vmem:[#allocation6 + $0x6c0] ss:$8 sps:$4 sm:$0xff]  }
 0x2bf   : > { %2678 = vrot.lane.b32.xlu1 %v2673_v9, %s5615_s29 }
 0x2c0   : > { %2674 = vrot.lane.b32.xlu0 %v5948_v12, %s5615_s29 }
 0x2c1   : > { %1837 = vmatpush1.bf16.msra.mxu0 %v5002_v8  ;;  %v5139_v8 = vld [vmem:[#allocation6 + $0x414] ss:$8 sps:$4 sm:$0xff]  }
 0x2c2   : > { %1838 = vmatprep.subr.bf16.mxu0 %v5007_v11 }
 0x2c3   : > { %2925 = vrot.lane.b32.xlu1 %v1374_v33, %s5617_s21  ;;  %v5032_v33 = vld [vmem:[#allocation6 + $0xc0] ss:$8 sps:$4 sm:$0xff]  }
 0x2c4   : > { %2927 = vrot.lane.b32.xlu0 %v5896_v24, %s5617_s21  ;;  %v5025_v24 = vld [vmem:[#allocation6 + $0x94] ss:$8 sps:$4 sm:$0xff]  }
 0x2c5   : > { %1839 = vmatpush1.bf16.msra.mxu0 %v5005_v13  ;;  %v5134_v13 = vld [vmem:[#allocation6 + $0x6d0] ss:$8 sps:$4 sm:$0xff]  }
 0x2c6   : > { %1840 = vmatprep.subr.bf16.mxu0 %v5010_v14  ;;  %v5137_v14 = vld [vmem:[#allocation6 + $0x410] ss:$8 sps:$4 sm:$0xff]  }
 0x2c7   : > { %2923 = vrot.lane.b32.xlu1 %v5909_v30, %s5617_s21  ;;  %v5029_v30 = vld [vmem:[#allocation6 + $0xb0] ss:$8 sps:$4 sm:$0xff]  }
 0x2c8   : > { %3175 = vrot.lane.b32.xlu0 %v1466_v54, %s5617_s21  ;;  %v5112_v54 = vld [vmem:[#allocation6 + $0x694] ss:$8 sps:$4 sm:$0xff]  }
 0x2c9   : > { %1841 = vmatpush1.bf16.msra.mxu0 %v5008_v15 }
 0x2ca   : > { %1842 = vmatprep.subr.bf16.mxu0 %v5013_v16  ;;  %v5142_v16 = vld [vmem:[#allocation6 + $0x6e4] ss:$8 sps:$4 sm:$0xff]  }
 0x2cb   : > { %3177 = vrot.lane.b32.xlu1 %v2420_v51, %s5617_s21  ;;  %v5098_v51 = vld [vmem:[#allocation6 + $0x670] ss:$8 sps:$4 sm:$0xff]  }
 0x2cc   : > { %3173 = vrot.lane.b32.xlu0 %v1454_v57, %s5617_s21  ;;  %v5116_v57 = vld [vmem:[#allocation6 + $0x6a0] ss:$8 sps:$4 sm:$0xff]  }
 0x2cd   : > { %1843 = vmatpush1.bf16.msra.mxu0 %v5011_v17  ;;  %v5145_v17 = vld [vmem:[#allocation6 + $0x424] ss:$8 sps:$4 sm:$0xff]  }
 0x2ce   : > { %1844 = vmatprep.subr.bf16.mxu0 %v5016_v18 }
 0x2cf   : > { %3424 = vrot.lane.b32.xlu1 %v5940_v5, %s5617_s21 }
 0x2d0   : > { %3426 = vrot.lane.b32.xlu0 %v2673_v9, %s5617_s21 }
 0x2d1   : > { %1845 = vmatpush1.bf16.msra.mxu0 %v5014_v19  ;;  %v5140_v19 = vld [vmem:[#allocation6 + $0x6e0] ss:$8 sps:$4 sm:$0xff]  }
 0x2d2   : > { %1846 = vmatprep.subr.bf16.mxu0 %v5019_v20  ;;  %v5143_v20 = vld [vmem:[#allocation6 + $0x420] ss:$8 sps:$4 sm:$0xff]  }
 0x2d3   : > { %3422 = vrot.lane.b32.xlu1 %v5948_v12, %s5617_s21  ;;  %s385_s21 = scalar_lea.vmem %s6171_s8, %s4761_s19 }
 0x2d5   : > { %1847 = vmatpush1.bf16.msra.mxu0 %v5017_v21  ;;  %v5148_v21 = vld [vmem:[#allocation6 + $0x6f4] ss:$8 sps:$4 sm:$0xff]  }
 0x2d6   : > { %1848 = vmatprep.subr.bf16.mxu0 %v5022_v22  ;;  %v5151_v22 = vld [vmem:[#allocation6 + $0x434] ss:$8 sps:$4 sm:$0xff]  }
 0x2d9   : > { %1849 = vmatpush1.bf16.msra.mxu0 %v5020_v23  ;;  %v5146_v23 = vld [vmem:[#allocation6 + $0x6f0] ss:$8 sps:$4 sm:$0xff]  }
 0x2da   : > { %1850 = vmatprep.subr.bf16.mxu0 %v5025_v24  ;;  %v5149_v24 = vld [vmem:[#allocation6 + $0x430] ss:$8 sps:$4 sm:$0xff]  }
 0x2dd   : > { %1851 = vmatpush1.bf16.msra.mxu0 %v5023_v25  ;;  %v5154_v25 = vld [vmem:[#allocation6 + $0x444] ss:$8 sps:$4 sm:$0xff]  }
 0x2de   : > { %1852 = vmatprep.subr.bf16.mxu0 %v5028_v27  ;;  %v5152_v27 = vld [vmem:[#allocation6 + $0x440] ss:$8 sps:$4 sm:$0xff]  }
 0x2e1   : > { %1853 = vmatpush1.bf16.msra.mxu0 %v5026_v28  ;;  %v5157_v28 = vld [vmem:[#allocation6 + $0x454] ss:$8 sps:$4 sm:$0xff]  }
 0x2e2   : > { %1854 = vmatprep.subr.bf16.mxu0 %v5031_v29  ;;  %v5155_v29 = vld [vmem:[#allocation6 + $0x450] ss:$8 sps:$4 sm:$0xff]  }
 0x2e5   : > { %1855 = vmatpush1.bf16.msra.mxu0 %v5029_v30  ;;  %v5160_v30 = vld [vmem:[#allocation6 + $0x464] ss:$8 sps:$4 sm:$0xff]  }
 0x2e6   : > { %1856 = vmatprep.subr.bf16.mxu0 %v5034_v31  ;;  %v5158_v31 = vld [vmem:[#allocation6 + $0x460] ss:$8 sps:$4 sm:$0xff]  }
 0x2e9   : > { %1857 = vmatpush1.bf16.msra.mxu0 %v5032_v33  ;;  %v5163_v33 = vld [vmem:[#allocation6 + $0x474] ss:$8 sps:$4 sm:$0xff]  }
 0x2ea   : > { %1858 = vmatprep.subr.bf16.mxu0 %v5040_v0  ;;  %v5161_v0 = vld [vmem:[#allocation6 + $0x470] ss:$8 sps:$4 sm:$0xff]  }
 0x2ed   : > { %1859 = vmatpush1.bf16.msra.mxu0 %v5038_v34  ;;  %v5166_v34 = vld [vmem:[#allocation6 + $0x484] ss:$8 sps:$4 sm:$0xff]  }
 0x2ee   : > { %1860 = vmatprep.subr.bf16.mxu0 %v5046_v35  ;;  %v5164_v35 = vld [vmem:[#allocation6 + $0x480] ss:$8 sps:$4 sm:$0xff]  }
 0x2f1   : > { %1861 = vmatpush1.bf16.msra.mxu0 %v5044_v36  ;;  %v5169_v36 = vld [vmem:[#allocation6 + $0x494] ss:$8 sps:$4 sm:$0xff]  }
 0x2f2   : > { %1862 = vmatprep.subr.bf16.mxu0 %v5052_v37  ;;  %v5167_v37 = vld [vmem:[#allocation6 + $0x490] ss:$8 sps:$4 sm:$0xff]  }
 0x2f5   : > { %1863 = vmatpush1.bf16.msra.mxu0 %v5050_v38  ;;  %v5170_v38 = vld [vmem:[#allocation6 + $0x4a0] ss:$8 sps:$4 sm:$0xff]  }
 0x2f6   : > { %2079 = vmatprep.subr.bf16.mxu0 %v5058_v39  ;;  %v5175_v39 = vld [vmem:[#allocation6 + $0x4b4] ss:$8 sps:$4 sm:$0xff]  }
 0x2f8   : > { %4398 = vmatmul.mubr.msk.bf16.vlgmr.msra.gmra.mrb[4].mxu0 %vm5926_vm7, %v4397_v32  ;;  %v5094_v32 = vld [vmem:[#allocation6 + $0x664] ss:$8 sps:$4 sm:$0xff]  }
 0x2f9   : > { %2080 = vmatpush1.bf16.msra.mxu0 %v5056_v40  ;;  %2111 = vmatprep.mubr.bf16.mxu0 %v5940_v5  ;;  %v5131_v5 = vld [vmem:[#allocation6 + $0x400] ss:$8 sps:$4 sm:$0xff]   ;;  %v5173_v40 = vld [vmem:[#allocation6 + $0x4b0] ss:$8 sps:$4 sm:$0xff]  }
 0x2fa   : > { %2081 = vmatprep.subr.bf16.mxu0 %v5064_v41  ;;  %v5178_v41 = vld [vmem:[#allocation6 + $0x4c4] ss:$8 sps:$4 sm:$0xff]  }
 0x2fd   : > { %2082 = vmatpush1.bf16.msra.mxu0 %v5062_v42  ;;  %v5176_v42 = vld [vmem:[#allocation6 + $0x4c0] ss:$8 sps:$4 sm:$0xff]  }
 0x2fe   : > { %2083 = vmatprep.subr.bf16.mxu0 %v5070_v43  ;;  %v5181_v43 = vld [vmem:[#allocation6 + $0x4d4] ss:$8 sps:$4 sm:$0xff]  }
 0x301   : > { %2084 = vmatpush1.bf16.msra.mxu0 %v5068_v44  ;;  %v5179_v44 = vld [vmem:[#allocation6 + $0x4d0] ss:$8 sps:$4 sm:$0xff]  }
 0x302   : > { %2085 = vmatprep.subr.bf16.mxu0 %v5076_v45  ;;  %v5184_v45 = vld [vmem:[#allocation6 + $0x4e4] ss:$8 sps:$4 sm:$0xff]  }
 0x305   : > { %2086 = vmatpush1.bf16.msra.mxu0 %v5074_v46  ;;  %v5182_v46 = vld [vmem:[#allocation6 + $0x4e0] ss:$8 sps:$4 sm:$0xff]  }
 0x306   : > { %2087 = vmatprep.subr.bf16.mxu0 %v5082_v47  ;;  %v5187_v47 = vld [vmem:[#allocation6 + $0x4f4] ss:$8 sps:$4 sm:$0xff]  }
 0x309   : > { %2088 = vmatpush1.bf16.msra.mxu0 %v5080_v48 }
 0x30a   : > { %2089 = vmatprep.subr.bf16.mxu0 %v5088_v10  ;;  %v5185_v10 = vld [vmem:[#allocation6 + $0x4f0] ss:$8 sps:$4 sm:$0xff]  }
 0x30d   : > { %2090 = vmatpush1.bf16.msra.mxu0 %v5086_v26  ;;  %v5190_v26 = vld [vmem:[#allocation6 + $0x704] ss:$8 sps:$4 sm:$0xff]  }
 0x30e   : > { %2091 = vmatprep.subr.bf16.mxu0 %v5094_v32 }
 0x311   : > { %2092 = vmatpush1.bf16.msra.mxu0 %v5092_v49  ;;  %v5188_v49 = vld [vmem:[#allocation6 + $0x700] ss:$8 sps:$4 sm:$0xff]  }
 0x312   : > { %2093 = vmatprep.subr.bf16.mxu0 %v5100_v50  ;;  %v5193_v50 = vld [vmem:[#allocation6 + $0x714] ss:$8 sps:$4 sm:$0xff]  }
 0x315   : > { %2094 = vmatpush1.bf16.msra.mxu0 %v5098_v51 }
 0x316   : > { %2095 = vmatprep.subr.bf16.mxu0 %v5106_v52 }
 0x319   : > { %2096 = vmatpush1.bf16.msra.mxu0 %v5104_v53 }
 0x31a   : > { %2097 = vmatprep.subr.bf16.mxu0 %v5112_v54  ;;  %v5191_v54 = vld [vmem:[#allocation6 + $0x710] ss:$8 sps:$4 sm:$0xff]  }
 0x31d   : > { %2098 = vmatpush1.bf16.msra.mxu0 %v5110_v55  ;;  %v5196_v55 = vld [vmem:[#allocation6 + $0x724] ss:$8 sps:$4 sm:$0xff]  }
 0x31e   : > { %2099 = vmatprep.subr.bf16.mxu0 %v5118_v56  ;;  %v5194_v56 = vld [vmem:[#allocation6 + $0x720] ss:$8 sps:$4 sm:$0xff]  }
 0x320   : > { %v2164_v61 = vpop.permute.xlu1 %2163 }
 0x321   : > { %2100 = vmatpush1.bf16.msra.mxu0 %v5116_v57  ;;  %v5199_v57 = vld [vmem:[#allocation6 + $0x734] ss:$8 sps:$4 sm:$0xff]  }
 0x322   : > { %v2162_v1 = vpop.permute.xlu0 %2161  ;;  %2101 = vmatprep.subr.bf16.mxu0 %v5124_v58  ;;  %v5197_v58 = vld [vmem:[#allocation6 + $0x730] ss:$8 sps:$4 sm:$0xff]  }
 0x323   : > { %v2167_v3 = vsel %vm2165_vm8, %v2162_v1, %v2164_v61  ;;  %v5202_v61 = vld [vmem:[#allocation6 + $0x744] ss:$8 sps:$4 sm:$0xff]  }
 0x324   : > { %2362 = vmatprep.mubr.bf16.mxu1 %v2167_v3  ;;  %v5208_v3 = vld [vmem:[#allocation6 + $0x764] ss:$8 sps:$4 sm:$0xff]  }
 0x325   : > { %2102 = vmatpush1.bf16.msra.mxu0 %v5122_v63  ;;  %v5200_v63 = vld [vmem:[#allocation6 + $0x740] ss:$8 sps:$4 sm:$0xff]  }
 0x326   : > { %v2160_v6 = vpop.permute.xlu0 %2159  ;;  %2103 = vmatprep.subr.bf16.mxu0 %v5130_v2  ;;  %v5203_v2 = vld [vmem:[#allocation6 + $0x750] ss:$8 sps:$4 sm:$0xff]  }
 0x327   : > { %v2166_v9 = vsel %vm2165_vm8, %v2160_v6, %v2162_v1  ;;  %v5205_v1 = vld [vmem:[#allocation6 + $0x754] ss:$8 sps:$4 sm:$0xff]   ;;  %v5209_v6 = vld [vmem:[#allocation6 + $0x770] ss:$8 sps:$4 sm:$0xff]  }
 0x328   : > { %2363 = vmatmul.mubr.bf16.vlgmr.msra.gmra.mrb[4].mxu1 %v2166_v9  ;;  %v5217_v9 = vld [vmem:[#allocation6 + $0x794] ss:$8 sps:$4 sm:$0xff]  }
 0x329   : > { %2104 = vmatpush1.bf16.msra.mxu0 %v5128_v4  ;;  %2592 = vmatpush1.bf16.msra.mxu1 %v5131_v5  ;;  %v5964_v11 = vpop.permute.xlu1 %2423  ;;  %v5206_v4 = vld [vmem:[#allocation6 + $0x760] ss:$8 sps:$4 sm:$0xff]   ;;  %v5211_v5 = vld [vmem:[#allocation6 + $0x774] ss:$8 sps:$4 sm:$0xff]  }
 0x32a   : > { %v2426_v15 = vpop.permute.xlu0 %2425  ;;  %2105 = vmatprep.subr.bf16.mxu0 %v5136_v7  ;;  %2593 = vmatprep.subr.bf16.mxu1 %v5139_v8  ;;  %v5214_v7 = vld [vmem:[#allocation6 + $0x784] ss:$8 sps:$4 sm:$0xff]   ;;  %v5212_v8 = vld [vmem:[#allocation6 + $0x780] ss:$8 sps:$4 sm:$0xff]  }
 0x32b   : > { %v2428_v18 = vsel %vm2165_vm8, %v5964_v11, %v2426_v15  ;;  %v5223_v15 = vld [vmem:[#allocation6 + $0x7b4] ss:$8 sps:$4 sm:$0xff]  }
 0x32c   : > { %2623 = vmatprep.mubr.bf16.mxu1 %v2428_v18  ;;  %v5224_v18 = vld [vmem:[#allocation6 + $0x7c0] ss:$8 sps:$4 sm:$0xff]  }
 0x32d   : > { %2106 = vmatpush1.bf16.msra.mxu0 %v5134_v13  ;;  %2594 = vmatpush1.bf16.msra.mxu1 %v5137_v14  ;;  %v2422_v48 = vpop.permute.xlu1 %2421  ;;  %v5220_v13 = vld [vmem:[#allocation6 + $0x7a4] ss:$8 sps:$4 sm:$0xff]   ;;  %v5218_v14 = vld [vmem:[#allocation6 + $0x7a0] ss:$8 sps:$4 sm:$0xff]  }
 0x32e   : > { %2107 = vmatprep.subr.bf16.mxu0 %v5142_v16  ;;  %2595 = vmatprep.subr.bf16.mxu1 %v5145_v17  ;;  %v2427_v51 = vsel %vm2165_vm8, %v2422_v48, %v5964_v11  ;;  %v5971_v52 = vpop.permute.xlu0 %2676  ;;  %v5215_v11 = vld [vmem:[#allocation6 + $0x790] ss:$8 sps:$4 sm:$0xff]   ;;  %v5226_v17 = vld [vmem:[#allocation6 + $0x7c4] ss:$8 sps:$4 sm:$0xff]   ;;  %v5265_v48 = vld [vmem:[#allocation6 + $0x294] ss:$8 sps:$4 sm:$0xff]  }
 0x32f   : > { %v5221_v16 = vld [vmem:[#allocation6 + $0x7b0] ss:$8 sps:$4 sm:$0xff]  }
 0x331   : > { %2108 = vmatpush1.bf16.msra.mxu0 %v5140_v19  ;;  %2596 = vmatpush1.bf16.msra.mxu1 %v5143_v20  ;;  %v2679_v32 = vpop.permute.xlu1 %2678  ;;  %v5229_v19 = vld [vmem:[#allocation6 + $0x7d4] ss:$8 sps:$4 sm:$0xff]   ;;  %v5227_v20 = vld [vmem:[#allocation6 + $0x7d0] ss:$8 sps:$4 sm:$0xff]  }
 0x332   : > { %2109 = vmatprep.subr.bf16.mxu0 %v5148_v21  ;;  %2597 = vmatprep.subr.bf16.mxu1 %v5151_v22  ;;  %v2681_v53 = vsel %vm2165_vm8, %v5971_v52, %v2679_v32  ;;  %v5232_v21 = vld [vmem:[#allocation6 + $0x7e4] ss:$8 sps:$4 sm:$0xff]   ;;  %v5230_v22 = vld [vmem:[#allocation6 + $0x7e0] ss:$8 sps:$4 sm:$0xff]  }
 0x333   : > { %v5266_v32 = vld [vmem:[#allocation6 + $0x2a0] ss:$8 sps:$4 sm:$0xff]  }
 0x335   : > { %2110 = vmatpush1.bf16.msra.mxu0 %v5146_v23  ;;  %2598 = vmatpush1.bf16.msra.mxu1 %v5149_v24  ;;  %v5235_v23 = vld [vmem:[#allocation6 + $0x7f4] ss:$8 sps:$4 sm:$0xff]   ;;  %v2675_v24 = vpop.permute.xlu0 %2674 }
 0x336   : > { %2599 = vmatprep.subr.bf16.mxu1 %v5154_v25  ;;  %v5233_v25 = vld [vmem:[#allocation6 + $0x7f0] ss:$8 sps:$4 sm:$0xff]  }
 0x338   : > { %2112 = vmatmul.mubr.bf16.vlgmr.msra.gmra.mrb[4].mxu0 %v5948_v12  ;;  %v5172_v12 = vld [vmem:[#allocation6 + $0x4a4] ss:$8 sps:$4 sm:$0xff]  }
 0x339   : > { %2600 = vmatpush1.bf16.msra.mxu1 %v5152_v27  ;;  %v5238_v27 = vld [vmem:[#allocation6 + $0x204] ss:$8 sps:$4 sm:$0xff]  }
 0x33a   : > { %2601 = vmatprep.subr.bf16.mxu1 %v5157_v28  ;;  %v5975_v28 = vpop.permute.xlu1 %2925 }
 0x33d   : > { %2602 = vmatpush1.bf16.msra.mxu1 %v5155_v29  ;;  %v2928_v29 = vpop.permute.xlu0 %2927 }
 0x33e   : > { %2603 = vmatprep.subr.bf16.mxu1 %v5160_v30  ;;  %v5236_v30 = vld [vmem:[#allocation6 + $0x200] ss:$8 sps:$4 sm:$0xff]  }
 0x341   : > { %2604 = vmatpush1.bf16.msra.mxu1 %v5158_v31  ;;  %v5241_v31 = vld [vmem:[#allocation6 + $0x214] ss:$8 sps:$4 sm:$0xff]  }
 0x342   : > { %2605 = vmatprep.subr.bf16.mxu1 %v5163_v33  ;;  %v2680_v33 = vsel %vm2165_vm8, %v2675_v24, %v5971_v52  ;;  %v5272_v52 = vld [vmem:[#allocation6 + $0x2c0] ss:$8 sps:$4 sm:$0xff]  }
 0x343   : > { %v5296_v24 = vld [vmem:[#allocation6 + $0x540] ss:$8 sps:$4 sm:$0xff]  }
 0x345   : > { %2606 = vmatpush1.bf16.msra.mxu1 %v5161_v0  ;;  %v2931_v0 = vsel %vm2929_vm9, %v5975_v28, %v2928_v29  ;;  %v5299_v29 = vld [vmem:[#allocation6 + $0x550] ss:$8 sps:$4 sm:$0xff]  }
 0x346   : > { %2607 = vmatprep.subr.bf16.mxu1 %v5166_v34  ;;  %v5239_v34 = vld [vmem:[#allocation6 + $0x210] ss:$8 sps:$4 sm:$0xff]  }
 0x349   : > { %2608 = vmatpush1.bf16.msra.mxu1 %v5164_v35  ;;  %v5244_v35 = vld [vmem:[#allocation6 + $0x224] ss:$8 sps:$4 sm:$0xff]  }
 0x34a   : > { %2609 = vmatprep.subr.bf16.mxu1 %v5169_v36  ;;  %v5242_v36 = vld [vmem:[#allocation6 + $0x220] ss:$8 sps:$4 sm:$0xff]  }
 0x34d   : > { %2610 = vmatpush1.bf16.msra.mxu1 %v5167_v37  ;;  %v5247_v37 = vld [vmem:[#allocation6 + $0x234] ss:$8 sps:$4 sm:$0xff]  }
 0x34e   : > { %2611 = vmatprep.subr.bf16.mxu1 %v5172_v12  ;;  %v5245_v12 = vld [vmem:[#allocation6 + $0x230] ss:$8 sps:$4 sm:$0xff]  }
 0x351   : > { %2612 = vmatpush1.bf16.msra.mxu1 %v5170_v38  ;;  %v5250_v38 = vld [vmem:[#allocation6 + $0x244] ss:$8 sps:$4 sm:$0xff]  }
 0x352   : > { %2613 = vmatprep.subr.bf16.mxu1 %v5175_v39  ;;  %v5248_v39 = vld [vmem:[#allocation6 + $0x240] ss:$8 sps:$4 sm:$0xff]  }
 0x355   : > { %2614 = vmatpush1.bf16.msra.mxu1 %v5173_v40  ;;  %v5253_v40 = vld [vmem:[#allocation6 + $0x254] ss:$8 sps:$4 sm:$0xff]  }
 0x356   : > { %2615 = vmatprep.subr.bf16.mxu1 %v5178_v41  ;;  %v5251_v41 = vld [vmem:[#allocation6 + $0x250] ss:$8 sps:$4 sm:$0xff]  }
 0x359   : > { %2616 = vmatpush1.bf16.msra.mxu1 %v5176_v42  ;;  %v5256_v42 = vld [vmem:[#allocation6 + $0x264] ss:$8 sps:$4 sm:$0xff]  }
 0x35a   : > { %2617 = vmatprep.subr.bf16.mxu1 %v5181_v43  ;;  %v5254_v43 = vld [vmem:[#allocation6 + $0x260] ss:$8 sps:$4 sm:$0xff]  }
 0x35d   : > { %2618 = vmatpush1.bf16.msra.mxu1 %v5179_v44  ;;  %v5259_v44 = vld [vmem:[#allocation6 + $0x274] ss:$8 sps:$4 sm:$0xff]  }
 0x35e   : > { %2619 = vmatprep.subr.bf16.mxu1 %v5184_v45  ;;  %v5257_v45 = vld [vmem:[#allocation6 + $0x270] ss:$8 sps:$4 sm:$0xff]  }
 0x361   : > { %2620 = vmatpush1.bf16.msra.mxu1 %v5182_v46  ;;  %v5262_v46 = vld [vmem:[#allocation6 + $0x284] ss:$8 sps:$4 sm:$0xff]  }
 0x362   : > { %2621 = vmatprep.subr.bf16.mxu1 %v5187_v47  ;;  %v5260_v47 = vld [vmem:[#allocation6 + $0x280] ss:$8 sps:$4 sm:$0xff]  }
 0x365   : > { %2622 = vmatpush1.bf16.msra.mxu1 %v5185_v10  ;;  %v5263_v10 = vld [vmem:[#allocation6 + $0x290] ss:$8 sps:$4 sm:$0xff]  }
 0x366   : > { %2844 = vmatprep.subr.bf16.mxu1 %v5190_v26  ;;  %v5268_v26 = vld [vmem:[#allocation6 + $0x2a4] ss:$8 sps:$4 sm:$0xff]  }
 0x368   : > { %2624 = vmatmul.mubr.bf16.vlgmr.msra.gmra.mrb[4].mxu1 %v2427_v51  ;;  %v5274_v51 = vld [vmem:[#allocation6 + $0x2c4] ss:$8 sps:$4 sm:$0xff]  }
 0x369   : > { %2845 = vmatpush1.bf16.msra.mxu1 %v5188_v49  ;;  %2876 = vmatprep.mubr.bf16.mxu1 %v2681_v53  ;;  %v5271_v49 = vld [vmem:[#allocation6 + $0x2b4] ss:$8 sps:$4 sm:$0xff]  }
 0x36a   : > { %2846 = vmatprep.subr.bf16.mxu1 %v5193_v50  ;;  %v5269_v50 = vld [vmem:[#allocation6 + $0x2b0] ss:$8 sps:$4 sm:$0xff]   ;;  %v5277_v53 = vld [vmem:[#allocation6 + $0x2d4] ss:$8 sps:$4 sm:$0xff]  }
 0x36d   : > { %2847 = vmatpush1.bf16.msra.mxu1 %v5191_v54  ;;  %v5275_v54 = vld [vmem:[#allocation6 + $0x2d0] ss:$8 sps:$4 sm:$0xff]  }
 0x36e   : > { %2848 = vmatprep.subr.bf16.mxu1 %v5196_v55  ;;  %v5280_v55 = vld [vmem:[#allocation6 + $0x2e4] ss:$8 sps:$4 sm:$0xff]  }
 0x371   : > { %2849 = vmatpush1.bf16.msra.mxu1 %v5194_v56  ;;  %v5278_v56 = vld [vmem:[#allocation6 + $0x2e0] ss:$8 sps:$4 sm:$0xff]  }
 0x372   : > { %2850 = vmatprep.subr.bf16.mxu1 %v5199_v57  ;;  %v5283_v57 = vld [vmem:[#allocation6 + $0x2f4] ss:$8 sps:$4 sm:$0xff]  }
 0x375   : > { %2851 = vmatpush1.bf16.msra.mxu1 %v5197_v58  ;;  %v2924_v58 = vpop.permute.xlu1 %2923 }
 0x376   : > { %2852 = vmatprep.subr.bf16.mxu1 %v5202_v61  ;;  %v5281_v61 = vld [vmem:[#allocation6 + $0x2f0] ss:$8 sps:$4 sm:$0xff]  }
 0x379   : > { %2853 = vmatpush1.bf16.msra.mxu1 %v5200_v63  ;;  %v5286_v63 = vld [vmem:[#allocation6 + $0x504] ss:$8 sps:$4 sm:$0xff]  }
 0x37a   : > { %2854 = vmatprep.subr.bf16.mxu1 %v5205_v1  ;;  %v3178_v1 = vpop.permute.xlu1 %3177 }
 0x37d   : > { %2855 = vmatpush1.bf16.msra.mxu1 %v5203_v2  ;;  %v5284_v2 = vld [vmem:[#allocation6 + $0x500] ss:$8 sps:$4 sm:$0xff]  }
 0x37e   : > { %2856 = vmatprep.subr.bf16.mxu1 %v5208_v3  ;;  %v5289_v3 = vld [vmem:[#allocation6 + $0x514] ss:$8 sps:$4 sm:$0xff]  }
 0x381   : > { %2857 = vmatpush1.bf16.msra.mxu1 %v5206_v4  ;;  %v2930_v4 = vsel %vm2929_vm9, %v2924_v58, %v5975_v28  ;;  %v5397_v28 = vld [vmem:[%s6168_s5 + $0x7c] ss:$12 sps:$4 sm:$0xff]  }
 0x382   : > { %2858 = vmatprep.subr.bf16.mxu1 %v5211_v5  ;;  %v5983_v5 = vpop.permute.xlu0 %3175  ;;  %v5325_v58 = vld [vmem:[#allocation6 + $0x5d4] ss:$8 sps:$4 sm:$0xff]  }
 0x385   : > { %2859 = vmatpush1.bf16.msra.mxu1 %v5209_v6  ;;  %v3180_v6 = vsel %vm2929_vm9, %v5983_v5, %v3178_v1  ;;  %v5328_v1 = vld [vmem:[#allocation6 + $0x5e4] ss:$8 sps:$4 sm:$0xff]  }
 0x386   : > { %2860 = vmatprep.subr.bf16.mxu1 %v5214_v7  ;;  %v5380_v7 = vld [vmem:[%s6168_s5] ss:$12 sps:$4 sm:$0xff]  }
 0x389   : > { %2861 = vmatpush1.bf16.msra.mxu1 %v5212_v8  ;;  %v5382_v8 = vld [vmem:[%s6168_s5 + $0x4] ss:$12 sps:$4 sm:$0xff]  }
 0x38a   : > { %2862 = vmatprep.subr.bf16.mxu1 %v5217_v9  ;;  %v5287_v9 = vld [vmem:[#allocation6 + $0x510] ss:$8 sps:$4 sm:$0xff]   ;;  %3998 = vmatprep.subr.bf16.mxu0 %v5382_v8  ;;  %v6073_v8 = vpop.permute.xlu1 %3424 }
 0x38b   : > { %3999 = vmatpush1.bf16.msra.mxu0 %v5380_v7  ;;  %v5334_v7 = vld [vmem:[#allocation6 + $0x804] ss:$8 sps:$4 sm:$0xff]  }
 0x38d   : > { %2863 = vmatpush1.bf16.msra.mxu1 %v5215_v11  ;;  %v5385_v11 = vld [vmem:[%s6168_s5 + $0x1c] ss:$12 sps:$4 sm:$0xff]  }
 0x38e   : > { %2864 = vmatprep.subr.bf16.mxu1 %v5220_v13  ;;  %v5292_v13 = vld [vmem:[#allocation6 + $0x524] ss:$8 sps:$4 sm:$0xff]   ;;  %4000 = vmatprep.subr.bf16.mxu0 %v5385_v11  ;;  %v5332_v11 = vld [vmem:[#allocation6 + $0x800] ss:$8 sps:$4 sm:$0xff]  }
 0x391   : > { %2865 = vmatpush1.bf16.msra.mxu1 %v5218_v14  ;;  %v5383_v14 = vld [vmem:[%s6168_s5 + $0x18] ss:$12 sps:$4 sm:$0xff]  }
 0x392   : > { %2866 = vmatprep.subr.bf16.mxu1 %v5223_v15  ;;  %v5388_v15 = vld [vmem:[%s6168_s5 + $0x34] ss:$12 sps:$4 sm:$0xff]   ;;  %4001 = vmatpush1.bf16.msra.mxu0 %v5383_v14 }
 0x393   : > { %4002 = vmatprep.subr.bf16.mxu0 %v5388_v15 }
 0x395   : > { %2867 = vmatpush1.bf16.msra.mxu1 %v5221_v16  ;;  %v5290_v16 = vld [vmem:[#allocation6 + $0x520] ss:$8 sps:$4 sm:$0xff]  }
 0x396   : > { %2868 = vmatprep.subr.bf16.mxu1 %v5226_v17  ;;  %v5295_v17 = vld [vmem:[#allocation6 + $0x534] ss:$8 sps:$4 sm:$0xff]  }
 0x399   : > { %2869 = vmatpush1.bf16.msra.mxu1 %v5224_v18  ;;  %v5386_v18 = vld [vmem:[%s6168_s5 + $0x30] ss:$12 sps:$4 sm:$0xff]  }
 0x39a   : > { %2870 = vmatprep.subr.bf16.mxu1 %v5229_v19  ;;  %v5391_v19 = vld [vmem:[%s6168_s5 + $0x4c] ss:$12 sps:$4 sm:$0xff]   ;;  %4003 = vmatpush1.bf16.msra.mxu0 %v5386_v18 }
 0x39b   : > { %4004 = vmatprep.subr.bf16.mxu0 %v5391_v19  ;;  %v5338_v18 = vld [vmem:[#allocation6 + $0x820] ss:$8 sps:$4 sm:$0xff]   ;;  %v5343_v19 = vld [vmem:[#allocation6 + $0x834] ss:$8 sps:$4 sm:$0xff]  }
 0x39d   : > { %2871 = vmatpush1.bf16.msra.mxu1 %v5227_v20  ;;  %v5293_v20 = vld [vmem:[#allocation6 + $0x530] ss:$8 sps:$4 sm:$0xff]  }
 0x39e   : > { %2872 = vmatprep.subr.bf16.mxu1 %v5232_v21  ;;  %v5298_v21 = vld [vmem:[#allocation6 + $0x544] ss:$8 sps:$4 sm:$0xff]  }
 0x3a1   : > { %2873 = vmatpush1.bf16.msra.mxu1 %v5230_v22  ;;  %v5389_v22 = vld [vmem:[%s6168_s5 + $0x48] ss:$12 sps:$4 sm:$0xff]  }
 0x3a2   : > { %2874 = vmatprep.subr.bf16.mxu1 %v5235_v23  ;;  %v5394_v23 = vld [vmem:[%s6168_s5 + $0x64] ss:$12 sps:$4 sm:$0xff]   ;;  %4005 = vmatpush1.bf16.msra.mxu0 %v5389_v22 }
 0x3a3   : > { %4006 = vmatprep.subr.bf16.mxu0 %v5394_v23  ;;  %v5344_v22 = vld [vmem:[#allocation6 + $0x840] ss:$8 sps:$4 sm:$0xff]   ;;  %v5347_v23 = vld [vmem:[#allocation6 + $0x850] ss:$8 sps:$4 sm:$0xff]  }
 0x3a5   : > { %2875 = vmatpush1.bf16.msra.mxu1 %v5233_v25  ;;  %v5301_v25 = vld [vmem:[#allocation6 + $0x554] ss:$8 sps:$4 sm:$0xff]  }
 0x3a6   : > { %3094 = vmatprep.subr.bf16.mxu1 %v5238_v27  ;;  %v5392_v27 = vld [vmem:[%s6168_s5 + $0x60] ss:$12 sps:$4 sm:$0xff]  }
 0x3a7   : > { %4007 = vmatpush1.bf16.msra.mxu0 %v5392_v27  ;;  %v5355_v27 = vld [vmem:[#allocation6 + $0x874] ss:$8 sps:$4 sm:$0xff]  }
 0x3a8   : > { %2877 = vmatmul.mubr.bf16.vlgmr.msra.gmra.mrb[4].mxu1 %v2680_v33  ;;  %4008 = vmatprep.subr.bf16.mxu0 %v5397_v28  ;;  %v5400_v33 = vld [vmem:[%s6168_s5 + $0x94] ss:$12 sps:$4 sm:$0xff]  }
 0x3a9   : > { %3095 = vmatpush1.bf16.msra.mxu1 %v5236_v30  ;;  %3126 = vmatprep.mubr.bf16.mxu1 %v2931_v0  ;;  %v5304_v30 = vld [vmem:[#allocation6 + $0x564] ss:$8 sps:$4 sm:$0xff]   ;;  %v5302_v0 = vld [vmem:[#allocation6 + $0x560] ss:$8 sps:$4 sm:$0xff]   ;;  %v5353_v28 = vld [vmem:[#allocation6 + $0x870] ss:$8 sps:$4 sm:$0xff]  }
 0x3aa   : > { %3096 = vmatprep.subr.bf16.mxu1 %v5241_v31  ;;  %v5395_v31 = vld [vmem:[%s6168_s5 + $0x78] ss:$12 sps:$4 sm:$0xff]  }
 0x3ab   : > { %4009 = vmatpush1.bf16.msra.mxu0 %v5395_v31  ;;  %v5361_v31 = vld [vmem:[#allocation6 + $0x894] ss:$8 sps:$4 sm:$0xff]  }
 0x3ac   : > { %4010 = vmatprep.subr.bf16.mxu0 %v5400_v33  ;;  %v5359_v33 = vld [vmem:[#allocation6 + $0x890] ss:$8 sps:$4 sm:$0xff]  }
 0x3ad   : > { %3097 = vmatpush1.bf16.msra.mxu1 %v5239_v34  ;;  %v5307_v34 = vld [vmem:[#allocation6 + $0x574] ss:$8 sps:$4 sm:$0xff]  }
 0x3ae   : > { %3098 = vmatprep.subr.bf16.mxu1 %v5244_v35  ;;  %v5398_v35 = vld [vmem:[%s6168_s5 + $0x90] ss:$12 sps:$4 sm:$0xff]  }
 0x3af   : > { %4011 = vmatpush1.bf16.msra.mxu0 %v5398_v35  ;;  %v5367_v35 = vld [vmem:[#allocation6 + $0x8b4] ss:$8 sps:$4 sm:$0xff]  }
 0x3b1   : > { %3099 = vmatpush1.bf16.msra.mxu1 %v5242_v36  ;;  %v5403_v36 = vld [vmem:[%s6168_s5 + $0xac] ss:$12 sps:$4 sm:$0xff]  }
 0x3b2   : > { %3100 = vmatprep.subr.bf16.mxu1 %v5247_v37  ;;  %v5305_v37 = vld [vmem:[#allocation6 + $0x570] ss:$8 sps:$4 sm:$0xff]   ;;  %4012 = vmatprep.subr.bf16.mxu0 %v5403_v36 }
 0x3b3   : > { %v5365_v36 = vld [vmem:[#allocation6 + $0x8b0] ss:$8 sps:$4 sm:$0xff]  }
 0x3b5   : > { %3101 = vmatpush1.bf16.msra.mxu1 %v5245_v12  ;;  %v5310_v12 = vld [vmem:[#allocation6 + $0x584] ss:$8 sps:$4 sm:$0xff]  }
 0x3b6   : > { %3102 = vmatprep.subr.bf16.mxu1 %v5250_v38  ;;  %v5401_v38 = vld [vmem:[%s6168_s5 + $0xa8] ss:$12 sps:$4 sm:$0xff]  }
 0x3b7   : > { %4013 = vmatpush1.bf16.msra.mxu0 %v5401_v38  ;;  %v5373_v38 = vld [vmem:[#allocation6 + $0x8d4] ss:$8 sps:$4 sm:$0xff]  }
 0x3b9   : > { %3103 = vmatpush1.bf16.msra.mxu1 %v5248_v39  ;;  %v5406_v39 = vld [vmem:[%s6168_s5 + $0xc4] ss:$12 sps:$4 sm:$0xff]  }
 0x3ba   : > { %3104 = vmatprep.subr.bf16.mxu1 %v5253_v40  ;;  %v5308_v40 = vld [vmem:[#allocation6 + $0x580] ss:$8 sps:$4 sm:$0xff]   ;;  %4014 = vmatprep.subr.bf16.mxu0 %v5406_v39  ;;  %v5371_v39 = vld [vmem:[#allocation6 + $0x8d0] ss:$8 sps:$4 sm:$0xff]  }
 0x3bd   : > { %3105 = vmatpush1.bf16.msra.mxu1 %v5251_v41  ;;  %v5313_v41 = vld [vmem:[#allocation6 + $0x594] ss:$8 sps:$4 sm:$0xff]  }
 0x3be   : > { %3106 = vmatprep.subr.bf16.mxu1 %v5256_v42  ;;  %v5404_v42 = vld [vmem:[%s6168_s5 + $0xc0] ss:$12 sps:$4 sm:$0xff]  }
 0x3bf   : > { %4015 = vmatpush1.bf16.msra.mxu0 %v5404_v42  ;;  %v5379_v42 = vld [vmem:[#allocation6 + $0x8f4] ss:$8 sps:$4 sm:$0xff]  }
 0x3c1   : > { %3107 = vmatpush1.bf16.msra.mxu1 %v5254_v43  ;;  %v5409_v43 = vld [vmem:[%s6168_s5 + $0xdc] ss:$12 sps:$4 sm:$0xff]  }
 0x3c2   : > { %3108 = vmatprep.subr.bf16.mxu1 %v5259_v44  ;;  %v5311_v44 = vld [vmem:[#allocation6 + $0x590] ss:$8 sps:$4 sm:$0xff]   ;;  %4016 = vmatprep.subr.bf16.mxu0 %v5409_v43 }
 0x3c3   : > { %v5377_v43 = vld [vmem:[#allocation6 + $0x8f0] ss:$8 sps:$4 sm:$0xff]  }
 0x3c5   : > { %3109 = vmatpush1.bf16.msra.mxu1 %v5257_v45  ;;  %v5316_v45 = vld [vmem:[#allocation6 + $0x5a4] ss:$8 sps:$4 sm:$0xff]  }
 0x3c6   : > { %3110 = vmatprep.subr.bf16.mxu1 %v5262_v46 }
 0x3c9   : > { %3111 = vmatpush1.bf16.msra.mxu1 %v5260_v47  ;;  %v5407_v47 = vld [vmem:[%s6168_s5 + $0xd8] ss:$12 sps:$4 sm:$0xff]  }
 0x3ca   : > { %3112 = vmatprep.subr.bf16.mxu1 %v5265_v48  ;;  %4017 = vmatpush1.bf16.msra.mxu0 %v5407_v47  ;;  %v5421_v47 = vld [vmem:[%s6168_s5 + $0x13c] ss:$12 sps:$4 sm:$0xff]  }
 0x3cd   : > { %3113 = vmatpush1.bf16.msra.mxu1 %v5263_v10  ;;  %v5412_v10 = vld [vmem:[%s6168_s5 + $0xf4] ss:$12 sps:$4 sm:$0xff]  }
 0x3ce   : > { %3114 = vmatprep.subr.bf16.mxu1 %v5268_v26  ;;  %4018 = vmatprep.subr.bf16.mxu0 %v5412_v10  ;;  %v5419_v10 = vld [vmem:[%s6168_s5 + $0x138] ss:$12 sps:$4 sm:$0xff]  }
 0x3d1   : > { %3115 = vmatpush1.bf16.msra.mxu1 %v5266_v32  ;;  %v5314_v32 = vld [vmem:[#allocation6 + $0x5a0] ss:$8 sps:$4 sm:$0xff]  }
 0x3d2   : > { %3116 = vmatprep.subr.bf16.mxu1 %v5271_v49 }
 0x3d5   : > { %3117 = vmatpush1.bf16.msra.mxu1 %v5269_v50  ;;  %v5319_v50 = vld [vmem:[#allocation6 + $0x5b4] ss:$8 sps:$4 sm:$0xff]  }
 0x3d6   : > { %3118 = vmatprep.subr.bf16.mxu1 %v5274_v51  ;;  %v5410_v51 = vld [vmem:[%s6168_s5 + $0xf0] ss:$12 sps:$4 sm:$0xff]  }
 0x3d7   : > { %4019 = vmatpush1.bf16.msra.mxu0 %v5410_v51  ;;  %v5425_v51 = vld [vmem:[%s6168_s5 + $0x168] ss:$12 sps:$4 sm:$0xff]  }
 0x3d9   : > { %3119 = vmatpush1.bf16.msra.mxu1 %v5272_v52  ;;  %v5415_v52 = vld [vmem:[%s6168_s5 + $0x10c] ss:$12 sps:$4 sm:$0xff]  }
 0x3da   : > { %3120 = vmatprep.subr.bf16.mxu1 %v5277_v53  ;;  %v5317_v53 = vld [vmem:[#allocation6 + $0x5b0] ss:$8 sps:$4 sm:$0xff]   ;;  %4020 = vmatprep.subr.bf16.mxu0 %v5415_v52 }
 0x3db   : > { %v5427_v52 = vld [vmem:[%s6168_s5 + $0x16c] ss:$12 sps:$4 sm:$0xff]  }
 0x3dd   : > { %3121 = vmatpush1.bf16.msra.mxu1 %v5275_v54  ;;  %v5322_v54 = vld [vmem:[#allocation6 + $0x5c4] ss:$8 sps:$4 sm:$0xff]  }
 0x3de   : > { %3122 = vmatprep.subr.bf16.mxu1 %v5280_v55  ;;  %v5413_v55 = vld [vmem:[%s6168_s5 + $0x108] ss:$12 sps:$4 sm:$0xff]  }
 0x3df   : > { %4021 = vmatpush1.bf16.msra.mxu0 %v5413_v55 }
 0x3e1   : > { %3123 = vmatpush1.bf16.msra.mxu1 %v5278_v56  ;;  %v5418_v56 = vld [vmem:[%s6168_s5 + $0x124] ss:$12 sps:$4 sm:$0xff]  }
 0x3e2   : > { %3124 = vmatprep.subr.bf16.mxu1 %v5283_v57  ;;  %v5320_v57 = vld [vmem:[#allocation6 + $0x5c0] ss:$8 sps:$4 sm:$0xff]   ;;  %4022 = vmatprep.subr.bf16.mxu0 %v5418_v56 }
 0x3e5   : > { %3125 = vmatpush1.bf16.msra.mxu1 %v5281_v61  ;;  %v5416_v61 = vld [vmem:[%s6168_s5 + $0x120] ss:$12 sps:$4 sm:$0xff]  }
 0x3e6   : > { %3343 = vmatprep.subr.bf16.mxu1 %v5286_v63  ;;  %v5323_v63 = vld [vmem:[#allocation6 + $0x5d0] ss:$8 sps:$4 sm:$0xff]   ;;  %4023 = vmatpush1.bf16.msra.mxu0 %v5416_v61 }
 0x3e7   : > { %4024 = vmatprep.subr.bf16.mxu0 %v5421_v47 }
 0x3e8   : > { %3127 = vmatmul.mubr.bf16.vlgmr.msra.gmra.mrb[4].mxu1 %v2930_v4  ;;  %v3174_v4 = vpop.permute.xlu0 %3173 }
 0x3e9   : > { %3344 = vmatpush1.bf16.msra.mxu1 %v5284_v2  ;;  %3375 = vmatprep.mubr.bf16.mxu1 %v3180_v6  ;;  %v5326_v2 = vld [vmem:[#allocation6 + $0x5e0] ss:$8 sps:$4 sm:$0xff]   ;;  %v5329_v6 = vld [vmem:[#allocation6 + $0x5f0] ss:$8 sps:$4 sm:$0xff]   ;;  %v3179_v14 = vsel %vm2929_vm9, %v3174_v4, %v5983_v5  ;;  %v5349_v5 = vld [vmem:[#allocation6 + $0x854] ss:$8 sps:$4 sm:$0xff]  }
 0x3ea   : > { %3345 = vmatprep.subr.bf16.mxu1 %v5289_v3  ;;  %v5331_v3 = vld [vmem:[#allocation6 + $0x5f4] ss:$8 sps:$4 sm:$0xff]   ;;  %4025 = vmatpush1.bf16.msra.mxu0 %v5419_v10 }
 0x3ed   : > { %3346 = vmatpush1.bf16.msra.mxu1 %v5287_v9  ;;  %v3427_v9 = vpop.permute.xlu0 %3426 }
 0x3ee   : > { %3347 = vmatprep.subr.bf16.mxu1 %v5292_v13  ;;  %v5337_v13 = vld [vmem:[#allocation6 + $0x814] ss:$8 sps:$4 sm:$0xff]   ;;  %v3429_v15 = vsel %vm2929_vm9, %v6073_v8, %v3427_v9 }
 0x3f1   : > { %3348 = vmatpush1.bf16.msra.mxu1 %v5290_v16  ;;  %v5335_v16 = vld [vmem:[#allocation6 + $0x810] ss:$8 sps:$4 sm:$0xff]  }
 0x3f2   : > { %3349 = vmatprep.subr.bf16.mxu1 %v5295_v17  ;;  %v5340_v17 = vld [vmem:[#allocation6 + $0x824] ss:$8 sps:$4 sm:$0xff]  }
 0x3f5   : > { %3350 = vmatpush1.bf16.msra.mxu1 %v5293_v20  ;;  %v5341_v20 = vld [vmem:[#allocation6 + $0x830] ss:$8 sps:$4 sm:$0xff]  }
 0x3f6   : > { %3351 = vmatprep.subr.bf16.mxu1 %v5298_v21  ;;  %v5346_v21 = vld [vmem:[#allocation6 + $0x844] ss:$8 sps:$4 sm:$0xff]  }
 0x3f9   : > { %3352 = vmatpush1.bf16.msra.mxu1 %v5296_v24  ;;  %v5352_v24 = vld [vmem:[#allocation6 + $0x864] ss:$8 sps:$4 sm:$0xff]  }
 0x3fa   : > { %3353 = vmatprep.subr.bf16.mxu1 %v5301_v25  ;;  %v5350_v25 = vld [vmem:[#allocation6 + $0x860] ss:$8 sps:$4 sm:$0xff]  }
 0x3fd   : > { %3354 = vmatpush1.bf16.msra.mxu1 %v5299_v29  ;;  %v5358_v29 = vld [vmem:[#allocation6 + $0x884] ss:$8 sps:$4 sm:$0xff]  }
 0x3fe   : > { %3355 = vmatprep.subr.bf16.mxu1 %v5304_v30  ;;  %v5356_v30 = vld [vmem:[#allocation6 + $0x880] ss:$8 sps:$4 sm:$0xff]  }
 0x401   : > { %3356 = vmatpush1.bf16.msra.mxu1 %v5302_v0  ;;  %v5364_v0 = vld [vmem:[#allocation6 + $0x8a4] ss:$8 sps:$4 sm:$0xff]  }
 0x402   : > { %3357 = vmatprep.subr.bf16.mxu1 %v5307_v34  ;;  %v5362_v34 = vld [vmem:[#allocation6 + $0x8a0] ss:$8 sps:$4 sm:$0xff]  }
 0x405   : > { %3358 = vmatpush1.bf16.msra.mxu1 %v5305_v37  ;;  %v5370_v37 = vld [vmem:[#allocation6 + $0x8c4] ss:$8 sps:$4 sm:$0xff]  }
 0x406   : > { %3359 = vmatprep.subr.bf16.mxu1 %v5310_v12  ;;  %v5368_v12 = vld [vmem:[#allocation6 + $0x8c0] ss:$8 sps:$4 sm:$0xff]  }
 0x409   : > { %3360 = vmatpush1.bf16.msra.mxu1 %v5308_v40  ;;  %v5376_v40 = vld [vmem:[#allocation6 + $0x8e4] ss:$8 sps:$4 sm:$0xff]  }
 0x40a   : > { %3361 = vmatprep.subr.bf16.mxu1 %v5313_v41  ;;  %v5374_v41 = vld [vmem:[#allocation6 + $0x8e0] ss:$8 sps:$4 sm:$0xff]  }
 0x40b   : > { %v6044_v46 = vpop.f32.mrb[4].mxu0 }
 0x40c   : > { %v6049_v48 = vpop.f32.mrb[5].mxu0 }
 0x40d   : > { %v6054_v26 = vpop.f32.mrb[6].mxu0  ;;  %3362 = vmatpush1.bf16.msra.mxu1 %v5311_v44  ;;  %v3423_v44 = vpop.permute.xlu1 %3422 }
 0x40e   : > { %v6056_v49 = vpop.f32.mrb[7].mxu0  ;;  %3363 = vmatprep.subr.bf16.mxu1 %v5316_v45  ;;  %v3428_v45 = vsel %vm2929_vm9, %v3423_v44, %v6073_v8 }
 0x411   : > { %3364 = vmatpush1.bf16.msra.mxu1 %v5314_v32  ;;  %v5424_v32 = vld [vmem:[%s6168_s5 + $0x154] ss:$12 sps:$4 sm:$0xff]  }
 0x412   : > { %3365 = vmatprep.subr.bf16.mxu1 %v5319_v50  ;;  %v5422_v50 = vld [vmem:[%s6168_s5 + $0x150] ss:$12 sps:$4 sm:$0xff]   ;;  %4026 = vmatprep.subr.bf16.mxu0 %v5424_v32 }
 0x413   : > { %4027 = vmatpush1.bf16.msra.mxu0 %v5422_v50 }
 0x414   : > { %4028 = vmatprep.subr.bf16.mxu0 %v5427_v52 }
 0x415   : > { %3366 = vmatpush1.bf16.msra.mxu1 %v5317_v53  ;;  %v5428_v53 = vld [vmem:[%s6168_s5 + $0xc8] ss:$12 sps:$4 sm:$0xff]  }
 0x416   : > { %3367 = vmatprep.subr.bf16.mxu1 %v5322_v54  ;;  %v3639_v54 = vld [vmem:[#allocation7] sm:$0x3] }
 0x417   : > { %4029 = vmatpush1.bf16.msra.mxu0 %v5425_v51  ;;  %v3644_v55 = vrot.slane %v3639_v54, %v5864_v60 }
 0x418   : > { %4674 = vmatprep.subr.bf16.mxu0 %v5428_v53 }
 0x419   : > { %3368 = vmatpush1.bf16.msra.mxu1 %v5320_v57  ;;  %v3648_v57 = vrot.slane %v3639_v54, %v5867_v62 }
 0x41a   : > { %3369 = vmatprep.subr.bf16.mxu1 %v5325_v58 }
 0x41d   : > { %3370 = vmatpush1.bf16.msra.mxu1 %v5323_v63 }
 0x41e   : > { %3371 = vmatprep.subr.bf16.mxu1 %v5328_v1 }
 0x421   : > { %3372 = vmatpush1.bf16.msra.mxu1 %v5326_v2 }
 0x422   : > { %3373 = vmatprep.subr.bf16.mxu1 %v5331_v3 }
 0x425   : > { %3374 = vmatpush1.bf16.msra.mxu1 %v5329_v6 }
 0x426   : > { %3592 = vmatprep.subr.bf16.mxu1 %v5334_v7 }
 0x428   : > { %3376 = vmatmul.mubr.bf16.vlgmr.msra.gmra.mrb[4].mxu1 %v3179_v14 }
 0x429   : > { %3593 = vmatpush1.bf16.msra.mxu1 %v5332_v11  ;;  %3624 = vmatprep.mubr.bf16.mxu1 %v3429_v15 }
 0x42a   : > { %3594 = vmatprep.subr.bf16.mxu1 %v5337_v13 }
 0x42d   : > { %3595 = vmatpush1.bf16.msra.mxu1 %v5335_v16 }
 0x42e   : > { %3596 = vmatprep.subr.bf16.mxu1 %v5340_v17 }
 0x431   : > { %3597 = vmatpush1.bf16.msra.mxu1 %v5338_v18  ;;  %v5433_v18 = vld [vmem:[%s6168_s5 + $0x38] ss:$12 sps:$4 sm:$0xff]  }
 0x432   : > { %3598 = vmatprep.subr.bf16.mxu1 %v5343_v19  ;;  %v5434_v19 = vld [vmem:[%s6168_s5 + $0x110] ss:$12 sps:$4 sm:$0xff]  }
 0x435   : > { %3599 = vmatpush1.bf16.msra.mxu1 %v5341_v20  ;;  %v5435_v20 = vld [vmem:[%s6168_s5 + $0x50] ss:$12 sps:$4 sm:$0xff]  }
 0x436   : > { %3600 = vmatprep.subr.bf16.mxu1 %v5346_v21  ;;  %v5436_v21 = vld [vmem:[%s6168_s5 + $0x128] ss:$12 sps:$4 sm:$0xff]  }
 0x439   : > { %3601 = vmatpush1.bf16.msra.mxu1 %v5344_v22  ;;  %v5437_v22 = vld [vmem:[%s6168_s5 + $0x68] ss:$12 sps:$4 sm:$0xff]  }
 0x43a   : > { %3602 = vmatprep.subr.bf16.mxu1 %v5349_v5  ;;  %v5438_v5 = vld [vmem:[%s6168_s5 + $0x140] ss:$12 sps:$4 sm:$0xff]  }
 0x43d   : > { %3603 = vmatpush1.bf16.msra.mxu1 %v5347_v23  ;;  %v5439_v23 = vld [vmem:[%s6168_s5 + $0x80] ss:$12 sps:$4 sm:$0xff]  }
 0x43e   : > { %3604 = vmatprep.subr.bf16.mxu1 %v5352_v24  ;;  %v5440_v24 = vld [vmem:[%s6168_s5 + $0x158] ss:$12 sps:$4 sm:$0xff]  }
 0x441   : > { %3605 = vmatpush1.bf16.msra.mxu1 %v5350_v25  ;;  %v5441_v25 = vld [vmem:[%s6168_s5 + $0x98] ss:$12 sps:$4 sm:$0xff]  }
 0x442   : > { %3606 = vmatprep.subr.bf16.mxu1 %v5355_v27  ;;  %v5442_v27 = vld [vmem:[%s6168_s5 + $0x170] ss:$12 sps:$4 sm:$0xff]  }
 0x445   : > { %3607 = vmatpush1.bf16.msra.mxu1 %v5353_v28  ;;  %v5443_v28 = vld [vmem:[%s6168_s5 + $0xb0] ss:$12 sps:$4 sm:$0xff]  }
 0x446   : > { %3608 = vmatprep.subr.bf16.mxu1 %v5358_v29  ;;  %v3725_v29 = vld [vmem:[#allocation9] sm:$0x7] }
 0x449   : > { %3609 = vmatpush1.bf16.msra.mxu1 %v5356_v30  ;;  %v3730_v30 = vrot.slane %v3725_v29, %v5864_v60  ;;  %v3737_v60 = vsub.s32 2, %v5861_v59 }
 0x44a   : > { %3610 = vmatprep.subr.bf16.mxu1 %v5361_v31  ;;  %v3734_v31 = vrot.slane %v3725_v29, %v5867_v62 }
 0x44b   : > { %v3738_v62 = vrot.slane %v3725_v29, %v3737_v60 }
 0x44d   : > { %3611 = vmatpush1.bf16.msra.mxu1 %v5359_v33 }
 0x44e   : > { %3612 = vmatprep.subr.bf16.mxu1 %v5364_v0 }
 0x451   : > { %3613 = vmatpush1.bf16.msra.mxu1 %v5362_v34 }
 0x452   : > { %3614 = vmatprep.subr.bf16.mxu1 %v5367_v35 }
 0x455   : > { %3615 = vmatpush1.bf16.msra.mxu1 %v5365_v36 }
 0x456   : > { %3616 = vmatprep.subr.bf16.mxu1 %v5370_v37 }
 0x459   : > { %3617 = vmatpush1.bf16.msra.mxu1 %v5368_v12 }
 0x45a   : > { %3618 = vmatprep.subr.bf16.mxu1 %v5373_v38 }
 0x45d   : > { %3619 = vmatpush1.bf16.msra.mxu1 %v5371_v39 }
 0x45e   : > { %3620 = vmatprep.subr.bf16.mxu1 %v5376_v40 }
 0x461   : > { %3621 = vmatpush1.bf16.msra.mxu1 %v5374_v41 }
 0x462   : > { %3622 = vmatprep.subr.bf16.mxu1 %v5379_v42 }
 0x465   : > { %3623 = vmatpush1.bf16.msra.mxu1 %v5377_v43 }
 0x468   : > { %3625 = vmatmul.mubr.bf16.vlgmr.msra.gmra.mrb[4].mxu1 %v3428_v45 }
 0x53b   : > { %v3626_v56 = vpop.f32.mrb[4].mxu1 }
 0x53c   : > { %v4700_v58 = vadd.f32 %v3626_v56, %v6044_v46  ;;  %v3628_v61 = vpop.f32.mrb[5].mxu1  ;;  %v5429_v46 = vld [vmem:[%s6168_s5 + $0x8] ss:$12 sps:$4 sm:$0xff]  }
 0x53d   : > { %v4701_v63 = vadd.f32 %v3628_v61, %v6049_v48  ;;  %v3630_v1 = vpop.f32.mrb[6].mxu1  ;;  %v5430_v48 = vld [vmem:[%s6168_s5 + $0xe0] ss:$12 sps:$4 sm:$0xff]  }
 0x53e   : > { %v3651_v2 = vadd.f32 %v4700_v58, %v3644_v55  ;;  %v4702_v3 = vadd.f32 %v3630_v1, %v6054_v26  ;;  %v3632_v4 = vpop.f32.mrb[7].mxu1  ;;  %v5431_v26 = vld [vmem:[%s6168_s5 + $0x20] ss:$12 sps:$4 sm:$0xff]  }
 0x53f   : > { %v3652_v6 = vadd.f32 %v4701_v63, %v3648_v57  ;;  %v4703_v7 = vadd.f32 %v3632_v4, %v6056_v49  ;;  %v5432_v49 = vld [vmem:[%s6168_s5 + $0xf8] ss:$12 sps:$4 sm:$0xff]  }
 0x540   : > { %v3653_v8 = vadd.f32 %v4702_v3, %v3644_v55  ;;  %v3655_v11 = vmax.f32 %v3651_v2, 0.0 }
 0x541   : > { %v3654_v9 = vadd.f32 %v4703_v7, %v3648_v57  ;;  %v3656_v14 = vmax.f32 %v3652_v6, 0.0 }
 0x542   : > { %v3657_v13 = vmax.f32 %v3653_v8, 0.0 }
 0x543   : > { %v3658_v15 = vmax.f32 %v3654_v9, 0.0 }
 0x544   : > { %v3659_v16 = vpack.c.bf16 %v3657_v13, %v3655_v11 }
 0x545   : > { %v3660_v17 = vpack.c.bf16 %v3658_v15, %v3656_v14 }
 0x547   : > { %4030 = vmatprep.mubr.bf16.mxu0 %v3660_v17 }
 0x548   : > { %4031 = vmatmul.mubr.bf16.vlgmr.msra.gmra.mrb[8].mxu0 %v3659_v16 }
 0x549   : > { %4675 = vmatpush3.bf16.msra.mxu0 %v5429_v46  ;;  %4073 = vmatprep.mubr.bf16.mxu0 %v3660_v17 }
 0x54a   : > { %4676 = vmatprep.subr.bf16.mxu0 %v5430_v48 }
 0x54d   : > { %4677 = vmatpush3.bf16.msra.mxu0 %v5431_v26 }
 0x54e   : > { %4678 = vmatprep.subr.bf16.mxu0 %v5432_v49 }
 0x551   : > { %4679 = vmatpush3.bf16.msra.mxu0 %v5433_v18 }
 0x552   : > { %4680 = vmatprep.subr.bf16.mxu0 %v5434_v19 }
 0x555   : > { %4681 = vmatpush3.bf16.msra.mxu0 %v5435_v20 }
 0x556   : > { %4682 = vmatprep.subr.bf16.mxu0 %v5436_v21 }
 0x559   : > { %4683 = vmatpush3.bf16.msra.mxu0 %v5437_v22 }
 0x55a   : > { %4684 = vmatprep.subr.bf16.mxu0 %v5438_v5 }
 0x55d   : > { %4685 = vmatpush3.bf16.msra.mxu0 %v5439_v23 }
 0x55e   : > { %4686 = vmatprep.subr.bf16.mxu0 %v5440_v24 }
 0x561   : > { %4687 = vmatpush3.bf16.msra.mxu0 %v5441_v25 }
 0x562   : > { %4688 = vmatprep.subr.bf16.mxu0 %v5442_v27 }
 0x565   : > { %4689 = vmatpush3.bf16.msra.mxu0 %v5443_v28 }
 0x568   : > { %4074 = vmatmul.mubr.bf16.vlgmr.msra.gmra.mrb[12].mxu0 %v3659_v16 }
 0x61b   : > { %v4032_v33 = vpop.f32.mrb[8].mxu0 }
 0x61c   : > { %v4033_v0 = vadd.f32 %v4032_v33, %v3730_v30  ;;  %v4034_v34 = vpop.f32.mrb[9].mxu0 }
 0x61d   : > { %v4035_v35 = vadd.f32 %v4034_v34, %v3734_v31  ;;  %v4036_v36 = vpop.f32.mrb[10].mxu0 }
 0x61e   : > { %4082 = vst [vmem:[%s385_s21] sm:$0xff] %v4033_v0  ;;  %v4037_v37 = vadd.f32 %v4036_v36, %v3730_v30  ;;  %v4038_v12 = vpop.f32.mrb[11].mxu0 }
 0x61f   : > { %4083 = vst [vmem:[%s385_s21 + $0x8] sm:$0xff] %v4035_v35  ;;  %v4039_v38 = vadd.f32 %v4038_v12, %v3734_v31 }
 0x620   : > { %4086 = vst [vmem:[%s385_s21 + $0x18] sm:$0xff] %v4037_v37 }
 0x621   : > { %4087 = vst [vmem:[%s385_s21 + $0x20] sm:$0xff] %v4039_v38 }
 0x63b   : > { %v4690_v39 = vpop.f32.mrb[12].mxu0 }
 0x63c   : > { %v4691_v40 = vpop.f32.mrb[13].mxu0 }
 0x63d   : > { %v4692_v41 = vadd.f32 %v4691_v40, %v4690_v39  ;;  %v4693_v42 = vpop.f32.mrb[14].mxu0 }
 0x63e   : > { %v4694_v43 = vpop.f32.mrb[15].mxu0 }
 0x63f   : > { %v4076_v44 = vadd.f32 %v4692_v41, %v3738_v62  ;;  %v4695_v45 = vadd.f32 %v4694_v43, %v4693_v42 }
 0x641   : > { %4085 = vst.msk [vmem:[%s385_s21 + $0x10] sm:$0xff] %vm4084_vm10, %v4076_v44  ;;  %v4079_v47 = vadd.f32 %v4695_v45, %v3738_v62 }
 0x643   : > { %4088 = vst.msk [vmem:[%s385_s21 + $0x28] sm:$0xff] %vm4084_vm10, %v4079_v47 }
 0x644 PF: > { %s22_s27 = sadd.s32 1, %s5602_s27  }
 0x645   : > { %p19_p6 = scmp.ge.s32.totalorder %s22_s27, 4  }
 0x647   :  { %21 = sbr.rel (!%p19_p6) target bundleno = 3 (0x3), region = 111 }
 0x64e   :  { %4126 = vsyncpa [#allocation3], 1 }
 0x64f   :  { %4128 = vsyncpa [#allocation3 + $0x1], 1 }
 0x650   :  { %4129 = vsyncpa [#allocation5], 1 }
 0x651   :  { %4130 = vsyncpa [#allocation8], 1 }

// kernel: faster_rcnn_forward.3
= control target key start
LH: loop header
LB: loop body
LE: loop exit
PB: predicated region body
PF: predicated region fallthrough
CT: control target
= control target key end

     0   :  { %v399_v19 = vmov 0.0   ;;  %vm400_vm0 = vmmov 0   ;;  %vm235_vm1 = vcmask 261120   ;;  %vm280_vm2 = vcmask 39936   ;;  %s509_s1 = inlined_call_operand.vmem [shape: bf16[256,32], index: 1, kind: input, shape index: {}]   ;;  %s510_s0 = inlined_call_operand.vmem [shape: bf16[16,256], index: 0, kind: input, shape index: {}]   ;;  %s511_s3 = inlined_call_operand.vmem [shape: bf16[32,25], index: 3, kind: input, shape index: {}]   ;;  %s512_s2 = inlined_call_operand.vmem [shape: f32[1,32], index: 2, kind: input, shape index: {}]   ;;  %s513_s4 = inlined_call_operand.vmem [shape: f32[1,25], index: 4, kind: input, shape index: {}]   ;;  %s514_s5 = inlined_call_operand.vmem [shape: f32[16,25], index: 5, kind: output, shape index: {}]  }
   0x1   :  { %v370_v0 = vld [vmem:[%s509_s1 + $0x40] sm:$0xff]   ;;  %v372_v2 = vld [vmem:[%s509_s1 + $0x48] sm:$0xff]   ;;  %v374_v4 = vld [vmem:[%s509_s1 + $0x50] sm:$0xff]   ;;  %360 = vmatprep.subr.bf16.mxu1 %v399_v19  ;;  %364 = vmatprep.mubr.msk.bf16.mxu1 %vm400_vm0, %v399_v19  ;;  %vm305_vm3 = vcmask 203776  }
   0x2   :  { %v371_v1 = vld [vmem:[%s509_s1] sm:$0xff]   ;;  %335 = vmatprep.subr.bf16.mxu0 %v370_v0  ;;  %v373_v3 = vld [vmem:[%s509_s1 + $0x8] sm:$0xff]   ;;  %v375_v5 = vld [vmem:[%s509_s1 + $0x10] sm:$0xff]  }
   0x3   :  { %336 = vmatpush3.bf16.msra.mxu0 %v371_v1  ;;  %v376_v6 = vld [vmem:[%s509_s1 + $0x58] sm:$0xff]   ;;  %v378_v8 = vld [vmem:[%s509_s1 + $0x60] sm:$0xff]   ;;  %v380_v10 = vld [vmem:[%s509_s1 + $0x68] sm:$0xff]  }
   0x4   :  { %337 = vmatprep.subr.bf16.mxu0 %v372_v2  ;;  %v377_v7 = vld [vmem:[%s509_s1 + $0x18] sm:$0xff]   ;;  %v379_v9 = vld [vmem:[%s509_s1 + $0x20] sm:$0xff]   ;;  %v381_v12 = vld [vmem:[%s509_s1 + $0x28] sm:$0xff]  }
   0x5   :  { %v388_v11 = vld [vmem:[%s510_s0 + $0x4] ss:$8 sps:$4 sm:$0xff]   ;;  %v382_v13 = vld [vmem:[%s509_s1 + $0x70] sm:$0xff]   ;;  %v384_v15 = vld [vmem:[%s509_s1 + $0x78] sm:$0xff]  }
   0x6   :  { %200 = vmatprep.mubr.bf16.mxu0 %v388_v11  ;;  %v383_v14 = vld [vmem:[%s509_s1 + $0x30] sm:$0xff]   ;;  %v385_v16 = vld [vmem:[%s509_s1 + $0x38] sm:$0xff]   ;;  %v386_v17 = vld [vmem:[%s510_s0] ss:$8 sps:$4 sm:$0xff]  }
   0x7   :  { %338 = vmatpush3.bf16.msra.mxu0 %v373_v3  ;;  %v389_v18 = vld [vmem:[%s511_s3] sm:$0xff]   ;;  %v390_v20 = vld [vmem:[%s511_s3 + $0x8] sm:$0xff]  }
   0x8   :  { %339 = vmatprep.subr.bf16.mxu0 %v374_v4  ;;  %361 = vmatpush3.bf16.msra.mxu1 %v389_v18  ;;  %v312_v22 = vld [vmem:[%s512_s2] ss:$0 sm:$0xff] }
   0x9   :  { %362 = vmatprep.subr.bf16.mxu1 %v399_v19  ;;  %v331_v33 = vld [vmem:[%s513_s4] ss:$0 sm:$0xff] }
   0xb   :  { %340 = vmatpush3.bf16.msra.mxu0 %v375_v5 }
   0xc   :  { %341 = vmatprep.subr.bf16.mxu0 %v376_v6  ;;  %363 = vmatpush3.bf16.msra.mxu1 %v390_v20 }
   0xf   :  { %342 = vmatpush3.bf16.msra.mxu0 %v377_v7 }
  0x10   :  { %343 = vmatprep.subr.bf16.mxu0 %v378_v8 }
  0x13   :  { %344 = vmatpush3.bf16.msra.mxu0 %v379_v9 }
  0x14   :  { %345 = vmatprep.subr.bf16.mxu0 %v380_v10 }
  0x17   :  { %346 = vmatpush3.bf16.msra.mxu0 %v381_v12 }
  0x18   :  { %347 = vmatprep.subr.bf16.mxu0 %v382_v13 }
  0x1b   :  { %348 = vmatpush3.bf16.msra.mxu0 %v383_v14 }
  0x1c   :  { %349 = vmatprep.subr.bf16.mxu0 %v384_v15 }
  0x1f   :  { %350 = vmatpush3.bf16.msra.mxu0 %v385_v16 }
  0x22   :  { %201 = vmatmul.mubr.bf16.vlgmr.msra.gmra.mrb[0].mxu0 %v386_v17 }
  0xf5   :  { %v351_v21 = vpop.f32.mrb[0].mxu0 }
  0xf6   :  { %v352_v23 = vpop.f32.mrb[1].mxu0 }
  0xf7   :  { %v353_v24 = vadd.f32 %v352_v23, %v351_v21  ;;  %v354_v25 = vpop.f32.mrb[2].mxu0 }
  0xf8   :  { %v355_v26 = vpop.f32.mrb[3].mxu0 }
  0xf9   :  { %v203_v27 = vadd.f32 %v353_v24, %v312_v22  ;;  %v356_v28 = vadd.f32 %v355_v26, %v354_v25 }
  0xfb   :  { %v206_v29 = vadd.f32 %v356_v28, %v312_v22  ;;  %v209_v30 = vmax.f32 %v203_v27, 0.0 }
  0xfd   :  { %v210_v31 = vmax.f32 %v206_v29, 0.0 }
  0xff   :  { %v211_v32 = vpack.c.bf16 %v210_v31, %v209_v30 }
 0x101   :  { %365 = vmatmul.mubr.msk.bf16.vlgmr.msra.gmra.mrb[0].mxu1 %vm235_vm1, %v211_v32 }
 0x1d4   :  { %v273_v34 = vpop.f32.mrb[0].mxu1 }
 0x1d5   :  { %v274_v35 = vadd.f32 %v331_v33, %v273_v34  ;;  %v366_v36 = vpop.f32.mrb[1].mxu1 }
 0x1d6   :  { %v276_v37 = vpop.f32.mrb[2].mxu1 }
 0x1d7   :  { %v277_v38 = vadd.f32 %v331_v33, %v276_v37  ;;  %v367_v39 = vpop.f32.mrb[3].mxu1  ;;  %v281_v40 = vsel %vm280_vm2, %v274_v35, -inf }
 0x1d8   :  { %282 = vmax.xlane.f32.xlu0 %v281_v40 }
 0x1d9   :  { %v284_v41 = vsel %vm280_vm2, %v277_v38, -inf }
 0x1dc   :  { %285 = vmax.xlane.f32.xlu0 %v284_v41 }
 0x265   :  { %v283_v42 = vpop.xlane.xlu0 %282 }
 0x266   :  { %v287_v43 = vsub.f32 %v274_v35, %v283_v42 }
 0x268   :  { %v289_v44 = vmul.f32 1.442695, %v287_v43 }
 0x269   :  { %v286_v45 = vpop.xlane.xlu0 %285 }
 0x26a   :  { %391 = vpow2.f32 %v289_v44  ;;  %v288_v46 = vsub.f32 %v277_v38, %v286_v45 }
 0x26c   :  { %v291_v47 = vmul.f32 1.442695, %v288_v46 }
 0x26e   :  { %393 = vpow2.f32 %v291_v47 }
 0x274   :  { %v392_v48 = vpop.eup %391 }
 0x275   :  { %v293_v49 = vsel %vm280_vm2, %v392_v48, 0.0 }
 0x276   :  { %294 = vadd.xlane.f32.xlu1 %v293_v49 }
 0x278   :  { %v394_v50 = vpop.eup %393 }
 0x279   :  { %v296_v51 = vsel %vm280_vm2, %v394_v50, 0.0 }
 0x27a   :  { %297 = vadd.xlane.f32.xlu1 %v296_v51 }
 0x303   :  { %v295_v52 = vpop.xlane.xlu1 %294 }
 0x304   :  { %395 = vrcp.f32 %v295_v52 }
 0x307   :  { %v298_v53 = vpop.xlane.xlu1 %297 }
 0x308   :  { %397 = vrcp.f32 %v298_v53 }
 0x30e   :  { %v396_v54 = vpop.eup %395 }
 0x30f   :  { %v301_v55 = vmul.f32 %v396_v54, %v392_v48 }
 0x311   :  { %v303_v56 = vsel %vm280_vm2, %v301_v55, %v274_v35 }
 0x312   :  { %v398_v57 = vpop.eup %397  ;;  %306 = vst.msk [vmem:[%s514_s5] sm:$0xff] %vm305_vm3, %v303_v56 }
 0x313   :  { %v302_v58 = vmul.f32 %v398_v57, %v394_v50 }
 0x315   :  { %v304_v59 = vsel %vm280_vm2, %v302_v58, %v277_v38 }
 0x316   :  { %307 = vst.msk [vmem:[%s514_s5 + $0x8] sm:$0xff] %vm305_vm3, %v304_v59 }

</bundles_post_ra>
